<compile_context>
chip_gen: v7x
topology: tpu7x:2x2x1
jax: 0.10.0
libtpu: 0.0.40
codegen_flags: <defaults>
</compile_context>

<pallas_src>
import functools

import jax
import jax.numpy as jnp
from jax.experimental import pallas as pl
from jax.experimental.pallas import tpu as pltpu

LANE = 128


def _zero_map(nd):
    return lambda *_: (0,) * nd


def _full_block(arr):
    return pl.BlockSpec(arr.shape, _zero_map(arr.ndim))


# ----------------------------------------------------------------------------
# Kernel 1: fully fused VisBl (one image per grid step, all weights in VMEM)
#   conv1 (im2col matmul) + ReLU
#   maxpool1 3x3/s1            (separable max on flat rows)
#   conv2 3x3/s1/p1 (kn2row) + ReLU + maxpool2   (bn1 folded into conv2)
#   conv3 3x3/s1/p1 (kn2row) + ReLU + maxpool3   (bn2 folded into conv3)
#   linear5 + ReLU                                (bn3 folded into linear5)
# ----------------------------------------------------------------------------
def _visbl_kernel(p_ref, w1_ref, b1_ref, w2_ref, b2_ref, w3_ref, b3_ref,
                  w5_ref, b5_ref, o_ref, *, H1):
    C1 = w1_ref.shape[1]          # 128 (lane-padded conv1 out channels)
    C2 = b2_ref.shape[1]          # 256
    C3 = b3_ref.shape[1]          # 512
    P1 = H1 - 2                   # pooled-1 / conv2 spatial
    P2 = P1 - 2                   # pooled-2 / conv3 spatial

    # ---- conv1: im2col matmul (M = H1*H1) + ReLU (f32 epilogue) ----
    h1 = jnp.dot(p_ref[0], w1_ref[...], preferred_element_type=jnp.float32)
    h1 = jnp.maximum(h1 + b1_ref[...], 0.0)                       # (H1*H1, C1)

    # ---- maxpool1 3x3/s1 (separable, flat-row form) ----
    hrow = []
    for r in range(H1):
        b = r * H1
        hrow.append(jnp.maximum(jnp.maximum(h1[b:b + P1], h1[b + 1:b + 1 + P1]),
                                h1[b + 2:b + 2 + P1]))             # (P1, C1)
    pool1 = [jnp.maximum(jnp.maximum(hrow[i], hrow[i + 1]), hrow[i + 2])
             for i in range(P1)]                                   # P1 x (P1, C1)

    # ---- zero-padded conv2 input built in-register (no HBM pad) ----
    zfull = jnp.zeros((P1 + 2, C1), jnp.bfloat16)
    z1 = jnp.zeros((1, C1), jnp.bfloat16)
    x2 = jnp.concatenate(
        [zfull]
        + [jnp.concatenate([z1, pool1[i].astype(jnp.bfloat16), z1], axis=0)
           for i in range(P1)]
        + [zfull], axis=0)                                         # ((P1+2)^2, C1)

    # ---- conv2 as kn2row: one big matmul, then shift-accumulate ----
    Wp2 = P1 + 2
    y2 = jnp.dot(x2, w2_ref[...], preferred_element_type=jnp.float32)  # (49, 9*C2)
    b2 = b2_ref[...]
    c2 = []
    for ho in range(P1):
        acc = jnp.zeros((P1, C2), jnp.float32)
        for kh in range(3):
            rb = (ho + kh) * Wp2
            for kw in range(3):
                t = (kh * 3 + kw) * C2
                acc = acc + y2[rb + kw:rb + kw + P1, t:t + C2]
        c2.append(jnp.maximum(acc + b2, 0.0))                      # (P1, C2)

    # ---- maxpool2 3x3/s1 (separable) ----
    h2row = [jnp.maximum(jnp.maximum(c2[r][0:P2], c2[r][1:1 + P2]), c2[r][2:2 + P2])
             for r in range(P1)]
    pool2 = [jnp.maximum(jnp.maximum(h2row[i], h2row[i + 1]), h2row[i + 2])
             for i in range(P2)]                                   # P2 x (P2, C2)

    # ---- zero-padded conv3 input ----
    zfull3 = jnp.zeros((P2 + 2, C2), jnp.bfloat16)
    z13 = jnp.zeros((1, C2), jnp.bfloat16)
    x3 = jnp.concatenate(
        [zfull3]
        + [jnp.concatenate([z13, pool2[i].astype(jnp.bfloat16), z13], axis=0)
           for i in range(P2)]
        + [zfull3], axis=0)                                        # ((P2+2)^2, C2)

    # ---- conv3 as kn2row ----
    Wp3 = P2 + 2
    y3 = jnp.dot(x3, w3_ref[...], preferred_element_type=jnp.float32)  # (25, 9*C3)
    b3 = b3_ref[...]
    c3 = []
    for ho in range(P2):
        acc = jnp.zeros((P2, C3), jnp.float32)
        for kh in range(3):
            rb = (ho + kh) * Wp3
            for kw in range(3):
                t = (kh * 3 + kw) * C3
                acc = acc + y3[rb + kw:rb + kw + P2, t:t + C3]
        c3.append(jnp.maximum(acc + b3, 0.0))                      # (P2, C3)

    # ---- maxpool3 3x3/s1 -> 1x1 (P2 == 3): global 3x3 max ----
    # TODO(synk): only the 1x1 pooled case (vis_hw=16 path) is handled here.
    m = jnp.maximum(jnp.maximum(c3[0], c3[1]), c3[2])              # (P2, C3)
    feat = jnp.maximum(jnp.maximum(m[0:1], m[1:2]), m[2:3])        # (1, C3)

    # ---- linear5 (bn3 folded) + ReLU; Dropout(0.2) = identity at inference ----
    v = jnp.dot(feat.astype(jnp.bfloat16), w5_ref[...],
                preferred_element_type=jnp.float32)
    o_ref[0] = jnp.maximum(v + b5_ref[...], 0.0).astype(o_ref.dtype)


# ----------------------------------------------------------------------------
# Kernel 2: fused AudBl + fusion MLP (whole batch, all weights in VMEM)
# ----------------------------------------------------------------------------
def _fusion_kernel(*refs, n_img, lo1, has_audio):
    if has_audio:
        (pa_ref, vis_ref, aw1, ab1, aw2, ab2, aw3, ab3,
         f0w, f0b, f1w, f1b, f2w, f2b, f3w, f3b, f4w, f4b, o_ref) = refs
        ca = ab2.shape[1]                        # audio conv2 out channels (128)
        lo2 = (lo1 - 1) // 2 + 1
        # audio conv1 (im2col matmul) + ReLU
        h1 = jnp.dot(pa_ref[...], aw1[...], preferred_element_type=jnp.float32)
        h1 = jnp.maximum(h1 + ab1[...], 0.0)                       # (N*lo1, 64)
        # audio conv2 (k=3, s=2, p=1): shift-after-matmul + static row gather
        y = jnp.dot(h1.astype(jnp.bfloat16), aw2[...],
                    preferred_element_type=jnp.float32)            # (N*lo1, 3*ca)
        a_parts = []
        for lo in range(lo2):
            rows = []
            for n in range(n_img):
                r = n * lo1
                acc = None
                for k in range(3):
                    src = 2 * lo + k - 1                           # padding=1
                    if 0 <= src < lo1:
                        term = y[r + src:r + src + 1, k * ca:(k + 1) * ca]
                        acc = term if acc is None else acc + term
                rows.append(acc)
            a_parts.append(jnp.maximum(jnp.concatenate(rows, axis=0) + ab2[...],
                                       0.0))                       # (N, ca)
        # audio linear3 + ReLU (torch channel-major Flatten order is folded into
        # the column-reordered weight prepared once in prepare_params)
        a_cat = jnp.concatenate([a.astype(jnp.bfloat16) for a in a_parts], axis=1)
        ha = jnp.dot(a_cat, aw3[...], preferred_element_type=jnp.float32)
        ha = jnp.maximum(ha + ab3[...], 0.0)                       # (N, 128)
        # implicit torch.cat((audio, visual), axis=-1)
        x0 = jnp.concatenate([ha.astype(jnp.bfloat16), vis_ref[...]], axis=1)
    else:
        (vis_ref, f0w, f0b, f1w, f1b, f2w, f2b, f3w, f3b, f4w, f4b, o_ref) = refs
        x0 = vis_ref[...]

    # fusion MLP: 4 x (Linear + ReLU) + Linear; Dropout = identity at inference
    h = jnp.dot(x0, f0w[...], preferred_element_type=jnp.float32)
    h = jnp.maximum(h + f0b[...], 0.0)
    for w_r, b_r in ((f1w, f1b), (f2w, f2b), (f3w, f3b)):
        h = jnp.dot(h.astype(jnp.bfloat16), w_r[...],
                    preferred_element_type=jnp.float32)
        h = jnp.maximum(h + b_r[...], 0.0)
    yf = jnp.dot(h.astype(jnp.bfloat16), f4w[...],
                 preferred_element_type=jnp.float32) + f4b[...]
    # columns 1..127 are zero weight/bias padding -> constant 3.0; sliced off
    # by the wrapper (lane-dense store).
    o_ref[...] = (4.0 * jax.nn.sigmoid(yf) + 1.0).astype(o_ref.dtype)


# ----------------------------------------------------------------------------
# Per-call input im2col (runs on the raw inputs only; tiny XLA glue)
# ----------------------------------------------------------------------------
def _vis_conv1_patches(x_nchw):
    """Visual conv1: k=3, stride=3, pad=3.  Returns ((N, Ho*Ho, 128) bf16, Ho)."""
    N, C, H, W = x_nchw.shape
    assert H == W
    x = jnp.transpose(x_nchw, (0, 2, 3, 1))                        # NHWC
    xp = jnp.pad(x, ((0, 0), (3, 3), (3, 3), (0, 0)))
    Hp = H + 6
    Ho = (Hp - 3) // 3 + 1
    end = 3 * (Ho - 1) + 1
    cols = []
    for kh in range(3):
        for kw in range(3):
            cols.append(xp[:, kh:kh + end:3, kw:kw + end:3, :])    # (N,Ho,Ho,C)
    p = jnp.stack(cols, axis=-1).reshape(N, Ho * Ho, C * 9)        # idx = c*9+tap
    p = jnp.pad(p, ((0, 0), (0, 0), (0, LANE - C * 9)))            # lane-dense K
    return p.astype(jnp.bfloat16), Ho


def _aud_conv1_patches(a_ncl):
    """Audio conv1: k=3, stride=2, pad=1.  Returns ((N*Lo, 128) bf16, Lo)."""
    N, C, L = a_ncl.shape
    x = jnp.transpose(a_ncl, (0, 2, 1))                            # NLC
    xp = jnp.pad(x, ((0, 0), (1, 1), (0, 0)))
    Lo = (L + 2 - 3) // 2 + 1
    end = 2 * (Lo - 1) + 1
    cols = [xp[:, k:k + end:2, :] for k in range(3)]               # (N,Lo,C)
    p = jnp.stack(cols, axis=-1).reshape(N * Lo, C * 3)            # idx = c*3+k
    p = jnp.pad(p, ((0, 0), (0, LANE - C * 3)))
    return p.astype(jnp.bfloat16), Lo


# ----------------------------------------------------------------------------
# Parameter setup (torch layout) + exact BN folding
# ----------------------------------------------------------------------------
def _uniform(key, shape, fan_in):
    bound = 1.0 / jnp.sqrt(jnp.float32(fan_in))
    return jax.random.uniform(key, shape, jnp.float32, -bound, bound)


def _bn_scale_shift(C, eps=1e-5):
    # PyTorch BatchNorm inference defaults: gamma=1, beta=0, mean=0, var=1.
    gamma = jnp.ones((C,), jnp.float32)
    beta = jnp.zeros((C,), jnp.float32)
    mean = jnp.zeros((C,), jnp.float32)
    var = jnp.ones((C,), jnp.float32)
    scale = gamma / jnp.sqrt(var + eps)
    shift = beta - mean * scale
    return scale, shift


def _fold_bn_into_conv(w, b, scale, shift):
    wf = w * scale[None, :, None, None]
    bf = b + jnp.sum(w * shift[None, :, None, None], axis=(1, 2, 3))
    return wf, bf


def _fold_bn_into_linear(w, b, scale, shift):
    wf = w * scale[None, :]
    bf = b + w @ shift
    return wf, bf


def init_params(key, aud_len=8, vis_ch=3, vis_hw=16, audio_included=True):
    ks = jax.random.split(key, 20)
    p = {}
    # --- AudBl ---
    p["a_conv1_w"] = _uniform(ks[0], (64, 30, 3), 30 * 3)
    p["a_conv1_b"] = _uniform(ks[1], (64,), 30 * 3)
    p["a_conv2_w"] = _uniform(ks[2], (128, 64, 3), 64 * 3)
    p["a_conv2_b"] = _uniform(ks[3], (128,), 64 * 3)
    lo1 = (aud_len + 2 - 3) // 2 + 1
    lo2 = (lo1 + 2 - 3) // 2 + 1
    a_flat = 128 * lo2
    p["a_lin3_w"] = _uniform(ks[4], (128, a_flat), a_flat)
    p["a_lin3_b"] = _uniform(ks[5], (128,), a_flat)
    # --- VisBl (BN folded into the following conv / linear) ---
    p["v_conv1_w"] = _uniform(ks[6], (64, vis_ch, 3, 3), vis_ch * 9)
    p["v_conv1_b"] = _uniform(ks[7], (64,), vis_ch * 9)
    w2 = _uniform(ks[8], (256, 64, 3, 3), 64 * 9)
    b2 = _uniform(ks[9], (256,), 64 * 9)
    w3 = _uniform(ks[10], (512, 256, 3, 3), 256 * 9)
    b3 = _uniform(ks[11], (512,), 256 * 9)
    s1, t1 = _bn_scale_shift(64)
    s2, t2 = _bn_scale_shift(256)
    s3, t3 = _bn_scale_shift(512)
    p["v_conv2_w"], p["v_conv2_b"] = _fold_bn_into_conv(w2, b2, s1, t1)
    p["v_conv3_w"], p["v_conv3_b"] = _fold_bn_into_conv(w3, b3, s2, t2)
    h = (vis_hw + 2 * 3 - 3) // 3 + 1          # conv1 (k3, s3, p3)
    h = h - 2                                  # maxpool1
    h = h - 2                                  # conv2 (p1) + maxpool2
    h = h - 2                                  # conv3 (p1) + maxpool3
    v_flat = 512 * h * h
    w5 = _uniform(ks[12], (512, v_flat), v_flat)
    b5 = _uniform(ks[13], (512,), v_flat)
    scale_feat = jnp.repeat(s3, h * h)         # torch Flatten is channel-major
    shift_feat = jnp.repeat(t3, h * h)
    p["v_lin5_w"], p["v_lin5_b"] = _fold_bn_into_linear(w5, b5, scale_feat, shift_feat)
    # --- fusion MLP ---
    d0 = (128 + 512) if audio_included else 512
    dims = [d0, 512, 512, 256, 128, 1]
    for i in range(5):
        p[f"f{i}_w"] = _uniform(ks[14 + i], (dims[i + 1], dims[i]), dims[i])
        p[f"f{i}_b"] = _uniform(ks[19 - i], (dims[i + 1],), dims[i])
    return p


def prepare_params(p, audio_included=True):
    """One-time conversion of torch-layout params into kernel-ready tensors
    (kn2row weight layout, lane padding, bf16 weights / f32 biases).  Hoisted
    out of the per-step forward so no weight prep runs per call."""
    bf = jnp.bfloat16
    q = {}
    # --- VisBl ---
    c1 = p["v_conv1_b"].shape[0]                                   # 64
    w1 = p["v_conv1_w"].reshape(c1, -1).T                          # (Cin*9, 64)
    w1 = jnp.pad(w1, ((0, LANE - w1.shape[0]), (0, LANE - c1)))
    q["v_w1"] = w1.astype(bf)                                      # (128, 128)
    q["v_b1"] = jnp.pad(p["v_conv1_b"], (0, LANE - c1)).reshape(1, LANE).astype(jnp.float32)
    cin2, cout2 = p["v_conv2_w"].shape[1], p["v_conv2_w"].shape[0]
    w2 = jnp.transpose(p["v_conv2_w"], (1, 2, 3, 0)).reshape(cin2, 9 * cout2)
    q["v_w2"] = jnp.pad(w2, ((0, LANE - cin2), (0, 0))).astype(bf)  # (128, 2304)
    q["v_b2"] = p["v_conv2_b"].reshape(1, cout2).astype(jnp.float32)
    cin3, cout3 = p["v_conv3_w"].shape[1], p["v_conv3_w"].shape[0]
    q["v_w3"] = jnp.transpose(p["v_conv3_w"], (1, 2, 3, 0)).reshape(cin3, 9 * cout3).astype(bf)
    q["v_b3"] = p["v_conv3_b"].reshape(1, cout3).astype(jnp.float32)
    q["v_w5"] = p["v_lin5_w"].T.astype(bf)                          # (512, 512)
    q["v_b5"] = p["v_lin5_b"].reshape(1, -1).astype(jnp.float32)
    # --- AudBl ---
    if audio_included:
        ca1 = p["a_conv1_b"].shape[0]                               # 64
        wa1 = p["a_conv1_w"].reshape(ca1, -1).T                     # (90, 64)
        q["a_w1"] = jnp.pad(wa1, ((0, LANE - wa1.shape[0]), (0, 0))).astype(bf)
        q["a_b1"] = p["a_conv1_b"].reshape(1, -1).astype(jnp.float32)
        q["a_w2"] = jnp.transpose(p["a_conv2_w"], (1, 2, 0)).reshape(
            p["a_conv2_w"].shape[1], -1).astype(bf)                 # (64, 3*128)
        q["a_b2"] = p["a_conv2_b"].reshape(1, -1).astype(jnp.float32)
        w3 = p["a_lin3_w"]                                          # (128, 128*lo2)
        dout, din = w3.shape
        ca = p["a_conv2_b"].shape[0]                                # 128
        lo2 = din // ca
        # reorder input columns from torch channel-major (c*lo2+l) to l-major
        w3r = w3.reshape(dout, ca, lo2).transpose(2, 1, 0).reshape(lo2 * ca, dout)
        q["a_w3"] = w3r.astype(bf)                                  # (lo2*128, 128)
        q["a_b3"] = p["a_lin3_b"].reshape(1, -1).astype(jnp.float32)
    # --- fusion MLP ---
    q["f0_w"] = p["f0_w"].T.astype(bf)                              # (640|512, 512)
    q["f0_b"] = p["f0_b"].reshape(1, -1).astype(jnp.float32)
    for i in (1, 2, 3):
        q[f"f{i}_w"] = p[f"f{i}_w"].T.astype(bf)
        q[f"f{i}_b"] = p[f"f{i}_b"].reshape(1, -1).astype(jnp.float32)
    w4 = p["f4_w"].T                                                # (128, 1)
    q["f4_w"] = jnp.pad(w4, ((0, 0), (0, LANE - w4.shape[1]))).astype(bf)
    q["f4_b"] = jnp.pad(p["f4_b"].reshape(1, -1), ((0, 0), (0, LANE - 1))).astype(jnp.float32)
    return q


# ----------------------------------------------------------------------------
# pallas_call wrappers
# ----------------------------------------------------------------------------
def _visbl_call(q, patches, h1_spatial):
    N = patches.shape[0]
    cout5 = q["v_b5"].shape[1]
    assert h1_spatial - 6 == 1, "fused VisBl kernel assumes 1x1 final pooled spatial"
    kernel = functools.partial(_visbl_kernel, H1=h1_spatial)
    weights = (q["v_w1"], q["v_b1"], q["v_w2"], q["v_b2"],
               q["v_w3"], q["v_b3"], q["v_w5"], q["v_b5"])
    flops = 2 * N * (patches.shape[1] * q["v_w1"].shape[0] * q["v_w1"].shape[1]
                     + (h1_spatial ** 2) * q["v_w2"].shape[0] * q["v_w2"].shape[1]
                     + ((h1_spatial - 2) ** 2) * q["v_w3"].shape[0] * q["v_w3"].shape[1]
                     + q["v_w5"].shape[0] * q["v_w5"].shape[1])
    bytes_w = sum(int(w.size) * w.dtype.itemsize for w in weights)
    out = pl.pallas_call(
        kernel,
        out_shape=jax.ShapeDtypeStruct((N, 1, cout5), jnp.bfloat16),
        grid=(N,),
        in_specs=[pl.BlockSpec((1,) + patches.shape[1:], lambda n: (n, 0, 0))]
                 + [_full_block(w) for w in weights],
        out_specs=pl.BlockSpec((1, 1, cout5), lambda n: (n, 0, 0)),
        compiler_params=pltpu.CompilerParams(
            dimension_semantics=("parallel",),
            vmem_limit_bytes=32 * 1024 * 1024),
        cost_estimate=pl.CostEstimate(
            flops=int(flops), transcendentals=0,
            bytes_accessed=int(bytes_w + patches.size * 2 + N * cout5 * 2)),
    )(patches, *weights)
    return out.reshape(N, cout5)


def _fusion_call(q, vis_feat, aud_patches, lo1, audio_included):
    N = vis_feat.shape[0]
    if audio_included:
        args = (aud_patches, vis_feat,
                q["a_w1"], q["a_b1"], q["a_w2"], q["a_b2"], q["a_w3"], q["a_b3"],
                q["f0_w"], q["f0_b"], q["f1_w"], q["f1_b"], q["f2_w"], q["f2_b"],
                q["f3_w"], q["f3_b"], q["f4_w"], q["f4_b"])
    else:
        args = (vis_feat,
                q["f0_w"], q["f0_b"], q["f1_w"], q["f1_b"], q["f2_w"], q["f2_b"],
                q["f3_w"], q["f3_b"], q["f4_w"], q["f4_b"])
    kernel = functools.partial(_fusion_kernel, n_img=N, lo1=lo1,
                               has_audio=audio_included)
    # TODO(synk): at batch sizes > 2, split the batch into >=2 "parallel" grid
    # blocks here so v7x's second TensorCore is also used for the MLP.
    out = pl.pallas_call(
        kernel,
        out_shape=jax.ShapeDtypeStruct((N, LANE), jnp.float32),
        grid=(1,),
        in_specs=[_full_block(a) for a in args],
        out_specs=pl.BlockSpec((N, LANE), lambda i: (0, 0)),
        compiler_params=pltpu.CompilerParams(
            dimension_semantics=("arbitrary",)),
    )(*args)
    return out[:, :1]


# ----------------------------------------------------------------------------
# Forward pass (2 pallas_calls total; only raw-input im2col runs per step)
# ----------------------------------------------------------------------------
def avm_forward(q, audio_input, visual_input, audio_included=True):
    patches, h1_spatial = _vis_conv1_patches(visual_input)
    vis_feat = _visbl_call(q, patches, h1_spatial)                 # (N, 512) bf16
    if audio_included:
        aud_patches, lo1 = _aud_conv1_patches(audio_input)
    else:
        aud_patches, lo1 = None, 0
    return _fusion_call(q, vis_feat, aud_patches, lo1, audio_included)  # (N, 1)


# ----------------------------------------------------------------------------
if __name__ == "__main__":
    key = jax.random.PRNGKey(0)
    k_a, k_v, k_p = jax.random.split(key, 3)

    N, AUD_L, VIS_C, VIS_HW = 2, 8, 3, 16
    audio_input = jax.random.normal(k_a, (N, 30, AUD_L), jnp.float32)
    visual_input = jax.random.normal(k_v, (N, VIS_C, VIS_HW, VIS_HW), jnp.float32)

    params = init_params(k_p, aud_len=AUD_L, vis_ch=VIS_C, vis_hw=VIS_HW,
                         audio_included=True)
    prep = prepare_params(params, audio_included=True)   # one-time weight prep

    fwd = jax.jit(avm_forward, static_argnames=("audio_included",))
    out = fwd(prep, audio_input, visual_input, audio_included=True)
    out = jax.block_until_ready(out)

    assert out.shape == (N, 1)
    assert bool(jnp.all(out >= 1.0)) and bool(jnp.all(out <= 5.0))
    print("KERNEL_OK")
</pallas_src>

<mosaic_0001>
module attributes {stable_mosaic.version = 11 : i64} {
  func.func @_visbl_kernel(%arg0: i32, %arg1: memref<1x49x128xbf16, #tpu.memory_space<vmem>>, %arg2: memref<128x128xbf16, #tpu.memory_space<vmem>>, %arg3: memref<1x128xf32, #tpu.memory_space<vmem>>, %arg4: memref<128x2304xbf16, #tpu.memory_space<vmem>>, %arg5: memref<1x256xf32, #tpu.memory_space<vmem>>, %arg6: memref<256x4608xbf16, #tpu.memory_space<vmem>>, %arg7: memref<1x512xf32, #tpu.memory_space<vmem>>, %arg8: memref<512x512xbf16, #tpu.memory_space<vmem>>, %arg9: memref<1x512xf32, #tpu.memory_space<vmem>>, %arg10: memref<1x1x512xbf16, #tpu.memory_space<vmem>>) attributes {dimension_semantics = [#tpu.dimension_semantics<parallel>], iteration_bounds = array<i64: 2>, scalar_prefetch = 0 : i64, scratch_operands = 0 : i64, tpu.core_type = #tpu.core_type<tc>, window_params = [{transform_indices = @transform_0, window_bounds = array<i64: 1, 49, 128>}, {pipeline_mode = #tpu.pipeline_mode<synchronous>, transform_indices = @transform_1, window_bounds = array<i64: 128, 128>}, {pipeline_mode = #tpu.pipeline_mode<synchronous>, transform_indices = @transform_2, window_bounds = array<i64: 1, 128>}, {pipeline_mode = #tpu.pipeline_mode<synchronous>, transform_indices = @transform_3, window_bounds = array<i64: 128, 2304>}, {pipeline_mode = #tpu.pipeline_mode<synchronous>, transform_indices = @transform_4, window_bounds = array<i64: 1, 256>}, {pipeline_mode = #tpu.pipeline_mode<synchronous>, transform_indices = @transform_5, window_bounds = array<i64: 256, 4608>}, {pipeline_mode = #tpu.pipeline_mode<synchronous>, transform_indices = @transform_6, window_bounds = array<i64: 1, 512>}, {pipeline_mode = #tpu.pipeline_mode<synchronous>, transform_indices = @transform_7, window_bounds = array<i64: 512, 512>}, {pipeline_mode = #tpu.pipeline_mode<synchronous>, transform_indices = @transform_8, window_bounds = array<i64: 1, 512>}, {transform_indices = @transform_9, window_bounds = array<i64: 1, 1, 512>}]} {
    %c0 = arith.constant 0 : index
    %c0_0 = arith.constant 0 : index
    %c0_1 = arith.constant 0 : index
    %0 = vector.load %arg1[%c0, %c0_0, %c0_1] : memref<1x49x128xbf16, #tpu.memory_space<vmem>>, vector<1x49x128xbf16>
    %1 = vector.shape_cast %0 : vector<1x49x128xbf16> to vector<49x128xbf16>
    %c0_2 = arith.constant 0 : index
    %c0_3 = arith.constant 0 : index
    %2 = vector.load %arg2[%c0_2, %c0_3] : memref<128x128xbf16, #tpu.memory_space<vmem>>, vector<128x128xbf16>
    %cst = arith.constant dense<0.000000e+00> : vector<49x128xf32>
    %3 = tpu.matmul %1, %2, %cst {dimension_numbers = #tpu.dot_dimension_numbers<[1], [0], [0], [1], [0, 0, 1, 1], [], []>} : vector<49x128xbf16>, vector<128x128xbf16>, vector<49x128xf32> -> vector<49x128xf32>
    %c0_4 = arith.constant 0 : index
    %c0_5 = arith.constant 0 : index
    %4 = vector.load %arg3[%c0_4, %c0_5] : memref<1x128xf32, #tpu.memory_space<vmem>>, vector<1x128xf32>
    %5 = vector.broadcast %4 : vector<1x128xf32> to vector<49x128xf32>
    %6 = arith.addf %3, %5 : vector<49x128xf32>
    %cst_6 = arith.constant 0.000000e+00 : f32
    %7 = vector.broadcast %cst_6 : f32 to vector<49x128xf32>
    %8 = arith.maximumf %6, %7 : vector<49x128xf32>
    %9 = vector.extract_strided_slice %8 {offsets = [0, 0], sizes = [5, 128], strides = [1, 1]} : vector<49x128xf32> to vector<5x128xf32>
    %10 = vector.extract_strided_slice %8 {offsets = [1, 0], sizes = [5, 128], strides = [1, 1]} : vector<49x128xf32> to vector<5x128xf32>
    %11 = arith.maximumf %9, %10 : vector<5x128xf32>
    %12 = vector.extract_strided_slice %8 {offsets = [2, 0], sizes = [5, 128], strides = [1, 1]} : vector<49x128xf32> to vector<5x128xf32>
    %13 = arith.maximumf %11, %12 : vector<5x128xf32>
    %14 = vector.extract_strided_slice %8 {offsets = [7, 0], sizes = [5, 128], strides = [1, 1]} : vector<49x128xf32> to vector<5x128xf32>
    %15 = vector.extract_strided_slice %8 {offsets = [8, 0], sizes = [5, 128], strides = [1, 1]} : vector<49x128xf32> to vector<5x128xf32>
    %16 = arith.maximumf %14, %15 : vector<5x128xf32>
    %17 = vector.extract_strided_slice %8 {offsets = [9, 0], sizes = [5, 128], strides = [1, 1]} : vector<49x128xf32> to vector<5x128xf32>
    %18 = arith.maximumf %16, %17 : vector<5x128xf32>
    %19 = vector.extract_strided_slice %8 {offsets = [14, 0], sizes = [5, 128], strides = [1, 1]} : vector<49x128xf32> to vector<5x128xf32>
    %20 = vector.extract_strided_slice %8 {offsets = [15, 0], sizes = [5, 128], strides = [1, 1]} : vector<49x128xf32> to vector<5x128xf32>
    %21 = arith.maximumf %19, %20 : vector<5x128xf32>
    %22 = vector.extract_strided_slice %8 {offsets = [16, 0], sizes = [5, 128], strides = [1, 1]} : vector<49x128xf32> to vector<5x128xf32>
    %23 = arith.maximumf %21, %22 : vector<5x128xf32>
    %24 = vector.extract_strided_slice %8 {offsets = [21, 0], sizes = [5, 128], strides = [1, 1]} : vector<49x128xf32> to vector<5x128xf32>
    %25 = vector.extract_strided_slice %8 {offsets = [22, 0], sizes = [5, 128], strides = [1, 1]} : vector<49x128xf32> to vector<5x128xf32>
    %26 = arith.maximumf %24, %25 : vector<5x128xf32>
    %27 = vector.extract_strided_slice %8 {offsets = [23, 0], sizes = [5, 128], strides = [1, 1]} : vector<49x128xf32> to vector<5x128xf32>
    %28 = arith.maximumf %26, %27 : vector<5x128xf32>
    %29 = vector.extract_strided_slice %8 {offsets = [28, 0], sizes = [5, 128], strides = [1, 1]} : vector<49x128xf32> to vector<5x128xf32>
    %30 = vector.extract_strided_slice %8 {offsets = [29, 0], sizes = [5, 128], strides = [1, 1]} : vector<49x128xf32> to vector<5x128xf32>
    %31 = arith.maximumf %29, %30 : vector<5x128xf32>
    %32 = vector.extract_strided_slice %8 {offsets = [30, 0], sizes = [5, 128], strides = [1, 1]} : vector<49x128xf32> to vector<5x128xf32>
    %33 = arith.maximumf %31, %32 : vector<5x128xf32>
    %34 = vector.extract_strided_slice %8 {offsets = [35, 0], sizes = [5, 128], strides = [1, 1]} : vector<49x128xf32> to vector<5x128xf32>
    %35 = vector.extract_strided_slice %8 {offsets = [36, 0], sizes = [5, 128], strides = [1, 1]} : vector<49x128xf32> to vector<5x128xf32>
    %36 = arith.maximumf %34, %35 : vector<5x128xf32>
    %37 = vector.extract_strided_slice %8 {offsets = [37, 0], sizes = [5, 128], strides = [1, 1]} : vector<49x128xf32> to vector<5x128xf32>
    %38 = arith.maximumf %36, %37 : vector<5x128xf32>
    %39 = vector.extract_strided_slice %8 {offsets = [42, 0], sizes = [5, 128], strides = [1, 1]} : vector<49x128xf32> to vector<5x128xf32>
    %40 = vector.extract_strided_slice %8 {offsets = [43, 0], sizes = [5, 128], strides = [1, 1]} : vector<49x128xf32> to vector<5x128xf32>
    %41 = arith.maximumf %39, %40 : vector<5x128xf32>
    %42 = vector.extract_strided_slice %8 {offsets = [44, 0], sizes = [5, 128], strides = [1, 1]} : vector<49x128xf32> to vector<5x128xf32>
    %43 = arith.maximumf %41, %42 : vector<5x128xf32>
    %44 = arith.maximumf %13, %18 : vector<5x128xf32>
    %45 = arith.maximumf %44, %23 : vector<5x128xf32>
    %46 = arith.maximumf %18, %23 : vector<5x128xf32>
    %47 = arith.maximumf %46, %28 : vector<5x128xf32>
    %48 = arith.maximumf %23, %28 : vector<5x128xf32>
    %49 = arith.maximumf %48, %33 : vector<5x128xf32>
    %50 = arith.maximumf %28, %33 : vector<5x128xf32>
    %51 = arith.maximumf %50, %38 : vector<5x128xf32>
    %52 = arith.maximumf %33, %38 : vector<5x128xf32>
    %53 = arith.maximumf %52, %43 : vector<5x128xf32>
    %cst_7 = arith.constant 0.000000e+00 : bf16
    %54 = vector.broadcast %cst_7 : bf16 to vector<7x128xbf16>
    %cst_8 = arith.constant 0.000000e+00 : bf16
    %55 = vector.broadcast %cst_8 : bf16 to vector<1x128xbf16>
    %56 = arith.truncf %45 : vector<5x128xf32> to vector<5x128xbf16>
    %57 = tpu.concatenate %55, %56, %55 in 0 : vector<1x128xbf16>, vector<5x128xbf16>, vector<1x128xbf16> -> vector<7x128xbf16>
    %58 = arith.truncf %47 : vector<5x128xf32> to vector<5x128xbf16>
    %59 = tpu.concatenate %55, %58, %55 in 0 : vector<1x128xbf16>, vector<5x128xbf16>, vector<1x128xbf16> -> vector<7x128xbf16>
    %60 = arith.truncf %49 : vector<5x128xf32> to vector<5x128xbf16>
    %61 = tpu.concatenate %55, %60, %55 in 0 : vector<1x128xbf16>, vector<5x128xbf16>, vector<1x128xbf16> -> vector<7x128xbf16>
    %62 = arith.truncf %51 : vector<5x128xf32> to vector<5x128xbf16>
    %63 = tpu.concatenate %55, %62, %55 in 0 : vector<1x128xbf16>, vector<5x128xbf16>, vector<1x128xbf16> -> vector<7x128xbf16>
    %64 = arith.truncf %53 : vector<5x128xf32> to vector<5x128xbf16>
    %65 = tpu.concatenate %55, %64, %55 in 0 : vector<1x128xbf16>, vector<5x128xbf16>, vector<1x128xbf16> -> vector<7x128xbf16>
    %66 = tpu.concatenate %54, %57, %59, %61, %63, %65, %54 in 0 : vector<7x128xbf16>, vector<7x128xbf16>, vector<7x128xbf16>, vector<7x128xbf16>, vector<7x128xbf16>, vector<7x128xbf16>, vector<7x128xbf16> -> vector<49x128xbf16>
    %c0_9 = arith.constant 0 : index
    %c0_10 = arith.constant 0 : index
    %67 = vector.load %arg4[%c0_9, %c0_10] : memref<128x2304xbf16, #tpu.memory_space<vmem>>, vector<128x2304xbf16>
    %cst_11 = arith.constant dense<0.000000e+00> : vector<49x2304xf32>
    %68 = tpu.matmul %66, %67, %cst_11 {dimension_numbers = #tpu.dot_dimension_numbers<[1], [0], [0], [1], [0, 0, 1, 1], [], []>} : vector<49x128xbf16>, vector<128x2304xbf16>, vector<49x2304xf32> -> vector<49x2304xf32>
    %c0_12 = arith.constant 0 : index
    %c0_13 = arith.constant 0 : index
    %69 = vector.load %arg5[%c0_12, %c0_13] : memref<1x256xf32, #tpu.memory_space<vmem>>, vector<1x256xf32>
    %cst_14 = arith.constant 0.000000e+00 : f32
    %70 = vector.broadcast %cst_14 : f32 to vector<5x256xf32>
    %71 = vector.extract_strided_slice %68 {offsets = [0, 0], sizes = [5, 256], strides = [1, 1]} : vector<49x2304xf32> to vector<5x256xf32>
    %72 = arith.addf %70, %71 : vector<5x256xf32>
    %73 = vector.extract_strided_slice %68 {offsets = [1, 256], sizes = [5, 256], strides = [1, 1]} : vector<49x2304xf32> to vector<5x256xf32>
    %74 = arith.addf %72, %73 : vector<5x256xf32>
    %75 = vector.extract_strided_slice %68 {offsets = [2, 512], sizes = [5, 256], strides = [1, 1]} : vector<49x2304xf32> to vector<5x256xf32>
    %76 = arith.addf %74, %75 : vector<5x256xf32>
    %77 = vector.extract_strided_slice %68 {offsets = [7, 768], sizes = [5, 256], strides = [1, 1]} : vector<49x2304xf32> to vector<5x256xf32>
    %78 = arith.addf %76, %77 : vector<5x256xf32>
    %79 = vector.extract_strided_slice %68 {offsets = [8, 1024], sizes = [5, 256], strides = [1, 1]} : vector<49x2304xf32> to vector<5x256xf32>
    %80 = arith.addf %78, %79 : vector<5x256xf32>
    %81 = vector.extract_strided_slice %68 {offsets = [9, 1280], sizes = [5, 256], strides = [1, 1]} : vector<49x2304xf32> to vector<5x256xf32>
    %82 = arith.addf %80, %81 : vector<5x256xf32>
    %83 = vector.extract_strided_slice %68 {offsets = [14, 1536], sizes = [5, 256], strides = [1, 1]} : vector<49x2304xf32> to vector<5x256xf32>
    %84 = arith.addf %82, %83 : vector<5x256xf32>
    %85 = vector.extract_strided_slice %68 {offsets = [15, 1792], sizes = [5, 256], strides = [1, 1]} : vector<49x2304xf32> to vector<5x256xf32>
    %86 = arith.addf %84, %85 : vector<5x256xf32>
    %87 = vector.extract_strided_slice %68 {offsets = [16, 2048], sizes = [5, 256], strides = [1, 1]} : vector<49x2304xf32> to vector<5x256xf32>
    %88 = arith.addf %86, %87 : vector<5x256xf32>
    %89 = vector.broadcast %69 : vector<1x256xf32> to vector<5x256xf32>
    %90 = arith.addf %88, %89 : vector<5x256xf32>
    %cst_15 = arith.constant 0.000000e+00 : f32
    %91 = vector.broadcast %cst_15 : f32 to vector<5x256xf32>
    %92 = arith.maximumf %90, %91 : vector<5x256xf32>
    %cst_16 = arith.constant 0.000000e+00 : f32
    %93 = vector.broadcast %cst_16 : f32 to vector<5x256xf32>
    %94 = vector.extract_strided_slice %68 {offsets = [7, 0], sizes = [5, 256], strides = [1, 1]} : vector<49x2304xf32> to vector<5x256xf32>
    %95 = arith.addf %93, %94 : vector<5x256xf32>
    %96 = vector.extract_strided_slice %68 {offsets = [8, 256], sizes = [5, 256], strides = [1, 1]} : vector<49x2304xf32> to vector<5x256xf32>
    %97 = arith.addf %95, %96 : vector<5x256xf32>
    %98 = vector.extract_strided_slice %68 {offsets = [9, 512], sizes = [5, 256], strides = [1, 1]} : vector<49x2304xf32> to vector<5x256xf32>
    %99 = arith.addf %97, %98 : vector<5x256xf32>
    %100 = vector.extract_strided_slice %68 {offsets = [14, 768], sizes = [5, 256], strides = [1, 1]} : vector<49x2304xf32> to vector<5x256xf32>
    %101 = arith.addf %99, %100 : vector<5x256xf32>
    %102 = vector.extract_strided_slice %68 {offsets = [15, 1024], sizes = [5, 256], strides = [1, 1]} : vector<49x2304xf32> to vector<5x256xf32>
    %103 = arith.addf %101, %102 : vector<5x256xf32>
    %104 = vector.extract_strided_slice %68 {offsets = [16, 1280], sizes = [5, 256], strides = [1, 1]} : vector<49x2304xf32> to vector<5x256xf32>
    %105 = arith.addf %103, %104 : vector<5x256xf32>
    %106 = vector.extract_strided_slice %68 {offsets = [21, 1536], sizes = [5, 256], strides = [1, 1]} : vector<49x2304xf32> to vector<5x256xf32>
    %107 = arith.addf %105, %106 : vector<5x256xf32>
    %108 = vector.extract_strided_slice %68 {offsets = [22, 1792], sizes = [5, 256], strides = [1, 1]} : vector<49x2304xf32> to vector<5x256xf32>
    %109 = arith.addf %107, %108 : vector<5x256xf32>
    %110 = vector.extract_strided_slice %68 {offsets = [23, 2048], sizes = [5, 256], strides = [1, 1]} : vector<49x2304xf32> to vector<5x256xf32>
    %111 = arith.addf %109, %110 : vector<5x256xf32>
    %112 = vector.broadcast %69 : vector<1x256xf32> to vector<5x256xf32>
    %113 = arith.addf %111, %112 : vector<5x256xf32>
    %cst_17 = arith.constant 0.000000e+00 : f32
    %114 = vector.broadcast %cst_17 : f32 to vector<5x256xf32>
    %115 = arith.maximumf %113, %114 : vector<5x256xf32>
    %cst_18 = arith.constant 0.000000e+00 : f32
    %116 = vector.broadcast %cst_18 : f32 to vector<5x256xf32>
    %117 = vector.extract_strided_slice %68 {offsets = [14, 0], sizes = [5, 256], strides = [1, 1]} : vector<49x2304xf32> to vector<5x256xf32>
    %118 = arith.addf %116, %117 : vector<5x256xf32>
    %119 = vector.extract_strided_slice %68 {offsets = [15, 256], sizes = [5, 256], strides = [1, 1]} : vector<49x2304xf32> to vector<5x256xf32>
    %120 = arith.addf %118, %119 : vector<5x256xf32>
    %121 = vector.extract_strided_slice %68 {offsets = [16, 512], sizes = [5, 256], strides = [1, 1]} : vector<49x2304xf32> to vector<5x256xf32>
    %122 = arith.addf %120, %121 : vector<5x256xf32>
    %123 = vector.extract_strided_slice %68 {offsets = [21, 768], sizes = [5, 256], strides = [1, 1]} : vector<49x2304xf32> to vector<5x256xf32>
    %124 = arith.addf %122, %123 : vector<5x256xf32>
    %125 = vector.extract_strided_slice %68 {offsets = [22, 1024], sizes = [5, 256], strides = [1, 1]} : vector<49x2304xf32> to vector<5x256xf32>
    %126 = arith.addf %124, %125 : vector<5x256xf32>
    %127 = vector.extract_strided_slice %68 {offsets = [23, 1280], sizes = [5, 256], strides = [1, 1]} : vector<49x2304xf32> to vector<5x256xf32>
    %128 = arith.addf %126, %127 : vector<5x256xf32>
    %129 = vector.extract_strided_slice %68 {offsets = [28, 1536], sizes = [5, 256], strides = [1, 1]} : vector<49x2304xf32> to vector<5x256xf32>
    %130 = arith.addf %128, %129 : vector<5x256xf32>
    %131 = vector.extract_strided_slice %68 {offsets = [29, 1792], sizes = [5, 256], strides = [1, 1]} : vector<49x2304xf32> to vector<5x256xf32>
    %132 = arith.addf %130, %131 : vector<5x256xf32>
    %133 = vector.extract_strided_slice %68 {offsets = [30, 2048], sizes = [5, 256], strides = [1, 1]} : vector<49x2304xf32> to vector<5x256xf32>
    %134 = arith.addf %132, %133 : vector<5x256xf32>
    %135 = vector.broadcast %69 : vector<1x256xf32> to vector<5x256xf32>
    %136 = arith.addf %134, %135 : vector<5x256xf32>
    %cst_19 = arith.constant 0.000000e+00 : f32
    %137 = vector.broadcast %cst_19 : f32 to vector<5x256xf32>
    %138 = arith.maximumf %136, %137 : vector<5x256xf32>
    %cst_20 = arith.constant 0.000000e+00 : f32
    %139 = vector.broadcast %cst_20 : f32 to vector<5x256xf32>
    %140 = vector.extract_strided_slice %68 {offsets = [21, 0], sizes = [5, 256], strides = [1, 1]} : vector<49x2304xf32> to vector<5x256xf32>
    %141 = arith.addf %139, %140 : vector<5x256xf32>
    %142 = vector.extract_strided_slice %68 {offsets = [22, 256], sizes = [5, 256], strides = [1, 1]} : vector<49x2304xf32> to vector<5x256xf32>
    %143 = arith.addf %141, %142 : vector<5x256xf32>
    %144 = vector.extract_strided_slice %68 {offsets = [23, 512], sizes = [5, 256], strides = [1, 1]} : vector<49x2304xf32> to vector<5x256xf32>
    %145 = arith.addf %143, %144 : vector<5x256xf32>
    %146 = vector.extract_strided_slice %68 {offsets = [28, 768], sizes = [5, 256], strides = [1, 1]} : vector<49x2304xf32> to vector<5x256xf32>
    %147 = arith.addf %145, %146 : vector<5x256xf32>
    %148 = vector.extract_strided_slice %68 {offsets = [29, 1024], sizes = [5, 256], strides = [1, 1]} : vector<49x2304xf32> to vector<5x256xf32>
    %149 = arith.addf %147, %148 : vector<5x256xf32>
    %150 = vector.extract_strided_slice %68 {offsets = [30, 1280], sizes = [5, 256], strides = [1, 1]} : vector<49x2304xf32> to vector<5x256xf32>
    %151 = arith.addf %149, %150 : vector<5x256xf32>
    %152 = vector.extract_strided_slice %68 {offsets = [35, 1536], sizes = [5, 256], strides = [1, 1]} : vector<49x2304xf32> to vector<5x256xf32>
    %153 = arith.addf %151, %152 : vector<5x256xf32>
    %154 = vector.extract_strided_slice %68 {offsets = [36, 1792], sizes = [5, 256], strides = [1, 1]} : vector<49x2304xf32> to vector<5x256xf32>
    %155 = arith.addf %153, %154 : vector<5x256xf32>
    %156 = vector.extract_strided_slice %68 {offsets = [37, 2048], sizes = [5, 256], strides = [1, 1]} : vector<49x2304xf32> to vector<5x256xf32>
    %157 = arith.addf %155, %156 : vector<5x256xf32>
    %158 = vector.broadcast %69 : vector<1x256xf32> to vector<5x256xf32>
    %159 = arith.addf %157, %158 : vector<5x256xf32>
    %cst_21 = arith.constant 0.000000e+00 : f32
    %160 = vector.broadcast %cst_21 : f32 to vector<5x256xf32>
    %161 = arith.maximumf %159, %160 : vector<5x256xf32>
    %cst_22 = arith.constant 0.000000e+00 : f32
    %162 = vector.broadcast %cst_22 : f32 to vector<5x256xf32>
    %163 = vector.extract_strided_slice %68 {offsets = [28, 0], sizes = [5, 256], strides = [1, 1]} : vector<49x2304xf32> to vector<5x256xf32>
    %164 = arith.addf %162, %163 : vector<5x256xf32>
    %165 = vector.extract_strided_slice %68 {offsets = [29, 256], sizes = [5, 256], strides = [1, 1]} : vector<49x2304xf32> to vector<5x256xf32>
    %166 = arith.addf %164, %165 : vector<5x256xf32>
    %167 = vector.extract_strided_slice %68 {offsets = [30, 512], sizes = [5, 256], strides = [1, 1]} : vector<49x2304xf32> to vector<5x256xf32>
    %168 = arith.addf %166, %167 : vector<5x256xf32>
    %169 = vector.extract_strided_slice %68 {offsets = [35, 768], sizes = [5, 256], strides = [1, 1]} : vector<49x2304xf32> to vector<5x256xf32>
    %170 = arith.addf %168, %169 : vector<5x256xf32>
    %171 = vector.extract_strided_slice %68 {offsets = [36, 1024], sizes = [5, 256], strides = [1, 1]} : vector<49x2304xf32> to vector<5x256xf32>
    %172 = arith.addf %170, %171 : vector<5x256xf32>
    %173 = vector.extract_strided_slice %68 {offsets = [37, 1280], sizes = [5, 256], strides = [1, 1]} : vector<49x2304xf32> to vector<5x256xf32>
    %174 = arith.addf %172, %173 : vector<5x256xf32>
    %175 = vector.extract_strided_slice %68 {offsets = [42, 1536], sizes = [5, 256], strides = [1, 1]} : vector<49x2304xf32> to vector<5x256xf32>
    %176 = arith.addf %174, %175 : vector<5x256xf32>
    %177 = vector.extract_strided_slice %68 {offsets = [43, 1792], sizes = [5, 256], strides = [1, 1]} : vector<49x2304xf32> to vector<5x256xf32>
    %178 = arith.addf %176, %177 : vector<5x256xf32>
    %179 = vector.extract_strided_slice %68 {offsets = [44, 2048], sizes = [5, 256], strides = [1, 1]} : vector<49x2304xf32> to vector<5x256xf32>
    %180 = arith.addf %178, %179 : vector<5x256xf32>
    %181 = vector.broadcast %69 : vector<1x256xf32> to vector<5x256xf32>
    %182 = arith.addf %180, %181 : vector<5x256xf32>
    %cst_23 = arith.constant 0.000000e+00 : f32
    %183 = vector.broadcast %cst_23 : f32 to vector<5x256xf32>
    %184 = arith.maximumf %182, %183 : vector<5x256xf32>
    %185 = vector.extract_strided_slice %92 {offsets = [0, 0], sizes = [3, 256], strides = [1, 1]} : vector<5x256xf32> to vector<3x256xf32>
    %186 = vector.extract_strided_slice %92 {offsets = [1, 0], sizes = [3, 256], strides = [1, 1]} : vector<5x256xf32> to vector<3x256xf32>
    %187 = arith.maximumf %185, %186 : vector<3x256xf32>
    %188 = vector.extract_strided_slice %92 {offsets = [2, 0], sizes = [3, 256], strides = [1, 1]} : vector<5x256xf32> to vector<3x256xf32>
    %189 = arith.maximumf %187, %188 : vector<3x256xf32>
    %190 = vector.extract_strided_slice %115 {offsets = [0, 0], sizes = [3, 256], strides = [1, 1]} : vector<5x256xf32> to vector<3x256xf32>
    %191 = vector.extract_strided_slice %115 {offsets = [1, 0], sizes = [3, 256], strides = [1, 1]} : vector<5x256xf32> to vector<3x256xf32>
    %192 = arith.maximumf %190, %191 : vector<3x256xf32>
    %193 = vector.extract_strided_slice %115 {offsets = [2, 0], sizes = [3, 256], strides = [1, 1]} : vector<5x256xf32> to vector<3x256xf32>
    %194 = arith.maximumf %192, %193 : vector<3x256xf32>
    %195 = vector.extract_strided_slice %138 {offsets = [0, 0], sizes = [3, 256], strides = [1, 1]} : vector<5x256xf32> to vector<3x256xf32>
    %196 = vector.extract_strided_slice %138 {offsets = [1, 0], sizes = [3, 256], strides = [1, 1]} : vector<5x256xf32> to vector<3x256xf32>
    %197 = arith.maximumf %195, %196 : vector<3x256xf32>
    %198 = vector.extract_strided_slice %138 {offsets = [2, 0], sizes = [3, 256], strides = [1, 1]} : vector<5x256xf32> to vector<3x256xf32>
    %199 = arith.maximumf %197, %198 : vector<3x256xf32>
    %200 = vector.extract_strided_slice %161 {offsets = [0, 0], sizes = [3, 256], strides = [1, 1]} : vector<5x256xf32> to vector<3x256xf32>
    %201 = vector.extract_strided_slice %161 {offsets = [1, 0], sizes = [3, 256], strides = [1, 1]} : vector<5x256xf32> to vector<3x256xf32>
    %202 = arith.maximumf %200, %201 : vector<3x256xf32>
    %203 = vector.extract_strided_slice %161 {offsets = [2, 0], sizes = [3, 256], strides = [1, 1]} : vector<5x256xf32> to vector<3x256xf32>
    %204 = arith.maximumf %202, %203 : vector<3x256xf32>
    %205 = vector.extract_strided_slice %184 {offsets = [0, 0], sizes = [3, 256], strides = [1, 1]} : vector<5x256xf32> to vector<3x256xf32>
    %206 = vector.extract_strided_slice %184 {offsets = [1, 0], sizes = [3, 256], strides = [1, 1]} : vector<5x256xf32> to vector<3x256xf32>
    %207 = arith.maximumf %205, %206 : vector<3x256xf32>
    %208 = vector.extract_strided_slice %184 {offsets = [2, 0], sizes = [3, 256], strides = [1, 1]} : vector<5x256xf32> to vector<3x256xf32>
    %209 = arith.maximumf %207, %208 : vector<3x256xf32>
    %210 = arith.maximumf %189, %194 : vector<3x256xf32>
    %211 = arith.maximumf %210, %199 : vector<3x256xf32>
    %212 = arith.maximumf %194, %199 : vector<3x256xf32>
    %213 = arith.maximumf %212, %204 : vector<3x256xf32>
    %214 = arith.maximumf %199, %204 : vector<3x256xf32>
    %215 = arith.maximumf %214, %209 : vector<3x256xf32>
    %cst_24 = arith.constant 0.000000e+00 : bf16
    %216 = vector.broadcast %cst_24 : bf16 to vector<5x256xbf16>
    %cst_25 = arith.constant 0.000000e+00 : bf16
    %217 = vector.broadcast %cst_25 : bf16 to vector<1x256xbf16>
    %218 = arith.truncf %211 : vector<3x256xf32> to vector<3x256xbf16>
    %219 = tpu.concatenate %217, %218, %217 in 0 : vector<1x256xbf16>, vector<3x256xbf16>, vector<1x256xbf16> -> vector<5x256xbf16>
    %220 = arith.truncf %213 : vector<3x256xf32> to vector<3x256xbf16>
    %221 = tpu.concatenate %217, %220, %217 in 0 : vector<1x256xbf16>, vector<3x256xbf16>, vector<1x256xbf16> -> vector<5x256xbf16>
    %222 = arith.truncf %215 : vector<3x256xf32> to vector<3x256xbf16>
    %223 = tpu.concatenate %217, %222, %217 in 0 : vector<1x256xbf16>, vector<3x256xbf16>, vector<1x256xbf16> -> vector<5x256xbf16>
    %224 = tpu.concatenate %216, %219, %221, %223, %216 in 0 : vector<5x256xbf16>, vector<5x256xbf16>, vector<5x256xbf16>, vector<5x256xbf16>, vector<5x256xbf16> -> vector<25x256xbf16>
    %c0_26 = arith.constant 0 : index
    %c0_27 = arith.constant 0 : index
    %225 = vector.load %arg6[%c0_26, %c0_27] : memref<256x4608xbf16, #tpu.memory_space<vmem>>, vector<256x4608xbf16>
    %cst_28 = arith.constant dense<0.000000e+00> : vector<25x4608xf32>
    %226 = tpu.matmul %224, %225, %cst_28 {dimension_numbers = #tpu.dot_dimension_numbers<[1], [0], [0], [1], [0, 0, 1, 1], [], []>} : vector<25x256xbf16>, vector<256x4608xbf16>, vector<25x4608xf32> -> vector<25x4608xf32>
    %c0_29 = arith.constant 0 : index
    %c0_30 = arith.constant 0 : index
    %227 = vector.load %arg7[%c0_29, %c0_30] : memref<1x512xf32, #tpu.memory_space<vmem>>, vector<1x512xf32>
    %cst_31 = arith.constant 0.000000e+00 : f32
    %228 = vector.broadcast %cst_31 : f32 to vector<3x512xf32>
    %229 = vector.extract_strided_slice %226 {offsets = [0, 0], sizes = [3, 512], strides = [1, 1]} : vector<25x4608xf32> to vector<3x512xf32>
    %230 = arith.addf %228, %229 : vector<3x512xf32>
    %231 = vector.extract_strided_slice %226 {offsets = [1, 512], sizes = [3, 512], strides = [1, 1]} : vector<25x4608xf32> to vector<3x512xf32>
    %232 = arith.addf %230, %231 : vector<3x512xf32>
    %233 = vector.extract_strided_slice %226 {offsets = [2, 1024], sizes = [3, 512], strides = [1, 1]} : vector<25x4608xf32> to vector<3x512xf32>
    %234 = arith.addf %232, %233 : vector<3x512xf32>
    %235 = vector.extract_strided_slice %226 {offsets = [5, 1536], sizes = [3, 512], strides = [1, 1]} : vector<25x4608xf32> to vector<3x512xf32>
    %236 = arith.addf %234, %235 : vector<3x512xf32>
    %237 = vector.extract_strided_slice %226 {offsets = [6, 2048], sizes = [3, 512], strides = [1, 1]} : vector<25x4608xf32> to vector<3x512xf32>
    %238 = arith.addf %236, %237 : vector<3x512xf32>
    %239 = vector.extract_strided_slice %226 {offsets = [7, 2560], sizes = [3, 512], strides = [1, 1]} : vector<25x4608xf32> to vector<3x512xf32>
    %240 = arith.addf %238, %239 : vector<3x512xf32>
    %241 = vector.extract_strided_slice %226 {offsets = [10, 3072], sizes = [3, 512], strides = [1, 1]} : vector<25x4608xf32> to vector<3x512xf32>
    %242 = arith.addf %240, %241 : vector<3x512xf32>
    %243 = vector.extract_strided_slice %226 {offsets = [11, 3584], sizes = [3, 512], strides = [1, 1]} : vector<25x4608xf32> to vector<3x512xf32>
    %244 = arith.addf %242, %243 : vector<3x512xf32>
    %245 = vector.extract_strided_slice %226 {offsets = [12, 4096], sizes = [3, 512], strides = [1, 1]} : vector<25x4608xf32> to vector<3x512xf32>
    %246 = arith.addf %244, %245 : vector<3x512xf32>
    %247 = vector.broadcast %227 : vector<1x512xf32> to vector<3x512xf32>
    %248 = arith.addf %246, %247 : vector<3x512xf32>
    %cst_32 = arith.constant 0.000000e+00 : f32
    %249 = vector.broadcast %cst_32 : f32 to vector<3x512xf32>
    %250 = arith.maximumf %248, %249 : vector<3x512xf32>
    %cst_33 = arith.constant 0.000000e+00 : f32
    %251 = vector.broadcast %cst_33 : f32 to vector<3x512xf32>
    %252 = vector.extract_strided_slice %226 {offsets = [5, 0], sizes = [3, 512], strides = [1, 1]} : vector<25x4608xf32> to vector<3x512xf32>
    %253 = arith.addf %251, %252 : vector<3x512xf32>
    %254 = vector.extract_strided_slice %226 {offsets = [6, 512], sizes = [3, 512], strides = [1, 1]} : vector<25x4608xf32> to vector<3x512xf32>
    %255 = arith.addf %253, %254 : vector<3x512xf32>
    %256 = vector.extract_strided_slice %226 {offsets = [7, 1024], sizes = [3, 512], strides = [1, 1]} : vector<25x4608xf32> to vector<3x512xf32>
    %257 = arith.addf %255, %256 : vector<3x512xf32>
    %258 = vector.extract_strided_slice %226 {offsets = [10, 1536], sizes = [3, 512], strides = [1, 1]} : vector<25x4608xf32> to vector<3x512xf32>
    %259 = arith.addf %257, %258 : vector<3x512xf32>
    %260 = vector.extract_strided_slice %226 {offsets = [11, 2048], sizes = [3, 512], strides = [1, 1]} : vector<25x4608xf32> to vector<3x512xf32>
    %261 = arith.addf %259, %260 : vector<3x512xf32>
    %262 = vector.extract_strided_slice %226 {offsets = [12, 2560], sizes = [3, 512], strides = [1, 1]} : vector<25x4608xf32> to vector<3x512xf32>
    %263 = arith.addf %261, %262 : vector<3x512xf32>
    %264 = vector.extract_strided_slice %226 {offsets = [15, 3072], sizes = [3, 512], strides = [1, 1]} : vector<25x4608xf32> to vector<3x512xf32>
    %265 = arith.addf %263, %264 : vector<3x512xf32>
    %266 = vector.extract_strided_slice %226 {offsets = [16, 3584], sizes = [3, 512], strides = [1, 1]} : vector<25x4608xf32> to vector<3x512xf32>
    %267 = arith.addf %265, %266 : vector<3x512xf32>
    %268 = vector.extract_strided_slice %226 {offsets = [17, 4096], sizes = [3, 512], strides = [1, 1]} : vector<25x4608xf32> to vector<3x512xf32>
    %269 = arith.addf %267, %268 : vector<3x512xf32>
    %270 = vector.broadcast %227 : vector<1x512xf32> to vector<3x512xf32>
    %271 = arith.addf %269, %270 : vector<3x512xf32>
    %cst_34 = arith.constant 0.000000e+00 : f32
    %272 = vector.broadcast %cst_34 : f32 to vector<3x512xf32>
    %273 = arith.maximumf %271, %272 : vector<3x512xf32>
    %cst_35 = arith.constant 0.000000e+00 : f32
    %274 = vector.broadcast %cst_35 : f32 to vector<3x512xf32>
    %275 = vector.extract_strided_slice %226 {offsets = [10, 0], sizes = [3, 512], strides = [1, 1]} : vector<25x4608xf32> to vector<3x512xf32>
    %276 = arith.addf %274, %275 : vector<3x512xf32>
    %277 = vector.extract_strided_slice %226 {offsets = [11, 512], sizes = [3, 512], strides = [1, 1]} : vector<25x4608xf32> to vector<3x512xf32>
    %278 = arith.addf %276, %277 : vector<3x512xf32>
    %279 = vector.extract_strided_slice %226 {offsets = [12, 1024], sizes = [3, 512], strides = [1, 1]} : vector<25x4608xf32> to vector<3x512xf32>
    %280 = arith.addf %278, %279 : vector<3x512xf32>
    %281 = vector.extract_strided_slice %226 {offsets = [15, 1536], sizes = [3, 512], strides = [1, 1]} : vector<25x4608xf32> to vector<3x512xf32>
    %282 = arith.addf %280, %281 : vector<3x512xf32>
    %283 = vector.extract_strided_slice %226 {offsets = [16, 2048], sizes = [3, 512], strides = [1, 1]} : vector<25x4608xf32> to vector<3x512xf32>
    %284 = arith.addf %282, %283 : vector<3x512xf32>
    %285 = vector.extract_strided_slice %226 {offsets = [17, 2560], sizes = [3, 512], strides = [1, 1]} : vector<25x4608xf32> to vector<3x512xf32>
    %286 = arith.addf %284, %285 : vector<3x512xf32>
    %287 = vector.extract_strided_slice %226 {offsets = [20, 3072], sizes = [3, 512], strides = [1, 1]} : vector<25x4608xf32> to vector<3x512xf32>
    %288 = arith.addf %286, %287 : vector<3x512xf32>
    %289 = vector.extract_strided_slice %226 {offsets = [21, 3584], sizes = [3, 512], strides = [1, 1]} : vector<25x4608xf32> to vector<3x512xf32>
    %290 = arith.addf %288, %289 : vector<3x512xf32>
    %291 = vector.extract_strided_slice %226 {offsets = [22, 4096], sizes = [3, 512], strides = [1, 1]} : vector<25x4608xf32> to vector<3x512xf32>
    %292 = arith.addf %290, %291 : vector<3x512xf32>
    %293 = vector.broadcast %227 : vector<1x512xf32> to vector<3x512xf32>
    %294 = arith.addf %292, %293 : vector<3x512xf32>
    %cst_36 = arith.constant 0.000000e+00 : f32
    %295 = vector.broadcast %cst_36 : f32 to vector<3x512xf32>
    %296 = arith.maximumf %294, %295 : vector<3x512xf32>
    %297 = arith.maximumf %250, %273 : vector<3x512xf32>
    %298 = arith.maximumf %297, %296 : vector<3x512xf32>
    %299 = vector.extract_strided_slice %298 {offsets = [0, 0], sizes = [1, 512], strides = [1, 1]} : vector<3x512xf32> to vector<1x512xf32>
    %300 = vector.extract_strided_slice %298 {offsets = [1, 0], sizes = [1, 512], strides = [1, 1]} : vector<3x512xf32> to vector<1x512xf32>
    %301 = arith.maximumf %299, %300 : vector<1x512xf32>
    %302 = vector.extract_strided_slice %298 {offsets = [2, 0], sizes = [1, 512], strides = [1, 1]} : vector<3x512xf32> to vector<1x512xf32>
    %303 = arith.maximumf %301, %302 : vector<1x512xf32>
    %304 = arith.truncf %303 : vector<1x512xf32> to vector<1x512xbf16>
    %c0_37 = arith.constant 0 : index
    %c0_38 = arith.constant 0 : index
    %305 = vector.load %arg8[%c0_37, %c0_38] : memref<512x512xbf16, #tpu.memory_space<vmem>>, vector<512x512xbf16>
    %cst_39 = arith.constant dense<0.000000e+00> : vector<1x512xf32>
    %306 = tpu.matmul %304, %305, %cst_39 {dimension_numbers = #tpu.dot_dimension_numbers<[1], [0], [0], [1], [0, 0, 1, 1], [], []>} : vector<1x512xbf16>, vector<512x512xbf16>, vector<1x512xf32> -> vector<1x512xf32>
    %c0_40 = arith.constant 0 : index
    %c0_41 = arith.constant 0 : index
    %307 = vector.load %arg9[%c0_40, %c0_41] : memref<1x512xf32, #tpu.memory_space<vmem>>, vector<1x512xf32>
    %308 = arith.addf %306, %307 : vector<1x512xf32>
    %cst_42 = arith.constant 0.000000e+00 : f32
    %309 = vector.broadcast %cst_42 : f32 to vector<1x512xf32>
    %310 = arith.maximumf %308, %309 : vector<1x512xf32>
    %311 = arith.truncf %310 : vector<1x512xf32> to vector<1x512xbf16>
    %c0_43 = arith.constant 0 : index
    %c0_44 = arith.constant 0 : index
    %c0_45 = arith.constant 0 : index
    %312 = vector.load %arg10[%c0_43, %c0_44, %c0_45] : memref<1x1x512xbf16, #tpu.memory_space<vmem>>, vector<1x1x512xbf16>
    %313 = vector.shape_cast %312 : vector<1x1x512xbf16> to vector<1x512xbf16>
    %314 = vector.shape_cast %311 : vector<1x512xbf16> to vector<1x1x512xbf16>
    tpu.vector_store %arg10[%c0_43, %c0_44, %c0_45], %314 {strides = array<i32>} : memref<1x1x512xbf16, #tpu.memory_space<vmem>>, vector<1x1x512xbf16>,
    return
  }
  func.func @transform_0(%arg0: i32) -> (i32, i32, i32) {
    %c0_i32 = arith.constant 0 : i32
    %c0_i32_0 = arith.constant 0 : i32
    %c0_i32_1 = arith.constant 0 : i32
    return %arg0, %c0_i32, %c0_i32_0 : i32, i32, i32
  }
  func.func @transform_1(%arg0: i32) -> (i32, i32) {
    %c0_i32 = arith.constant 0 : i32
    %c0_i32_0 = arith.constant 0 : i32
    %c0_i32_1 = arith.constant 0 : i32
    return %c0_i32, %c0_i32_0 : i32, i32
  }
  func.func @transform_2(%arg0: i32) -> (i32, i32) {
    %c0_i32 = arith.constant 0 : i32
    %c0_i32_0 = arith.constant 0 : i32
    %c0_i32_1 = arith.constant 0 : i32
    return %c0_i32, %c0_i32_0 : i32, i32
  }
  func.func @transform_3(%arg0: i32) -> (i32, i32) {
    %c0_i32 = arith.constant 0 : i32
    %c0_i32_0 = arith.constant 0 : i32
    %c0_i32_1 = arith.constant 0 : i32
    return %c0_i32, %c0_i32_0 : i32, i32
  }
  func.func @transform_4(%arg0: i32) -> (i32, i32) {
    %c0_i32 = arith.constant 0 : i32
    %c0_i32_0 = arith.constant 0 : i32
    %c0_i32_1 = arith.constant 0 : i32
    return %c0_i32, %c0_i32_0 : i32, i32
  }
  func.func @transform_5(%arg0: i32) -> (i32, i32) {
    %c0_i32 = arith.constant 0 : i32
    %c0_i32_0 = arith.constant 0 : i32
    %c0_i32_1 = arith.constant 0 : i32
    return %c0_i32, %c0_i32_0 : i32, i32
  }
  func.func @transform_6(%arg0: i32) -> (i32, i32) {
    %c0_i32 = arith.constant 0 : i32
    %c0_i32_0 = arith.constant 0 : i32
    %c0_i32_1 = arith.constant 0 : i32
    return %c0_i32, %c0_i32_0 : i32, i32
  }
  func.func @transform_7(%arg0: i32) -> (i32, i32) {
    %c0_i32 = arith.constant 0 : i32
    %c0_i32_0 = arith.constant 0 : i32
    %c0_i32_1 = arith.constant 0 : i32
    return %c0_i32, %c0_i32_0 : i32, i32
  }
  func.func @transform_8(%arg0: i32) -> (i32, i32) {
    %c0_i32 = arith.constant 0 : i32
    %c0_i32_0 = arith.constant 0 : i32
    %c0_i32_1 = arith.constant 0 : i32
    return %c0_i32, %c0_i32_0 : i32, i32
  }
  func.func @transform_9(%arg0: i32) -> (i32, i32, i32) {
    %c0_i32 = arith.constant 0 : i32
    %c0_i32_0 = arith.constant 0 : i32
    %c0_i32_1 = arith.constant 0 : i32
    return %arg0, %c0_i32, %c0_i32_0 : i32, i32, i32
  }
}

module attributes {stable_mosaic.version = 11 : i64} {
  func.func @_fusion_kernel(%arg0: i32, %arg1: memref<8x128xbf16, #tpu.memory_space<vmem>>, %arg2: memref<2x512xbf16, #tpu.memory_space<vmem>>, %arg3: memref<128x64xbf16, #tpu.memory_space<vmem>>, %arg4: memref<1x64xf32, #tpu.memory_space<vmem>>, %arg5: memref<64x384xbf16, #tpu.memory_space<vmem>>, %arg6: memref<1x128xf32, #tpu.memory_space<vmem>>, %arg7: memref<256x128xbf16, #tpu.memory_space<vmem>>, %arg8: memref<1x128xf32, #tpu.memory_space<vmem>>, %arg9: memref<640x512xbf16, #tpu.memory_space<vmem>>, %arg10: memref<1x512xf32, #tpu.memory_space<vmem>>, %arg11: memref<512x512xbf16, #tpu.memory_space<vmem>>, %arg12: memref<1x512xf32, #tpu.memory_space<vmem>>, %arg13: memref<512x256xbf16, #tpu.memory_space<vmem>>, %arg14: memref<1x256xf32, #tpu.memory_space<vmem>>, %arg15: memref<256x128xbf16, #tpu.memory_space<vmem>>, %arg16: memref<1x128xf32, #tpu.memory_space<vmem>>, %arg17: memref<128x128xbf16, #tpu.memory_space<vmem>>, %arg18: memref<1x128xf32, #tpu.memory_space<vmem>>, %arg19: memref<2x128xf32, #tpu.memory_space<vmem>>) attributes {dimension_semantics = [#tpu.dimension_semantics<arbitrary>], iteration_bounds = array<i64: 1>, scalar_prefetch = 0 : i64, scratch_operands = 0 : i64, tpu.core_type = #tpu.core_type<tc>, window_params = [{pipeline_mode = #tpu.pipeline_mode<synchronous>, transform_indices = @transform_0, window_bounds = array<i64: 8, 128>}, {pipeline_mode = #tpu.pipeline_mode<synchronous>, transform_indices = @transform_1, window_bounds = array<i64: 2, 512>}, {pipeline_mode = #tpu.pipeline_mode<synchronous>, transform_indices = @transform_2, window_bounds = array<i64: 128, 64>}, {pipeline_mode = #tpu.pipeline_mode<synchronous>, transform_indices = @transform_3, window_bounds = array<i64: 1, 64>}, {pipeline_mode = #tpu.pipeline_mode<synchronous>, transform_indices = @transform_4, window_bounds = array<i64: 64, 384>}, {pipeline_mode = #tpu.pipeline_mode<synchronous>, transform_indices = @transform_5, window_bounds = array<i64: 1, 128>}, {pipeline_mode = #tpu.pipeline_mode<synchronous>, transform_indices = @transform_6, window_bounds = array<i64: 256, 128>}, {pipeline_mode = #tpu.pipeline_mode<synchronous>, transform_indices = @transform_7, window_bounds = array<i64: 1, 128>}, {pipeline_mode = #tpu.pipeline_mode<synchronous>, transform_indices = @transform_8, window_bounds = array<i64: 640, 512>}, {pipeline_mode = #tpu.pipeline_mode<synchronous>, transform_indices = @transform_9, window_bounds = array<i64: 1, 512>}, {pipeline_mode = #tpu.pipeline_mode<synchronous>, transform_indices = @transform_10, window_bounds = array<i64: 512, 512>}, {pipeline_mode = #tpu.pipeline_mode<synchronous>, transform_indices = @transform_11, window_bounds = array<i64: 1, 512>}, {pipeline_mode = #tpu.pipeline_mode<synchronous>, transform_indices = @transform_12, window_bounds = array<i64: 512, 256>}, {pipeline_mode = #tpu.pipeline_mode<synchronous>, transform_indices = @transform_13, window_bounds = array<i64: 1, 256>}, {pipeline_mode = #tpu.pipeline_mode<synchronous>, transform_indices = @transform_14, window_bounds = array<i64: 256, 128>}, {pipeline_mode = #tpu.pipeline_mode<synchronous>, transform_indices = @transform_15, window_bounds = array<i64: 1, 128>}, {pipeline_mode = #tpu.pipeline_mode<synchronous>, transform_indices = @transform_16, window_bounds = array<i64: 128, 128>}, {pipeline_mode = #tpu.pipeline_mode<synchronous>, transform_indices = @transform_17, window_bounds = array<i64: 1, 128>}, {pipeline_mode = #tpu.pipeline_mode<synchronous>, transform_indices = @transform_18, window_bounds = array<i64: 2, 128>}]} {
    %c0 = arith.constant 0 : index
    %c0_0 = arith.constant 0 : index
    %0 = vector.load %arg1[%c0, %c0_0] : memref<8x128xbf16, #tpu.memory_space<vmem>>, vector<8x128xbf16>
    %c0_1 = arith.constant 0 : index
    %c0_2 = arith.constant 0 : index
    %1 = vector.load %arg3[%c0_1, %c0_2] : memref<128x64xbf16, #tpu.memory_space<vmem>>, vector<128x64xbf16>
    %cst = arith.constant dense<0.000000e+00> : vector<8x64xf32>
    %2 = tpu.matmul %0, %1, %cst {dimension_numbers = #tpu.dot_dimension_numbers<[1], [0], [0], [1], [0, 0, 1, 1], [], []>} : vector<8x128xbf16>, vector<128x64xbf16>, vector<8x64xf32> -> vector<8x64xf32>
    %c0_3 = arith.constant 0 : index
    %c0_4 = arith.constant 0 : index
    %3 = vector.load %arg4[%c0_3, %c0_4] : memref<1x64xf32, #tpu.memory_space<vmem>>, vector<1x64xf32>
    %4 = vector.broadcast %3 : vector<1x64xf32> to vector<8x64xf32>
    %5 = arith.addf %2, %4 : vector<8x64xf32>
    %cst_5 = arith.constant 0.000000e+00 : f32
    %6 = vector.broadcast %cst_5 : f32 to vector<8x64xf32>
    %7 = arith.maximumf %5, %6 : vector<8x64xf32>
    %8 = arith.truncf %7 : vector<8x64xf32> to vector<8x64xbf16>
    %c0_6 = arith.constant 0 : index
    %c0_7 = arith.constant 0 : index
    %9 = vector.load %arg5[%c0_6, %c0_7] : memref<64x384xbf16, #tpu.memory_space<vmem>>, vector<64x384xbf16>
    %cst_8 = arith.constant dense<0.000000e+00> : vector<8x384xf32>
    %10 = tpu.matmul %8, %9, %cst_8 {dimension_numbers = #tpu.dot_dimension_numbers<[1], [0], [0], [1], [0, 0, 1, 1], [], []>} : vector<8x64xbf16>, vector<64x384xbf16>, vector<8x384xf32> -> vector<8x384xf32>
    %11 = vector.extract_strided_slice %10 {offsets = [0, 128], sizes = [1, 128], strides = [1, 1]} : vector<8x384xf32> to vector<1x128xf32>
    %12 = vector.extract_strided_slice %10 {offsets = [1, 256], sizes = [1, 128], strides = [1, 1]} : vector<8x384xf32> to vector<1x128xf32>
    %13 = arith.addf %11, %12 : vector<1x128xf32>
    %14 = vector.extract_strided_slice %10 {offsets = [4, 128], sizes = [1, 128], strides = [1, 1]} : vector<8x384xf32> to vector<1x128xf32>
    %15 = vector.extract_strided_slice %10 {offsets = [5, 256], sizes = [1, 128], strides = [1, 1]} : vector<8x384xf32> to vector<1x128xf32>
    %16 = arith.addf %14, %15 : vector<1x128xf32>
    %17 = tpu.concatenate %13, %16 in 0 : vector<1x128xf32>, vector<1x128xf32> -> vector<2x128xf32>
    %c0_9 = arith.constant 0 : index
    %c0_10 = arith.constant 0 : index
    %18 = vector.load %arg6[%c0_9, %c0_10] : memref<1x128xf32, #tpu.memory_space<vmem>>, vector<1x128xf32>
    %19 = vector.broadcast %18 : vector<1x128xf32> to vector<2x128xf32>
    %20 = arith.addf %17, %19 : vector<2x128xf32>
    %cst_11 = arith.constant 0.000000e+00 : f32
    %21 = vector.broadcast %cst_11 : f32 to vector<2x128xf32>
    %22 = arith.maximumf %20, %21 : vector<2x128xf32>
    %23 = vector.extract_strided_slice %10 {offsets = [1, 0], sizes = [1, 128], strides = [1, 1]} : vector<8x384xf32> to vector<1x128xf32>
    %24 = vector.extract_strided_slice %10 {offsets = [2, 128], sizes = [1, 128], strides = [1, 1]} : vector<8x384xf32> to vector<1x128xf32>
    %25 = arith.addf %23, %24 : vector<1x128xf32>
    %26 = vector.extract_strided_slice %10 {offsets = [3, 256], sizes = [1, 128], strides = [1, 1]} : vector<8x384xf32> to vector<1x128xf32>
    %27 = arith.addf %25, %26 : vector<1x128xf32>
    %28 = vector.extract_strided_slice %10 {offsets = [5, 0], sizes = [1, 128], strides = [1, 1]} : vector<8x384xf32> to vector<1x128xf32>
    %29 = vector.extract_strided_slice %10 {offsets = [6, 128], sizes = [1, 128], strides = [1, 1]} : vector<8x384xf32> to vector<1x128xf32>
    %30 = arith.addf %28, %29 : vector<1x128xf32>
    %31 = vector.extract_strided_slice %10 {offsets = [7, 256], sizes = [1, 128], strides = [1, 1]} : vector<8x384xf32> to vector<1x128xf32>
    %32 = arith.addf %30, %31 : vector<1x128xf32>
    %33 = tpu.concatenate %27, %32 in 0 : vector<1x128xf32>, vector<1x128xf32> -> vector<2x128xf32>
    %c0_12 = arith.constant 0 : index
    %c0_13 = arith.constant 0 : index
    %34 = vector.load %arg6[%c0_12, %c0_13] : memref<1x128xf32, #tpu.memory_space<vmem>>, vector<1x128xf32>
    %35 = vector.broadcast %34 : vector<1x128xf32> to vector<2x128xf32>
    %36 = arith.addf %33, %35 : vector<2x128xf32>
    %cst_14 = arith.constant 0.000000e+00 : f32
    %37 = vector.broadcast %cst_14 : f32 to vector<2x128xf32>
    %38 = arith.maximumf %36, %37 : vector<2x128xf32>
    %39 = arith.truncf %22 : vector<2x128xf32> to vector<2x128xbf16>
    %40 = arith.truncf %38 : vector<2x128xf32> to vector<2x128xbf16>
    %41 = tpu.concatenate %39, %40 in 1 : vector<2x128xbf16>, vector<2x128xbf16> -> vector<2x256xbf16>
    %c0_15 = arith.constant 0 : index
    %c0_16 = arith.constant 0 : index
    %42 = vector.load %arg7[%c0_15, %c0_16] : memref<256x128xbf16, #tpu.memory_space<vmem>>, vector<256x128xbf16>
    %cst_17 = arith.constant dense<0.000000e+00> : vector<2x128xf32>
    %43 = tpu.matmul %41, %42, %cst_17 {dimension_numbers = #tpu.dot_dimension_numbers<[1], [0], [0], [1], [0, 0, 1, 1], [], []>} : vector<2x256xbf16>, vector<256x128xbf16>, vector<2x128xf32> -> vector<2x128xf32>
    %c0_18 = arith.constant 0 : index
    %c0_19 = arith.constant 0 : index
    %44 = vector.load %arg8[%c0_18, %c0_19] : memref<1x128xf32, #tpu.memory_space<vmem>>, vector<1x128xf32>
    %45 = vector.broadcast %44 : vector<1x128xf32> to vector<2x128xf32>
    %46 = arith.addf %43, %45 : vector<2x128xf32>
    %cst_20 = arith.constant 0.000000e+00 : f32
    %47 = vector.broadcast %cst_20 : f32 to vector<2x128xf32>
    %48 = arith.maximumf %46, %47 : vector<2x128xf32>
    %49 = arith.truncf %48 : vector<2x128xf32> to vector<2x128xbf16>
    %c0_21 = arith.constant 0 : index
    %c0_22 = arith.constant 0 : index
    %50 = vector.load %arg2[%c0_21, %c0_22] : memref<2x512xbf16, #tpu.memory_space<vmem>>, vector<2x512xbf16>
    %51 = tpu.concatenate %49, %50 in 1 : vector<2x128xbf16>, vector<2x512xbf16> -> vector<2x640xbf16>
    %c0_23 = arith.constant 0 : index
    %c0_24 = arith.constant 0 : index
    %52 = vector.load %arg9[%c0_23, %c0_24] : memref<640x512xbf16, #tpu.memory_space<vmem>>, vector<640x512xbf16>
    %cst_25 = arith.constant dense<0.000000e+00> : vector<2x512xf32>
    %53 = tpu.matmul %51, %52, %cst_25 {dimension_numbers = #tpu.dot_dimension_numbers<[1], [0], [0], [1], [0, 0, 1, 1], [], []>} : vector<2x640xbf16>, vector<640x512xbf16>, vector<2x512xf32> -> vector<2x512xf32>
    %c0_26 = arith.constant 0 : index
    %c0_27 = arith.constant 0 : index
    %54 = vector.load %arg10[%c0_26, %c0_27] : memref<1x512xf32, #tpu.memory_space<vmem>>, vector<1x512xf32>
    %55 = vector.broadcast %54 : vector<1x512xf32> to vector<2x512xf32>
    %56 = arith.addf %53, %55 : vector<2x512xf32>
    %cst_28 = arith.constant 0.000000e+00 : f32
    %57 = vector.broadcast %cst_28 : f32 to vector<2x512xf32>
    %58 = arith.maximumf %56, %57 : vector<2x512xf32>
    %59 = arith.truncf %58 : vector<2x512xf32> to vector<2x512xbf16>
    %c0_29 = arith.constant 0 : index
    %c0_30 = arith.constant 0 : index
    %60 = vector.load %arg11[%c0_29, %c0_30] : memref<512x512xbf16, #tpu.memory_space<vmem>>, vector<512x512xbf16>
    %cst_31 = arith.constant dense<0.000000e+00> : vector<2x512xf32>
    %61 = tpu.matmul %59, %60, %cst_31 {dimension_numbers = #tpu.dot_dimension_numbers<[1], [0], [0], [1], [0, 0, 1, 1], [], []>} : vector<2x512xbf16>, vector<512x512xbf16>, vector<2x512xf32> -> vector<2x512xf32>
    %c0_32 = arith.constant 0 : index
    %c0_33 = arith.constant 0 : index
    %62 = vector.load %arg12[%c0_32, %c0_33] : memref<1x512xf32, #tpu.memory_space<vmem>>, vector<1x512xf32>
    %63 = vector.broadcast %62 : vector<1x512xf32> to vector<2x512xf32>
    %64 = arith.addf %61, %63 : vector<2x512xf32>
    %cst_34 = arith.constant 0.000000e+00 : f32
    %65 = vector.broadcast %cst_34 : f32 to vector<2x512xf32>
    %66 = arith.maximumf %64, %65 : vector<2x512xf32>
    %67 = arith.truncf %66 : vector<2x512xf32> to vector<2x512xbf16>
    %c0_35 = arith.constant 0 : index
    %c0_36 = arith.constant 0 : index
    %68 = vector.load %arg13[%c0_35, %c0_36] : memref<512x256xbf16, #tpu.memory_space<vmem>>, vector<512x256xbf16>
    %cst_37 = arith.constant dense<0.000000e+00> : vector<2x256xf32>
    %69 = tpu.matmul %67, %68, %cst_37 {dimension_numbers = #tpu.dot_dimension_numbers<[1], [0], [0], [1], [0, 0, 1, 1], [], []>} : vector<2x512xbf16>, vector<512x256xbf16>, vector<2x256xf32> -> vector<2x256xf32>
    %c0_38 = arith.constant 0 : index
    %c0_39 = arith.constant 0 : index
    %70 = vector.load %arg14[%c0_38, %c0_39] : memref<1x256xf32, #tpu.memory_space<vmem>>, vector<1x256xf32>
    %71 = vector.broadcast %70 : vector<1x256xf32> to vector<2x256xf32>
    %72 = arith.addf %69, %71 : vector<2x256xf32>
    %cst_40 = arith.constant 0.000000e+00 : f32
    %73 = vector.broadcast %cst_40 : f32 to vector<2x256xf32>
    %74 = arith.maximumf %72, %73 : vector<2x256xf32>
    %75 = arith.truncf %74 : vector<2x256xf32> to vector<2x256xbf16>
    %c0_41 = arith.constant 0 : index
    %c0_42 = arith.constant 0 : index
    %76 = vector.load %arg15[%c0_41, %c0_42] : memref<256x128xbf16, #tpu.memory_space<vmem>>, vector<256x128xbf16>
    %cst_43 = arith.constant dense<0.000000e+00> : vector<2x128xf32>
    %77 = tpu.matmul %75, %76, %cst_43 {dimension_numbers = #tpu.dot_dimension_numbers<[1], [0], [0], [1], [0, 0, 1, 1], [], []>} : vector<2x256xbf16>, vector<256x128xbf16>, vector<2x128xf32> -> vector<2x128xf32>
    %c0_44 = arith.constant 0 : index
    %c0_45 = arith.constant 0 : index
    %78 = vector.load %arg16[%c0_44, %c0_45] : memref<1x128xf32, #tpu.memory_space<vmem>>, vector<1x128xf32>
    %79 = vector.broadcast %78 : vector<1x128xf32> to vector<2x128xf32>
    %80 = arith.addf %77, %79 : vector<2x128xf32>
    %cst_46 = arith.constant 0.000000e+00 : f32
    %81 = vector.broadcast %cst_46 : f32 to vector<2x128xf32>
    %82 = arith.maximumf %80, %81 : vector<2x128xf32>
    %83 = arith.truncf %82 : vector<2x128xf32> to vector<2x128xbf16>
    %c0_47 = arith.constant 0 : index
    %c0_48 = arith.constant 0 : index
    %84 = vector.load %arg17[%c0_47, %c0_48] : memref<128x128xbf16, #tpu.memory_space<vmem>>, vector<128x128xbf16>
    %cst_49 = arith.constant dense<0.000000e+00> : vector<2x128xf32>
    %85 = tpu.matmul %83, %84, %cst_49 {dimension_numbers = #tpu.dot_dimension_numbers<[1], [0], [0], [1], [0, 0, 1, 1], [], []>} : vector<2x128xbf16>, vector<128x128xbf16>, vector<2x128xf32> -> vector<2x128xf32>
    %c0_50 = arith.constant 0 : index
    %c0_51 = arith.constant 0 : index
    %86 = vector.load %arg18[%c0_50, %c0_51] : memref<1x128xf32, #tpu.memory_space<vmem>>, vector<1x128xf32>
    %87 = vector.broadcast %86 : vector<1x128xf32> to vector<2x128xf32>
    %88 = arith.addf %85, %87 : vector<2x128xf32>
    %89 = arith.negf %88 : vector<2x128xf32>
    %90 = math.exp %89 : vector<2x128xf32>
    %cst_52 = arith.constant 1.000000e+00 : f32
    %91 = vector.broadcast %cst_52 : f32 to vector<2x128xf32>
    %92 = arith.addf %91, %90 : vector<2x128xf32>
    %93 = arith.divf %91, %92 : vector<2x128xf32>
    %cst_53 = arith.constant 4.000000e+00 : f32
    %94 = vector.broadcast %cst_53 : f32 to vector<2x128xf32>
    %95 = arith.mulf %94, %93 : vector<2x128xf32>
    %cst_54 = arith.constant 1.000000e+00 : f32
    %96 = vector.broadcast %cst_54 : f32 to vector<2x128xf32>
    %97 = arith.addf %95, %96 : vector<2x128xf32>
    %c0_55 = arith.constant 0 : index
    %c0_56 = arith.constant 0 : index
    %98 = vector.load %arg19[%c0_55, %c0_56] : memref<2x128xf32, #tpu.memory_space<vmem>>, vector<2x128xf32>
    tpu.vector_store %arg19[%c0_55, %c0_56], %97 {strides = array<i32>} : memref<2x128xf32, #tpu.memory_space<vmem>>, vector<2x128xf32>,
    return
  }
  func.func @transform_0(%arg0: i32) -> (i32, i32) {
    %c0_i32 = arith.constant 0 : i32
    %c0_i32_0 = arith.constant 0 : i32
    %c0_i32_1 = arith.constant 0 : i32
    return %c0_i32, %c0_i32_0 : i32, i32
  }
  func.func @transform_1(%arg0: i32) -> (i32, i32) {
    %c0_i32 = arith.constant 0 : i32
    %c0_i32_0 = arith.constant 0 : i32
    %c0_i32_1 = arith.constant 0 : i32
    return %c0_i32, %c0_i32_0 : i32, i32
  }
  func.func @transform_2(%arg0: i32) -> (i32, i32) {
    %c0_i32 = arith.constant 0 : i32
    %c0_i32_0 = arith.constant 0 : i32
    %c0_i32_1 = arith.constant 0 : i32
    return %c0_i32, %c0_i32_0 : i32, i32
  }
  func.func @transform_3(%arg0: i32) -> (i32, i32) {
    %c0_i32 = arith.constant 0 : i32
    %c0_i32_0 = arith.constant 0 : i32
    %c0_i32_1 = arith.constant 0 : i32
    return %c0_i32, %c0_i32_0 : i32, i32
  }
  func.func @transform_4(%arg0: i32) -> (i32, i32) {
    %c0_i32 = arith.constant 0 : i32
    %c0_i32_0 = arith.constant 0 : i32
    %c0_i32_1 = arith.constant 0 : i32
    return %c0_i32, %c0_i32_0 : i32, i32
  }
  func.func @transform_5(%arg0: i32) -> (i32, i32) {
    %c0_i32 = arith.constant 0 : i32
    %c0_i32_0 = arith.constant 0 : i32
    %c0_i32_1 = arith.constant 0 : i32
    return %c0_i32, %c0_i32_0 : i32, i32
  }
  func.func @transform_6(%arg0: i32) -> (i32, i32) {
    %c0_i32 = arith.constant 0 : i32
    %c0_i32_0 = arith.constant 0 : i32
    %c0_i32_1 = arith.constant 0 : i32
    return %c0_i32, %c0_i32_0 : i32, i32
  }
  func.func @transform_7(%arg0: i32) -> (i32, i32) {
    %c0_i32 = arith.constant 0 : i32
    %c0_i32_0 = arith.constant 0 : i32
    %c0_i32_1 = arith.constant 0 : i32
    return %c0_i32, %c0_i32_0 : i32, i32
  }
  func.func @transform_8(%arg0: i32) -> (i32, i32) {
    %c0_i32 = arith.constant 0 : i32
    %c0_i32_0 = arith.constant 0 : i32
    %c0_i32_1 = arith.constant 0 : i32
    return %c0_i32, %c0_i32_0 : i32, i32
  }
  func.func @transform_9(%arg0: i32) -> (i32, i32) {
    %c0_i32 = arith.constant 0 : i32
    %c0_i32_0 = arith.constant 0 : i32
    %c0_i32_1 = arith.constant 0 : i32
    return %c0_i32, %c0_i32_0 : i32, i32
  }
  func.func @transform_10(%arg0: i32) -> (i32, i32) {
    %c0_i32 = arith.constant 0 : i32
    %c0_i32_0 = arith.constant 0 : i32
    %c0_i32_1 = arith.constant 0 : i32
    return %c0_i32, %c0_i32_0 : i32, i32
  }
  func.func @transform_11(%arg0: i32) -> (i32, i32) {
    %c0_i32 = arith.constant 0 : i32
    %c0_i32_0 = arith.constant 0 : i32
    %c0_i32_1 = arith.constant 0 : i32
    return %c0_i32, %c0_i32_0 : i32, i32
  }
  func.func @transform_12(%arg0: i32) -> (i32, i32) {
    %c0_i32 = arith.constant 0 : i32
    %c0_i32_0 = arith.constant 0 : i32
    %c0_i32_1 = arith.constant 0 : i32
    return %c0_i32, %c0_i32_0 : i32, i32
  }
  func.func @transform_13(%arg0: i32) -> (i32, i32) {
    %c0_i32 = arith.constant 0 : i32
    %c0_i32_0 = arith.constant 0 : i32
    %c0_i32_1 = arith.constant 0 : i32
    return %c0_i32, %c0_i32_0 : i32, i32
  }
  func.func @transform_14(%arg0: i32) -> (i32, i32) {
    %c0_i32 = arith.constant 0 : i32
    %c0_i32_0 = arith.constant 0 : i32
    %c0_i32_1 = arith.constant 0 : i32
    return %c0_i32, %c0_i32_0 : i32, i32
  }
  func.func @transform_15(%arg0: i32) -> (i32, i32) {
    %c0_i32 = arith.constant 0 : i32
    %c0_i32_0 = arith.constant 0 : i32
    %c0_i32_1 = arith.constant 0 : i32
    return %c0_i32, %c0_i32_0 : i32, i32
  }
  func.func @transform_16(%arg0: i32) -> (i32, i32) {
    %c0_i32 = arith.constant 0 : i32
    %c0_i32_0 = arith.constant 0 : i32
    %c0_i32_1 = arith.constant 0 : i32
    return %c0_i32, %c0_i32_0 : i32, i32
  }
  func.func @transform_17(%arg0: i32) -> (i32, i32) {
    %c0_i32 = arith.constant 0 : i32
    %c0_i32_0 = arith.constant 0 : i32
    %c0_i32_1 = arith.constant 0 : i32
    return %c0_i32, %c0_i32_0 : i32, i32
  }
  func.func @transform_18(%arg0: i32) -> (i32, i32) {
    %c0_i32 = arith.constant 0 : i32
    %c0_i32_0 = arith.constant 0 : i32
    %c0_i32_1 = arith.constant 0 : i32
    return %c0_i32, %c0_i32_0 : i32, i32
  }
}

</mosaic_0001>

<bundles_post_ra>
// kernel: avm_forward.3
= control target key start
LH: loop header
LB: loop body
LE: loop exit
PB: predicated region body
PF: predicated region fallthrough
CT: control target
= control target key end

     0   :  { %v4740_v0 = vmov 0.0   ;;  %vm4741_vm0 = vmmov 0   ;;  %v4742_v22 = vmov 0   ;;  %vm254_vm1 = vcmask 523264   ;;  %s6195_s2 = inlined_call_operand.vmem [shape: bf16[128,64], index: 2, kind: input, shape index: {}]   ;;  %s6196_s4 = inlined_call_operand.vmem [shape: bf16[64,384], index: 4, kind: input, shape index: {}]   ;;  %s6197_s0 = inlined_call_operand.vmem [shape: bf16[8,128], index: 0, kind: input, shape index: {}]   ;;  %s6198_s6 = inlined_call_operand.vmem [shape: bf16[256,128], index: 6, kind: input, shape index: {}]   ;;  %s6199_s3 = inlined_call_operand.vmem [shape: f32[1,64], index: 3, kind: input, shape index: {}]   ;;  %s6200_s8 = inlined_call_operand.vmem [shape: bf16[640,512], index: 8, kind: input, shape index: {}]   ;;  %s6201_s5 = inlined_call_operand.vmem [shape: f32[1,128], index: 5, kind: input, shape index: {}]   ;;  %s6202_s1 = inlined_call_operand.vmem [shape: bf16[2,512], index: 1, kind: input, shape index: {}]   ;;  %s6203_s10 = inlined_call_operand.vmem [shape: bf16[512,512], index: 10, kind: input, shape index: {}]   ;;  %s6204_s7 = inlined_call_operand.vmem [shape: f32[1,128], index: 7, kind: input, shape index: {}]   ;;  %s6205_s12 = inlined_call_operand.vmem [shape: bf16[512,256], index: 12, kind: input, shape index: {}]   ;;  %s6206_s9 = inlined_call_operand.vmem [shape: f32[1,512], index: 9, kind: input, shape index: {}]   ;;  %s6207_s14 = inlined_call_operand.vmem [shape: bf16[256,128], index: 14, kind: input, shape index: {}]   ;;  %s6208_s11 = inlined_call_operand.vmem [shape: f32[1,512], index: 11, kind: input, shape index: {}]   ;;  %s6209_s16 = inlined_call_operand.vmem [shape: bf16[128,128], index: 16, kind: input, shape index: {}]   ;;  %s6210_s13 = inlined_call_operand.vmem [shape: f32[1,256], index: 13, kind: input, shape index: {}]   ;;  %s6211_s15 = inlined_call_operand.vmem [shape: f32[1,128], index: 15, kind: input, shape index: {}]   ;;  %s6212_s17 = inlined_call_operand.vmem [shape: f32[1,128], index: 17, kind: input, shape index: {}]   ;;  %s6213_s18 = inlined_call_operand.vmem [shape: f32[2,128], index: 18, kind: output, shape index: {}]  }
   0x1   :  { %6216 = sst [smem:[#allocation2_spill]] %s6195_s2  ;;  %4050 = vmatprep.subr.bf16.mxu0 %v4740_v0  ;;  %4066 = vmatprep.mubr.msk.bf16.mxu0 %vm4741_vm0, %v4740_v0  ;;  %v4168_v23 = vld [vmem:[%s6198_s6 + $0x40] sm:$0xff]   ;;  %v4170_v33 = vld [vmem:[%s6198_s6 + $0x48] sm:$0xff]   ;;  %v4172_v35 = vld [vmem:[%s6198_s6 + $0x50] sm:$0xff]   ;;  %vm346_vm2 = vcmask 1040384  }
   0x2   :  { %6217 = sst [smem:[#allocation3_spill]] %s6196_s4  ;;  %s6219_s29 = sld [smem:[#allocation2_spill]]  ;;  %4070 = vmatprep.subr.bf16.mxu1 %v4740_v0  ;;  %4078 = vmatprep.mubr.msk.bf16.mxu1 %vm4741_vm0, %v4740_v0  ;;  %v3562_v24 = vld [vmem:[%s6199_s3] ss:$0 sm:$0xff]  ;;  %v4171_v34 = vld [vmem:[%s6198_s6 + $0x8] sm:$0xff]   ;;  %v4173_v36 = vld [vmem:[%s6198_s6 + $0x10] sm:$0xff]  }
   0x3   :  { %6218 = sst [smem:[#allocation4_spill]] %s6197_s0  ;;  %s6220_s23 = sld [smem:[#allocation3_spill]]  ;;  %v4169_v31 = vld [vmem:[%s6198_s6] sm:$0xff]   ;;  %v4174_v37 = vld [vmem:[%s6198_s6 + $0x58] sm:$0xff]   ;;  %v4178_v41 = vld [vmem:[%s6198_s6 + $0x68] sm:$0xff]  }
   0x4   :  { %s6221_s25 = sld [smem:[#allocation4_spill]]  ;;  %v4175_v38 = vld [vmem:[%s6198_s6 + $0x18] sm:$0xff]   ;;  %v4176_v39 = vld [vmem:[%s6198_s6 + $0x60] sm:$0xff]   ;;  %v4179_v42 = vld [vmem:[%s6198_s6 + $0x28] sm:$0xff]  }
   0x5   :  { %v4177_v40 = vld [vmem:[%s6198_s6 + $0x20] sm:$0xff]   ;;  %v4180_v43 = vld [vmem:[%s6198_s6 + $0x70] sm:$0xff]   ;;  %v4182_v45 = vld [vmem:[%s6198_s6 + $0x78] sm:$0xff]  }
   0x6   :  { %v4181_v44 = vld [vmem:[%s6198_s6 + $0x30] sm:$0xff]   ;;  %v4183_v46 = vld [vmem:[%s6198_s6 + $0x38] sm:$0xff]  }
   0x7   :  { %v4184_v47 = vld [vmem:[%s6200_s8] ss:$16 sps:$4 sm:$0xff]   ;;  %v4186_v48 = vld [vmem:[%s6200_s8 + $0x4] ss:$16 sps:$4 sm:$0xff]   ;;  %v4189_v49 = vld [vmem:[%s6200_s8 + $0xc] ss:$16 sps:$4 sm:$0xff]  }
   0x8   :  { %v4144_v1 = vld [vmem:[%s6219_s29] sm:$0xff]   ;;  %v4145_v2 = vld [vmem:[%s6219_s29 + $0x8] sm:$0xff]   ;;  %v4146_v3 = vld [vmem:[%s6219_s29 + $0x10] sm:$0xff]  }
   0x9   :  { %4051 = vmatpush3.bf16.msra.mxu0 %v4144_v1  ;;  %v4147_v4 = vld [vmem:[%s6219_s29 + $0x18] sm:$0xff]   ;;  %v4155_v5 = vld [vmem:[%s6220_s23 + $0x8] ss:$12 sps:$4 sm:$0xff]   ;;  %v4159_v6 = vld [vmem:[%s6220_s23 + $0x20] ss:$12 sps:$4 sm:$0xff]  }
   0xa   :  { %4052 = vmatprep.subr.bf16.mxu0 %v4740_v0  ;;  %4071 = vmatpush3.bf16.msra.mxu1 %v4155_v5  ;;  %v4148_v7 = vld [vmem:[%s6219_s29 + $0x20] sm:$0xff]   ;;  %v4149_v8 = vld [vmem:[%s6219_s29 + $0x28] sm:$0xff]   ;;  %v4150_v9 = vld [vmem:[%s6219_s29 + $0x30] sm:$0xff]  }
   0xb   :  { %4072 = vmatprep.subr.bf16.mxu1 %v4740_v0  ;;  %v4151_v10 = vld [vmem:[%s6219_s29 + $0x38] sm:$0xff]   ;;  %v4154_v11 = vld [vmem:[%s6220_s23 + $0x4] ss:$12 sps:$4 sm:$0xff]   ;;  %v60_v12 = vld [vmem:[%s6221_s25] sm:$0xf] }
   0xc   :  { %v4152_v13 = vld [vmem:[%s6220_s23] ss:$12 sps:$4 sm:$0xff]   ;;  %v4158_v14 = vld [vmem:[%s6220_s23 + $0x1c] ss:$12 sps:$4 sm:$0xff]   ;;  %v4156_v15 = vld [vmem:[%s6220_s23 + $0x18] ss:$12 sps:$4 sm:$0xff]  }
   0xd   :  { %4053 = vmatpush3.bf16.msra.mxu0 %v4145_v2  ;;  %v4162_v16 = vld [vmem:[%s6220_s23 + $0x34] ss:$12 sps:$4 sm:$0xff]   ;;  %v4160_v17 = vld [vmem:[%s6220_s23 + $0x30] ss:$12 sps:$4 sm:$0xff]   ;;  %v4163_v18 = vld [vmem:[%s6220_s23 + $0x38] ss:$12 sps:$4 sm:$0xff]  }
   0xe   :  { %4054 = vmatprep.subr.bf16.mxu0 %v4740_v0  ;;  %4073 = vmatpush3.bf16.msra.mxu1 %v4159_v6  ;;  %v4166_v19 = vld [vmem:[%s6220_s23 + $0x4c] ss:$12 sps:$4 sm:$0xff]   ;;  %v4164_v20 = vld [vmem:[%s6220_s23 + $0x48] ss:$12 sps:$4 sm:$0xff]   ;;  %v4167_v21 = vld [vmem:[%s6220_s23 + $0x50] ss:$12 sps:$4 sm:$0xff]  }
   0xf   :  { %4074 = vmatprep.subr.bf16.mxu1 %v4740_v0  ;;  %v4192_v50 = vld [vmem:[%s6200_s8 + $0x24] ss:$16 sps:$4 sm:$0xff]   ;;  %v4190_v51 = vld [vmem:[%s6200_s8 + $0x20] ss:$16 sps:$4 sm:$0xff]  }
  0x10   :  { %v4198_v52 = vld [vmem:[%s6200_s8 + $0x44] ss:$16 sps:$4 sm:$0xff]   ;;  %v4196_v53 = vld [vmem:[%s6200_s8 + $0x40] ss:$16 sps:$4 sm:$0xff]  }
  0x11   :  { %4055 = vmatpush3.bf16.msra.mxu0 %v4146_v3  ;;  %v4204_v54 = vld [vmem:[%s6200_s8 + $0x64] ss:$16 sps:$4 sm:$0xff]   ;;  %v4202_v55 = vld [vmem:[%s6200_s8 + $0x60] ss:$16 sps:$4 sm:$0xff]  }
  0x12   :  { %4056 = vmatprep.subr.bf16.mxu0 %v4740_v0  ;;  %4075 = vmatpush3.bf16.msra.mxu1 %v4163_v18  ;;  %v4210_v56 = vld [vmem:[%s6200_s8 + $0x84] ss:$16 sps:$4 sm:$0xff]   ;;  %v4208_v57 = vld [vmem:[%s6200_s8 + $0x80] ss:$16 sps:$4 sm:$0xff]  }
  0x13   :  { %4076 = vmatprep.subr.bf16.mxu1 %v4740_v0  ;;  %v4216_v58 = vld [vmem:[%s6200_s8 + $0xa4] ss:$16 sps:$4 sm:$0xff]   ;;  %v4214_v59 = vld [vmem:[%s6200_s8 + $0xa0] ss:$16 sps:$4 sm:$0xff]  }
  0x14   :  { %v4222_v60 = vld [vmem:[%s6200_s8 + $0xc4] ss:$16 sps:$4 sm:$0xff]   ;;  %v4220_v61 = vld [vmem:[%s6200_s8 + $0xc0] ss:$16 sps:$4 sm:$0xff]  }
  0x15   :  { %4057 = vmatpush3.bf16.msra.mxu0 %v4147_v4  ;;  %v4228_v62 = vld [vmem:[%s6200_s8 + $0xe4] ss:$16 sps:$4 sm:$0xff]   ;;  %v4226_v63 = vld [vmem:[%s6200_s8 + $0xe0] ss:$16 sps:$4 sm:$0xff]  }
  0x16   :  { %4058 = vmatprep.subr.bf16.mxu0 %v4740_v0  ;;  %4077 = vmatpush3.bf16.msra.mxu1 %v4167_v21  ;;  %v4234_v1 = vld [vmem:[%s6200_s8 + $0x104] ss:$16 sps:$4 sm:$0xff]   ;;  %v4232_v2 = vld [vmem:[%s6200_s8 + $0x100] ss:$16 sps:$4 sm:$0xff]  }
  0x17   :  { %1563 = vmatprep.subr.bf16.mxu1 %v4186_v48  ;;  %v4240_v3 = vld [vmem:[%s6200_s8 + $0x124] ss:$16 sps:$4 sm:$0xff]   ;;  %v4238_v4 = vld [vmem:[%s6200_s8 + $0x120] ss:$16 sps:$4 sm:$0xff]   ;;  %v4211_v48 = vld [vmem:[%s6200_s8 + $0x88] ss:$16 sps:$4 sm:$0xff]  }
  0x18   :  { %v4246_v5 = vld [vmem:[%s6200_s8 + $0x144] ss:$16 sps:$4 sm:$0xff]   ;;  %v4244_v6 = vld [vmem:[%s6200_s8 + $0x140] ss:$16 sps:$4 sm:$0xff]  }
  0x19   :  { %4059 = vmatpush3.bf16.msra.mxu0 %v4148_v7  ;;  %v4252_v7 = vld [vmem:[%s6200_s8 + $0x164] ss:$16 sps:$4 sm:$0xff]  }
  0x1a   :  { %4060 = vmatprep.subr.bf16.mxu0 %v4740_v0 }
  0x1d   :  { %4061 = vmatpush3.bf16.msra.mxu0 %v4149_v8  ;;  %v4250_v8 = vld [vmem:[%s6200_s8 + $0x160] ss:$16 sps:$4 sm:$0xff]  }
  0x1e   :  { %4062 = vmatprep.subr.bf16.mxu0 %v4740_v0 }
  0x21   :  { %4063 = vmatpush3.bf16.msra.mxu0 %v4150_v9  ;;  %v4258_v9 = vld [vmem:[%s6200_s8 + $0x184] ss:$16 sps:$4 sm:$0xff]  }
  0x22   :  { %4064 = vmatprep.subr.bf16.mxu0 %v4740_v0 }
  0x25   :  { %4065 = vmatpush3.bf16.msra.mxu0 %v4151_v10  ;;  %v4256_v10 = vld [vmem:[%s6200_s8 + $0x180] ss:$16 sps:$4 sm:$0xff]  }
  0x26   :  { %258 = vmatprep.subr.bf16.mxu0 %v4154_v11  ;;  %v4264_v11 = vld [vmem:[%s6200_s8 + $0x1a4] ss:$16 sps:$4 sm:$0xff]  }
  0x28   :  { %4067 = vmatmul.mubr.bf16.vlgmr.msra.gmra.mrb[0].mxu0 %v60_v12  ;;  %v4262_v12 = vld [vmem:[%s6200_s8 + $0x1a0] ss:$16 sps:$4 sm:$0xff]  }
  0x29   :  { %259 = vmatpush1.bf16.msra.mxu0 %v4152_v13  ;;  %290 = vmatprep.mubr.bf16.mxu0 %v4742_v22 }
  0x2a   :  { %260 = vmatprep.subr.bf16.mxu0 %v4158_v14 }
  0x2d   :  { %261 = vmatpush1.bf16.msra.mxu0 %v4156_v15 }
  0x2e   :  { %262 = vmatprep.subr.bf16.mxu0 %v4162_v16 }
  0x31   :  { %263 = vmatpush1.bf16.msra.mxu0 %v4160_v17 }
  0x32   :  { %264 = vmatprep.subr.bf16.mxu0 %v4166_v19 }
  0x35   :  { %265 = vmatpush1.bf16.msra.mxu0 %v4164_v20 }
  0x36   :  { %3997 = vmatprep.subr.bf16.mxu0 %v4168_v23 }
  0xfb   :  { %v166_v25 = vpop.f32.mrb[0].mxu0 }
  0xfc   :  { %v167_v26 = vadd.f32 %v3562_v24, %v166_v25  ;;  %v4068_v27 = vpop.f32.mrb[1].mxu0 }
  0xfd   :  { %v169_v28 = vpop.f32.mrb[2].mxu0 }
  0xfe   :  { %v172_v29 = vmax.f32 %v167_v26, 0.0  ;;  %v4069_v30 = vpop.f32.mrb[3].mxu0  ;;  %v3585_v28 = vld [vmem:[%s6201_s5] ss:$0 sm:$0xff] }
 0x100   :  { %v173_v32 = vpack.c.bf16 %v172_v29, %v172_v29 }
 0x102   :  { %3583 = vmatmul.mubr.msk.bf16.vlgmr.msra.gmra.mrb[4].mxu0 %vm254_vm1, %v173_v32  ;;  %4079 = vmatmul.mubr.msk.bf16.vlgmr.msra.gmra.mrb[0].mxu1 %vm254_vm1, %v173_v32 }
 0x103   :  { %3998 = vmatpush3.bf16.msra.mxu0 %v4169_v31  ;;  %1564 = vmatpush1.bf16.msra.mxu1 %v4184_v47  ;;  %v4213_v47 = vld [vmem:[%s6200_s8 + $0x8c] ss:$16 sps:$4 sm:$0xff]  }
 0x104   :  { %3999 = vmatprep.subr.bf16.mxu0 %v4170_v33  ;;  %1565 = vmatprep.subr.bf16.mxu1 %v4192_v50  ;;  %v4217_v50 = vld [vmem:[%s6200_s8 + $0xa8] ss:$16 sps:$4 sm:$0xff]  }
 0x107   :  { %4000 = vmatpush3.bf16.msra.mxu0 %v4171_v34  ;;  %1566 = vmatpush1.bf16.msra.mxu1 %v4190_v51  ;;  %v4225_v51 = vld [vmem:[%s6200_s8 + $0xcc] ss:$16 sps:$4 sm:$0xff]  }
 0x108   :  { %4001 = vmatprep.subr.bf16.mxu0 %v4172_v35  ;;  %1567 = vmatprep.subr.bf16.mxu1 %v4198_v52  ;;  %v4223_v52 = vld [vmem:[%s6200_s8 + $0xc8] ss:$16 sps:$4 sm:$0xff]  }
 0x10b   :  { %4002 = vmatpush3.bf16.msra.mxu0 %v4173_v36  ;;  %1568 = vmatpush1.bf16.msra.mxu1 %v4196_v53  ;;  %v4231_v53 = vld [vmem:[%s6200_s8 + $0xec] ss:$16 sps:$4 sm:$0xff]  }
 0x10c   :  { %4003 = vmatprep.subr.bf16.mxu0 %v4174_v37  ;;  %1569 = vmatprep.subr.bf16.mxu1 %v4204_v54  ;;  %v4229_v54 = vld [vmem:[%s6200_s8 + $0xe8] ss:$16 sps:$4 sm:$0xff]  }
 0x10f   :  { %4004 = vmatpush3.bf16.msra.mxu0 %v4175_v38  ;;  %1570 = vmatpush1.bf16.msra.mxu1 %v4202_v55  ;;  %v4237_v55 = vld [vmem:[%s6200_s8 + $0x10c] ss:$16 sps:$4 sm:$0xff]  }
 0x110   :  { %4005 = vmatprep.subr.bf16.mxu0 %v4176_v39  ;;  %1571 = vmatprep.subr.bf16.mxu1 %v4210_v56  ;;  %v4187_v39 = vld [vmem:[%s6200_s8 + $0x8] ss:$16 sps:$4 sm:$0xff]  }
 0x111   :  { %v4235_v56 = vld [vmem:[%s6200_s8 + $0x108] ss:$16 sps:$4 sm:$0xff]  }
 0x113   :  { %4006 = vmatpush3.bf16.msra.mxu0 %v4177_v40  ;;  %1572 = vmatpush1.bf16.msra.mxu1 %v4208_v57  ;;  %v4243_v57 = vld [vmem:[%s6200_s8 + $0x12c] ss:$16 sps:$4 sm:$0xff]  }
 0x114   :  { %4007 = vmatprep.subr.bf16.mxu0 %v4178_v41  ;;  %1573 = vmatprep.subr.bf16.mxu1 %v4216_v58  ;;  %v4195_v41 = vld [vmem:[%s6200_s8 + $0x2c] ss:$16 sps:$4 sm:$0xff]   ;;  %v4241_v58 = vld [vmem:[%s6200_s8 + $0x128] ss:$16 sps:$4 sm:$0xff]  }
 0x117   :  { %4008 = vmatpush3.bf16.msra.mxu0 %v4179_v42  ;;  %1574 = vmatpush1.bf16.msra.mxu1 %v4214_v59  ;;  %v4193_v42 = vld [vmem:[%s6200_s8 + $0x28] ss:$16 sps:$4 sm:$0xff]   ;;  %v4249_v59 = vld [vmem:[%s6200_s8 + $0x14c] ss:$16 sps:$4 sm:$0xff]  }
 0x118   :  { %4009 = vmatprep.subr.bf16.mxu0 %v4180_v43  ;;  %1575 = vmatprep.subr.bf16.mxu1 %v4222_v60  ;;  %v4201_v43 = vld [vmem:[%s6200_s8 + $0x4c] ss:$16 sps:$4 sm:$0xff]   ;;  %v4247_v60 = vld [vmem:[%s6200_s8 + $0x148] ss:$16 sps:$4 sm:$0xff]  }
 0x11b   :  { %4010 = vmatpush3.bf16.msra.mxu0 %v4181_v44  ;;  %1576 = vmatpush1.bf16.msra.mxu1 %v4220_v61  ;;  %v4199_v44 = vld [vmem:[%s6200_s8 + $0x48] ss:$16 sps:$4 sm:$0xff]   ;;  %v4255_v61 = vld [vmem:[%s6200_s8 + $0x16c] ss:$16 sps:$4 sm:$0xff]  }
 0x11c   :  { %4011 = vmatprep.subr.bf16.mxu0 %v4182_v45  ;;  %1577 = vmatprep.subr.bf16.mxu1 %v4228_v62  ;;  %v4207_v45 = vld [vmem:[%s6200_s8 + $0x6c] ss:$16 sps:$4 sm:$0xff]   ;;  %v4253_v62 = vld [vmem:[%s6200_s8 + $0x168] ss:$16 sps:$4 sm:$0xff]  }
 0x11f   :  { %4012 = vmatpush3.bf16.msra.mxu0 %v4183_v46  ;;  %1578 = vmatpush1.bf16.msra.mxu1 %v4226_v63  ;;  %v4205_v46 = vld [vmem:[%s6200_s8 + $0x68] ss:$16 sps:$4 sm:$0xff]   ;;  %v4261_v63 = vld [vmem:[%s6200_s8 + $0x18c] ss:$16 sps:$4 sm:$0xff]  }
 0x120   :  { %1686 = vmatprep.subr.bf16.mxu0 %v4189_v49  ;;  %1579 = vmatprep.subr.bf16.mxu1 %v4234_v1  ;;  %v4219_v49 = vld [vmem:[%s6200_s8 + $0xac] ss:$16 sps:$4 sm:$0xff]   ;;  %v4259_v1 = vld [vmem:[%s6200_s8 + $0x188] ss:$16 sps:$4 sm:$0xff]  }
 0x123   :  { %1580 = vmatpush1.bf16.msra.mxu1 %v4232_v2  ;;  %v4267_v2 = vld [vmem:[%s6200_s8 + $0x1ac] ss:$16 sps:$4 sm:$0xff]  }
 0x124   :  { %1581 = vmatprep.subr.bf16.mxu1 %v4240_v3  ;;  %v4265_v3 = vld [vmem:[%s6200_s8 + $0x1a8] ss:$16 sps:$4 sm:$0xff]  }
 0x127   :  { %1582 = vmatpush1.bf16.msra.mxu1 %v4238_v4  ;;  %v4270_v4 = vld [vmem:[%s6200_s8 + $0x1c4] ss:$16 sps:$4 sm:$0xff]  }
 0x128   :  { %1583 = vmatprep.subr.bf16.mxu1 %v4246_v5  ;;  %v4273_v5 = vld [vmem:[%s6200_s8 + $0x1cc] ss:$16 sps:$4 sm:$0xff]  }
 0x12b   :  { %1584 = vmatpush1.bf16.msra.mxu1 %v4244_v6  ;;  %v4268_v6 = vld [vmem:[%s6200_s8 + $0x1c0] ss:$16 sps:$4 sm:$0xff]  }
 0x12c   :  { %1585 = vmatprep.subr.bf16.mxu1 %v4252_v7  ;;  %v4271_v7 = vld [vmem:[%s6200_s8 + $0x1c8] ss:$16 sps:$4 sm:$0xff]  }
 0x12f   :  { %1586 = vmatpush1.bf16.msra.mxu1 %v4250_v8  ;;  %v4743_v8 = vmov 1966171168  }
 0x130   :  { %1587 = vmatprep.subr.bf16.mxu1 %v4258_v9  ;;  %v562_v9 = vunpack.c.l.s4 %v4743_v8  ;;  %v4342_v8 = vld [vmem:[%s6200_s8 + $0x344] ss:$16 sps:$4 sm:$0xff]  }
 0x133   :  { %1588 = vmatpush1.bf16.msra.mxu1 %v4256_v10  ;;  %v564_v10 = vlaneseq }
 0x134   :  { %1589 = vmatprep.subr.bf16.mxu1 %v4264_v11  ;;  %v4276_v11 = vld [vmem:[%s6200_s8 + $0x1e4] ss:$16 sps:$4 sm:$0xff]  }
 0x137   :  { %1590 = vmatpush1.bf16.msra.mxu1 %v4262_v12  ;;  %v4279_v12 = vld [vmem:[%s6200_s8 + $0x1ec] ss:$16 sps:$4 sm:$0xff]  }
 0x138   :  { %1591 = vmatprep.subr.bf16.mxu1 %v4270_v4  ;;  %v4336_v4 = vld [vmem:[%s6200_s8 + $0x324] ss:$16 sps:$4 sm:$0xff]  }
 0x13b   :  { %1592 = vmatpush1.bf16.msra.mxu1 %v4268_v6  ;;  %v4334_v6 = vld [vmem:[%s6200_s8 + $0x320] ss:$16 sps:$4 sm:$0xff]  }
 0x13c   :  { %1593 = vmatprep.subr.bf16.mxu1 %v4276_v11  ;;  %v4343_v11 = vld [vmem:[%s6200_s8 + $0x348] ss:$16 sps:$4 sm:$0xff]  }
 0x1d5   :  { %v292_v13 = vpop.f32.mrb[4].mxu0  ;;  %v333_v14 = vpop.f32.mrb[0].mxu1 }
 0x1d6   :  { %v340_v15 = vrot.slane %v333_v14, 1  ;;  %v294_v16 = vpop.f32.mrb[5].mxu0  ;;  %v4080_v17 = vpop.f32.mrb[1].mxu1  ;;  %v361_v25 = vrot.slane %v333_v14, 2  ;;  %v5159_v14 = vshrl.u32 %v564_v10, 7 }
 0x1d7   :  { %v358_v18 = vrot.slane %v294_v16, 1  ;;  %v296_v19 = vpop.f32.mrb[6].mxu0  ;;  %v336_v20 = vpop.f32.mrb[2].mxu1  ;;  %v4340_v10 = vld [vmem:[%s6200_s8 + $0x340] ss:$16 sps:$4 sm:$0xff]  }
 0x1d8   :  { %v342_v21 = vadd.f32 %v340_v15, %v294_v16  ;;  %v297_v23 = vpop.f32.mrb[7].mxu0  ;;  %v4081_v24 = vpop.f32.mrb[3].mxu1  ;;  %v4274_v15 = vld [vmem:[%s6200_s8 + $0x1e0] ss:$16 sps:$4 sm:$0xff]   ;;  %v4277_v16 = vld [vmem:[%s6200_s8 + $0x1e8] ss:$16 sps:$4 sm:$0xff]  }
 0x1d9   :  { %v360_v26 = vadd.f32 %v358_v18, %v292_v13  ;;  %v563_v13 = vunpack.c.0.s8 %v562_v9  ;;  %1594 = vmatpush1.bf16.msra.mxu1 %v4274_v15  ;;  %v5173_v18 = vld.sshfl [vmem:[%s6202_s1] sm:$0x33 pattern:$0x75316420]  ;;  %v4282_v20 = vld [vmem:[%s6200_s8 + $0x204] ss:$16 sps:$4 sm:$0xff]  }
 0x1da   :  { %v344_v27 = vrot.slane %v342_v21, 3  ;;  %1604 = vmatprep.subr.bf16.mxu1 %v4282_v20  ;;  %v3586_v24 = vld [vmem:[%s6204_s7] ss:$0 sm:$0xff]  ;;  %v4345_v9 = vld [vmem:[%s6200_s8 + $0x34c] ss:$16 sps:$4 sm:$0xff]  }
 0x1db   :  { %v363_v29 = vadd.f32 %v361_v25, %v360_v26  ;;  %v5168_v17 = vsub.s32 %v563_v13, %v5159_v14  ;;  %v4351_v13 = vld [vmem:[%s6200_s8 + $0x36c] ss:$16 sps:$4 sm:$0xff]   ;;  %v4346_v15 = vld [vmem:[%s6200_s8 + $0x360] ss:$16 sps:$4 sm:$0xff]  }
 0x1dc   :  { %v347_v30 = vsel %vm346_vm2, %v342_v21, %v344_v27  ;;  %v4285_v21 = vld [vmem:[%s6200_s8 + $0x20c] ss:$16 sps:$4 sm:$0xff]  }
 0x1dd   :  { %v365_v31 = vrot.slane %v363_v29, 1  ;;  %v367_v32 = vrot.slane %v363_v29, 4  ;;  %v355_v33 = vadd.f32 %v3585_v28, %v347_v30  ;;  %v567_v19 = vrot.slane %v5173_v18, %v5168_v17  ;;  %v4357_v20 = vld [vmem:[%s6200_s8 + $0x38c] ss:$16 sps:$4 sm:$0xff]  }
 0x1df   :  { %v369_v34 = vsel %vm346_vm2, %v365_v31, %v367_v32  ;;  %v356_v36 = vmax.f32 %v355_v33, 0.0  ;;  %1595 = vmatprep.mubr.bf16.mxu1 %v567_v19  ;;  %v4280_v31 = vld [vmem:[%s6200_s8 + $0x200] ss:$16 sps:$4 sm:$0xff]   ;;  %v4283_v32 = vld [vmem:[%s6200_s8 + $0x208] ss:$16 sps:$4 sm:$0xff]  }
 0x1e0   :  { %v370_v35 = vadd.f32 %v3585_v28, %v369_v34  ;;  %v4288_v34 = vld [vmem:[%s6200_s8 + $0x224] ss:$16 sps:$4 sm:$0xff]  }
 0x1e1   :  { %v372_v40 = vpack.c.bf16 %v356_v36, %v356_v36  ;;  %v575_v36 = vcombine.high %v567_v19, %v567_v19 }
 0x1e2   :  { %v371_v37 = vmax.f32 %v370_v35, 0.0  ;;  %v4291_v35 = vld [vmem:[%s6200_s8 + $0x22c] ss:$16 sps:$4 sm:$0xff]  }
 0x1e4   :  { %v373_v38 = vpack.c.bf16 %v371_v37, %v371_v37  ;;  %v4286_v37 = vld [vmem:[%s6200_s8 + $0x220] ss:$16 sps:$4 sm:$0xff]  }
 0x1e6   :  { %541 = vmatprep.mubr.bf16.mxu0 %v373_v38  ;;  %v4289_v38 = vld [vmem:[%s6200_s8 + $0x228] ss:$16 sps:$4 sm:$0xff]  }
 0x1e7   :  { %542 = vmatmul.mubr.bf16.vlgmr.msra.gmra.mrb[8].mxu0 %v372_v40  ;;  %v4297_v40 = vld [vmem:[%s6200_s8 + $0x24c] ss:$16 sps:$4 sm:$0xff]  }
 0x1e8   :  { %1687 = vmatpush1.bf16.msra.mxu0 %v4187_v39  ;;  %1718 = vmatprep.mubr.bf16.mxu0 %v567_v19  ;;  %v4294_v39 = vld [vmem:[%s6200_s8 + $0x244] ss:$16 sps:$4 sm:$0xff]  }
 0x1e9   :  { %1688 = vmatprep.subr.bf16.mxu0 %v4195_v41  ;;  %v4292_v41 = vld [vmem:[%s6200_s8 + $0x240] ss:$16 sps:$4 sm:$0xff]   ;;  %v4354_v19 = vld [vmem:[%s6200_s8 + $0x384] ss:$16 sps:$4 sm:$0xff]  }
 0x1ec   :  { %1689 = vmatpush1.bf16.msra.mxu0 %v4193_v42  ;;  %v4295_v42 = vld [vmem:[%s6200_s8 + $0x248] ss:$16 sps:$4 sm:$0xff]  }
 0x1ed   :  { %1690 = vmatprep.subr.bf16.mxu0 %v4201_v43  ;;  %v4300_v43 = vld [vmem:[%s6200_s8 + $0x264] ss:$16 sps:$4 sm:$0xff]  }
 0x1f0   :  { %1691 = vmatpush1.bf16.msra.mxu0 %v4199_v44  ;;  %v4303_v44 = vld [vmem:[%s6200_s8 + $0x26c] ss:$16 sps:$4 sm:$0xff]  }
 0x1f1   :  { %1692 = vmatprep.subr.bf16.mxu0 %v4207_v45  ;;  %v4298_v45 = vld [vmem:[%s6200_s8 + $0x260] ss:$16 sps:$4 sm:$0xff]  }
 0x1f4   :  { %1693 = vmatpush1.bf16.msra.mxu0 %v4205_v46  ;;  %v4301_v46 = vld [vmem:[%s6200_s8 + $0x268] ss:$16 sps:$4 sm:$0xff]  }
 0x1f5   :  { %1694 = vmatprep.subr.bf16.mxu0 %v4213_v47  ;;  %v4306_v47 = vld [vmem:[%s6200_s8 + $0x284] ss:$16 sps:$4 sm:$0xff]  }
 0x1f8   :  { %1695 = vmatpush1.bf16.msra.mxu0 %v4211_v48  ;;  %v4309_v48 = vld [vmem:[%s6200_s8 + $0x28c] ss:$16 sps:$4 sm:$0xff]  }
 0x1f9   :  { %1696 = vmatprep.subr.bf16.mxu0 %v4219_v49  ;;  %v4304_v49 = vld [vmem:[%s6200_s8 + $0x280] ss:$16 sps:$4 sm:$0xff]  }
 0x1fc   :  { %1697 = vmatpush1.bf16.msra.mxu0 %v4217_v50  ;;  %v4307_v50 = vld [vmem:[%s6200_s8 + $0x288] ss:$16 sps:$4 sm:$0xff]  }
 0x1fd   :  { %1698 = vmatprep.subr.bf16.mxu0 %v4225_v51  ;;  %v4312_v51 = vld [vmem:[%s6200_s8 + $0x2a4] ss:$16 sps:$4 sm:$0xff]  }
 0x200   :  { %1699 = vmatpush1.bf16.msra.mxu0 %v4223_v52  ;;  %v4315_v52 = vld [vmem:[%s6200_s8 + $0x2ac] ss:$16 sps:$4 sm:$0xff]  }
 0x201   :  { %1700 = vmatprep.subr.bf16.mxu0 %v4231_v53  ;;  %v4310_v53 = vld [vmem:[%s6200_s8 + $0x2a0] ss:$16 sps:$4 sm:$0xff]  }
 0x204   :  { %1701 = vmatpush1.bf16.msra.mxu0 %v4229_v54  ;;  %v4313_v54 = vld [vmem:[%s6200_s8 + $0x2a8] ss:$16 sps:$4 sm:$0xff]  }
 0x205   :  { %1702 = vmatprep.subr.bf16.mxu0 %v4237_v55  ;;  %v4318_v55 = vld [vmem:[%s6200_s8 + $0x2c4] ss:$16 sps:$4 sm:$0xff]  }
 0x208   :  { %1703 = vmatpush1.bf16.msra.mxu0 %v4235_v56  ;;  %v4321_v56 = vld [vmem:[%s6200_s8 + $0x2cc] ss:$16 sps:$4 sm:$0xff]  }
 0x209   :  { %1704 = vmatprep.subr.bf16.mxu0 %v4243_v57  ;;  %v4316_v57 = vld [vmem:[%s6200_s8 + $0x2c0] ss:$16 sps:$4 sm:$0xff]  }
 0x20c   :  { %1705 = vmatpush1.bf16.msra.mxu0 %v4241_v58  ;;  %v4319_v58 = vld [vmem:[%s6200_s8 + $0x2c8] ss:$16 sps:$4 sm:$0xff]  }
 0x20d   :  { %1706 = vmatprep.subr.bf16.mxu0 %v4249_v59  ;;  %v4324_v59 = vld [vmem:[%s6200_s8 + $0x2e4] ss:$16 sps:$4 sm:$0xff]  }
 0x210   :  { %1707 = vmatpush1.bf16.msra.mxu0 %v4247_v60  ;;  %v4327_v60 = vld [vmem:[%s6200_s8 + $0x2ec] ss:$16 sps:$4 sm:$0xff]  }
 0x211   :  { %1708 = vmatprep.subr.bf16.mxu0 %v4255_v61  ;;  %v4322_v61 = vld [vmem:[%s6200_s8 + $0x2e0] ss:$16 sps:$4 sm:$0xff]  }
 0x214   :  { %1709 = vmatpush1.bf16.msra.mxu0 %v4253_v62  ;;  %v4325_v62 = vld [vmem:[%s6200_s8 + $0x2e8] ss:$16 sps:$4 sm:$0xff]  }
 0x215   :  { %1710 = vmatprep.subr.bf16.mxu0 %v4261_v63  ;;  %v4330_v63 = vld [vmem:[%s6200_s8 + $0x304] ss:$16 sps:$4 sm:$0xff]  }
 0x218   :  { %1711 = vmatpush1.bf16.msra.mxu0 %v4259_v1  ;;  %v4333_v1 = vld [vmem:[%s6200_s8 + $0x30c] ss:$16 sps:$4 sm:$0xff]  }
 0x219   :  { %1712 = vmatprep.subr.bf16.mxu0 %v4267_v2  ;;  %v4328_v2 = vld [vmem:[%s6200_s8 + $0x300] ss:$16 sps:$4 sm:$0xff]  }
 0x21c   :  { %1713 = vmatpush1.bf16.msra.mxu0 %v4265_v3  ;;  %v4331_v3 = vld [vmem:[%s6200_s8 + $0x308] ss:$16 sps:$4 sm:$0xff]  }
 0x21d   :  { %1714 = vmatprep.subr.bf16.mxu0 %v4273_v5  ;;  %v4339_v5 = vld [vmem:[%s6200_s8 + $0x32c] ss:$16 sps:$4 sm:$0xff]  }
 0x220   :  { %1715 = vmatpush1.bf16.msra.mxu0 %v4271_v7  ;;  %v4337_v7 = vld [vmem:[%s6200_s8 + $0x328] ss:$16 sps:$4 sm:$0xff]  }
 0x221   :  { %1716 = vmatprep.subr.bf16.mxu0 %v4279_v12  ;;  %v4348_v12 = vld [vmem:[%s6200_s8 + $0x364] ss:$16 sps:$4 sm:$0xff]  }
 0x224   :  { %1717 = vmatpush1.bf16.msra.mxu0 %v4277_v16  ;;  %v4349_v16 = vld [vmem:[%s6200_s8 + $0x368] ss:$16 sps:$4 sm:$0xff]  }
 0x225   :  { %1727 = vmatprep.subr.bf16.mxu0 %v4285_v21  ;;  %v4352_v21 = vld [vmem:[%s6200_s8 + $0x380] ss:$16 sps:$4 sm:$0xff]  }
 0x2ba   :  { %v4013_v23 = vpop.f32.mrb[8].mxu0 }
 0x2bb   :  { %v4014_v25 = vpop.f32.mrb[9].mxu0 }
 0x2bc   :  { %v4015_v26 = vadd.f32 %v4014_v25, %v4013_v23  ;;  %v4016_v27 = vpop.f32.mrb[10].mxu0  ;;  %v4355_v23 = vld [vmem:[%s6200_s8 + $0x388] ss:$16 sps:$4 sm:$0xff]   ;;  %v4363_v25 = vld [vmem:[%s6200_s8 + $0x3ac] ss:$16 sps:$4 sm:$0xff]  }
 0x2bd   :  { %v4017_v28 = vpop.f32.mrb[11].mxu0  ;;  %v4361_v27 = vld [vmem:[%s6200_s8 + $0x3a8] ss:$16 sps:$4 sm:$0xff]  }
 0x2be   :  { %v544_v29 = vadd.f32 %v4015_v26, %v3586_v24  ;;  %v4360_v24 = vld [vmem:[%s6200_s8 + $0x3a4] ss:$16 sps:$4 sm:$0xff]   ;;  %v4358_v26 = vld [vmem:[%s6200_s8 + $0x3a0] ss:$16 sps:$4 sm:$0xff]  }
 0x2bf   :  { %v4366_v28 = vld [vmem:[%s6200_s8 + $0x3c4] ss:$16 sps:$4 sm:$0xff]  }
 0x2c0   :  { %v549_v30 = vmax.f32 %v544_v29, 0.0  ;;  %v4369_v29 = vld [vmem:[%s6200_s8 + $0x3cc] ss:$16 sps:$4 sm:$0xff]  }
 0x2c2   :  { %v550_v33 = vpack.c.bf16 %v549_v30, %v549_v30  ;;  %v4364_v30 = vld [vmem:[%s6200_s8 + $0x3c0] ss:$16 sps:$4 sm:$0xff]  }
 0x2c4   :  { %1596 = vmatmul.mubr.bf16.vlgmr.msra.gmra.mrb[4].mxu1 %v550_v33  ;;  %1719 = vmatmul.mubr.bf16.vlgmr.msra.gmra.mrb[12].mxu0 %v550_v33  ;;  %v4375_v33 = vld [vmem:[%s6200_s8 + $0x3ec] ss:$16 sps:$4 sm:$0xff]  }
 0x2c5   :  { %1605 = vmatpush1.bf16.msra.mxu1 %v4280_v31  ;;  %1728 = vmatpush1.bf16.msra.mxu0 %v4283_v32  ;;  %v4367_v31 = vld [vmem:[%s6200_s8 + $0x3c8] ss:$16 sps:$4 sm:$0xff]   ;;  %v4372_v32 = vld [vmem:[%s6200_s8 + $0x3e4] ss:$16 sps:$4 sm:$0xff]  }
 0x2c6   :  { %1606 = vmatprep.subr.bf16.mxu1 %v4288_v34  ;;  %1729 = vmatprep.subr.bf16.mxu0 %v4291_v35  ;;  %v560_v34 = vcombine.high %v5173_v18, %v5173_v18  ;;  %v4370_v35 = vld [vmem:[%s6200_s8 + $0x3e0] ss:$16 sps:$4 sm:$0xff]   ;;  %v4381_v18 = vld [vmem:[%s6200_s8 + $0x40c] ss:$16 sps:$4 sm:$0xff]  }
 0x2c7   :  { %1636 = vmatprep.mubr.bf16.mxu1 %v575_v36  ;;  %1759 = vmatprep.mubr.bf16.mxu0 %v575_v36  ;;  %v4373_v36 = vld [vmem:[%s6200_s8 + $0x3e8] ss:$16 sps:$4 sm:$0xff]  }
 0x2c9   :  { %1607 = vmatpush1.bf16.msra.mxu1 %v4286_v37  ;;  %1730 = vmatpush1.bf16.msra.mxu0 %v4289_v38  ;;  %v4378_v37 = vld [vmem:[%s6200_s8 + $0x404] ss:$16 sps:$4 sm:$0xff]   ;;  %v5381_v38 = vrot.slane %v560_v34, %v5168_v17  ;;  %v4387_v17 = vld [vmem:[%s6200_s8 + $0x42c] ss:$16 sps:$4 sm:$0xff]  }
 0x2ca   :  { %1608 = vmatprep.subr.bf16.mxu1 %v4294_v39  ;;  %1731 = vmatprep.subr.bf16.mxu0 %v4297_v40  ;;  %v4376_v39 = vld [vmem:[%s6200_s8 + $0x400] ss:$16 sps:$4 sm:$0xff]   ;;  %v4379_v40 = vld [vmem:[%s6200_s8 + $0x408] ss:$16 sps:$4 sm:$0xff]   ;;  %v4465_v34 = vld [vmem:[%s6203_s10 + $0xcc] ss:$16 sps:$4 sm:$0xff]  }
 0x2cd   :  { %1609 = vmatpush1.bf16.msra.mxu1 %v4292_v41  ;;  %1732 = vmatpush1.bf16.msra.mxu0 %v4295_v42  ;;  %v4384_v41 = vld [vmem:[%s6200_s8 + $0x424] ss:$16 sps:$4 sm:$0xff]   ;;  %v4382_v42 = vld [vmem:[%s6200_s8 + $0x420] ss:$16 sps:$4 sm:$0xff]  }
 0x2ce   :  { %1610 = vmatprep.subr.bf16.mxu1 %v4300_v43  ;;  %1733 = vmatprep.subr.bf16.mxu0 %v4303_v44  ;;  %v4385_v43 = vld [vmem:[%s6200_s8 + $0x428] ss:$16 sps:$4 sm:$0xff]   ;;  %v4390_v44 = vld [vmem:[%s6200_s8 + $0x444] ss:$16 sps:$4 sm:$0xff]  }
 0x2d1   :  { %1611 = vmatpush1.bf16.msra.mxu1 %v4298_v45  ;;  %1734 = vmatpush1.bf16.msra.mxu0 %v4301_v46  ;;  %v4393_v45 = vld [vmem:[%s6200_s8 + $0x44c] ss:$16 sps:$4 sm:$0xff]   ;;  %v4388_v46 = vld [vmem:[%s6200_s8 + $0x440] ss:$16 sps:$4 sm:$0xff]  }
 0x2d2   :  { %1612 = vmatprep.subr.bf16.mxu1 %v4306_v47  ;;  %1735 = vmatprep.subr.bf16.mxu0 %v4309_v48  ;;  %v4391_v47 = vld [vmem:[%s6200_s8 + $0x448] ss:$16 sps:$4 sm:$0xff]   ;;  %v4396_v48 = vld [vmem:[%s6200_s8 + $0x464] ss:$16 sps:$4 sm:$0xff]  }
 0x2d5   :  { %1613 = vmatpush1.bf16.msra.mxu1 %v4304_v49  ;;  %1736 = vmatpush1.bf16.msra.mxu0 %v4307_v50  ;;  %v4394_v49 = vld [vmem:[%s6200_s8 + $0x460] ss:$16 sps:$4 sm:$0xff]   ;;  %v4397_v50 = vld [vmem:[%s6200_s8 + $0x468] ss:$16 sps:$4 sm:$0xff]  }
 0x2d6   :  { %1614 = vmatprep.subr.bf16.mxu1 %v4312_v51  ;;  %1737 = vmatprep.subr.bf16.mxu0 %v4315_v52  ;;  %v4402_v51 = vld [vmem:[%s6200_s8 + $0x484] ss:$16 sps:$4 sm:$0xff]   ;;  %v4405_v52 = vld [vmem:[%s6200_s8 + $0x48c] ss:$16 sps:$4 sm:$0xff]  }
 0x2d9   :  { %1615 = vmatpush1.bf16.msra.mxu1 %v4310_v53  ;;  %1738 = vmatpush1.bf16.msra.mxu0 %v4313_v54  ;;  %v4400_v53 = vld [vmem:[%s6200_s8 + $0x480] ss:$16 sps:$4 sm:$0xff]   ;;  %v4403_v54 = vld [vmem:[%s6200_s8 + $0x488] ss:$16 sps:$4 sm:$0xff]  }
 0x2da   :  { %1616 = vmatprep.subr.bf16.mxu1 %v4318_v55  ;;  %1739 = vmatprep.subr.bf16.mxu0 %v4321_v56  ;;  %v4408_v55 = vld [vmem:[%s6200_s8 + $0x4a4] ss:$16 sps:$4 sm:$0xff]   ;;  %v4411_v56 = vld [vmem:[%s6200_s8 + $0x4ac] ss:$16 sps:$4 sm:$0xff]  }
 0x2dd   :  { %1617 = vmatpush1.bf16.msra.mxu1 %v4316_v57  ;;  %1740 = vmatpush1.bf16.msra.mxu0 %v4319_v58  ;;  %v4406_v57 = vld [vmem:[%s6200_s8 + $0x4a0] ss:$16 sps:$4 sm:$0xff]   ;;  %v4409_v58 = vld [vmem:[%s6200_s8 + $0x4a8] ss:$16 sps:$4 sm:$0xff]  }
 0x2de   :  { %1618 = vmatprep.subr.bf16.mxu1 %v4324_v59  ;;  %1741 = vmatprep.subr.bf16.mxu0 %v4327_v60  ;;  %v4414_v59 = vld [vmem:[%s6200_s8 + $0x4c4] ss:$16 sps:$4 sm:$0xff]   ;;  %v4417_v60 = vld [vmem:[%s6200_s8 + $0x4cc] ss:$16 sps:$4 sm:$0xff]  }
 0x2e1   :  { %1619 = vmatpush1.bf16.msra.mxu1 %v4322_v61  ;;  %1742 = vmatpush1.bf16.msra.mxu0 %v4325_v62  ;;  %v4412_v61 = vld [vmem:[%s6200_s8 + $0x4c0] ss:$16 sps:$4 sm:$0xff]   ;;  %v4415_v62 = vld [vmem:[%s6200_s8 + $0x4c8] ss:$16 sps:$4 sm:$0xff]  }
 0x2e2   :  { %1620 = vmatprep.subr.bf16.mxu1 %v4330_v63  ;;  %1743 = vmatprep.subr.bf16.mxu0 %v4333_v1  ;;  %v4420_v63 = vld [vmem:[%s6200_s8 + $0x4e4] ss:$16 sps:$4 sm:$0xff]   ;;  %v4423_v1 = vld [vmem:[%s6200_s8 + $0x4ec] ss:$16 sps:$4 sm:$0xff]  }
 0x2e5   :  { %1621 = vmatpush1.bf16.msra.mxu1 %v4328_v2  ;;  %1744 = vmatpush1.bf16.msra.mxu0 %v4331_v3  ;;  %v4418_v2 = vld [vmem:[%s6200_s8 + $0x4e0] ss:$16 sps:$4 sm:$0xff]   ;;  %v4421_v3 = vld [vmem:[%s6200_s8 + $0x4e8] ss:$16 sps:$4 sm:$0xff]  }
 0x2e6   :  { %1622 = vmatprep.subr.bf16.mxu1 %v4336_v4  ;;  %1745 = vmatprep.subr.bf16.mxu0 %v4339_v5  ;;  %v4426_v4 = vld [vmem:[%s6203_s10 + $0x4] ss:$16 sps:$4 sm:$0xff]   ;;  %v4429_v5 = vld [vmem:[%s6203_s10 + $0xc] ss:$16 sps:$4 sm:$0xff]  }
 0x2e9   :  { %1623 = vmatpush1.bf16.msra.mxu1 %v4334_v6  ;;  %1746 = vmatpush1.bf16.msra.mxu0 %v4337_v7  ;;  %v576_v6 = vcombine.high %v5381_v38, %v5381_v38  ;;  %v4424_v7 = vld [vmem:[%s6203_s10] ss:$16 sps:$4 sm:$0xff]  }
 0x2ea   :  { %1624 = vmatprep.subr.bf16.mxu1 %v4342_v8  ;;  %1747 = vmatprep.subr.bf16.mxu0 %v4345_v9  ;;  %v4427_v8 = vld [vmem:[%s6203_s10 + $0x8] ss:$16 sps:$4 sm:$0xff]   ;;  %v4432_v9 = vld [vmem:[%s6203_s10 + $0x24] ss:$16 sps:$4 sm:$0xff]  }
 0x2ed   :  { %1625 = vmatpush1.bf16.msra.mxu1 %v4340_v10  ;;  %1748 = vmatpush1.bf16.msra.mxu0 %v4343_v11  ;;  %v4435_v10 = vld [vmem:[%s6203_s10 + $0x2c] ss:$16 sps:$4 sm:$0xff]   ;;  %v4430_v11 = vld [vmem:[%s6203_s10 + $0x20] ss:$16 sps:$4 sm:$0xff]  }
 0x2ee   :  { %1626 = vmatprep.subr.bf16.mxu1 %v4348_v12  ;;  %1749 = vmatprep.subr.bf16.mxu0 %v4351_v13  ;;  %v4433_v12 = vld [vmem:[%s6203_s10 + $0x28] ss:$16 sps:$4 sm:$0xff]   ;;  %v4438_v13 = vld [vmem:[%s6203_s10 + $0x44] ss:$16 sps:$4 sm:$0xff]  }
 0x2f1   :  { %1627 = vmatpush1.bf16.msra.mxu1 %v4346_v15  ;;  %1750 = vmatpush1.bf16.msra.mxu0 %v4349_v16  ;;  %v4441_v15 = vld [vmem:[%s6203_s10 + $0x4c] ss:$16 sps:$4 sm:$0xff]   ;;  %v4436_v16 = vld [vmem:[%s6203_s10 + $0x40] ss:$16 sps:$4 sm:$0xff]  }
 0x2f2   :  { %1628 = vmatprep.subr.bf16.mxu1 %v4354_v19  ;;  %1751 = vmatprep.subr.bf16.mxu0 %v4357_v20  ;;  %v4439_v19 = vld [vmem:[%s6203_s10 + $0x48] ss:$16 sps:$4 sm:$0xff]   ;;  %v4444_v20 = vld [vmem:[%s6203_s10 + $0x64] ss:$16 sps:$4 sm:$0xff]  }
 0x2f5   :  { %1629 = vmatpush1.bf16.msra.mxu1 %v4352_v21  ;;  %1752 = vmatpush1.bf16.msra.mxu0 %v4355_v23  ;;  %v4447_v21 = vld [vmem:[%s6203_s10 + $0x6c] ss:$16 sps:$4 sm:$0xff]   ;;  %v4442_v23 = vld [vmem:[%s6203_s10 + $0x60] ss:$16 sps:$4 sm:$0xff]  }
 0x2f6   :  { %1630 = vmatprep.subr.bf16.mxu1 %v4360_v24  ;;  %1753 = vmatprep.subr.bf16.mxu0 %v4363_v25  ;;  %v4445_v24 = vld [vmem:[%s6203_s10 + $0x68] ss:$16 sps:$4 sm:$0xff]   ;;  %v4450_v25 = vld [vmem:[%s6203_s10 + $0x84] ss:$16 sps:$4 sm:$0xff]  }
 0x2f9   :  { %1631 = vmatpush1.bf16.msra.mxu1 %v4358_v26  ;;  %1754 = vmatpush1.bf16.msra.mxu0 %v4361_v27  ;;  %v4453_v26 = vld [vmem:[%s6203_s10 + $0x8c] ss:$16 sps:$4 sm:$0xff]   ;;  %v4448_v27 = vld [vmem:[%s6203_s10 + $0x80] ss:$16 sps:$4 sm:$0xff]  }
 0x2fa   :  { %1632 = vmatprep.subr.bf16.mxu1 %v4366_v28  ;;  %1755 = vmatprep.subr.bf16.mxu0 %v4369_v29  ;;  %v4451_v28 = vld [vmem:[%s6203_s10 + $0x88] ss:$16 sps:$4 sm:$0xff]   ;;  %v4456_v29 = vld [vmem:[%s6203_s10 + $0xa4] ss:$16 sps:$4 sm:$0xff]  }
 0x2fd   :  { %1633 = vmatpush1.bf16.msra.mxu1 %v4364_v30  ;;  %1756 = vmatpush1.bf16.msra.mxu0 %v4367_v31  ;;  %v4459_v30 = vld [vmem:[%s6203_s10 + $0xac] ss:$16 sps:$4 sm:$0xff]   ;;  %v4454_v31 = vld [vmem:[%s6203_s10 + $0xa0] ss:$16 sps:$4 sm:$0xff]  }
 0x2fe   :  { %1634 = vmatprep.subr.bf16.mxu1 %v4372_v32  ;;  %1757 = vmatprep.subr.bf16.mxu0 %v4375_v33  ;;  %v4457_v32 = vld [vmem:[%s6203_s10 + $0xa8] ss:$16 sps:$4 sm:$0xff]   ;;  %v4462_v33 = vld [vmem:[%s6203_s10 + $0xc4] ss:$16 sps:$4 sm:$0xff]  }
 0x301   :  { %1635 = vmatpush1.bf16.msra.mxu1 %v4370_v35  ;;  %1758 = vmatpush1.bf16.msra.mxu0 %v4373_v36  ;;  %v4460_v35 = vld [vmem:[%s6203_s10 + $0xc0] ss:$16 sps:$4 sm:$0xff]   ;;  %v4463_v36 = vld [vmem:[%s6203_s10 + $0xc8] ss:$16 sps:$4 sm:$0xff]  }
 0x302   :  { %1645 = vmatprep.subr.bf16.mxu1 %v4378_v37  ;;  %1768 = vmatprep.subr.bf16.mxu0 %v4381_v18  ;;  %v4468_v37 = vld [vmem:[%s6203_s10 + $0xe4] ss:$16 sps:$4 sm:$0xff]   ;;  %v4471_v18 = vld [vmem:[%s6203_s10 + $0xec] ss:$16 sps:$4 sm:$0xff]  }
 0x304   :  { %1637 = vmatmul.mubr.bf16.vlgmr.msra.gmra.mrb[4].mxu1 %v5381_v38  ;;  %1760 = vmatmul.mubr.bf16.vlgmr.msra.gmra.mrb[12].mxu0 %v5381_v38  ;;  %v4466_v38 = vld [vmem:[%s6203_s10 + $0xe0] ss:$16 sps:$4 sm:$0xff]  }
 0x305   :  { %1646 = vmatpush1.bf16.msra.mxu1 %v4376_v39  ;;  %1769 = vmatpush1.bf16.msra.mxu0 %v4379_v40  ;;  %v4469_v39 = vld [vmem:[%s6203_s10 + $0xe8] ss:$16 sps:$4 sm:$0xff]   ;;  %v4474_v40 = vld [vmem:[%s6203_s10 + $0x104] ss:$16 sps:$4 sm:$0xff]  }
 0x306   :  { %1647 = vmatprep.subr.bf16.mxu1 %v4384_v41  ;;  %1770 = vmatprep.subr.bf16.mxu0 %v4387_v17  ;;  %v4477_v41 = vld [vmem:[%s6203_s10 + $0x10c] ss:$16 sps:$4 sm:$0xff]   ;;  %v4472_v17 = vld [vmem:[%s6203_s10 + $0x100] ss:$16 sps:$4 sm:$0xff]  }
 0x307   :  { %1677 = vmatprep.mubr.bf16.mxu1 %v4742_v22  ;;  %1800 = vmatprep.mubr.bf16.mxu0 %v4742_v22  ;;  %v4399_v22 = vld [vmem:[%s6200_s8 + $0x46c] ss:$16 sps:$4 sm:$0xff]  }
 0x309   :  { %1648 = vmatpush1.bf16.msra.mxu1 %v4382_v42  ;;  %1771 = vmatpush1.bf16.msra.mxu0 %v4385_v43  ;;  %v4475_v42 = vld [vmem:[%s6203_s10 + $0x108] ss:$16 sps:$4 sm:$0xff]   ;;  %v4480_v43 = vld [vmem:[%s6203_s10 + $0x124] ss:$16 sps:$4 sm:$0xff]  }
 0x30a   :  { %1649 = vmatprep.subr.bf16.mxu1 %v4390_v44  ;;  %1772 = vmatprep.subr.bf16.mxu0 %v4393_v45  ;;  %v4483_v44 = vld [vmem:[%s6203_s10 + $0x12c] ss:$16 sps:$4 sm:$0xff]   ;;  %v4478_v45 = vld [vmem:[%s6203_s10 + $0x120] ss:$16 sps:$4 sm:$0xff]  }
 0x30d   :  { %1650 = vmatpush1.bf16.msra.mxu1 %v4388_v46  ;;  %1773 = vmatpush1.bf16.msra.mxu0 %v4391_v47  ;;  %v4481_v46 = vld [vmem:[%s6203_s10 + $0x128] ss:$16 sps:$4 sm:$0xff]   ;;  %v4486_v47 = vld [vmem:[%s6203_s10 + $0x144] ss:$16 sps:$4 sm:$0xff]  }
 0x30e   :  { %1651 = vmatprep.subr.bf16.mxu1 %v4396_v48  ;;  %1774 = vmatprep.subr.bf16.mxu0 %v4399_v22  ;;  %v4489_v48 = vld [vmem:[%s6203_s10 + $0x14c] ss:$16 sps:$4 sm:$0xff]   ;;  %v4484_v22 = vld [vmem:[%s6203_s10 + $0x140] ss:$16 sps:$4 sm:$0xff]  }
 0x311   :  { %1652 = vmatpush1.bf16.msra.mxu1 %v4394_v49  ;;  %1775 = vmatpush1.bf16.msra.mxu0 %v4397_v50  ;;  %v4487_v49 = vld [vmem:[%s6203_s10 + $0x148] ss:$16 sps:$4 sm:$0xff]   ;;  %v4492_v50 = vld [vmem:[%s6203_s10 + $0x164] ss:$16 sps:$4 sm:$0xff]  }
 0x312   :  { %1653 = vmatprep.subr.bf16.mxu1 %v4402_v51  ;;  %1776 = vmatprep.subr.bf16.mxu0 %v4405_v52  ;;  %v4495_v51 = vld [vmem:[%s6203_s10 + $0x16c] ss:$16 sps:$4 sm:$0xff]   ;;  %v4490_v52 = vld [vmem:[%s6203_s10 + $0x160] ss:$16 sps:$4 sm:$0xff]  }
 0x315   :  { %1654 = vmatpush1.bf16.msra.mxu1 %v4400_v53  ;;  %1777 = vmatpush1.bf16.msra.mxu0 %v4403_v54  ;;  %v4493_v53 = vld [vmem:[%s6203_s10 + $0x168] ss:$16 sps:$4 sm:$0xff]   ;;  %v4498_v54 = vld [vmem:[%s6203_s10 + $0x184] ss:$16 sps:$4 sm:$0xff]  }
 0x316   :  { %1655 = vmatprep.subr.bf16.mxu1 %v4408_v55  ;;  %1778 = vmatprep.subr.bf16.mxu0 %v4411_v56  ;;  %v4501_v55 = vld [vmem:[%s6203_s10 + $0x18c] ss:$16 sps:$4 sm:$0xff]   ;;  %v4496_v56 = vld [vmem:[%s6203_s10 + $0x180] ss:$16 sps:$4 sm:$0xff]  }
 0x319   :  { %1656 = vmatpush1.bf16.msra.mxu1 %v4406_v57  ;;  %1779 = vmatpush1.bf16.msra.mxu0 %v4409_v58  ;;  %v4499_v57 = vld [vmem:[%s6203_s10 + $0x188] ss:$16 sps:$4 sm:$0xff]   ;;  %v4504_v58 = vld [vmem:[%s6203_s10 + $0x1a4] ss:$16 sps:$4 sm:$0xff]  }
 0x31a   :  { %1657 = vmatprep.subr.bf16.mxu1 %v4414_v59  ;;  %1780 = vmatprep.subr.bf16.mxu0 %v4417_v60  ;;  %v4507_v59 = vld [vmem:[%s6203_s10 + $0x1ac] ss:$16 sps:$4 sm:$0xff]   ;;  %v4502_v60 = vld [vmem:[%s6203_s10 + $0x1a0] ss:$16 sps:$4 sm:$0xff]  }
 0x31d   :  { %1658 = vmatpush1.bf16.msra.mxu1 %v4412_v61  ;;  %1781 = vmatpush1.bf16.msra.mxu0 %v4415_v62  ;;  %v4505_v61 = vld [vmem:[%s6203_s10 + $0x1a8] ss:$16 sps:$4 sm:$0xff]   ;;  %v4510_v62 = vld [vmem:[%s6203_s10 + $0x1c4] ss:$16 sps:$4 sm:$0xff]  }
 0x31e   :  { %1659 = vmatprep.subr.bf16.mxu1 %v4420_v63  ;;  %1782 = vmatprep.subr.bf16.mxu0 %v4423_v1  ;;  %v4513_v63 = vld [vmem:[%s6203_s10 + $0x1cc] ss:$16 sps:$4 sm:$0xff]   ;;  %v4508_v1 = vld [vmem:[%s6203_s10 + $0x1c0] ss:$16 sps:$4 sm:$0xff]  }
 0x321   :  { %1660 = vmatpush1.bf16.msra.mxu1 %v4418_v2  ;;  %1783 = vmatpush1.bf16.msra.mxu0 %v4421_v3  ;;  %v4511_v2 = vld [vmem:[%s6203_s10 + $0x1c8] ss:$16 sps:$4 sm:$0xff]   ;;  %v4516_v3 = vld [vmem:[%s6203_s10 + $0x1e4] ss:$16 sps:$4 sm:$0xff]  }
 0x322   :  { %2607 = vmatprep.subr.bf16.mxu1 %v4426_v4  ;;  %2689 = vmatprep.subr.bf16.mxu0 %v4429_v5  ;;  %v4519_v4 = vld [vmem:[%s6203_s10 + $0x1ec] ss:$16 sps:$4 sm:$0xff]   ;;  %v4514_v5 = vld [vmem:[%s6203_s10 + $0x1e0] ss:$16 sps:$4 sm:$0xff]  }
 0x324   :  { %1678 = vmatmul.mubr.bf16.vlgmr.msra.gmra.mrb[4].mxu1 %v576_v6  ;;  %1801 = vmatmul.mubr.bf16.vlgmr.msra.gmra.mrb[12].mxu0 %v576_v6  ;;  %v4517_v6 = vld [vmem:[%s6203_s10 + $0x1e8] ss:$16 sps:$4 sm:$0xff]  }
 0x325   :  { %2608 = vmatpush1.bf16.msra.mxu1 %v4424_v7  ;;  %2690 = vmatpush1.bf16.msra.mxu0 %v4427_v8  ;;  %v4522_v7 = vld [vmem:[%s6203_s10 + $0x204] ss:$16 sps:$4 sm:$0xff]   ;;  %v4525_v8 = vld [vmem:[%s6203_s10 + $0x20c] ss:$16 sps:$4 sm:$0xff]  }
 0x326   :  { %2609 = vmatprep.subr.bf16.mxu1 %v4432_v9  ;;  %2691 = vmatprep.subr.bf16.mxu0 %v4435_v10  ;;  %v5678_v9 = vsub.s32 0, %v5159_v14  ;;  %v5683_v10 = vld [vmem:[%s6206_s9] sm:$0xf] }
 0x329   :  { %2610 = vmatpush1.bf16.msra.mxu1 %v4430_v11  ;;  %2692 = vmatpush1.bf16.msra.mxu0 %v4433_v12  ;;  %v5686_v11 = vsub.s32 1, %v5159_v14  ;;  %v757_v12 = vsub.s32 3, %v5159_v14 }
 0x32a   :  { %2611 = vmatprep.subr.bf16.mxu1 %v4438_v13  ;;  %2693 = vmatprep.subr.bf16.mxu0 %v4441_v15  ;;  %v746_v13 = vrot.slane %v5683_v10, %v5678_v9 }
 0x32b   :  { %v750_v15 = vrot.slane %v5683_v10, %v5686_v11 }
 0x32d   :  { %2612 = vmatpush1.bf16.msra.mxu1 %v4436_v16  ;;  %2694 = vmatpush1.bf16.msra.mxu0 %v4439_v19  ;;  %v758_v16 = vrot.slane %v5683_v10, %v757_v12 }
 0x32e   :  { %2613 = vmatprep.subr.bf16.mxu1 %v4444_v20  ;;  %2695 = vmatprep.subr.bf16.mxu0 %v4447_v21 }
 0x331   :  { %2614 = vmatpush1.bf16.msra.mxu1 %v4442_v23  ;;  %2696 = vmatpush1.bf16.msra.mxu0 %v4445_v24 }
 0x332   :  { %2615 = vmatprep.subr.bf16.mxu1 %v4450_v25  ;;  %2697 = vmatprep.subr.bf16.mxu0 %v4453_v26 }
 0x335   :  { %2616 = vmatpush1.bf16.msra.mxu1 %v4448_v27  ;;  %2698 = vmatpush1.bf16.msra.mxu0 %v4451_v28 }
 0x336   :  { %2617 = vmatprep.subr.bf16.mxu1 %v4456_v29  ;;  %2699 = vmatprep.subr.bf16.mxu0 %v4459_v30 }
 0x339   :  { %2618 = vmatpush1.bf16.msra.mxu1 %v4454_v31  ;;  %2700 = vmatpush1.bf16.msra.mxu0 %v4457_v32 }
 0x33a   :  { %2619 = vmatprep.subr.bf16.mxu1 %v4462_v33  ;;  %2701 = vmatprep.subr.bf16.mxu0 %v4465_v34 }
 0x33d   :  { %2620 = vmatpush1.bf16.msra.mxu1 %v4460_v35  ;;  %2702 = vmatpush1.bf16.msra.mxu0 %v4463_v36  ;;  %v4520_v35 = vld [vmem:[%s6203_s10 + $0x200] ss:$16 sps:$4 sm:$0xff]   ;;  %v4523_v36 = vld [vmem:[%s6203_s10 + $0x208] ss:$16 sps:$4 sm:$0xff]  }
 0x33e   :  { %2621 = vmatprep.subr.bf16.mxu1 %v4468_v37  ;;  %2703 = vmatprep.subr.bf16.mxu0 %v4471_v18  ;;  %v4528_v18 = vld [vmem:[%s6203_s10 + $0x224] ss:$16 sps:$4 sm:$0xff]  }
 0x341   :  { %2622 = vmatpush1.bf16.msra.mxu1 %v4466_v38  ;;  %2704 = vmatpush1.bf16.msra.mxu0 %v4469_v39  ;;  %v4531_v38 = vld [vmem:[%s6203_s10 + $0x22c] ss:$16 sps:$4 sm:$0xff]  }
 0x342   :  { %2623 = vmatprep.subr.bf16.mxu1 %v4474_v40  ;;  %2705 = vmatprep.subr.bf16.mxu0 %v4477_v41  ;;  %v4526_v40 = vld [vmem:[%s6203_s10 + $0x220] ss:$16 sps:$4 sm:$0xff]   ;;  %v4529_v41 = vld [vmem:[%s6203_s10 + $0x228] ss:$16 sps:$4 sm:$0xff]  }
 0x345   :  { %2624 = vmatpush1.bf16.msra.mxu1 %v4472_v17  ;;  %2706 = vmatpush1.bf16.msra.mxu0 %v4475_v42  ;;  %v4534_v17 = vld [vmem:[%s6203_s10 + $0x244] ss:$16 sps:$4 sm:$0xff]   ;;  %v4537_v42 = vld [vmem:[%s6203_s10 + $0x24c] ss:$16 sps:$4 sm:$0xff]  }
 0x346   :  { %2625 = vmatprep.subr.bf16.mxu1 %v4480_v43  ;;  %2707 = vmatprep.subr.bf16.mxu0 %v4483_v44  ;;  %v4532_v43 = vld [vmem:[%s6203_s10 + $0x240] ss:$16 sps:$4 sm:$0xff]   ;;  %v4535_v44 = vld [vmem:[%s6203_s10 + $0x248] ss:$16 sps:$4 sm:$0xff]  }
 0x349   :  { %2626 = vmatpush1.bf16.msra.mxu1 %v4478_v45  ;;  %2708 = vmatpush1.bf16.msra.mxu0 %v4481_v46  ;;  %v4540_v45 = vld [vmem:[%s6203_s10 + $0x264] ss:$16 sps:$4 sm:$0xff]   ;;  %v4543_v46 = vld [vmem:[%s6203_s10 + $0x26c] ss:$16 sps:$4 sm:$0xff]  }
 0x34a   :  { %2627 = vmatprep.subr.bf16.mxu1 %v4486_v47  ;;  %2709 = vmatprep.subr.bf16.mxu0 %v4489_v48  ;;  %v4538_v47 = vld [vmem:[%s6203_s10 + $0x260] ss:$16 sps:$4 sm:$0xff]   ;;  %v4541_v48 = vld [vmem:[%s6203_s10 + $0x268] ss:$16 sps:$4 sm:$0xff]  }
 0x34d   :  { %2628 = vmatpush1.bf16.msra.mxu1 %v4484_v22  ;;  %2710 = vmatpush1.bf16.msra.mxu0 %v4487_v49  ;;  %v4546_v22 = vld [vmem:[%s6203_s10 + $0x284] ss:$16 sps:$4 sm:$0xff]   ;;  %v4549_v49 = vld [vmem:[%s6203_s10 + $0x28c] ss:$16 sps:$4 sm:$0xff]  }
 0x34e   :  { %2629 = vmatprep.subr.bf16.mxu1 %v4492_v50  ;;  %2711 = vmatprep.subr.bf16.mxu0 %v4495_v51  ;;  %v4544_v50 = vld [vmem:[%s6203_s10 + $0x280] ss:$16 sps:$4 sm:$0xff]   ;;  %v4547_v51 = vld [vmem:[%s6203_s10 + $0x288] ss:$16 sps:$4 sm:$0xff]  }
 0x351   :  { %2630 = vmatpush1.bf16.msra.mxu1 %v4490_v52  ;;  %2712 = vmatpush1.bf16.msra.mxu0 %v4493_v53  ;;  %v4552_v52 = vld [vmem:[%s6203_s10 + $0x2a4] ss:$16 sps:$4 sm:$0xff]   ;;  %v4555_v53 = vld [vmem:[%s6203_s10 + $0x2ac] ss:$16 sps:$4 sm:$0xff]  }
 0x352   :  { %2631 = vmatprep.subr.bf16.mxu1 %v4498_v54  ;;  %2713 = vmatprep.subr.bf16.mxu0 %v4501_v55  ;;  %v4550_v54 = vld [vmem:[%s6203_s10 + $0x2a0] ss:$16 sps:$4 sm:$0xff]   ;;  %v4553_v55 = vld [vmem:[%s6203_s10 + $0x2a8] ss:$16 sps:$4 sm:$0xff]  }
 0x355   :  { %2632 = vmatpush1.bf16.msra.mxu1 %v4496_v56  ;;  %2714 = vmatpush1.bf16.msra.mxu0 %v4499_v57  ;;  %v4558_v56 = vld [vmem:[%s6203_s10 + $0x2c4] ss:$16 sps:$4 sm:$0xff]   ;;  %v4561_v57 = vld [vmem:[%s6203_s10 + $0x2cc] ss:$16 sps:$4 sm:$0xff]  }
 0x356   :  { %2633 = vmatprep.subr.bf16.mxu1 %v4504_v58  ;;  %2715 = vmatprep.subr.bf16.mxu0 %v4507_v59  ;;  %v4556_v58 = vld [vmem:[%s6203_s10 + $0x2c0] ss:$16 sps:$4 sm:$0xff]   ;;  %v4559_v59 = vld [vmem:[%s6203_s10 + $0x2c8] ss:$16 sps:$4 sm:$0xff]  }
 0x359   :  { %2634 = vmatpush1.bf16.msra.mxu1 %v4502_v60  ;;  %2716 = vmatpush1.bf16.msra.mxu0 %v4505_v61  ;;  %v4564_v60 = vld [vmem:[%s6203_s10 + $0x2e4] ss:$16 sps:$4 sm:$0xff]   ;;  %v4567_v61 = vld [vmem:[%s6203_s10 + $0x2ec] ss:$16 sps:$4 sm:$0xff]  }
 0x35a   :  { %2635 = vmatprep.subr.bf16.mxu1 %v4510_v62  ;;  %2717 = vmatprep.subr.bf16.mxu0 %v4513_v63  ;;  %v4562_v62 = vld [vmem:[%s6203_s10 + $0x2e0] ss:$16 sps:$4 sm:$0xff]   ;;  %v4565_v63 = vld [vmem:[%s6203_s10 + $0x2e8] ss:$16 sps:$4 sm:$0xff]  }
 0x35d   :  { %2636 = vmatpush1.bf16.msra.mxu1 %v4508_v1  ;;  %2718 = vmatpush1.bf16.msra.mxu0 %v4511_v2  ;;  %v4570_v1 = vld [vmem:[%s6203_s10 + $0x304] ss:$16 sps:$4 sm:$0xff]   ;;  %v4573_v2 = vld [vmem:[%s6203_s10 + $0x30c] ss:$16 sps:$4 sm:$0xff]  }
 0x35e   :  { %2637 = vmatprep.subr.bf16.mxu1 %v4516_v3  ;;  %2719 = vmatprep.subr.bf16.mxu0 %v4519_v4  ;;  %v4568_v3 = vld [vmem:[%s6203_s10 + $0x300] ss:$16 sps:$4 sm:$0xff]   ;;  %v4571_v4 = vld [vmem:[%s6203_s10 + $0x308] ss:$16 sps:$4 sm:$0xff]  }
 0x361   :  { %2638 = vmatpush1.bf16.msra.mxu1 %v4514_v5  ;;  %2720 = vmatpush1.bf16.msra.mxu0 %v4517_v6  ;;  %v4576_v5 = vld [vmem:[%s6203_s10 + $0x324] ss:$16 sps:$4 sm:$0xff]   ;;  %v4579_v6 = vld [vmem:[%s6203_s10 + $0x32c] ss:$16 sps:$4 sm:$0xff]  }
 0x362   :  { %2648 = vmatprep.subr.bf16.mxu1 %v4522_v7  ;;  %2730 = vmatprep.subr.bf16.mxu0 %v4525_v8  ;;  %v4574_v7 = vld [vmem:[%s6203_s10 + $0x320] ss:$16 sps:$4 sm:$0xff]   ;;  %v4577_v8 = vld [vmem:[%s6203_s10 + $0x328] ss:$16 sps:$4 sm:$0xff]  }
 0x3f7   :  { %v1679_v19 = vpop.f32.mrb[4].mxu1  ;;  %v5696_v20 = vpop.f32.mrb[12].mxu0 }
 0x3f8   :  { %v4102_v21 = vadd.f32 %v1679_v19, %v746_v13  ;;  %v1681_v23 = vpop.f32.mrb[5].mxu1  ;;  %v1804_v24 = vpop.f32.mrb[13].mxu0  ;;  %v4582_v13 = vld [vmem:[%s6203_s10 + $0x344] ss:$16 sps:$4 sm:$0xff]   ;;  %v4583_v19 = vld [vmem:[%s6203_s10 + $0x348] ss:$16 sps:$4 sm:$0xff]  }
 0x3f9   :  { %v4103_v25 = vadd.f32 %v1681_v23, %v750_v15  ;;  %v4105_v26 = vadd.f32 %v1804_v24, %v758_v16  ;;  %v1683_v27 = vpop.f32.mrb[6].mxu1  ;;  %v1806_v28 = vpop.f32.mrb[14].mxu0  ;;  %v4585_v15 = vld [vmem:[%s6203_s10 + $0x34c] ss:$16 sps:$4 sm:$0xff]   ;;  %v4580_v16 = vld [vmem:[%s6203_s10 + $0x340] ss:$16 sps:$4 sm:$0xff]  }
 0x3fa   :  { %v1809_v29 = vmax.f32 %v4102_v21, 0.0  ;;  %v1684_v30 = vpop.f32.mrb[7].mxu1  ;;  %v1807_v31 = vpop.f32.mrb[15].mxu0  ;;  %v4588_v21 = vld [vmem:[%s6203_s10 + $0x364] ss:$16 sps:$4 sm:$0xff]  }
 0x3fb   :  { %v1810_v32 = vmax.f32 %v4103_v25, 0.0  ;;  %v1812_v33 = vmax.f32 %v4105_v26, 0.0  ;;  %v4591_v23 = vld [vmem:[%s6203_s10 + $0x36c] ss:$16 sps:$4 sm:$0xff]   ;;  %v4586_v24 = vld [vmem:[%s6203_s10 + $0x360] ss:$16 sps:$4 sm:$0xff]  }
 0x3fc   :  { %v1813_v37 = vpack.c.bf16 %v1809_v29, %v1809_v29  ;;  %v4589_v25 = vld [vmem:[%s6203_s10 + $0x368] ss:$16 sps:$4 sm:$0xff]   ;;  %v4594_v26 = vld [vmem:[%s6203_s10 + $0x384] ss:$16 sps:$4 sm:$0xff]   ;;  %v4597_v27 = vld [vmem:[%s6203_s10 + $0x38c] ss:$16 sps:$4 sm:$0xff]  }
 0x3fd   :  { %v1814_v34 = vpack.c.bf16 %v1810_v32, %v1810_v32  ;;  %v1816_v39 = vpack.c.bf16 %v1812_v33, %v1812_v33  ;;  %v4592_v28 = vld [vmem:[%s6203_s10 + $0x380] ss:$16 sps:$4 sm:$0xff]   ;;  %v4595_v29 = vld [vmem:[%s6203_s10 + $0x388] ss:$16 sps:$4 sm:$0xff]   ;;  %v753_v30 = vsub.s32 2, %v5159_v14 }
 0x3fe   :  { %v4600_v31 = vld [vmem:[%s6203_s10 + $0x3a4] ss:$16 sps:$4 sm:$0xff]   ;;  %v4603_v32 = vld [vmem:[%s6203_s10 + $0x3ac] ss:$16 sps:$4 sm:$0xff]   ;;  %v4598_v33 = vld [vmem:[%s6203_s10 + $0x3a0] ss:$16 sps:$4 sm:$0xff]  }
 0x3ff   :  { %2639 = vmatprep.mubr.bf16.mxu1 %v1814_v34  ;;  %2721 = vmatprep.mubr.bf16.mxu0 %v1814_v34  ;;  %v4601_v34 = vld [vmem:[%s6203_s10 + $0x3a8] ss:$16 sps:$4 sm:$0xff]  }
 0x400   :  { %2640 = vmatmul.mubr.bf16.vlgmr.msra.gmra.mrb[8].mxu1 %v1813_v37  ;;  %2722 = vmatmul.mubr.bf16.vlgmr.msra.gmra.mrb[16].mxu0 %v1813_v37  ;;  %v4609_v37 = vld [vmem:[%s6203_s10 + $0x3cc] ss:$16 sps:$4 sm:$0xff]   ;;  %v4709_v14 = vld [vmem:[%s6205_s12 + $0x1f0] ss:$8 sps:$4 sm:$0xff]  }
 0x401   :  { %2649 = vmatpush1.bf16.msra.mxu1 %v4520_v35  ;;  %2731 = vmatpush1.bf16.msra.mxu0 %v4523_v36  ;;  %v754_v35 = vrot.slane %v5683_v10, %v753_v30  ;;  %v4606_v36 = vld [vmem:[%s6203_s10 + $0x3c4] ss:$16 sps:$4 sm:$0xff]   ;;  %v4607_v10 = vld [vmem:[%s6203_s10 + $0x3c8] ss:$16 sps:$4 sm:$0xff]  }
 0x402   :  { %2680 = vmatprep.mubr.bf16.mxu1 %v1816_v39  ;;  %2762 = vmatprep.mubr.bf16.mxu0 %v1816_v39  ;;  %v4612_v39 = vld [vmem:[%s6203_s10 + $0x3e4] ss:$16 sps:$4 sm:$0xff]  }
 0x403   :  { %2650 = vmatprep.subr.bf16.mxu1 %v4528_v18  ;;  %2732 = vmatprep.subr.bf16.mxu0 %v4531_v38  ;;  %v4604_v18 = vld [vmem:[%s6203_s10 + $0x3c0] ss:$16 sps:$4 sm:$0xff]   ;;  %v4104_v38 = vadd.f32 %v5696_v20, %v754_v35  ;;  %v4613_v20 = vld [vmem:[%s6203_s10 + $0x3e8] ss:$16 sps:$4 sm:$0xff]  }
 0x405   :  { %2651 = vmatpush1.bf16.msra.mxu1 %v4526_v40  ;;  %2733 = vmatpush1.bf16.msra.mxu0 %v4529_v41  ;;  %v4615_v40 = vld [vmem:[%s6203_s10 + $0x3ec] ss:$16 sps:$4 sm:$0xff]   ;;  %v4610_v41 = vld [vmem:[%s6203_s10 + $0x3e0] ss:$16 sps:$4 sm:$0xff]  }
 0x406   :  { %2652 = vmatprep.subr.bf16.mxu1 %v4534_v17  ;;  %2734 = vmatprep.subr.bf16.mxu0 %v4537_v42  ;;  %v1811_v17 = vmax.f32 %v4104_v38, 0.0  ;;  %v4618_v42 = vld [vmem:[%s6205_s12 + $0x4] ss:$8 sps:$4 sm:$0xff]  }
 0x409   :  { %2653 = vmatpush1.bf16.msra.mxu1 %v4532_v43  ;;  %2735 = vmatpush1.bf16.msra.mxu0 %v4535_v44  ;;  %v4616_v43 = vld [vmem:[%s6205_s12] ss:$8 sps:$4 sm:$0xff]   ;;  %v1815_v44 = vpack.c.bf16 %v1811_v17, %v1811_v17 }
 0x40a   :  { %2654 = vmatprep.subr.bf16.mxu1 %v4540_v45  ;;  %2736 = vmatprep.subr.bf16.mxu0 %v4543_v46  ;;  %v4621_v45 = vld [vmem:[%s6205_s12 + $0x14] ss:$8 sps:$4 sm:$0xff]   ;;  %v4619_v46 = vld [vmem:[%s6205_s12 + $0x10] ss:$8 sps:$4 sm:$0xff]  }
 0x40d   :  { %2655 = vmatpush1.bf16.msra.mxu1 %v4538_v47  ;;  %2737 = vmatpush1.bf16.msra.mxu0 %v4541_v48  ;;  %v4624_v47 = vld [vmem:[%s6205_s12 + $0x24] ss:$8 sps:$4 sm:$0xff]   ;;  %v4622_v48 = vld [vmem:[%s6205_s12 + $0x20] ss:$8 sps:$4 sm:$0xff]  }
 0x40e   :  { %2656 = vmatprep.subr.bf16.mxu1 %v4546_v22  ;;  %2738 = vmatprep.subr.bf16.mxu0 %v4549_v49  ;;  %v4627_v22 = vld [vmem:[%s6205_s12 + $0x34] ss:$8 sps:$4 sm:$0xff]   ;;  %v4625_v49 = vld [vmem:[%s6205_s12 + $0x30] ss:$8 sps:$4 sm:$0xff]  }
 0x411   :  { %2657 = vmatpush1.bf16.msra.mxu1 %v4544_v50  ;;  %2739 = vmatpush1.bf16.msra.mxu0 %v4547_v51  ;;  %v4630_v50 = vld [vmem:[%s6205_s12 + $0x44] ss:$8 sps:$4 sm:$0xff]   ;;  %v4628_v51 = vld [vmem:[%s6205_s12 + $0x40] ss:$8 sps:$4 sm:$0xff]  }
 0x412   :  { %2658 = vmatprep.subr.bf16.mxu1 %v4552_v52  ;;  %2740 = vmatprep.subr.bf16.mxu0 %v4555_v53  ;;  %v4633_v52 = vld [vmem:[%s6205_s12 + $0x54] ss:$8 sps:$4 sm:$0xff]   ;;  %v4631_v53 = vld [vmem:[%s6205_s12 + $0x50] ss:$8 sps:$4 sm:$0xff]  }
 0x415   :  { %2659 = vmatpush1.bf16.msra.mxu1 %v4550_v54  ;;  %2741 = vmatpush1.bf16.msra.mxu0 %v4553_v55  ;;  %v4636_v54 = vld [vmem:[%s6205_s12 + $0x64] ss:$8 sps:$4 sm:$0xff]   ;;  %v4634_v55 = vld [vmem:[%s6205_s12 + $0x60] ss:$8 sps:$4 sm:$0xff]  }
 0x416   :  { %2660 = vmatprep.subr.bf16.mxu1 %v4558_v56  ;;  %2742 = vmatprep.subr.bf16.mxu0 %v4561_v57  ;;  %v4639_v56 = vld [vmem:[%s6205_s12 + $0x74] ss:$8 sps:$4 sm:$0xff]   ;;  %v4637_v57 = vld [vmem:[%s6205_s12 + $0x70] ss:$8 sps:$4 sm:$0xff]  }
 0x419   :  { %2661 = vmatpush1.bf16.msra.mxu1 %v4556_v58  ;;  %2743 = vmatpush1.bf16.msra.mxu0 %v4559_v59  ;;  %v4642_v58 = vld [vmem:[%s6205_s12 + $0x84] ss:$8 sps:$4 sm:$0xff]   ;;  %v4640_v59 = vld [vmem:[%s6205_s12 + $0x80] ss:$8 sps:$4 sm:$0xff]  }
 0x41a   :  { %2662 = vmatprep.subr.bf16.mxu1 %v4564_v60  ;;  %2744 = vmatprep.subr.bf16.mxu0 %v4567_v61  ;;  %v4645_v60 = vld [vmem:[%s6205_s12 + $0x94] ss:$8 sps:$4 sm:$0xff]   ;;  %v4643_v61 = vld [vmem:[%s6205_s12 + $0x90] ss:$8 sps:$4 sm:$0xff]  }
 0x41d   :  { %2663 = vmatpush1.bf16.msra.mxu1 %v4562_v62  ;;  %2745 = vmatpush1.bf16.msra.mxu0 %v4565_v63  ;;  %v4648_v62 = vld [vmem:[%s6205_s12 + $0xa4] ss:$8 sps:$4 sm:$0xff]   ;;  %v4646_v63 = vld [vmem:[%s6205_s12 + $0xa0] ss:$8 sps:$4 sm:$0xff]  }
 0x41e   :  { %2664 = vmatprep.subr.bf16.mxu1 %v4570_v1  ;;  %2746 = vmatprep.subr.bf16.mxu0 %v4573_v2  ;;  %v4651_v1 = vld [vmem:[%s6205_s12 + $0xb4] ss:$8 sps:$4 sm:$0xff]   ;;  %v4649_v2 = vld [vmem:[%s6205_s12 + $0xb0] ss:$8 sps:$4 sm:$0xff]  }
 0x421   :  { %2665 = vmatpush1.bf16.msra.mxu1 %v4568_v3  ;;  %2747 = vmatpush1.bf16.msra.mxu0 %v4571_v4  ;;  %v4654_v3 = vld [vmem:[%s6205_s12 + $0xc4] ss:$8 sps:$4 sm:$0xff]   ;;  %v4652_v4 = vld [vmem:[%s6205_s12 + $0xc0] ss:$8 sps:$4 sm:$0xff]  }
 0x422   :  { %2666 = vmatprep.subr.bf16.mxu1 %v4576_v5  ;;  %2748 = vmatprep.subr.bf16.mxu0 %v4579_v6  ;;  %v4657_v5 = vld [vmem:[%s6205_s12 + $0xd4] ss:$8 sps:$4 sm:$0xff]   ;;  %v4655_v6 = vld [vmem:[%s6205_s12 + $0xd0] ss:$8 sps:$4 sm:$0xff]  }
 0x425   :  { %2667 = vmatpush1.bf16.msra.mxu1 %v4574_v7  ;;  %2749 = vmatpush1.bf16.msra.mxu0 %v4577_v8  ;;  %v4660_v7 = vld [vmem:[%s6205_s12 + $0xe4] ss:$8 sps:$4 sm:$0xff]   ;;  %v4658_v8 = vld [vmem:[%s6205_s12 + $0xe0] ss:$8 sps:$4 sm:$0xff]  }
 0x426   :  { %2668 = vmatprep.subr.bf16.mxu1 %v4582_v13  ;;  %2750 = vmatprep.subr.bf16.mxu0 %v4585_v15  ;;  %v4663_v13 = vld [vmem:[%s6205_s12 + $0xf4] ss:$8 sps:$4 sm:$0xff]   ;;  %v4661_v15 = vld [vmem:[%s6205_s12 + $0xf0] ss:$8 sps:$4 sm:$0xff]  }
 0x429   :  { %2669 = vmatpush1.bf16.msra.mxu1 %v4580_v16  ;;  %2751 = vmatpush1.bf16.msra.mxu0 %v4583_v19  ;;  %v4666_v16 = vld [vmem:[%s6205_s12 + $0x104] ss:$8 sps:$4 sm:$0xff]  }
 0x42a   :  { %2670 = vmatprep.subr.bf16.mxu1 %v4588_v21  ;;  %2752 = vmatprep.subr.bf16.mxu0 %v4591_v23  ;;  %v4712_v19 = vld [vmem:[%s6207_s14 + $0x40] sm:$0xff]   ;;  %v4714_v23 = vld [vmem:[%s6207_s14 + $0x48] sm:$0xff]  }
 0x42b   :  { %v4713_v21 = vld [vmem:[%s6207_s14] sm:$0xff]  }
 0x42d   :  { %2671 = vmatpush1.bf16.msra.mxu1 %v4586_v24  ;;  %2753 = vmatpush1.bf16.msra.mxu0 %v4589_v25  ;;  %v4715_v24 = vld [vmem:[%s6207_s14 + $0x8] sm:$0xff]   ;;  %v4716_v25 = vld [vmem:[%s6207_s14 + $0x50] sm:$0xff]  }
 0x42e   :  { %2672 = vmatprep.subr.bf16.mxu1 %v4594_v26  ;;  %2754 = vmatprep.subr.bf16.mxu0 %v4597_v27  ;;  %v4717_v26 = vld [vmem:[%s6207_s14 + $0x10] sm:$0xff]   ;;  %v4718_v27 = vld [vmem:[%s6207_s14 + $0x58] sm:$0xff]  }
 0x431   :  { %2673 = vmatpush1.bf16.msra.mxu1 %v4592_v28  ;;  %2755 = vmatpush1.bf16.msra.mxu0 %v4595_v29  ;;  %v4719_v28 = vld [vmem:[%s6207_s14 + $0x18] sm:$0xff]   ;;  %v4720_v29 = vld [vmem:[%s6207_s14 + $0x60] sm:$0xff]  }
 0x432   :  { %2674 = vmatprep.subr.bf16.mxu1 %v4600_v31  ;;  %2756 = vmatprep.subr.bf16.mxu0 %v4603_v32  ;;  %v4721_v31 = vld [vmem:[%s6207_s14 + $0x20] sm:$0xff]   ;;  %v4722_v32 = vld [vmem:[%s6207_s14 + $0x68] sm:$0xff]  }
 0x435   :  { %2675 = vmatpush1.bf16.msra.mxu1 %v4598_v33  ;;  %2757 = vmatpush1.bf16.msra.mxu0 %v4601_v34  ;;  %v4723_v33 = vld [vmem:[%s6207_s14 + $0x28] sm:$0xff]   ;;  %v6027_v34 = vld [vmem:[%s6208_s11] sm:$0xf] }
 0x436   :  { %2676 = vmatprep.subr.bf16.mxu1 %v4606_v36  ;;  %2758 = vmatprep.subr.bf16.mxu0 %v4609_v37  ;;  %v1950_v35 = vrot.slane %v6027_v34, %v5678_v9  ;;  %v1954_v36 = vrot.slane %v6027_v34, %v5686_v11  ;;  %v1962_v37 = vrot.slane %v6027_v34, %v757_v12  ;;  %v4664_v12 = vld [vmem:[%s6205_s12 + $0x100] ss:$8 sps:$4 sm:$0xff]  }
 0x439   :  { %2677 = vmatpush1.bf16.msra.mxu1 %v4604_v18  ;;  %2759 = vmatpush1.bf16.msra.mxu0 %v4607_v10 }
 0x43a   :  { %2678 = vmatprep.subr.bf16.mxu1 %v4612_v39  ;;  %2760 = vmatprep.subr.bf16.mxu0 %v4615_v40 }
 0x43d   :  { %2679 = vmatpush1.bf16.msra.mxu1 %v4610_v41  ;;  %2761 = vmatpush1.bf16.msra.mxu0 %v4613_v20 }
 0x43e   :  { %3175 = vmatprep.subr.bf16.mxu1 %v4618_v42  ;;  %4019 = vmatprep.subr.bf16.mxu0 %v4712_v19  ;;  %v4703_v19 = vld [vmem:[%s6205_s12 + $0x1d0] ss:$8 sps:$4 sm:$0xff]  }
 0x440   :  { %2681 = vmatmul.mubr.bf16.vlgmr.msra.gmra.mrb[8].mxu1 %v1815_v44  ;;  %2763 = vmatmul.mubr.bf16.vlgmr.msra.gmra.mrb[16].mxu0 %v1815_v44 }
 0x441   :  { %3176 = vmatpush1.bf16.msra.mxu1 %v4616_v43  ;;  %4020 = vmatpush3.bf16.msra.mxu0 %v4713_v21  ;;  %v1958_v21 = vrot.slane %v6027_v34, %v753_v30 }
 0x442   :  { %3177 = vmatprep.subr.bf16.mxu1 %v4621_v45  ;;  %4021 = vmatprep.subr.bf16.mxu0 %v4714_v23  ;;  %v4708_v23 = vld [vmem:[%s6205_s12 + $0x1e4] ss:$8 sps:$4 sm:$0xff]  }
 0x445   :  { %3178 = vmatpush1.bf16.msra.mxu1 %v4619_v46  ;;  %4022 = vmatpush3.bf16.msra.mxu0 %v4715_v24  ;;  %v4706_v24 = vld [vmem:[%s6205_s12 + $0x1e0] ss:$8 sps:$4 sm:$0xff]  }
 0x446   :  { %3179 = vmatprep.subr.bf16.mxu1 %v4624_v47  ;;  %4023 = vmatprep.subr.bf16.mxu0 %v4716_v25 }
 0x449   :  { %3180 = vmatpush1.bf16.msra.mxu1 %v4622_v48  ;;  %4024 = vmatpush3.bf16.msra.mxu0 %v4717_v26  ;;  %v4711_v26 = vld [vmem:[%s6205_s12 + $0x1f4] ss:$8 sps:$4 sm:$0xff]  }
 0x44a   :  { %3181 = vmatprep.subr.bf16.mxu1 %v4627_v22  ;;  %4025 = vmatprep.subr.bf16.mxu0 %v4718_v27 }
 0x44d   :  { %3182 = vmatpush1.bf16.msra.mxu1 %v4625_v49  ;;  %4026 = vmatpush3.bf16.msra.mxu0 %v4719_v28  ;;  %v4669_v49 = vld [vmem:[%s6205_s12 + $0x114] ss:$8 sps:$4 sm:$0xff]  }
 0x44e   :  { %3183 = vmatprep.subr.bf16.mxu1 %v4630_v50  ;;  %4027 = vmatprep.subr.bf16.mxu0 %v4720_v29  ;;  %v4724_v28 = vld [vmem:[%s6207_s14 + $0x70] sm:$0xff]  }
 0x44f   :  { %v4725_v29 = vld [vmem:[%s6207_s14 + $0x30] sm:$0xff]  }
 0x451   :  { %3184 = vmatpush1.bf16.msra.mxu1 %v4628_v51  ;;  %4028 = vmatpush3.bf16.msra.mxu0 %v4721_v31  ;;  %v4667_v51 = vld [vmem:[%s6205_s12 + $0x110] ss:$8 sps:$4 sm:$0xff]  }
 0x452   :  { %3185 = vmatprep.subr.bf16.mxu1 %v4633_v52  ;;  %4029 = vmatprep.subr.bf16.mxu0 %v4722_v32  ;;  %v4672_v52 = vld [vmem:[%s6205_s12 + $0x124] ss:$8 sps:$4 sm:$0xff]   ;;  %v4726_v31 = vld [vmem:[%s6207_s14 + $0x78] sm:$0xff]  }
 0x453   :  { %v4727_v32 = vld [vmem:[%s6207_s14 + $0x38] sm:$0xff]  }
 0x455   :  { %3186 = vmatpush1.bf16.msra.mxu1 %v4631_v53  ;;  %4030 = vmatpush3.bf16.msra.mxu0 %v4723_v33  ;;  %v4670_v53 = vld [vmem:[%s6205_s12 + $0x120] ss:$8 sps:$4 sm:$0xff]  }
 0x456   :  { %3187 = vmatprep.subr.bf16.mxu1 %v4636_v54  ;;  %v4675_v54 = vld [vmem:[%s6205_s12 + $0x134] ss:$8 sps:$4 sm:$0xff]   ;;  %4031 = vmatprep.subr.bf16.mxu0 %v4724_v28  ;;  %v2843_v33 = vld [vmem:[%s6210_s13] sm:$0x3] }
 0x457   :  { %v2848_v34 = vrot.slane %v2843_v33, %v5678_v9  ;;  %v4729_v9 = vld [vmem:[%s6209_s16 + $0x8] sm:$0xff]  }
 0x459   :  { %3188 = vmatpush1.bf16.msra.mxu1 %v4634_v55  ;;  %v4673_v55 = vld [vmem:[%s6205_s12 + $0x130] ss:$8 sps:$4 sm:$0xff]   ;;  %4032 = vmatpush3.bf16.msra.mxu0 %v4725_v29 }
 0x45a   :  { %3189 = vmatprep.subr.bf16.mxu1 %v4639_v56  ;;  %v4678_v56 = vld [vmem:[%s6205_s12 + $0x144] ss:$8 sps:$4 sm:$0xff]   ;;  %4033 = vmatprep.subr.bf16.mxu0 %v4726_v31 }
 0x45d   :  { %3190 = vmatpush1.bf16.msra.mxu1 %v4637_v57  ;;  %v4676_v57 = vld [vmem:[%s6205_s12 + $0x140] ss:$8 sps:$4 sm:$0xff]   ;;  %4034 = vmatpush3.bf16.msra.mxu0 %v4727_v32 }
 0x45e   :  { %3191 = vmatprep.subr.bf16.mxu1 %v4642_v58  ;;  %v4681_v58 = vld [vmem:[%s6205_s12 + $0x154] ss:$8 sps:$4 sm:$0xff]   ;;  %4082 = vmatprep.subr.bf16.mxu0 %v4740_v0 }
 0x461   :  { %3192 = vmatpush1.bf16.msra.mxu1 %v4640_v59  ;;  %v4679_v59 = vld [vmem:[%s6205_s12 + $0x150] ss:$8 sps:$4 sm:$0xff]  }
 0x462   :  { %3193 = vmatprep.subr.bf16.mxu1 %v4645_v60  ;;  %v4684_v60 = vld [vmem:[%s6205_s12 + $0x164] ss:$8 sps:$4 sm:$0xff]  }
 0x465   :  { %3194 = vmatpush1.bf16.msra.mxu1 %v4643_v61  ;;  %v4682_v61 = vld [vmem:[%s6205_s12 + $0x160] ss:$8 sps:$4 sm:$0xff]  }
 0x466   :  { %3195 = vmatprep.subr.bf16.mxu1 %v4648_v62  ;;  %v4687_v62 = vld [vmem:[%s6205_s12 + $0x174] ss:$8 sps:$4 sm:$0xff]  }
 0x469   :  { %3196 = vmatpush1.bf16.msra.mxu1 %v4646_v63  ;;  %v4685_v63 = vld [vmem:[%s6205_s12 + $0x170] ss:$8 sps:$4 sm:$0xff]  }
 0x46a   :  { %3197 = vmatprep.subr.bf16.mxu1 %v4651_v1  ;;  %v4690_v1 = vld [vmem:[%s6205_s12 + $0x184] ss:$8 sps:$4 sm:$0xff]  }
 0x46d   :  { %3198 = vmatpush1.bf16.msra.mxu1 %v4649_v2  ;;  %v4688_v2 = vld [vmem:[%s6205_s12 + $0x180] ss:$8 sps:$4 sm:$0xff]  }
 0x46e   :  { %3199 = vmatprep.subr.bf16.mxu1 %v4654_v3  ;;  %v4693_v3 = vld [vmem:[%s6205_s12 + $0x194] ss:$8 sps:$4 sm:$0xff]  }
 0x471   :  { %3200 = vmatpush1.bf16.msra.mxu1 %v4652_v4  ;;  %v4691_v4 = vld [vmem:[%s6205_s12 + $0x190] ss:$8 sps:$4 sm:$0xff]  }
 0x472   :  { %3201 = vmatprep.subr.bf16.mxu1 %v4657_v5  ;;  %v4696_v5 = vld [vmem:[%s6205_s12 + $0x1a4] ss:$8 sps:$4 sm:$0xff]  }
 0x475   :  { %3202 = vmatpush1.bf16.msra.mxu1 %v4655_v6  ;;  %v4694_v6 = vld [vmem:[%s6205_s12 + $0x1a0] ss:$8 sps:$4 sm:$0xff]  }
 0x476   :  { %3203 = vmatprep.subr.bf16.mxu1 %v4660_v7  ;;  %v4699_v7 = vld [vmem:[%s6205_s12 + $0x1b4] ss:$8 sps:$4 sm:$0xff]  }
 0x479   :  { %3204 = vmatpush1.bf16.msra.mxu1 %v4658_v8  ;;  %v4697_v8 = vld [vmem:[%s6205_s12 + $0x1b0] ss:$8 sps:$4 sm:$0xff]  }
 0x47a   :  { %3205 = vmatprep.subr.bf16.mxu1 %v4663_v13  ;;  %v4702_v13 = vld [vmem:[%s6205_s12 + $0x1c4] ss:$8 sps:$4 sm:$0xff]  }
 0x47d   :  { %3206 = vmatpush1.bf16.msra.mxu1 %v4661_v15  ;;  %v4700_v15 = vld [vmem:[%s6205_s12 + $0x1c0] ss:$8 sps:$4 sm:$0xff]  }
 0x47e   :  { %3216 = vmatprep.subr.bf16.mxu1 %v4666_v16  ;;  %v4705_v16 = vld [vmem:[%s6205_s12 + $0x1d4] ss:$8 sps:$4 sm:$0xff]  }
 0x513   :  { %v2682_v18 = vpop.f32.mrb[8].mxu1  ;;  %v6036_v10 = vpop.f32.mrb[16].mxu0 }
 0x514   :  { %v4106_v38 = vadd.f32 %v2682_v18, %v1950_v35  ;;  %v2684_v39 = vpop.f32.mrb[9].mxu1  ;;  %v2766_v40 = vpop.f32.mrb[17].mxu0  ;;  %v4108_v25 = vadd.f32 %v6036_v10, %v1958_v21  ;;  %v2852_v35 = vrot.slane %v2843_v33, %v5686_v11  ;;  %v4730_v11 = vld [vmem:[%s6209_s16 + $0x10] sm:$0xff]  }
 0x515   :  { %v4107_v41 = vadd.f32 %v2684_v39, %v1954_v36  ;;  %v4109_v20 = vadd.f32 %v2766_v40, %v1962_v37  ;;  %v2686_v17 = vpop.f32.mrb[10].mxu1  ;;  %v2768_v42 = vpop.f32.mrb[18].mxu0 }
 0x516   :  { %v2771_v43 = vmax.f32 %v4106_v38, 0.0  ;;  %v2687_v44 = vpop.f32.mrb[11].mxu1  ;;  %v2769_v45 = vpop.f32.mrb[19].mxu0  ;;  %v2773_v30 = vmax.f32 %v4108_v25, 0.0  ;;  %v4728_v17 = vld [vmem:[%s6209_s16] sm:$0xff]  }
 0x517   :  { %v2772_v46 = vmax.f32 %v4107_v41, 0.0  ;;  %v2774_v47 = vmax.f32 %v4109_v20, 0.0  ;;  %v4732_v44 = vld [vmem:[%s6209_s16 + $0x20] sm:$0xff]   ;;  %v4733_v45 = vld [vmem:[%s6209_s16 + $0x28] sm:$0xff]  }
 0x518   :  { %v2775_v22 = vpack.c.bf16 %v2771_v43, %v2771_v43  ;;  %v2777_v27 = vpack.c.bf16 %v2773_v30, %v2773_v30  ;;  %v4731_v43 = vld [vmem:[%s6209_s16 + $0x18] sm:$0xff]  }
 0x519   :  { %v2776_v48 = vpack.c.bf16 %v2772_v46, %v2772_v46  ;;  %v2778_v50 = vpack.c.bf16 %v2774_v47, %v2774_v47  ;;  %v4734_v46 = vld [vmem:[%s6209_s16 + $0x30] sm:$0xff]   ;;  %v4735_v47 = vld [vmem:[%s6209_s16 + $0x38] sm:$0xff]  }
 0x51b   :  { %3207 = vmatprep.mubr.bf16.mxu1 %v2776_v48 }
 0x51c   :  { %3208 = vmatmul.mubr.bf16.vlgmr.msra.gmra.mrb[12].mxu1 %v2775_v22 }
 0x51d   :  { %3217 = vmatpush1.bf16.msra.mxu1 %v4664_v12  ;;  %3248 = vmatprep.mubr.bf16.mxu1 %v2778_v50  ;;  %v3956_v12 = vld [vmem:[%s6211_s15] ss:$0 sm:$0xff] }
 0x51e   :  { %3218 = vmatprep.subr.bf16.mxu1 %v4669_v49 }
 0x521   :  { %3219 = vmatpush1.bf16.msra.mxu1 %v4667_v51 }
 0x522   :  { %3220 = vmatprep.subr.bf16.mxu1 %v4672_v52 }
 0x525   :  { %3221 = vmatpush1.bf16.msra.mxu1 %v4670_v53 }
 0x526   :  { %3222 = vmatprep.subr.bf16.mxu1 %v4675_v54 }
 0x529   :  { %3223 = vmatpush1.bf16.msra.mxu1 %v4673_v55 }
 0x52a   :  { %3224 = vmatprep.subr.bf16.mxu1 %v4678_v56 }
 0x52d   :  { %3225 = vmatpush1.bf16.msra.mxu1 %v4676_v57 }
 0x52e   :  { %3226 = vmatprep.subr.bf16.mxu1 %v4681_v58 }
 0x531   :  { %3227 = vmatpush1.bf16.msra.mxu1 %v4679_v59 }
 0x532   :  { %3228 = vmatprep.subr.bf16.mxu1 %v4684_v60 }
 0x535   :  { %3229 = vmatpush1.bf16.msra.mxu1 %v4682_v61 }
 0x536   :  { %3230 = vmatprep.subr.bf16.mxu1 %v4687_v62 }
 0x539   :  { %3231 = vmatpush1.bf16.msra.mxu1 %v4685_v63 }
 0x53a   :  { %3232 = vmatprep.subr.bf16.mxu1 %v4690_v1 }
 0x53d   :  { %3233 = vmatpush1.bf16.msra.mxu1 %v4688_v2 }
 0x53e   :  { %3234 = vmatprep.subr.bf16.mxu1 %v4693_v3 }
 0x541   :  { %3235 = vmatpush1.bf16.msra.mxu1 %v4691_v4 }
 0x542   :  { %3236 = vmatprep.subr.bf16.mxu1 %v4696_v5 }
 0x545   :  { %3237 = vmatpush1.bf16.msra.mxu1 %v4694_v6 }
 0x546   :  { %3238 = vmatprep.subr.bf16.mxu1 %v4699_v7 }
 0x549   :  { %3239 = vmatpush1.bf16.msra.mxu1 %v4697_v8 }
 0x54a   :  { %3240 = vmatprep.subr.bf16.mxu1 %v4702_v13 }
 0x54d   :  { %3241 = vmatpush1.bf16.msra.mxu1 %v4700_v15 }
 0x54e   :  { %3242 = vmatprep.subr.bf16.mxu1 %v4705_v16 }
 0x551   :  { %3243 = vmatpush1.bf16.msra.mxu1 %v4703_v19 }
 0x552   :  { %3244 = vmatprep.subr.bf16.mxu1 %v4708_v23 }
 0x555   :  { %3245 = vmatpush1.bf16.msra.mxu1 %v4706_v24 }
 0x556   :  { %3246 = vmatprep.subr.bf16.mxu1 %v4711_v26 }
 0x559   :  { %3247 = vmatpush1.bf16.msra.mxu1 %v4709_v14 }
 0x55c   :  { %3249 = vmatmul.mubr.bf16.vlgmr.msra.gmra.mrb[12].mxu1 %v2777_v27 }
 0x62f   :  { %v3250_v36 = vpop.f32.mrb[12].mxu1 }
 0x630   :  { %v4110_v37 = vadd.f32 %v3250_v36, %v2848_v34  ;;  %v3252_v18 = vpop.f32.mrb[13].mxu1 }
 0x631   :  { %v4111_v10 = vadd.f32 %v3252_v18, %v2852_v35  ;;  %v3254_v38 = vpop.f32.mrb[14].mxu1 }
 0x632   :  { %v3257_v39 = vmax.f32 %v4110_v37, 0.0  ;;  %v3255_v40 = vpop.f32.mrb[15].mxu1 }
 0x633   :  { %v3258_v41 = vmax.f32 %v4111_v10, 0.0 }
 0x634   :  { %v3259_v42 = vpack.c.bf16 %v3257_v39, %v3257_v39 }
 0x635   :  { %v3260_v20 = vpack.c.bf16 %v3258_v41, %v3258_v41 }
 0x637   :  { %3428 = vmatprep.mubr.bf16.mxu0 %v3260_v20 }
 0x638   :  { %3429 = vmatmul.mubr.bf16.vlgmr.msra.gmra.mrb[20].mxu0 %v3259_v42 }
 0x639   :  { %4083 = vmatpush3.bf16.msra.mxu0 %v4728_v17  ;;  %4098 = vmatprep.mubr.msk.bf16.mxu0 %vm4741_vm0, %v4740_v0 }
 0x63a   :  { %4084 = vmatprep.subr.bf16.mxu0 %v4740_v0 }
 0x63d   :  { %4085 = vmatpush3.bf16.msra.mxu0 %v4729_v9 }
 0x63e   :  { %4086 = vmatprep.subr.bf16.mxu0 %v4740_v0 }
 0x641   :  { %4087 = vmatpush3.bf16.msra.mxu0 %v4730_v11 }
 0x642   :  { %4088 = vmatprep.subr.bf16.mxu0 %v4740_v0 }
 0x645   :  { %4089 = vmatpush3.bf16.msra.mxu0 %v4731_v43 }
 0x646   :  { %4090 = vmatprep.subr.bf16.mxu0 %v4740_v0 }
 0x649   :  { %4091 = vmatpush3.bf16.msra.mxu0 %v4732_v44 }
 0x64a   :  { %4092 = vmatprep.subr.bf16.mxu0 %v4740_v0 }
 0x64d   :  { %4093 = vmatpush3.bf16.msra.mxu0 %v4733_v45 }
 0x64e   :  { %4094 = vmatprep.subr.bf16.mxu0 %v4740_v0 }
 0x651   :  { %4095 = vmatpush3.bf16.msra.mxu0 %v4734_v46 }
 0x652   :  { %4096 = vmatprep.subr.bf16.mxu0 %v4740_v0  ;;  %v3973_v0 = vld [vmem:[%s6212_s17] ss:$0 sm:$0xff] }
 0x655   :  { %4097 = vmatpush3.bf16.msra.mxu0 %v4735_v47 }
 0x70b   :  { %v4035_v48 = vpop.f32.mrb[20].mxu0 }
 0x70c   :  { %v4036_v22 = vpop.f32.mrb[21].mxu0 }
 0x70d   :  { %v4037_v49 = vadd.f32 %v4036_v22, %v4035_v48  ;;  %v4038_v50 = vpop.f32.mrb[22].mxu0 }
 0x70e   :  { %v4039_v51 = vpop.f32.mrb[23].mxu0 }
 0x70f   :  { %v3431_v52 = vadd.f32 %v4037_v49, %v3956_v12 }
 0x711   :  { %v3436_v53 = vmax.f32 %v3431_v52, 0.0 }
 0x713   :  { %v3437_v54 = vpack.c.bf16 %v3436_v53, %v3436_v53 }
 0x715   :  { %4099 = vmatmul.mubr.bf16.vlgmr.msra.gmra.mrb[24].mxu0 %v3437_v54 }
 0x7e8   :  { %v3543_v55 = vpop.f32.mrb[24].mxu0 }
 0x7e9   :  { %v3544_v56 = vadd.f32 %v3973_v0, %v3543_v55  ;;  %v4100_v57 = vpop.f32.mrb[25].mxu0 }
 0x7ea   :  { %v3546_v58 = vpop.f32.mrb[26].mxu0 }
 0x7eb   :  { %v3982_v59 = vmul.f32 -1.442695, %v3544_v56  ;;  %v4101_v60 = vpop.f32.mrb[27].mxu0 }
 0x7ed   :  { %4736 = vpow2.f32 %v3982_v59 }
 0x7f7   :  { %v4737_v61 = vpop.eup %4736 }
 0x7f8   :  { %v3552_v62 = vadd.f32 1.0, %v4737_v61 }
 0x7fa   :  { %4738 = vrcp.f32 %v3552_v62 }
 0x804   :  { %v4739_v63 = vpop.eup %4738 }
 0x805   :  { %v3555_v1 = vmul.f32 4.0, %v4739_v63 }
 0x807   :  { %v3556_v2 = vadd.f32 1.0, %v3555_v1 }
 0x809   :  { %3557 = vst [vmem:[%s6213_s18] sm:$0x3] %v3556_v2 }

// kernel: avm_forward.2
= control target key start
LH: loop header
LB: loop body
LE: loop exit
PB: predicated region body
PF: predicated region fallthrough
CT: control target
= control target key end

     0   :  { %14 = vsyncpa [#allocation3], 0  ;;  %s12978_s0 = inlined_call_operand.vmem [shape: bf16[2,49,128], index: 0, kind: input, shape index: {}]   ;;  %s12979_s1 = inlined_call_operand.hbm [shape: bf16[128,128], index: 1, kind: input, shape index: {}]   ;;  %s12980_s2 = inlined_call_operand.hbm [shape: f32[1,128], index: 2, kind: input, shape index: {}]   ;;  %s12981_s3 = inlined_call_operand.hbm [shape: bf16[128,2304], index: 3, kind: input, shape index: {}]   ;;  %s12982_s4 = inlined_call_operand.hbm [shape: f32[1,256], index: 4, kind: input, shape index: {}]   ;;  %s12983_s5 = inlined_call_operand.hbm [shape: bf16[256,4608], index: 5, kind: input, shape index: {}]   ;;  %s12984_s6 = inlined_call_operand.hbm [shape: f32[1,512], index: 6, kind: input, shape index: {}]   ;;  %s12985_s7 = inlined_call_operand.hbm [shape: bf16[512,512], index: 7, kind: input, shape index: {}]   ;;  %s12986_s8 = inlined_call_operand.hbm [shape: f32[1,512], index: 8, kind: input, shape index: {}]   ;;  %s12987_s9 = inlined_call_operand.vmem [shape: bf16[2,1,512], index: 9, kind: output, shape index: {}]  }
   0x1   :  { %15 = vsyncpa [#allocation5], 0 }
   0x2   :  { %16 = vsyncpa [#allocation8], 0 }
   0x3   :  { %17 = vsyncpa [#allocation11], 0 }
   0x4   :  { %18 = vsyncpa [#allocation14], 0  ;;  %s11742_s30 = smov 0  }
   0x5 LB: > { %s11674_s10 = smov [#allocation4]   ;;  %s11748_s12 = sadd.s32 4294967295, %s11672_s30   ;;  %s11672_s30 = sphi %s11742_s30, %s24_s30  }
   0x6   : > { %s275_s11 = sshll.u32 %s11674_s10, 4  ;;  %p9059_p0 = scmp.ge.s32.totalorder %s11672_s30, 1  ;;  %s11753_s11 = int_to_ptr.vmem [resolvable:$true] %s275_s11 }
   0x7   : > { %p249_p1 = scmp.lt.s32.totalorder %s11672_s30, 3  ;;  %p12988_p2 = scmp.eq.s32.totalorder %s11748_s12, 0 }
   0x8   : > { %s11675_s14 = smov [#allocation7]   ;;  %s11676_s16 = smov [#allocation10]  }
   0x9   : > { %p11755_p3 = pnand %p9059_p0, %p249_p1  ;;  %s299_s15 = sshll.u32 %s11675_s14, 4  ;;  %s11761_s15 = int_to_ptr.vmem [resolvable:$true] %s299_s15 }
   0xa   : > { %s323_s17 = sshll.u32 %s11676_s16, 4  ;;  %s11677_s19 = smov [#allocation2]   ;;  %s11769_s17 = int_to_ptr.vmem [resolvable:$true] %s323_s17 }
   0xb   : > { %s12990_s13 = scalar_select %p11755_p3, 1, 0 }
   0xc   : > { %p10071_p4 = pneg %p11755_p3  ;;  %s261_s20 = sshll.u32 %s11677_s19, 4  ;;  %s11771_s20 = int_to_ptr.vmem [resolvable:$true] %s261_s20 }
   0xd   : > { %s11422_s23 = scalar_lea.hbm %s12980_s2, 16 }
   0xe   : > { %p11765_p5 = pnand %p12988_p2, %p10071_p4  ;;  %p11423_p6 = scmp.ne.s32.totalorder %s12980_s2, %s11422_s23 }
   0xf   : > { %p11429_p10 = scmp.lt.u32.totalorder %s11422_s23, %s12980_s2 }
  0x10   : > { %p11781_p7 = pneg %p11765_p5 }
  0x12   : > { %p11425_p8 = pnand %p11781_p7, %p11423_p6 }
  0x14   : > { %p11426_p9 = pneg %p11425_p8 }
  0x16   : > { %p11431_p11 = pnand %p11429_p10, %p11426_p9 }
  0x18   : > { %11434 = shalt.err (!%p11431_p11)
}
  0x19   : > { %s11435_s29 = scalar_lea.vmem %s11753_s11, 16  ;;  %s11442_s10 = scalar_lea.vmem %s11753_s11, 32 }
  0x1a   : > { %p11436_p12 = scmp.ne.s32.totalorder %s11753_s11, %s11435_s29  ;;  %p11443_p1 = scmp.lt.s32.totalorder %s11753_s11, %s11753_s11 }
  0x1b   : > { %p11444_p4 = scmp.lt.s32.totalorder %s11442_s10, %s11435_s29 }
  0x1c   : > { %p11438_p13 = pnand %p11436_p12, %p11781_p7 }
  0x1d   : > { %p11445_p6 = por %p11444_p4, %p11443_p1 }
  0x1e   : > { %p11439_p0 = pneg %p11438_p13 }
  0x20   : > { %p11446_p8 = pnand %p11445_p6, %p11439_p0 }
  0x22   : > { %11449 = shalt.err (!%p11446_p8)
}
  0x23   : > { %10077 = dma.hbm_to_vmem [thread:$0]  (!%p11765_p5), %s12980_s2, 16, %s11753_s11, [#allocation5]  }
  0x24   : > { %s11450_s22 = scalar_lea.hbm %s12982_s4, 32 }
  0x25   : > { %p11451_p9 = scmp.ne.s32.totalorder %s12982_s4, %s11450_s22  ;;  %p11457_p12 = scmp.lt.u32.totalorder %s11450_s22, %s12982_s4 }
  0x27   : > { %p11453_p10 = pnand %p11451_p9, %p11781_p7 }
  0x29   : > { %p11454_p11 = pneg %p11453_p10 }
  0x2b   : > { %p11459_p13 = pnand %p11457_p12, %p11454_p11 }
  0x2d   : > { %11462 = shalt.err (!%p11459_p13)
}
  0x2e   : > { %s11463_s11 = scalar_lea.vmem %s11761_s15, 32  ;;  %p11471_p6 = scmp.lt.s32.totalorder %s11761_s15, %s11761_s15 }
  0x2f   : > { %p11464_p0 = scmp.ne.s32.totalorder %s11761_s15, %s11463_s11  ;;  %p11472_p8 = scmp.lt.s32.totalorder %s11463_s11, %s11463_s11 }
  0x31   : > { %p11466_p1 = pnand %p11464_p0, %p11781_p7  ;;  %p11473_p9 = por %p11472_p8, %p11471_p6 }
  0x33   : > { %p11467_p4 = pneg %p11466_p1 }
  0x35   : > { %p11474_p10 = pnand %p11473_p9, %p11467_p4 }
  0x37   : > { %11477 = shalt.err (!%p11474_p10)
}
  0x38   : > { %10083 = dma.hbm_to_vmem [thread:$0]  (!%p11765_p5), %s12982_s4, 32, %s11761_s15, [#allocation8]  }
  0x39   : > { %s11478_s16 = scalar_lea.hbm %s12984_s6, 64 }
  0x3a   : > { %p11479_p11 = scmp.ne.s32.totalorder %s12984_s6, %s11478_s16  ;;  %p11485_p0 = scmp.lt.u32.totalorder %s11478_s16, %s12984_s6 }
  0x3c   : > { %p11481_p12 = pnand %p11479_p11, %p11781_p7 }
  0x3e   : > { %p11482_p13 = pneg %p11481_p12 }
  0x40   : > { %p11487_p1 = pnand %p11485_p0, %p11482_p13 }
  0x42   : > { %11490 = shalt.err (!%p11487_p1)
}
  0x43   : > { %s11491_s15 = scalar_lea.vmem %s11769_s17, 64  ;;  %p11499_p9 = scmp.lt.s32.totalorder %s11769_s17, %s11769_s17 }
  0x44   : > { %p11492_p4 = scmp.ne.s32.totalorder %s11769_s17, %s11491_s15  ;;  %p11500_p10 = scmp.lt.s32.totalorder %s11491_s15, %s11491_s15 }
  0x46   : > { %p11494_p6 = pnand %p11492_p4, %p11781_p7  ;;  %p11501_p11 = por %p11500_p10, %p11499_p9 }
  0x48   : > { %p11495_p8 = pneg %p11494_p6 }
  0x4a   : > { %p11502_p12 = pnand %p11501_p11, %p11495_p8 }
  0x4c   : > { %11505 = shalt.err (!%p11502_p12)
}
  0x4d   : > { %10089 = dma.hbm_to_vmem [thread:$0]  (!%p11765_p5), %s12984_s6, 64, %s11769_s17, [#allocation11]  }
  0x4e   : > { %s11506_s28 = scalar_lea.hbm %s12979_s1, 1024 }
  0x4f   : > { %p11507_p13 = scmp.ne.s32.totalorder %s12979_s1, %s11506_s28  ;;  %p11513_p4 = scmp.lt.u32.totalorder %s11506_s28, %s12979_s1 }
  0x51   : > { %p11509_p0 = pnand %p11507_p13, %p11781_p7 }
  0x53   : > { %p11510_p1 = pneg %p11509_p0 }
  0x55   : > { %p11515_p6 = pnand %p11513_p4, %p11510_p1 }
  0x57   : > { %11518 = shalt.err (!%p11515_p6)
}
  0x58   : > { %s11519_s17 = scalar_lea.vmem %s11771_s20, 1024  ;;  %p11527_p11 = scmp.lt.s32.totalorder %s11771_s20, %s11771_s20 }
  0x59   : > { %p11520_p8 = scmp.ne.s32.totalorder %s11771_s20, %s11519_s17  ;;  %p11528_p12 = scmp.lt.s32.totalorder %s11519_s17, %s11519_s17 }
  0x5b   : > { %p11522_p9 = pnand %p11520_p8, %p11781_p7  ;;  %p11529_p13 = por %p11528_p12, %p11527_p11 }
  0x5d   : > { %p11523_p10 = pneg %p11522_p9 }
  0x5f   : > { %p11530_p0 = pnand %p11529_p13, %p11523_p10 }
  0x61   : > { %11533 = shalt.err (!%p11530_p0)
}
  0x62   : > { %s11678_s19 = smov 64   ;;  %s11679_s21 = smov 4  }
  0x63   : > { %10074 = dma.hbm_to_vmem [thread:$0]  (!%p11765_p5), %s12979_s1, 1024, %s11771_s20, [#allocation3], %s11678_s19, %s11678_s19, %s11679_s21  }
  0x64   : > { %s11680_s15 = smov [#allocation6]   ;;  %s11534_s11 = scalar_lea.hbm %s12981_s3, 18432 }
  0x65   : > { %s285_s24 = sshll.u32 %s11680_s15, 4  ;;  %p11535_p1 = scmp.ne.s32.totalorder %s12981_s3, %s11534_s11  ;;  %s286_s24 = int_to_ptr.vmem [resolvable:$true] %s285_s24 }
  0x66   : > { %p11541_p8 = scmp.lt.u32.totalorder %s11534_s11, %s12981_s3 }
  0x67   : > { %p11537_p4 = pnand %p11535_p1, %p11781_p7 }
  0x69   : > { %p11538_p6 = pneg %p11537_p4 }
  0x6b   : > { %p11543_p9 = pnand %p11541_p8, %p11538_p6 }
  0x6d   : > { %11546 = shalt.err (!%p11543_p9)
}
  0x6e   : > { %s11547_s20 = scalar_lea.vmem %s286_s24, 18432  ;;  %p11555_p13 = scmp.lt.s32.totalorder %s286_s24, %s286_s24 }
  0x6f   : > { %p11548_p10 = scmp.ne.s32.totalorder %s286_s24, %s11547_s20  ;;  %p11556_p0 = scmp.lt.s32.totalorder %s11547_s20, %s11547_s20 }
  0x71   : > { %p11550_p11 = pnand %p11548_p10, %p11781_p7  ;;  %p11557_p2 = por %p11556_p0, %p11555_p13 }
  0x73   : > { %p11551_p12 = pneg %p11550_p11 }
  0x75   : > { %p11558_p3 = pnand %p11557_p2, %p11551_p12 }
  0x77   : > { %11561 = shalt.err (!%p11558_p3)
}
  0x78   : > { %s11681_s16 = smov 1152   ;;  %s11682_s17 = smov 72  }
  0x79   : > { %10080 = dma.hbm_to_vmem [thread:$0]  (!%p11765_p5), %s12981_s3, 18432, %s286_s24, [#allocation5], %s11681_s16, %s11681_s16, %s11682_s17  }
  0x7a   : > { %s11683_s22 = smov [#allocation9]   ;;  %s11562_s27 = scalar_lea.hbm %s12983_s5, 73728 }
  0x7b   : > { %s309_s23 = sshll.u32 %s11683_s22, 4  ;;  %p11563_p2 = scmp.ne.s32.totalorder %s12983_s5, %s11562_s27  ;;  %s310_s23 = int_to_ptr.vmem [resolvable:$true] %s309_s23 }
  0x7c   : > { %p11569_p4 = scmp.lt.u32.totalorder %s11562_s27, %s12983_s5 }
  0x7d   : > { %p11565_p3 = pnand %p11563_p2, %p11781_p7 }
  0x7f   : > { %p11566_p1 = pneg %p11565_p3 }
  0x81   : > { %p11571_p6 = pnand %p11569_p4, %p11566_p1 }
  0x83   : > { %11574 = shalt.err (!%p11571_p6)
}
  0x84   : > { %s11575_s24 = scalar_lea.vmem %s310_s23, 73728  ;;  %p11583_p11 = scmp.lt.s32.totalorder %s310_s23, %s310_s23 }
  0x85   : > { %p11576_p8 = scmp.ne.s32.totalorder %s310_s23, %s11575_s24  ;;  %p11584_p12 = scmp.lt.s32.totalorder %s11575_s24, %s11575_s24 }
  0x87   : > { %p11578_p9 = pnand %p11576_p8, %p11781_p7  ;;  %p11585_p13 = por %p11584_p12, %p11583_p11 }
  0x89   : > { %p11579_p10 = pneg %p11578_p9 }
  0x8b   : > { %p11586_p0 = pnand %p11585_p13, %p11579_p10 }
  0x8d   : > { %11589 = shalt.err (!%p11586_p0)
}
  0x8e   : > { %s11684_s14 = smov 2304   ;;  %s11685_s20 = smov 144  }
  0x8f   : > { %10086 = dma.hbm_to_vmem [thread:$0]  (!%p11765_p5), %s12983_s5, 73728, %s310_s23, [#allocation8], %s11684_s14, %s11684_s14, %s11685_s20  }
  0x90   : > { %s11686_s19 = smov [#allocation12]   ;;  %s11590_s25 = scalar_lea.hbm %s12985_s7, 16384 }
  0x91   : > { %s333_s21 = sshll.u32 %s11686_s19, 4  ;;  %p11591_p2 = scmp.ne.s32.totalorder %s12985_s7, %s11590_s25  ;;  %s334_s21 = int_to_ptr.vmem [resolvable:$true] %s333_s21 }
  0x92   : > { %p11597_p4 = scmp.lt.u32.totalorder %s11590_s25, %s12985_s7 }
  0x93   : > { %p11593_p3 = pnand %p11591_p2, %p11781_p7 }
  0x95   : > { %p11594_p1 = pneg %p11593_p3 }
  0x97   : > { %p11599_p6 = pnand %p11597_p4, %p11594_p1 }
  0x99   : > { %11602 = shalt.err (!%p11599_p6)
}
  0x9a   : > { %s11603_s23 = scalar_lea.vmem %s334_s21, 16384  ;;  %p11611_p11 = scmp.lt.s32.totalorder %s334_s21, %s334_s21 }
  0x9b   : > { %p11604_p8 = scmp.ne.s32.totalorder %s334_s21, %s11603_s23  ;;  %p11612_p12 = scmp.lt.s32.totalorder %s11603_s23, %s11603_s23 }
  0x9d   : > { %p11606_p9 = pnand %p11604_p8, %p11781_p7  ;;  %p11613_p13 = por %p11612_p12, %p11611_p11 }
  0x9f   : > { %p11607_p10 = pneg %p11606_p9 }
  0xa1   : > { %p11614_p0 = pnand %p11613_p13, %p11607_p10 }
  0xa3   : > { %11617 = shalt.err (!%p11614_p0)
}
  0xa4   : > { %s11687_s10 = smov 256   ;;  %s11688_s24 = smov 16  }
  0xa5   : > { %10092 = dma.hbm_to_vmem [thread:$0]  (!%p11765_p5), %s12985_s7, 16384, %s334_s21, [#allocation11], %s11687_s10, %s11687_s10, %s11688_s24  }
  0xa6   : > { %s11689_s16 = smov [#allocation13]   ;;  %s11618_s15 = scalar_lea.hbm %s12986_s8, 64 }
  0xa7   : > { %s347_s17 = sshll.u32 %s11689_s16, 4  ;;  %p11619_p2 = scmp.ne.s32.totalorder %s12986_s8, %s11618_s15  ;;  %s348_s17 = int_to_ptr.vmem [resolvable:$true] %s347_s17 }
  0xa8   : > { %p11625_p4 = scmp.lt.u32.totalorder %s11618_s15, %s12986_s8 }
  0xa9   : > { %p11621_p3 = pnand %p11619_p2, %p11781_p7 }
  0xab   : > { %p11622_p1 = pneg %p11621_p3 }
  0xad   : > { %p11627_p6 = pnand %p11625_p4, %p11622_p1 }
  0xaf   : > { %11630 = shalt.err (!%p11627_p6)
}
  0xb0   : > { %s11631_s21 = scalar_lea.vmem %s348_s17, 64  ;;  %p11639_p11 = scmp.lt.s32.totalorder %s348_s17, %s348_s17 }
  0xb1   : > { %p11632_p8 = scmp.ne.s32.totalorder %s348_s17, %s11631_s21  ;;  %p11640_p12 = scmp.lt.s32.totalorder %s11631_s21, %s11631_s21 }
  0xb3   : > { %p11634_p9 = pnand %p11632_p8, %p11781_p7  ;;  %p11641_p13 = por %p11640_p12, %p11639_p11 }
  0xb5   : > { %p11635_p10 = pneg %p11634_p9 }
  0xb7   : > { %p11642_p0 = pnand %p11641_p13, %p11635_p10 }
  0xb9   : > { %11645 = shalt.err (!%p11642_p0)
}
  0xba   : > { %10095 = dma.hbm_to_vmem [thread:$0]  (!%p11765_p5), %s12986_s8, 64, %s348_s17, [#allocation14]  }
  0xbb   : > { %p12993_p2 = scmp.ne.s32.totalorder %s12990_s13, 0 }
  0xbc   : > { %p12994_p3 = scmp.eq.s32.totalorder (!%p12993_p2), %s11748_s12, 0 }
  0xbd   : > { %368 = sbr.rel (%p12993_p2) target bundleno = 1972 (0x7b4), region = 56 }
  0xc4   : > { %11651 = dma.done.wait (%p12994_p3), [#allocation3], 1024   ;;  %p12995_p7 = pmov %p12994_p3 }
  0xc5   : > { %p12996_p1 = pmov %p12994_p3 }
  0xc6   : > { %11653 = vsyncadd (%p12995_p7), [#allocation3], 4294966272 }
  0xc7   : > { %11655 = dma.done.wait (%p12996_p1), [#allocation5], 18448   ;;  %p12997_p4 = pmov %p12996_p1 }
  0xc8   : > { %p12998_p6 = pmov %p12996_p1 }
  0xc9   : > { %11657 = vsyncadd (%p12997_p4), [#allocation5], 4294948848 }
  0xca   : > { %11659 = dma.done.wait (%p12998_p6), [#allocation8], 73760   ;;  %p12999_p5 = pmov %p12996_p1 }
  0xcb   : > { %p13000_p8 = pmov %p12996_p1 }
  0xcc   : > { %11661 = vsyncadd (%p12999_p5), [#allocation8], 4294893536 }
  0xcd   : > { %11663 = dma.done.wait (%p13000_p8), [#allocation11], 16448   ;;  %p13001_p9 = pmov %p12996_p1 }
  0xce   : > { %p13002_p10 = pmov %p12996_p1 }
  0xcf   : > { %11665 = vsyncadd (%p13001_p9), [#allocation11], 4294950848 }
  0xd0   : > { %11667 = dma.done.wait (%p13002_p10), [#allocation14], 64   ;;  %p13003_p11 = pmov %p12996_p1 }
  0xd1   : > { %p431_p12 = scmp.lt.s32.totalorder %s11748_s12, 1  ;;  %v10138_v0 = vld [vmem:[#allocation2] sm:$0xff]   ;;  %v10139_v1 = vld [vmem:[#allocation2 + $0x8] sm:$0xff]   ;;  %v10140_v2 = vld [vmem:[#allocation2 + $0x10] sm:$0xff]   ;;  %v11690_v46 = vmov 0   ;;  %vm629_vm0 = vcmask 1046528  }
  0xd2   : > { %11669 = vsyncadd (%p13003_p11), [#allocation14], 4294967232  ;;  %10002 = vmatprep.subr.bf16.mxu0 %v10138_v0  ;;  %v10141_v3 = vld [vmem:[#allocation2 + $0x18] sm:$0xff]   ;;  %v10142_v5 = vld [vmem:[#allocation2 + $0x20] sm:$0xff]   ;;  %1759 = vmatprep.mubr.bf16.mxu1 %v11690_v46  ;;  %vm647_vm1 = vcmask 1045504   ;;  %vm685_vm2 = vcmask 1040384  }
  0xd3   : > { %s13017_s12 = smov (!%p431_p12, %s11748_s12), 1  ;;  %10003 = vmatpush3.bf16.msra.mxu0 %v10138_v0  ;;  %v10143_v6 = vld [vmem:[#allocation2 + $0x28] sm:$0xff]   ;;  %v10144_v7 = vld [vmem:[#allocation2 + $0x30] sm:$0xff]   ;;  %v10145_v8 = vld [vmem:[#allocation2 + $0x38] sm:$0xff]   ;;  %vm693_vm3 = vcmask 1041408   ;;  %vm765_vm6 = vcmask 1042432  }
  0xd4   : > { %s10038_s13 = smul.u32 28, %s13017_s12  ;;  %10004 = vmatprep.subr.bf16.mxu0 %v10139_v1  ;;  %v10150_v12 = vld [vmem:[#allocation6 + $0x4] ss:$72 sps:$4 sm:$0xff]   ;;  %v10152_v14 = vld [vmem:[#allocation6] ss:$72 sps:$4 sm:$0xff]   ;;  %vm839_vm7 = vcmask 1043456  }
  0xd5   : > { %v10155_v13 = vld [vmem:[#allocation6 + $0xc] ss:$72 sps:$4 sm:$0xff]   ;;  %v10153_v15 = vld [vmem:[#allocation6 + $0x8] ss:$72 sps:$4 sm:$0xff]   ;;  %1727 = vmatprep.subr.bf16.mxu1 %v10150_v12  ;;  %v10161_v17 = vld [vmem:[#allocation6 + $0x9c] ss:$72 sps:$4 sm:$0xff]  }
  0xd6   : > { %s435_s10 = scalar_lea.vmem %s12978_s0, %s10038_s13  ;;  %1728 = vmatpush1.bf16.msra.mxu1 %v10152_v14  ;;  %v10156_v16 = vld [vmem:[#allocation6 + $0x94] ss:$72 sps:$4 sm:$0xff]   ;;  %v10158_v18 = vld [vmem:[#allocation6 + $0x90] ss:$72 sps:$4 sm:$0xff]   ;;  %v10162_v20 = vld [vmem:[#allocation6 + $0x124] ss:$72 sps:$4 sm:$0xff]  }
  0xd7   : > { %10005 = vmatpush3.bf16.msra.mxu0 %v10139_v1  ;;  %v10146_v4 = vld [vmem:[%s435_s10] sm:$0xff]   ;;  %v10147_v9 = vld [vmem:[%s435_s10 + $0x8] sm:$0xff]   ;;  %v10148_v10 = vld [vmem:[%s435_s10 + $0x10] sm:$0xff]   ;;  %1729 = vmatprep.subr.bf16.mxu1 %v10156_v16  ;;  %vm762_vm4 = vsmask.f32 256  ;;  %vm859_vm14 = vcmask 1044480  }
  0xd8   : > { %10006 = vmatprep.subr.bf16.mxu0 %v10140_v2  ;;  %10018 = vmatprep.mubr.bf16.mxu0 %v10146_v4  ;;  %v10149_v11 = vld [vmem:[%s435_s10 + $0x18] ss:$0 sps:$4 sm:$0x11]   ;;  %v10159_v19 = vld [vmem:[#allocation6 + $0x98] ss:$72 sps:$4 sm:$0xff]   ;;  %vm12008_vm5 = vmand %vm685_vm2, %vm762_vm4  ;;  %vm3062_vm15 = vcmask 1047552  }
  0xd9   : > { %v10167_v21 = vld [vmem:[#allocation6 + $0x12c] ss:$72 sps:$4 sm:$0xff]   ;;  %v10164_v22 = vld [vmem:[#allocation6 + $0x120] ss:$72 sps:$4 sm:$0xff]   ;;  %v10173_v25 = vld [vmem:[#allocation6 + $0x1bc] ss:$72 sps:$4 sm:$0xff]  }
  0xda   : > { %1730 = vmatpush1.bf16.msra.mxu1 %v10158_v18  ;;  %v10165_v23 = vld [vmem:[#allocation6 + $0x128] ss:$72 sps:$4 sm:$0xff]   ;;  %v10168_v24 = vld [vmem:[#allocation6 + $0x1b4] ss:$72 sps:$4 sm:$0xff]   ;;  %v10171_v27 = vld [vmem:[#allocation6 + $0x1b8] ss:$72 sps:$4 sm:$0xff]  }
  0xdb   : > { %10007 = vmatpush3.bf16.msra.mxu0 %v10140_v2  ;;  %1731 = vmatprep.subr.bf16.mxu1 %v10162_v20  ;;  %v10170_v26 = vld [vmem:[#allocation6 + $0x1b0] ss:$72 sps:$4 sm:$0xff]   ;;  %v10174_v28 = vld [vmem:[#allocation6 + $0x244] ss:$72 sps:$4 sm:$0xff]   ;;  %v10176_v30 = vld [vmem:[#allocation6 + $0x240] ss:$72 sps:$4 sm:$0xff]  }
  0xdc   : > { %10008 = vmatprep.subr.bf16.mxu0 %v10141_v3  ;;  %v10179_v29 = vld [vmem:[#allocation6 + $0x24c] ss:$72 sps:$4 sm:$0xff]   ;;  %v10177_v31 = vld [vmem:[#allocation6 + $0x248] ss:$72 sps:$4 sm:$0xff]   ;;  %v10185_v33 = vld [vmem:[#allocation6 + $0x2dc] ss:$72 sps:$4 sm:$0xff]  }
  0xdd   : > { %v10180_v32 = vld [vmem:[#allocation6 + $0x2d4] ss:$72 sps:$4 sm:$0xff]   ;;  %v10182_v34 = vld [vmem:[#allocation6 + $0x2d0] ss:$72 sps:$4 sm:$0xff]   ;;  %v10186_v36 = vld [vmem:[#allocation6 + $0x364] ss:$72 sps:$4 sm:$0xff]  }
  0xde   : > { %1732 = vmatpush1.bf16.msra.mxu1 %v10164_v22  ;;  %v10183_v35 = vld [vmem:[#allocation6 + $0x2d8] ss:$72 sps:$4 sm:$0xff]   ;;  %v10191_v37 = vld [vmem:[#allocation6 + $0x36c] ss:$72 sps:$4 sm:$0xff]   ;;  %v10189_v39 = vld [vmem:[#allocation6 + $0x368] ss:$72 sps:$4 sm:$0xff]  }
  0xdf   : > { %10009 = vmatpush3.bf16.msra.mxu0 %v10141_v3  ;;  %1733 = vmatprep.subr.bf16.mxu1 %v10168_v24  ;;  %v10188_v38 = vld [vmem:[#allocation6 + $0x360] ss:$72 sps:$4 sm:$0xff]   ;;  %v10192_v40 = vld [vmem:[#allocation6 + $0x3f4] ss:$72 sps:$4 sm:$0xff]   ;;  %v10194_v42 = vld [vmem:[#allocation6 + $0x3f0] ss:$72 sps:$4 sm:$0xff]  }
  0xe0   : > { %10010 = vmatprep.subr.bf16.mxu0 %v10142_v5  ;;  %v10197_v41 = vld [vmem:[#allocation6 + $0x3fc] ss:$72 sps:$4 sm:$0xff]   ;;  %v10195_v43 = vld [vmem:[#allocation6 + $0x3f8] ss:$72 sps:$4 sm:$0xff]   ;;  %vm840_vm8 = vsmask.f32 3328 }
  0xe1   : > { %v10200_v44 = vld [vmem:[#allocation6 + $0x14] ss:$72 sps:$4 sm:$0xff]   ;;  %vm12027_vm9 = vmand %vm839_vm7, %vm840_vm8  ;;  %vm848_vm10 = vsmask.f32 2304  ;;  %vm856_vm11 = vsmask.f32 1280 }
  0xe2   : > { %1734 = vmatpush1.bf16.msra.mxu1 %v10170_v26  ;;  %v10203_v45 = vld [vmem:[#allocation6 + $0x1c] ss:$72 sps:$4 sm:$0xff]   ;;  %vm12046_vm12 = vmand %vm765_vm6, %vm848_vm10  ;;  %vm3063_vm4 = vsmask.f32 7424  ;;  %s9079_s24 = sshll.u32 %s13017_s12, 2 }
  0xe3   : > { %10011 = vmatpush3.bf16.msra.mxu0 %v10142_v5  ;;  %1735 = vmatprep.subr.bf16.mxu1 %v10174_v28  ;;  %v9080_v47 = vld [vmem:[#allocation4] ss:$0 sm:$0xff]  ;;  %vm12052_vm13 = vmand %vm693_vm3, %vm856_vm11  ;;  %s439_s16 = scalar_lea.vmem %s12987_s9, %s9079_s24 }
  0xe4   : > { %10012 = vmatprep.subr.bf16.mxu0 %v10143_v6 }
  0xe6   : > { %1736 = vmatpush1.bf16.msra.mxu1 %v10176_v30 }
  0xe7   : > { %10013 = vmatpush3.bf16.msra.mxu0 %v10143_v6  ;;  %1737 = vmatprep.subr.bf16.mxu1 %v10180_v32 }
  0xe8   : > { %10014 = vmatprep.subr.bf16.mxu0 %v10144_v7 }
  0xea   : > { %1738 = vmatpush1.bf16.msra.mxu1 %v10182_v34 }
  0xeb   : > { %10015 = vmatpush3.bf16.msra.mxu0 %v10144_v7  ;;  %1739 = vmatprep.subr.bf16.mxu1 %v10186_v36 }
  0xec   : > { %10016 = vmatprep.subr.bf16.mxu0 %v10145_v8 }
  0xee   : > { %1740 = vmatpush1.bf16.msra.mxu1 %v10188_v38 }
  0xef   : > { %10017 = vmatpush3.bf16.msra.mxu0 %v10145_v8  ;;  %1741 = vmatprep.subr.bf16.mxu1 %v10192_v40 }
  0xf0   : > { %1794 = vmatprep.subr.bf16.mxu0 %v10155_v13 }
  0xf2   : > { %10019 = vmatmul.mubr.bf16.vlgmr.msra.gmra.mrb[0].mxu0 %v10147_v9  ;;  %1742 = vmatpush1.bf16.msra.mxu1 %v10194_v42 }
  0xf3   : > { %10022 = vmatprep.mubr.bf16.mxu0 %v10148_v10  ;;  %1795 = vmatpush1.bf16.msra.mxu0 %v10153_v15 }
  0xf4   : > { %1796 = vmatprep.subr.bf16.mxu0 %v10161_v17  ;;  %1861 = vmatprep.subr.bf16.mxu1 %v10200_v44 }
  0xf7   : > { %1797 = vmatpush1.bf16.msra.mxu0 %v10159_v19 }
  0xf8   : > { %1798 = vmatprep.subr.bf16.mxu0 %v10167_v21 }
  0xfa   : > { %10023 = vmatmul.mubr.bf16.gmra.mrb[4].mxu0 %v10149_v11 }
  0xfb   : > { %1799 = vmatpush1.bf16.msra.mxu0 %v10165_v23  ;;  %1826 = vmatprep.mubr.bf16.mxu0 %v11690_v46 }
  0xfc   : > { %1800 = vmatprep.subr.bf16.mxu0 %v10173_v25 }
  0xff   : > { %1801 = vmatpush1.bf16.msra.mxu0 %v10171_v27 }
 0x100   : > { %1802 = vmatprep.subr.bf16.mxu0 %v10179_v29 }
 0x103   : > { %1803 = vmatpush1.bf16.msra.mxu0 %v10177_v31 }
 0x104   : > { %1804 = vmatprep.subr.bf16.mxu0 %v10185_v33 }
 0x107   : > { %1805 = vmatpush1.bf16.msra.mxu0 %v10183_v35 }
 0x108   : > { %1806 = vmatprep.subr.bf16.mxu0 %v10191_v37 }
 0x10b   : > { %1807 = vmatpush1.bf16.msra.mxu0 %v10189_v39 }
 0x10c   : > { %1808 = vmatprep.subr.bf16.mxu0 %v10197_v41 }
 0x10f   : > { %1809 = vmatpush1.bf16.msra.mxu0 %v10195_v43 }
 0x110   : > { %1928 = vmatprep.subr.bf16.mxu0 %v10203_v45 }
 0x1c5   : > { %v10020_v48 = vpop.f32.mrb[0].mxu0 }
 0x1c6   : > { %v584_v49 = vadd.f32 %v10020_v48, %v9080_v47  ;;  %v575_v50 = vpop.f32.mrb[1].mxu0 }
 0x1c7   : > { %v576_v51 = vadd.f32 %v9080_v47, %v575_v50  ;;  %v10021_v52 = vpop.f32.mrb[2].mxu0 }
 0x1c8   : > { %v607_v53 = vmax.f32 %v584_v49, 0.0  ;;  %v587_v54 = vadd.f32 %v10021_v52, %v9080_v47  ;;  %v578_v55 = vpop.f32.mrb[3].mxu0 }
 0x1c9   : > { %v605_v56 = vmax.f32 %v576_v51, 0.0  ;;  %v579_v57 = vadd.f32 %v9080_v47, %v578_v55 }
 0x1ca   : > { %v630_v58 = vrot.slane %v607_v53, 1  ;;  %v11976_v59 = vmax.f32 %v587_v54, 0.0  ;;  %v636_v63 = vrot.slane %v607_v53, 2 }
 0x1cb   : > { %v613_v60 = vrot.slane %v605_v56, 1  ;;  %v606_v61 = vmax.f32 %v579_v57, 0.0  ;;  %v616_v3 = vrot.slane %v605_v56, 2 }
 0x1cc   : > { %v635_v62 = vmax.f32 %v607_v53, %v630_v58  ;;  %v641_v0 = vrot.slane %v11976_v59, 1  ;;  %v648_v1 = vrot.slane %v11976_v59, 2 }
 0x1cd   : > { %v615_v2 = vmax.f32 %v605_v56, %v613_v60  ;;  %v620_v4 = vrot.slane %v606_v61, 1  ;;  %v10024_v5 = vpop.f32.mrb[4].mxu0  ;;  %v624_v14 = vrot.slane %v606_v61, 2 }
 0x1ce   : > { %v11980_v6 = vmax.f32 %v635_v62, %v636_v63  ;;  %v642_v7 = vsel %vm629_vm0, %v630_v58, %v641_v0  ;;  %v646_v8 = vmax.f32 %v11976_v59, %v641_v0  ;;  %v649_v9 = vsel %vm647_vm1, %v636_v63, %v648_v1  ;;  %v591_v10 = vpop.f32.mrb[5].mxu0 }
 0x1cf   : > { %v645_v11 = vmax.f32 %v607_v53, %v642_v7  ;;  %v622_v12 = vmax.f32 %v605_v56, %v620_v4  ;;  %v623_v13 = vmax.f32 %v606_v61, %v620_v4  ;;  %v10025_v15 = vpop.f32.mrb[6].mxu0  ;;  %v618_v17 = vmax.f32 %v615_v2, %v616_v3 }
 0x1d0   : > { %v695_v16 = vrot.slane %v11980_v6, 6  ;;  %v11986_v18 = vmax.f32 %v646_v8, %v648_v1  ;;  %v631_v19 = vsel %vm629_vm0, %v620_v4, %v630_v58  ;;  %v594_v20 = vpop.f32.mrb[7].mxu0  ;;  %v600_v27 = vadd.f32 %v10024_v5, %v9080_v47 }
 0x1d1   : > { %v11989_v21 = vmax.f32 %v645_v11, %v649_v9  ;;  %v626_v22 = vmax.f32 %v622_v12, %v624_v14  ;;  %v627_v23 = vmax.f32 %v623_v13, %v624_v14  ;;  %v634_v24 = vmax.f32 %v606_v61, %v631_v19 }
 0x1d2   : > { %v709_v25 = vrot.slane %v11986_v18, 6  ;;  %v716_v26 = vrot.slane %v11986_v18, 7  ;;  %v592_v28 = vadd.f32 %v9080_v47, %v591_v10  ;;  %v700_v33 = vrot.slane %v11980_v6, 7 }
 0x1d3   : > { %v638_v29 = vmax.f32 %v634_v24, %v636_v63  ;;  %v686_v30 = vrot.slane %v626_v22, 7  ;;  %v687_v31 = vrot.slane %v627_v23, 7  ;;  %v708_v32 = vrot.slane %v11989_v21, 6 }
 0x1d4   : > { %v715_v34 = vrot.slane %v11989_v21, 7  ;;  %v609_v35 = vmax.f32 %v592_v28, 0.0  ;;  %v595_v36 = vadd.f32 %v9080_v47, %v594_v20  ;;  %v611_v44 = vmax.f32 %v600_v27, 0.0 }
 0x1d5   : > { %v688_v37 = vsel %vm685_vm2, %v686_v30, %v687_v31  ;;  %v694_v38 = vrot.slane %v638_v29, 6  ;;  %v699_v39 = vrot.slane %v638_v29, 7  ;;  %v710_v40 = vsel %vm693_vm3, %v708_v32, %v709_v25 }
 0x1d6   : > { %v690_v41 = vmax.f32 %v618_v17, %v688_v37  ;;  %v717_v42 = vsel %vm685_vm2, %v715_v34, %v716_v26  ;;  %v720_v43 = vmax.f32 %v638_v29, %v715_v34  ;;  %v655_v50 = vrot.slane %v609_v35, 1 }
 0x1d7   : > { %v696_v45 = vsel %vm693_vm3, %v694_v38, %v695_v16  ;;  %v701_v48 = vsel %vm685_vm2, %v699_v39, %v700_v33  ;;  %v704_v49 = vmax.f32 %v626_v22, %v699_v39  ;;  %v661_v47 = vrot.slane %v609_v35, 2 }
 0x1d8   : > { %v698_v51 = vmax.f32 %v690_v41, %v696_v45  ;;  %v705_v52 = vmax.f32 %v627_v23, %v701_v48  ;;  %v721_v53 = vmax.f32 %v11980_v6, %v717_v42  ;;  %v656_v55 = vsel %vm629_vm0, %v641_v0, %v655_v50  ;;  %v10239_v48 = vld [vmem:[#allocation6 + $0x37c] ss:$72 sps:$4 sm:$0xff]  }
 0x1d9   : > { %v713_v54 = vmax.f32 %v704_v49, %v708_v32  ;;  %v660_v56 = vmax.f32 %v609_v35, %v655_v50  ;;  %v610_v57 = vmax.f32 %v595_v36, 0.0  ;;  %v659_v61 = vmax.f32 %v11976_v59, %v656_v55  ;;  %v10201_v55 = vld [vmem:[#allocation6 + $0x18] ss:$72 sps:$4 sm:$0xff]  }
 0x1da   : > { %v714_v58 = vmax.f32 %v705_v52, %v710_v40  ;;  %v752_v60 = vpack.c.bf16 %v698_v51, %v698_v51  ;;  %v662_v62 = vsel %vm647_vm1, %v648_v1, %v661_v47  ;;  %v679_v63 = vrot.slane %v611_v44, 2 }
 0x1db   : > { %v666_v2 = vmax.f32 %v660_v56, %v661_v47  ;;  %v668_v3 = vrot.slane %v610_v57, 1  ;;  %v672_v4 = vrot.slane %v610_v57, 2  ;;  %v665_v8 = vmax.f32 %v659_v61, %v662_v62 }
 0x1dc   : > { %v754_v5 = vshrl.u32 %v752_v60, 16  ;;  %v769_v7 = vpack.c.bf16 %v714_v58, %v713_v54  ;;  %v757_v6 = vshll.u32 %v752_v60, 16  ;;  %v10198_v54 = vld [vmem:[#allocation6 + $0x10] ss:$72 sps:$4 sm:$0xff]   ;;  %v10206_v58 = vld [vmem:[#allocation6 + $0xa4] ss:$72 sps:$4 sm:$0xff]  }
 0x1dd   : > { %v725_v9 = vrot.slane %v666_v2, 6  ;;  %v669_v0 = vsel %vm629_vm0, %v655_v50, %v668_v3  ;;  %v673_v10 = vsel %vm647_vm1, %v661_v47, %v672_v4  ;;  %v724_v12 = vrot.slane %v665_v8, 6  ;;  %v10209_v60 = vld [vmem:[#allocation6 + $0xac] ss:$72 sps:$4 sm:$0xff]  }
 0x1de   : > { %v756_v11 = vrot.slane %v754_v5, 7  ;;  %v732_v13 = vrot.slane %v666_v2, 7  ;;  %v671_v59 = vmax.f32 %v609_v35, %v669_v0  ;;  %v677_v14 = vmax.f32 %v610_v57, %v668_v3 }
 0x1df   : > { %v680_v15 = vsel %vm647_vm1, %v672_v4, %v679_v63  ;;  %v731_v16 = vrot.slane %v665_v8, 7  ;;  %v771_v19 = vrot.slane %v769_v7, 3  ;;  %v726_v20 = vsel %vm693_vm3, %v724_v12, %v725_v9  ;;  %v10204_v7 = vld [vmem:[#allocation6 + $0xa0] ss:$72 sps:$4 sm:$0xff]  }
 0x1e0   : > { %v759_v17 = vor.u32 %v757_v6, %v756_v11  ;;  %v729_v22 = vmax.f32 %v720_v43, %v724_v12  ;;  %v730_v23 = vmax.f32 %v721_v53, %v726_v20  ;;  %v675_v24 = vmax.f32 %v671_v59, %v673_v10  ;;  %v10212_v10 = vld [vmem:[#allocation6 + $0x134] ss:$72 sps:$4 sm:$0xff]   ;;  %v10210_v20 = vld [vmem:[#allocation6 + $0x130] ss:$72 sps:$4 sm:$0xff]  }
 0x1e1   : > { %v682_v25 = vmax.f32 %v677_v14, %v680_v15  ;;  %v733_v27 = vsel %vm685_vm2, %v731_v16, %v732_v13  ;;  %v736_v28 = vmax.f32 %v11989_v21, %v731_v16  ;;  %v773_v33 = vsel %vm12008_vm5, 0, %v771_v19  ;;  %v10215_v59 = vld [vmem:[#allocation6 + $0x13c] ss:$72 sps:$4 sm:$0xff]  }
 0x1e2   : > { %v764_v26 = vsel %vm12008_vm5, 0, %v759_v17  ;;  %v776_v29 = vpack.c.bf16 %v730_v23, %v729_v22  ;;  %v737_v30 = vmax.f32 %v11986_v18, %v733_v27  ;;  %v739_v31 = vrot.slane %v675_v24, 6  ;;  %v10213_v22 = vld [vmem:[#allocation6 + $0x138] ss:$72 sps:$4 sm:$0xff]   ;;  %v10281_v14 = vld [vmem:[#allocation6 + $0x2fc] ss:$72 sps:$4 sm:$0xff]  }
 0x1e3   : > { %v743_v32 = vrot.slane %v675_v24, 7  ;;  %v748_v34 = vrot.slane %v682_v25, 6  ;;  %v768_v35 = vsel %vm765_vm6, %v764_v26, 0  ;;  %v12023_v43 = vsel %vm765_vm6, %v773_v33, 0  ;;  %v10218_v25 = vld [vmem:[#allocation6 + $0x1c4] ss:$72 sps:$4 sm:$0xff]  }
 0x1e4   : > { %v778_v36 = vshrl.u32 %v776_v29, 16  ;;  %v781_v37 = vshll.u32 %v776_v29, 16  ;;  %v741_v38 = vmax.f32 %v736_v28, %v739_v31  ;;  %v742_v39 = vmax.f32 %v737_v30, %v739_v31  ;;  %v10221_v26 = vld [vmem:[#allocation6 + $0x1cc] ss:$72 sps:$4 sm:$0xff]   ;;  %v10216_v33 = vld [vmem:[#allocation6 + $0x1c0] ss:$72 sps:$4 sm:$0xff]  }
 0x1e5   : > { %v745_v40 = vmax.f32 %v665_v8, %v743_v32  ;;  %v746_v41 = vmax.f32 %v666_v2, %v743_v32  ;;  %v809_v42 = vshrl.u32 %v768_v35, 16  ;;  %v812_v21 = vshll.u32 %v768_v35, 16  ;;  %v10207_v8 = vld [vmem:[#allocation6 + $0xa8] ss:$72 sps:$4 sm:$0xff]  }
 0x1e6   : > { %v780_v18 = vrot.slane %v778_v36, 2  ;;  %v783_v44 = vrot.slane %v781_v37, 3  ;;  %v789_v45 = vpack.c.bf16 %v742_v39, %v741_v38  ;;  %v818_v61 = vrot.slane %v12023_v43, 1  ;;  %v10224_v37 = vld [vmem:[#allocation6 + $0x254] ss:$72 sps:$4 sm:$0xff]  }
 0x1e7   : > { %v750_v49 = vmax.f32 %v745_v40, %v748_v34  ;;  %v751_v50 = vmax.f32 %v746_v41, %v748_v34  ;;  %v811_v51 = vrot.slane %v809_v42, 4  ;;  %v814_v52 = vrot.slane %v812_v21, 5  ;;  %v10219_v34 = vld [vmem:[#allocation6 + $0x1c8] ss:$72 sps:$4 sm:$0xff]   ;;  %v10227_v38 = vld [vmem:[#allocation6 + $0x25c] ss:$72 sps:$4 sm:$0xff]  }
 0x1e8   : > { %v784_v47 = vor.u32 %v783_v44, %v780_v18  ;;  %v791_v53 = vrot.slane %v789_v45, 2  ;;  %v10222_v40 = vld [vmem:[#allocation6 + $0x250] ss:$72 sps:$4 sm:$0xff]   ;;  %v10230_v21 = vld [vmem:[#allocation6 + $0x2e4] ss:$72 sps:$4 sm:$0xff]  }
 0x1e9   : > { %v796_v56 = vpack.c.bf16 %v751_v50, %v750_v49  ;;  %v815_v57 = vor.u32 %v814_v52, %v811_v51  ;;  %v10225_v41 = vld [vmem:[#allocation6 + $0x258] ss:$72 sps:$4 sm:$0xff]   ;;  %v10233_v43 = vld [vmem:[#allocation6 + $0x2ec] ss:$72 sps:$4 sm:$0xff]   ;;  %v10231_v44 = vld [vmem:[#allocation6 + $0x2e8] ss:$72 sps:$4 sm:$0xff]  }
 0x1ea   : > { %v786_v62 = vsel %vm12008_vm5, 0, %v784_v47  ;;  %v793_v4 = vsel %vm12008_vm5, 0, %v791_v53  ;;  %v10228_v18 = vld [vmem:[#allocation6 + $0x2e0] ss:$72 sps:$4 sm:$0xff]   ;;  %v10236_v45 = vld [vmem:[#allocation6 + $0x374] ss:$72 sps:$4 sm:$0xff]  }
 0x1eb   : > { %v798_v63 = vshrl.u32 %v796_v56, 16  ;;  %v801_v2 = vshll.u32 %v796_v56, 16  ;;  %v842_v3 = vsel %vm12027_vm9, 0, %v815_v57  ;;  %v788_v6 = vsel %vm765_vm6, %v786_v62, 0  ;;  %v10234_v49 = vld [vmem:[#allocation6 + $0x370] ss:$72 sps:$4 sm:$0xff]   ;;  %vm12529_vm9 = vmand %vm3062_vm15, %vm3063_vm4 }
 0x1ec   : > { %v12039_v5 = vsel %vm629_vm0, %v842_v3, %v818_v61  ;;  %v820_v11 = vshrl.u32 %v788_v6, 16  ;;  %v823_v12 = vshll.u32 %v788_v6, 16  ;;  %v795_v15 = vsel %vm765_vm6, %v793_v4, 0  ;;  %v10237_v50 = vld [vmem:[#allocation6 + $0x378] ss:$72 sps:$4 sm:$0xff]  }
 0x1ed   : > { %v800_v9 = vrot.slane %v798_v63, 1  ;;  %v803_v0 = vrot.slane %v801_v2, 2  ;;  %1760 = vmatmul.mubr.bf16.vlgmr.msra.gmra.mrb[0].mxu1 %v12039_v5  ;;  %1827 = vmatmul.mubr.bf16.vlgmr.msra.gmra.mrb[8].mxu0 %v12039_v5  ;;  %v829_v28 = vrot.slane %v795_v15, 2  ;;  %v10242_v51 = vld [vmem:[#allocation6 + $0x404] ss:$72 sps:$4 sm:$0xff]  }
 0x1ee   : > { %1862 = vmatpush1.bf16.msra.mxu1 %v10198_v54  ;;  %1929 = vmatpush1.bf16.msra.mxu0 %v10201_v55  ;;  %v822_v17 = vrot.slane %v820_v11, 5  ;;  %v825_v19 = vrot.slane %v823_v12, 6  ;;  %v10245_v52 = vld [vmem:[#allocation6 + $0x40c] ss:$72 sps:$4 sm:$0xff]   ;;  %v10240_v47 = vld [vmem:[#allocation6 + $0x400] ss:$72 sps:$4 sm:$0xff]  }
 0x1ef   : > { %v804_v16 = vor.u32 %v803_v0, %v800_v9  ;;  %1863 = vmatprep.subr.bf16.mxu1 %v10206_v58  ;;  %1930 = vmatprep.subr.bf16.mxu0 %v10209_v60  ;;  %v10243_v53 = vld [vmem:[#allocation6 + $0x408] ss:$72 sps:$4 sm:$0xff]   ;;  %v10248_v54 = vld [vmem:[#allocation6 + $0x24] ss:$72 sps:$4 sm:$0xff]   ;;  %v10254_v58 = vld [vmem:[#allocation6 + $0xb4] ss:$72 sps:$4 sm:$0xff]  }
 0x1f0   : > { %1769 = vmatprep.mubr.bf16.mxu1 %v11690_v46  ;;  %1836 = vmatprep.mubr.bf16.mxu0 %v11690_v46  ;;  %v826_v24 = vor.u32 %v825_v19, %v822_v17  ;;  %v10251_v55 = vld [vmem:[#allocation6 + $0x2c] ss:$72 sps:$4 sm:$0xff]   ;;  %v10246_v56 = vld [vmem:[#allocation6 + $0x20] ss:$72 sps:$4 sm:$0xff]   ;;  %v10257_v60 = vld [vmem:[#allocation6 + $0xbc] ss:$72 sps:$4 sm:$0xff]  }
 0x1f1   : > { %v806_v23 = vsel %vm12008_vm5, 0, %v804_v16  ;;  %v10249_v57 = vld [vmem:[#allocation6 + $0x28] ss:$72 sps:$4 sm:$0xff]   ;;  %v10255_v62 = vld [vmem:[#allocation6 + $0xb8] ss:$72 sps:$4 sm:$0xff]  }
 0x1f2   : > { %v808_v27 = vsel %vm765_vm6, %v806_v23, 0  ;;  %1864 = vmatpush1.bf16.msra.mxu1 %v10204_v7  ;;  %1931 = vmatpush1.bf16.msra.mxu0 %v10207_v8  ;;  %v850_v31 = vsel %vm12046_vm12, %v818_v61, %v826_v24  ;;  %v10252_v61 = vld [vmem:[#allocation6 + $0xb0] ss:$72 sps:$4 sm:$0xff]   ;;  %v10260_v63 = vld [vmem:[#allocation6 + $0x144] ss:$72 sps:$4 sm:$0xff]  }
 0x1f3   : > { %v831_v29 = vshrl.u32 %v808_v27, 16  ;;  %v834_v30 = vshll.u32 %v808_v27, 16  ;;  %1865 = vmatprep.subr.bf16.mxu1 %v10212_v10  ;;  %1932 = vmatprep.subr.bf16.mxu0 %v10215_v59  ;;  %v12065_v32 = vsel %vm647_vm1, %v850_v31, %v829_v28  ;;  %v10263_v2 = vld [vmem:[#allocation6 + $0x14c] ss:$72 sps:$4 sm:$0xff]   ;;  %v10258_v3 = vld [vmem:[#allocation6 + $0x140] ss:$72 sps:$4 sm:$0xff]  }
 0x1f4   : > { %v10261_v4 = vld [vmem:[#allocation6 + $0x148] ss:$72 sps:$4 sm:$0xff]   ;;  %v10266_v7 = vld [vmem:[#allocation6 + $0x1d4] ss:$72 sps:$4 sm:$0xff]   ;;  %v10267_v9 = vld [vmem:[#allocation6 + $0x1d8] ss:$72 sps:$4 sm:$0xff]  }
 0x1f5   : > { %v833_v35 = vrot.slane %v831_v29, 6  ;;  %v836_v36 = vrot.slane %v834_v30, 7  ;;  %1770 = vmatmul.mubr.bf16.gmra.mrb[4].mxu1 %v12065_v32  ;;  %1837 = vmatmul.mubr.bf16.gmra.mrb[12].mxu0 %v12065_v32  ;;  %v10269_v8 = vld [vmem:[#allocation6 + $0x1dc] ss:$72 sps:$4 sm:$0xff]   ;;  %v10264_v6 = vld [vmem:[#allocation6 + $0x1d0] ss:$72 sps:$4 sm:$0xff]  }
 0x1f6   : > { %1866 = vmatpush1.bf16.msra.mxu1 %v10210_v20  ;;  %1933 = vmatpush1.bf16.msra.mxu0 %v10213_v22  ;;  %v10272_v0 = vld [vmem:[#allocation6 + $0x264] ss:$72 sps:$4 sm:$0xff]   ;;  %v10270_v11 = vld [vmem:[#allocation6 + $0x260] ss:$72 sps:$4 sm:$0xff]   ;;  %v10278_v59 = vld [vmem:[#allocation6 + $0x2f4] ss:$72 sps:$4 sm:$0xff]  }
 0x1f7   : > { %v837_v39 = vor.u32 %v836_v36, %v833_v35  ;;  %1867 = vmatprep.subr.bf16.mxu1 %v10218_v25  ;;  %1934 = vmatprep.subr.bf16.mxu0 %v10221_v26  ;;  %v10275_v10 = vld [vmem:[#allocation6 + $0x26c] ss:$72 sps:$4 sm:$0xff]   ;;  %v10273_v12 = vld [vmem:[#allocation6 + $0x268] ss:$72 sps:$4 sm:$0xff]   ;;  %v10279_v16 = vld [vmem:[#allocation6 + $0x2f8] ss:$72 sps:$4 sm:$0xff]  }
 0x1f8   : > { %1779 = vmatprep.mubr.bf16.mxu1 %v11690_v46  ;;  %1846 = vmatprep.mubr.bf16.mxu0 %v11690_v46  ;;  %v10276_v15 = vld [vmem:[#allocation6 + $0x2f0] ss:$72 sps:$4 sm:$0xff]   ;;  %v10284_v17 = vld [vmem:[#allocation6 + $0x384] ss:$72 sps:$4 sm:$0xff]   ;;  %v10282_v20 = vld [vmem:[#allocation6 + $0x380] ss:$72 sps:$4 sm:$0xff]  }
 0x1f9   : > { %v12073_v42 = vsel %vm12052_vm13, %v829_v28, %v837_v39  ;;  %v10287_v19 = vld [vmem:[#allocation6 + $0x38c] ss:$72 sps:$4 sm:$0xff]   ;;  %v10285_v22 = vld [vmem:[#allocation6 + $0x388] ss:$72 sps:$4 sm:$0xff]   ;;  %v10293_v24 = vld [vmem:[#allocation6 + $0x41c] ss:$72 sps:$4 sm:$0xff]  }
 0x1fa   : > { %1868 = vmatpush1.bf16.msra.mxu1 %v10216_v33  ;;  %1935 = vmatpush1.bf16.msra.mxu0 %v10219_v34  ;;  %v10290_v23 = vld [vmem:[#allocation6 + $0x414] ss:$72 sps:$4 sm:$0xff]   ;;  %v10288_v25 = vld [vmem:[#allocation6 + $0x410] ss:$72 sps:$4 sm:$0xff]   ;;  %v10302_v31 = vld [vmem:[#allocation6 + $0xc4] ss:$72 sps:$4 sm:$0xff]  }
 0x1fb   : > { %1869 = vmatprep.subr.bf16.mxu1 %v10224_v37  ;;  %1936 = vmatprep.subr.bf16.mxu0 %v10227_v38  ;;  %v10291_v26 = vld [vmem:[#allocation6 + $0x418] ss:$72 sps:$4 sm:$0xff]   ;;  %v10296_v27 = vld [vmem:[#allocation6 + $0x34] ss:$72 sps:$4 sm:$0xff]   ;;  %v10303_v35 = vld [vmem:[#allocation6 + $0xc8] ss:$72 sps:$4 sm:$0xff]  }
 0x1fc   : > { %v10299_v28 = vld [vmem:[#allocation6 + $0x3c] ss:$72 sps:$4 sm:$0xff]   ;;  %v10294_v29 = vld [vmem:[#allocation6 + $0x30] ss:$72 sps:$4 sm:$0xff]   ;;  %v10305_v33 = vld [vmem:[#allocation6 + $0xcc] ss:$72 sps:$4 sm:$0xff]  }
 0x1fd   : > { %9237 = vmatmul.mubr.msk.bf16.gmra.mrb[8].mxu1 %vm859_vm14, %v12073_v42  ;;  %9238 = vmatmul.mubr.msk.bf16.gmra.mrb[16].mxu0 %vm859_vm14, %v12073_v42  ;;  %v10297_v30 = vld [vmem:[#allocation6 + $0x38] ss:$72 sps:$4 sm:$0xff]   ;;  %v10308_v36 = vld [vmem:[#allocation6 + $0x154] ss:$72 sps:$4 sm:$0xff]  }
 0x1fe   : > { %1870 = vmatpush1.bf16.msra.mxu1 %v10222_v40  ;;  %1937 = vmatpush1.bf16.msra.mxu0 %v10225_v41  ;;  %v10300_v34 = vld [vmem:[#allocation6 + $0xc0] ss:$72 sps:$4 sm:$0xff]   ;;  %v10311_v37 = vld [vmem:[#allocation6 + $0x15c] ss:$72 sps:$4 sm:$0xff]   ;;  %v10306_v38 = vld [vmem:[#allocation6 + $0x150] ss:$72 sps:$4 sm:$0xff]  }
 0x1ff   : > { %1871 = vmatprep.subr.bf16.mxu1 %v10230_v21  ;;  %1938 = vmatprep.subr.bf16.mxu0 %v10233_v43  ;;  %v10309_v39 = vld [vmem:[#allocation6 + $0x158] ss:$72 sps:$4 sm:$0xff]   ;;  %v10314_v40 = vld [vmem:[#allocation6 + $0x1e4] ss:$72 sps:$4 sm:$0xff]   ;;  %v10315_v43 = vld [vmem:[#allocation6 + $0x1e8] ss:$72 sps:$4 sm:$0xff]  }
 0x200   : > { %1787 = vmatprep.mubr.bf16.mxu1 %v11690_v46  ;;  %1854 = vmatprep.mubr.bf16.mxu0 %v11690_v46  ;;  %v10317_v41 = vld [vmem:[#allocation6 + $0x1ec] ss:$72 sps:$4 sm:$0xff]   ;;  %v10312_v21 = vld [vmem:[#allocation6 + $0x1e0] ss:$72 sps:$4 sm:$0xff]  }
 0x202   : > { %1872 = vmatpush1.bf16.msra.mxu1 %v10228_v18  ;;  %1939 = vmatpush1.bf16.msra.mxu0 %v10231_v44  ;;  %v10320_v18 = vld [vmem:[#allocation6 + $0x274] ss:$72 sps:$4 sm:$0xff]  }
 0x203   : > { %1873 = vmatprep.subr.bf16.mxu1 %v10236_v45  ;;  %1940 = vmatprep.subr.bf16.mxu0 %v10239_v48  ;;  %v10323_v44 = vld [vmem:[#allocation6 + $0x27c] ss:$72 sps:$4 sm:$0xff]   ;;  %v10318_v45 = vld [vmem:[#allocation6 + $0x270] ss:$72 sps:$4 sm:$0xff]  }
 0x204   : > { %v10321_v48 = vld [vmem:[#allocation6 + $0x278] ss:$72 sps:$4 sm:$0xff]  }
 0x205   : > { %1788 = vmatmul.mubr.bf16.gmra.mrb[12].mxu1 %v11690_v46  ;;  %1855 = vmatmul.mubr.bf16.gmra.mrb[20].mxu0 %v11690_v46 }
 0x206   : > { %1874 = vmatpush1.bf16.msra.mxu1 %v10234_v49  ;;  %1941 = vmatpush1.bf16.msra.mxu0 %v10237_v50  ;;  %v10326_v49 = vld [vmem:[#allocation6 + $0x304] ss:$72 sps:$4 sm:$0xff]  }
 0x207   : > { %1875 = vmatprep.subr.bf16.mxu1 %v10242_v51  ;;  %1942 = vmatprep.subr.bf16.mxu0 %v10245_v52  ;;  %v10329_v50 = vld [vmem:[#allocation6 + $0x30c] ss:$72 sps:$4 sm:$0xff]   ;;  %v10324_v51 = vld [vmem:[#allocation6 + $0x300] ss:$72 sps:$4 sm:$0xff]  }
 0x208   : > { %1893 = vmatprep.mubr.bf16.mxu1 %v11690_v46  ;;  %1960 = vmatprep.mubr.bf16.mxu0 %v11690_v46  ;;  %v10327_v52 = vld [vmem:[#allocation6 + $0x308] ss:$72 sps:$4 sm:$0xff]  }
 0x20a   : > { %1876 = vmatpush1.bf16.msra.mxu1 %v10240_v47  ;;  %1943 = vmatpush1.bf16.msra.mxu0 %v10243_v53  ;;  %v10332_v47 = vld [vmem:[#allocation6 + $0x394] ss:$72 sps:$4 sm:$0xff]  }
 0x20b   : > { %1995 = vmatprep.subr.bf16.mxu1 %v10248_v54  ;;  %2062 = vmatprep.subr.bf16.mxu0 %v10251_v55  ;;  %v10335_v53 = vld [vmem:[#allocation6 + $0x39c] ss:$72 sps:$4 sm:$0xff]   ;;  %v10330_v54 = vld [vmem:[#allocation6 + $0x390] ss:$72 sps:$4 sm:$0xff]  }
 0x20c   : > { %v10333_v55 = vld [vmem:[#allocation6 + $0x398] ss:$72 sps:$4 sm:$0xff]  }
 0x20d   : > { %1894 = vmatmul.mubr.bf16.vlgmr.msra.gmra.mrb[16].mxu1 %v12039_v5  ;;  %1961 = vmatmul.mubr.bf16.vlgmr.msra.gmra.mrb[24].mxu0 %v12039_v5 }
 0x20e   : > { %1996 = vmatpush1.bf16.msra.mxu1 %v10246_v56  ;;  %2063 = vmatpush1.bf16.msra.mxu0 %v10249_v57  ;;  %v10338_v56 = vld [vmem:[#allocation6 + $0x424] ss:$72 sps:$4 sm:$0xff]  }
 0x20f   : > { %1997 = vmatprep.subr.bf16.mxu1 %v10254_v58  ;;  %2064 = vmatprep.subr.bf16.mxu0 %v10257_v60  ;;  %v10341_v57 = vld [vmem:[#allocation6 + $0x42c] ss:$72 sps:$4 sm:$0xff]   ;;  %v10336_v58 = vld [vmem:[#allocation6 + $0x420] ss:$72 sps:$4 sm:$0xff]  }
 0x210   : > { %1903 = vmatprep.mubr.bf16.mxu1 %v11690_v46  ;;  %1970 = vmatprep.mubr.bf16.mxu0 %v11690_v46  ;;  %v10339_v60 = vld [vmem:[#allocation6 + $0x428] ss:$72 sps:$4 sm:$0xff]  }
 0x212   : > { %1998 = vmatpush1.bf16.msra.mxu1 %v10252_v61  ;;  %2065 = vmatpush1.bf16.msra.mxu0 %v10255_v62  ;;  %v10344_v61 = vld [vmem:[#allocation6 + $0x44] ss:$72 sps:$4 sm:$0xff]   ;;  %v10342_v62 = vld [vmem:[#allocation6 + $0x40] ss:$72 sps:$4 sm:$0xff]  }
 0x213   : > { %1999 = vmatprep.subr.bf16.mxu1 %v10260_v63  ;;  %2066 = vmatprep.subr.bf16.mxu0 %v10263_v2  ;;  %v10347_v63 = vld [vmem:[#allocation6 + $0xd4] ss:$72 sps:$4 sm:$0xff]   ;;  %v10345_v2 = vld [vmem:[#allocation6 + $0xd0] ss:$72 sps:$4 sm:$0xff]  }
 0x215   : > { %1904 = vmatmul.mubr.bf16.gmra.mrb[20].mxu1 %v12065_v32  ;;  %1971 = vmatmul.mubr.bf16.gmra.mrb[28].mxu0 %v12065_v32 }
 0x216   : > { %2000 = vmatpush1.bf16.msra.mxu1 %v10258_v3  ;;  %2067 = vmatpush1.bf16.msra.mxu0 %v10261_v4  ;;  %v10350_v3 = vld [vmem:[#allocation6 + $0x164] ss:$72 sps:$4 sm:$0xff]   ;;  %v10348_v4 = vld [vmem:[#allocation6 + $0x160] ss:$72 sps:$4 sm:$0xff]  }
 0x217   : > { %2001 = vmatprep.subr.bf16.mxu1 %v10266_v7  ;;  %2068 = vmatprep.subr.bf16.mxu0 %v10269_v8  ;;  %v10353_v7 = vld [vmem:[#allocation6 + $0x1f4] ss:$72 sps:$4 sm:$0xff]   ;;  %v10351_v8 = vld [vmem:[#allocation6 + $0x1f0] ss:$72 sps:$4 sm:$0xff]  }
 0x218   : > { %1913 = vmatprep.mubr.bf16.mxu1 %v11690_v46  ;;  %1980 = vmatprep.mubr.bf16.mxu0 %v11690_v46 }
 0x21a   : > { %2002 = vmatpush1.bf16.msra.mxu1 %v10264_v6  ;;  %2069 = vmatpush1.bf16.msra.mxu0 %v10267_v9  ;;  %v10356_v6 = vld [vmem:[#allocation6 + $0x284] ss:$72 sps:$4 sm:$0xff]   ;;  %v10354_v9 = vld [vmem:[#allocation6 + $0x280] ss:$72 sps:$4 sm:$0xff]  }
 0x21b   : > { %2003 = vmatprep.subr.bf16.mxu1 %v10272_v0  ;;  %2070 = vmatprep.subr.bf16.mxu0 %v10275_v10  ;;  %v10359_v0 = vld [vmem:[#allocation6 + $0x314] ss:$72 sps:$4 sm:$0xff]   ;;  %v10357_v10 = vld [vmem:[#allocation6 + $0x310] ss:$72 sps:$4 sm:$0xff]  }
 0x21d   : > { %9239 = vmatmul.mubr.msk.bf16.gmra.mrb[24].mxu1 %vm859_vm14, %v12073_v42  ;;  %9240 = vmatmul.mubr.msk.bf16.gmra.mrb[32].mxu0 %vm859_vm14, %v12073_v42 }
 0x21e   : > { %2004 = vmatpush1.bf16.msra.mxu1 %v10270_v11  ;;  %2071 = vmatpush1.bf16.msra.mxu0 %v10273_v12  ;;  %v10362_v11 = vld [vmem:[#allocation6 + $0x3a4] ss:$72 sps:$4 sm:$0xff]   ;;  %v10360_v12 = vld [vmem:[#allocation6 + $0x3a0] ss:$72 sps:$4 sm:$0xff]  }
 0x21f   : > { %2005 = vmatprep.subr.bf16.mxu1 %v10278_v59  ;;  %2072 = vmatprep.subr.bf16.mxu0 %v10281_v14  ;;  %v10365_v59 = vld [vmem:[#allocation6 + $0x434] ss:$72 sps:$4 sm:$0xff]   ;;  %v10363_v14 = vld [vmem:[#allocation6 + $0x430] ss:$72 sps:$4 sm:$0xff]  }
 0x220   : > { %1921 = vmatprep.mubr.bf16.mxu1 %v11690_v46  ;;  %1988 = vmatprep.mubr.bf16.mxu0 %v11690_v46 }
 0x222   : > { %2006 = vmatpush1.bf16.msra.mxu1 %v10276_v15  ;;  %2073 = vmatpush1.bf16.msra.mxu0 %v10279_v16  ;;  %v10366_v15 = vld [vmem:[#allocation9] ss:$144 sps:$4 sm:$0xff]   ;;  %v10368_v16 = vld [vmem:[#allocation9 + $0x4] ss:$144 sps:$4 sm:$0xff]  }
 0x223   : > { %2007 = vmatprep.subr.bf16.mxu1 %v10284_v17  ;;  %2074 = vmatprep.subr.bf16.mxu0 %v10287_v19  ;;  %v10369_v17 = vld [vmem:[#allocation9 + $0x8] ss:$144 sps:$4 sm:$0xff]   ;;  %v10371_v19 = vld [vmem:[#allocation9 + $0xc] ss:$144 sps:$4 sm:$0xff]  }
 0x225   : > { %1922 = vmatmul.mubr.bf16.gmra.mrb[28].mxu1 %v11690_v46  ;;  %1989 = vmatmul.mubr.bf16.gmra.mrb[36].mxu0 %v11690_v46 }
 0x226   : > { %2008 = vmatpush1.bf16.msra.mxu1 %v10282_v20  ;;  %2075 = vmatpush1.bf16.msra.mxu0 %v10285_v22  ;;  %v10374_v20 = vld [vmem:[#allocation9 + $0x124] ss:$144 sps:$4 sm:$0xff]   ;;  %v10377_v22 = vld [vmem:[#allocation9 + $0x12c] ss:$144 sps:$4 sm:$0xff]  }
 0x227   : > { %2009 = vmatprep.subr.bf16.mxu1 %v10290_v23  ;;  %2076 = vmatprep.subr.bf16.mxu0 %v10293_v24  ;;  %v10378_v24 = vld [vmem:[#allocation9 + $0x240] ss:$144 sps:$4 sm:$0xff]  }
 0x228   : > { %2027 = vmatprep.mubr.bf16.mxu1 %v11690_v46  ;;  %2094 = vmatprep.mubr.bf16.mxu0 %v11690_v46 }
 0x22a   : > { %2010 = vmatpush1.bf16.msra.mxu1 %v10288_v25  ;;  %2077 = vmatpush1.bf16.msra.mxu0 %v10291_v26 }
 0x22b   : > { %2129 = vmatprep.subr.bf16.mxu1 %v10296_v27  ;;  %2196 = vmatprep.subr.bf16.mxu0 %v10299_v28  ;;  %v10381_v28 = vld [vmem:[#allocation9 + $0x248] ss:$144 sps:$4 sm:$0xff]  }
 0x22d   : > { %2028 = vmatmul.mubr.bf16.vlgmr.msra.gmra.mrb[32].mxu1 %v12039_v5  ;;  %2095 = vmatmul.mubr.bf16.vlgmr.msra.gmra.mrb[40].mxu0 %v12039_v5 }
 0x22e   : > { %2130 = vmatpush1.bf16.msra.mxu1 %v10294_v29  ;;  %2197 = vmatpush1.bf16.msra.mxu0 %v10297_v30 }
 0x22f   : > { %2131 = vmatprep.subr.bf16.mxu1 %v10302_v31  ;;  %2198 = vmatprep.subr.bf16.mxu0 %v10305_v33  ;;  %v10383_v33 = vld [vmem:[#allocation9 + $0x24c] ss:$144 sps:$4 sm:$0xff]  }
 0x230   : > { %2035 = vmatprep.mubr.bf16.mxu1 %v11690_v46  ;;  %2102 = vmatprep.mubr.bf16.mxu0 %v11690_v46 }
 0x232   : > { %2132 = vmatpush1.bf16.msra.mxu1 %v10300_v34  ;;  %2199 = vmatpush1.bf16.msra.mxu0 %v10303_v35 }
 0x233   : > { %2133 = vmatprep.subr.bf16.mxu1 %v10308_v36  ;;  %2200 = vmatprep.subr.bf16.mxu0 %v10311_v37 }
 0x235   : > { %2036 = vmatmul.mubr.bf16.gmra.mrb[36].mxu1 %v12065_v32  ;;  %2103 = vmatmul.mubr.bf16.gmra.mrb[44].mxu0 %v12065_v32 }
 0x236   : > { %2134 = vmatpush1.bf16.msra.mxu1 %v10306_v38  ;;  %2201 = vmatpush1.bf16.msra.mxu0 %v10309_v39  ;;  %v10384_v38 = vld [vmem:[#allocation9 + $0x360] ss:$144 sps:$4 sm:$0xff]  }
 0x237   : > { %2135 = vmatprep.subr.bf16.mxu1 %v10314_v40  ;;  %2202 = vmatprep.subr.bf16.mxu0 %v10317_v41  ;;  %v10386_v41 = vld [vmem:[#allocation9 + $0x364] ss:$144 sps:$4 sm:$0xff]  }
 0x238   : > { %2045 = vmatprep.mubr.bf16.mxu1 %v11690_v46  ;;  %2112 = vmatprep.mubr.bf16.mxu0 %v11690_v46 }
 0x23a   : > { %2136 = vmatpush1.bf16.msra.mxu1 %v10312_v21  ;;  %2203 = vmatpush1.bf16.msra.mxu0 %v10315_v43 }
 0x23b   : > { %2137 = vmatprep.subr.bf16.mxu1 %v10320_v18  ;;  %2204 = vmatprep.subr.bf16.mxu0 %v10323_v44  ;;  %v10387_v18 = vld [vmem:[#allocation9 + $0x368] ss:$144 sps:$4 sm:$0xff]   ;;  %v10389_v44 = vld [vmem:[#allocation9 + $0x36c] ss:$144 sps:$4 sm:$0xff]  }
 0x23d   : > { %9241 = vmatmul.mubr.msk.bf16.gmra.mrb[40].mxu1 %vm859_vm14, %v12073_v42  ;;  %9242 = vmatmul.mubr.msk.bf16.gmra.mrb[48].mxu0 %vm859_vm14, %v12073_v42 }
 0x23e   : > { %2138 = vmatpush1.bf16.msra.mxu1 %v10318_v45  ;;  %2205 = vmatpush1.bf16.msra.mxu0 %v10321_v48 }
 0x23f   : > { %2139 = vmatprep.subr.bf16.mxu1 %v10326_v49  ;;  %2206 = vmatprep.subr.bf16.mxu0 %v10329_v50 }
 0x240   : > { %2055 = vmatprep.mubr.bf16.mxu1 %v11690_v46  ;;  %2122 = vmatprep.mubr.bf16.mxu0 %v11690_v46 }
 0x242   : > { %2140 = vmatpush1.bf16.msra.mxu1 %v10324_v51  ;;  %2207 = vmatpush1.bf16.msra.mxu0 %v10327_v52 }
 0x243   : > { %2141 = vmatprep.subr.bf16.mxu1 %v10332_v47  ;;  %2208 = vmatprep.subr.bf16.mxu0 %v10335_v53 }
 0x245   : > { %2056 = vmatmul.mubr.bf16.gmra.mrb[44].mxu1 %v11690_v46  ;;  %2123 = vmatmul.mubr.bf16.gmra.mrb[52].mxu0 %v11690_v46 }
 0x246   : > { %2142 = vmatpush1.bf16.msra.mxu1 %v10330_v54  ;;  %2209 = vmatpush1.bf16.msra.mxu0 %v10333_v55 }
 0x247   : > { %2143 = vmatprep.subr.bf16.mxu1 %v10338_v56  ;;  %2210 = vmatprep.subr.bf16.mxu0 %v10341_v57 }
 0x248   : > { %2161 = vmatprep.mubr.bf16.mxu1 %v11690_v46  ;;  %2228 = vmatprep.mubr.bf16.mxu0 %v11690_v46 }
 0x24a   : > { %2144 = vmatpush1.bf16.msra.mxu1 %v10336_v58  ;;  %2211 = vmatpush1.bf16.msra.mxu0 %v10339_v60 }
 0x24b   : > { %2263 = vmatprep.subr.bf16.mxu1 %v10344_v61  ;;  %6529 = vmatprep.subr.bf16.mxu0 %v10368_v16 }
 0x24d   : > { %2162 = vmatmul.mubr.bf16.vlgmr.msra.gmra.mrb[48].mxu1 %v12039_v5  ;;  %2229 = vmatmul.mubr.bf16.vlgmr.msra.gmra.mrb[56].mxu0 %v12039_v5 }
 0x24e   : > { %2264 = vmatpush1.bf16.msra.mxu1 %v10342_v62  ;;  %2169 = vmatprep.mubr.bf16.mxu1 %v11690_v46 }
 0x24f   : > { %2265 = vmatprep.subr.bf16.mxu1 %v10347_v63  ;;  %2236 = vmatprep.mubr.bf16.mxu0 %v11690_v46 }
 0x250   : > { %6530 = vmatpush1.bf16.msra.mxu0 %v10366_v15 }
 0x251   : > { %6531 = vmatprep.subr.bf16.mxu0 %v10374_v20  ;;  %v10398_v20 = vld [vmem:[#allocation9 + $0x5a4] ss:$144 sps:$4 sm:$0xff]  }
 0x252   : > { %2266 = vmatpush1.bf16.msra.mxu1 %v10345_v2 }
 0x253   : > { %2267 = vmatprep.subr.bf16.mxu1 %v10350_v3 }
 0x255   : > { %2170 = vmatmul.mubr.bf16.gmra.mrb[52].mxu1 %v12065_v32  ;;  %2237 = vmatmul.mubr.bf16.gmra.mrb[60].mxu0 %v12065_v32 }
 0x256   : > { %2268 = vmatpush1.bf16.msra.mxu1 %v10348_v4  ;;  %2179 = vmatprep.mubr.bf16.mxu1 %v11690_v46 }
 0x257   : > { %2269 = vmatprep.subr.bf16.mxu1 %v10353_v7  ;;  %2246 = vmatprep.mubr.bf16.mxu0 %v11690_v46 }
 0x25a   : > { %2270 = vmatpush1.bf16.msra.mxu1 %v10351_v8 }
 0x25b   : > { %2271 = vmatprep.subr.bf16.mxu1 %v10356_v6  ;;  %v10392_v6 = vld [vmem:[#allocation9 + $0x484] ss:$144 sps:$4 sm:$0xff]  }
 0x25d   : > { %9243 = vmatmul.mubr.msk.bf16.gmra.mrb[56].mxu1 %vm859_vm14, %v12073_v42  ;;  %9244 = vmatmul.mubr.msk.bf16.gmra.mrb[64].mxu0 %vm859_vm14, %v12073_v42 }
 0x25e   : > { %2272 = vmatpush1.bf16.msra.mxu1 %v10354_v9  ;;  %2189 = vmatprep.mubr.bf16.mxu1 %v11690_v46  ;;  %v10395_v9 = vld [vmem:[#allocation9 + $0x48c] ss:$144 sps:$4 sm:$0xff]  }
 0x25f   : > { %2273 = vmatprep.subr.bf16.mxu1 %v10359_v0  ;;  %2256 = vmatprep.mubr.bf16.mxu0 %v11690_v46 }
 0x262   : > { %2274 = vmatpush1.bf16.msra.mxu1 %v10357_v10 }
 0x263   : > { %2275 = vmatprep.subr.bf16.mxu1 %v10362_v11 }
 0x265   : > { %2190 = vmatmul.mubr.bf16.gmra.mrb[60].mxu1 %v11690_v46  ;;  %2257 = vmatmul.mubr.bf16.gmra.mrb[68].mxu0 %v11690_v46 }
 0x266   : > { %2276 = vmatpush1.bf16.msra.mxu1 %v10360_v12  ;;  %2295 = vmatprep.mubr.bf16.mxu1 %v11690_v46  ;;  %v10390_v12 = vld [vmem:[#allocation9 + $0x480] ss:$144 sps:$4 sm:$0xff]  }
 0x267   : > { %2277 = vmatprep.subr.bf16.mxu1 %v10365_v59  ;;  %v10393_v59 = vld [vmem:[#allocation9 + $0x488] ss:$144 sps:$4 sm:$0xff]  }
 0x26a   : > { %2278 = vmatpush1.bf16.msra.mxu1 %v10363_v14 }
 0x26b   : > { %6578 = vmatprep.subr.bf16.mxu1 %v10371_v19 }
 0x26d   : > { %2296 = vmatmul.mubr.bf16.vlgmr.msra.gmra.mrb[64].mxu1 %v12039_v5  ;;  %v10372_v5 = vld [vmem:[#allocation9 + $0x120] ss:$144 sps:$4 sm:$0xff]  }
 0x26e   : > { %2301 = vmatprep.mubr.bf16.mxu1 %v11690_v46  ;;  %6579 = vmatpush1.bf16.msra.mxu1 %v10369_v17 }
 0x26f   : > { %6580 = vmatprep.subr.bf16.mxu1 %v10377_v22  ;;  %6532 = vmatpush1.bf16.msra.mxu0 %v10372_v5 }
 0x275   : > { %2302 = vmatmul.mubr.bf16.gmra.mrb[68].mxu1 %v12065_v32  ;;  %v10375_v32 = vld [vmem:[#allocation9 + $0x128] ss:$144 sps:$4 sm:$0xff]  }
 0x276   : > { %2311 = vmatprep.mubr.bf16.mxu1 %v11690_v46  ;;  %6581 = vmatpush1.bf16.msra.mxu1 %v10375_v32 }
 0x277   : > { %6582 = vmatprep.subr.bf16.mxu1 %v10383_v33 }
 0x27a   : > { %6583 = vmatpush1.bf16.msra.mxu1 %v10381_v28  ;;  %v10401_v28 = vld [vmem:[#allocation9 + $0x5ac] ss:$144 sps:$4 sm:$0xff]  }
 0x27b   : > { %6584 = vmatprep.subr.bf16.mxu1 %v10389_v44 }
 0x27d   : > { %9245 = vmatmul.mubr.msk.bf16.gmra.mrb[72].mxu1 %vm859_vm14, %v12073_v42 }
 0x27e   : > { %2321 = vmatprep.mubr.bf16.mxu1 %v11690_v46  ;;  %6585 = vmatpush1.bf16.msra.mxu1 %v10387_v18 }
 0x27f   : > { %6586 = vmatprep.subr.bf16.mxu1 %v10395_v9 }
 0x282   : > { %6587 = vmatpush1.bf16.msra.mxu1 %v10393_v59 }
 0x283   : > { %6588 = vmatprep.subr.bf16.mxu1 %v10401_v28 }
 0x285   : > { %2322 = vmatmul.mubr.bf16.gmra.mrb[76].mxu1 %v11690_v46  ;;  %v10380_v46 = vld [vmem:[#allocation9 + $0x244] ss:$144 sps:$4 sm:$0xff]  }
 0x286   : > { %6533 = vmatprep.subr.bf16.mxu0 %v10380_v46 }
 0x287   : > { %6534 = vmatpush1.bf16.msra.mxu0 %v10378_v24 }
 0x288   : > { %6535 = vmatprep.subr.bf16.mxu0 %v10386_v41 }
 0x28b   : > { %6536 = vmatpush1.bf16.msra.mxu0 %v10384_v38  ;;  %v10405_v38 = vld [vmem:[#allocation9 + $0x6c8] ss:$144 sps:$4 sm:$0xff]  }
 0x28c   : > { %6537 = vmatprep.subr.bf16.mxu0 %v10392_v6 }
 0x28f   : > { %6538 = vmatpush1.bf16.msra.mxu0 %v10390_v12 }
 0x290   : > { %6539 = vmatprep.subr.bf16.mxu0 %v10398_v20 }
 0x2c0   : > { %v1761_v42 = vpop.f32.mrb[0].mxu1  ;;  %v1828_v23 = vpop.f32.mrb[8].mxu0 }
 0x2c1   : > { %v2335_v25 = vrot.slane %v1828_v23, 1  ;;  %v1763_v26 = vpop.f32.mrb[1].mxu1  ;;  %v1830_v27 = vpop.f32.mrb[9].mxu0  ;;  %v10396_v23 = vld [vmem:[#allocation9 + $0x5a0] ss:$144 sps:$4 sm:$0xff]  }
 0x2c2   : > { %v2336_v29 = vrot.slane %v1830_v27, 1  ;;  %v1765_v30 = vpop.f32.mrb[2].mxu1  ;;  %v1832_v31 = vpop.f32.mrb[10].mxu0  ;;  %v10399_v27 = vld [vmem:[#allocation9 + $0x5a8] ss:$144 sps:$4 sm:$0xff]   ;;  %6540 = vmatpush1.bf16.msra.mxu0 %v10396_v23 }
 0x2c3   : > { %v12146_v34 = vadd.f32 %v2335_v25, %v1761_v42  ;;  %v2422_v35 = vrot.slane %v1832_v31, 1  ;;  %v1767_v36 = vpop.f32.mrb[3].mxu1  ;;  %v1834_v37 = vpop.f32.mrb[11].mxu0  ;;  %6589 = vmatpush1.bf16.msra.mxu1 %v10399_v27  ;;  %v10410_v23 = vld [vmem:[#allocation9 + $0x7e4] ss:$144 sps:$4 sm:$0xff]  }
 0x2c4   : > { %v12148_v39 = vadd.f32 %v2336_v29, %v1763_v26  ;;  %v2423_v40 = vrot.slane %v1834_v37, 1  ;;  %v10402_v37 = vld [vmem:[#allocation9 + $0x6c0] ss:$144 sps:$4 sm:$0xff]   ;;  %v10411_v27 = vld [vmem:[#allocation9 + $0x7e8] ss:$144 sps:$4 sm:$0xff]  }
 0x2c5   : > { %v12150_v21 = vadd.f32 %v2422_v35, %v1761_v42  ;;  %v12152_v43 = vadd.f32 %v2422_v35, %v1765_v30 }
 0x2c6   : > { %v12154_v45 = vadd.f32 %v2423_v40, %v1763_v26  ;;  %v12156_v48 = vadd.f32 %v2423_v40, %v1767_v36 }
 0x2c8   : > { %v1771_v49 = vpop.f32.mrb[4].mxu1  ;;  %v1838_v50 = vpop.f32.mrb[12].mxu0 }
 0x2c9   : > { %v2512_v51 = vrot.slane %v1838_v50, 1  ;;  %v1773_v52 = vpop.f32.mrb[5].mxu1  ;;  %v1840_v47 = vpop.f32.mrb[13].mxu0 }
 0x2ca   : > { %v2514_v53 = vrot.slane %v1840_v47, 1  ;;  %v1775_v54 = vpop.f32.mrb[6].mxu1  ;;  %v1842_v55 = vpop.f32.mrb[14].mxu0 }
 0x2cb   : > { %v2513_v56 = vsel %vm629_vm0, %v2422_v35, %v2512_v51  ;;  %v12159_v57 = vadd.f32 %v2512_v51, %v1771_v49  ;;  %v2610_v58 = vrot.slane %v1842_v55, 1  ;;  %v1777_v60 = vpop.f32.mrb[7].mxu1  ;;  %v1844_v61 = vpop.f32.mrb[15].mxu0  ;;  %v10404_v35 = vld [vmem:[#allocation9 + $0x6c4] ss:$144 sps:$4 sm:$0xff]  }
 0x2cc   : > { %v12161_v62 = vadd.f32 %v2513_v56, %v1765_v30  ;;  %v2515_v63 = vsel %vm629_vm0, %v2423_v40, %v2514_v53  ;;  %v12164_v2 = vadd.f32 %v2514_v53, %v1773_v52  ;;  %v2612_v3 = vrot.slane %v1844_v61, 1  ;;  %6541 = vmatprep.subr.bf16.mxu0 %v10404_v35 }
 0x2cd   : > { %v12166_v4 = vadd.f32 %v2515_v63, %v1767_v36  ;;  %v2611_v7 = vsel %vm629_vm0, %v2512_v51, %v2610_v58  ;;  %v12169_v8 = vadd.f32 %v2610_v58, %v1775_v54  ;;  %v10407_v36 = vld [vmem:[#allocation9 + $0x6cc] ss:$144 sps:$4 sm:$0xff]   ;;  %6542 = vmatpush1.bf16.msra.mxu0 %v10402_v37 }
 0x2ce   : > { %v12171_v0 = vadd.f32 %v2611_v7, %v1771_v49  ;;  %v2613_v10 = vsel %vm629_vm0, %v2514_v53, %v2612_v3  ;;  %v12174_v11 = vadd.f32 %v2612_v3, %v1777_v60  ;;  %6590 = vmatprep.subr.bf16.mxu1 %v10407_v36  ;;  %6543 = vmatprep.subr.bf16.mxu0 %v10410_v23 }
 0x2cf   : > { %v12176_v14 = vadd.f32 %v2613_v10, %v1773_v52  ;;  %6591 = vmatpush1.bf16.msra.mxu1 %v10405_v38 }
 0x2d0   : > { %v1781_v15 = vpop.f32.mrb[8].mxu1  ;;  %v1848_v16 = vpop.f32.mrb[16].mxu0 }
 0x2d1   : > { %v2704_v17 = vrot.slane %v1848_v16, 1  ;;  %v1783_v19 = vpop.f32.mrb[9].mxu1  ;;  %v1850_v5 = vpop.f32.mrb[17].mxu0 }
 0x2d2   : > { %v2706_v32 = vrot.slane %v1850_v5, 1  ;;  %v1785_v22 = vpop.f32.mrb[10].mxu1  ;;  %v1852_v42 = vpop.f32.mrb[18].mxu0 }
 0x2d3   : > { %v2705_v24 = vsel %vm629_vm0, %v2610_v58, %v2704_v17  ;;  %v12179_v46 = vadd.f32 %v2704_v17, %v1781_v15  ;;  %v1786_v25 = vpop.f32.mrb[11].mxu1  ;;  %v1853_v26 = vpop.f32.mrb[19].mxu0 }
 0x2d4   : > { %v12181_v29 = vadd.f32 %v2705_v24, %v1775_v54  ;;  %v2707_v30 = vsel %vm629_vm0, %v2612_v3, %v2706_v32  ;;  %v12184_v31 = vadd.f32 %v2706_v32, %v1783_v19  ;;  %v10413_v24 = vld [vmem:[#allocation9 + $0x7ec] ss:$144 sps:$4 sm:$0xff]  }
 0x2d5   : > { %v12186_v33 = vadd.f32 %v2707_v30, %v1777_v60  ;;  %6592 = vmatprep.subr.bf16.mxu1 %v10413_v24 }
 0x2d6   : > { %6593 = vmatpush1.bf16.msra.mxu1 %v10411_v27 }
 0x2d8   : > { %v1789_v40 = vpop.f32.mrb[12].mxu1  ;;  %v1856_v41 = vpop.f32.mrb[20].mxu0 }
 0x2d9   : > { %v1790_v18 = vpop.f32.mrb[13].mxu1  ;;  %v1857_v44 = vpop.f32.mrb[21].mxu0 }
 0x2da   : > { %v1791_v49 = vpop.f32.mrb[14].mxu1  ;;  %v1858_v50 = vpop.f32.mrb[22].mxu0 }
 0x2db   : > { %v1792_v51 = vpop.f32.mrb[15].mxu1  ;;  %v1859_v52 = vpop.f32.mrb[23].mxu0 }
 0x2dc   : > { %v10416_v51 = vld [vmem:[#allocation9 + $0x904] ss:$144 sps:$4 sm:$0xff]  }
 0x2e0   : > { %v1895_v47 = vpop.f32.mrb[16].mxu1  ;;  %v1962_v53 = vpop.f32.mrb[24].mxu0 }
 0x2e1   : > { %v2343_v54 = vrot.slane %v1895_v47, 2  ;;  %v1897_v55 = vpop.f32.mrb[17].mxu1  ;;  %v1964_v56 = vpop.f32.mrb[25].mxu0  ;;  %v2353_v3 = vrot.slane %v1962_v53, 7 }
 0x2e2   : > { %v2344_v58 = vrot.slane %v1897_v55, 2  ;;  %v1899_v60 = vpop.f32.mrb[18].mxu1  ;;  %v1966_v61 = vpop.f32.mrb[26].mxu0  ;;  %v2356_v59 = vrot.slane %v1964_v56, 7  ;;  %v10414_v55 = vld [vmem:[#allocation9 + $0x900] ss:$144 sps:$4 sm:$0xff]  }
 0x2e3   : > { %v2347_v63 = vadd.f32 %v2343_v54, %v12146_v34  ;;  %v2432_v7 = vrot.slane %v1899_v60, 2  ;;  %v2354_v6 = vrot.slane %v1966_v61, 7  ;;  %v1901_v9 = vpop.f32.mrb[19].mxu1  ;;  %v1968_v10 = vpop.f32.mrb[27].mxu0  ;;  %v10417_v56 = vld [vmem:[#allocation9 + $0x908] ss:$144 sps:$4 sm:$0xff]  }
 0x2e4   : > { %v2348_v12 = vadd.f32 %v2344_v58, %v12148_v39  ;;  %v2433_v15 = vrot.slane %v1901_v9, 2  ;;  %v2357_v16 = vrot.slane %v1968_v10, 7  ;;  %v10419_v61 = vld [vmem:[#allocation9 + $0x90c] ss:$144 sps:$4 sm:$0xff]  }
 0x2e5   : > { %v2436_v17 = vadd.f32 %v2432_v7, %v12150_v21  ;;  %v2438_v19 = vadd.f32 %v2432_v7, %v12152_v43  ;;  %v2355_v5 = vsel %vm685_vm2, %v2353_v3, %v2354_v6  ;;  %v10408_v43 = vld [vmem:[#allocation9 + $0x7e0] ss:$144 sps:$4 sm:$0xff]   ;;  %6594 = vmatprep.subr.bf16.mxu1 %v10419_v61  ;;  %v10434_v61 = vld [vmem:[#allocation9 + $0xc64] ss:$144 sps:$4 sm:$0xff]  }
 0x2e6   : > { %v2437_v20 = vadd.f32 %v2433_v15, %v12154_v45  ;;  %v2439_v34 = vadd.f32 %v2433_v15, %v12156_v48  ;;  %v12195_v32 = vadd.f32 %v2355_v5, %v2347_v63  ;;  %v2358_v22 = vsel %vm685_vm2, %v2356_v59, %v2357_v16  ;;  %6544 = vmatpush1.bf16.msra.mxu0 %v10408_v43 }
 0x2e7   : > { %v12198_v42 = vadd.f32 %v2436_v17, %v2354_v6  ;;  %v12200_v39 = vadd.f32 %v2358_v22, %v2348_v12  ;;  %6545 = vmatprep.subr.bf16.mxu0 %v10416_v51  ;;  %6595 = vmatpush1.bf16.msra.mxu1 %v10417_v56 }
 0x2e8   : > { %v1905_v25 = vpop.f32.mrb[20].mxu1  ;;  %v1972_v21 = vpop.f32.mrb[28].mxu0  ;;  %v12202_v26 = vadd.f32 %v2437_v20, %v2357_v16 }
 0x2e9   : > { %v2526_v28 = vrot.slane %v1905_v25, 2  ;;  %v2442_v45 = vrot.slane %v1972_v21, 7  ;;  %v1907_v30 = vpop.f32.mrb[21].mxu1  ;;  %v1974_v48 = vpop.f32.mrb[29].mxu0 }
 0x2ea   : > { %v2527_v35 = vrot.slane %v1907_v30, 2  ;;  %v2444_v36 = vrot.slane %v1974_v48, 7  ;;  %v1909_v37 = vpop.f32.mrb[22].mxu1  ;;  %v1976_v38 = vpop.f32.mrb[30].mxu0  ;;  %6546 = vmatpush1.bf16.msra.mxu0 %v10414_v55  ;;  %v10431_v55 = vld [vmem:[#allocation9 + $0xb4c] ss:$144 sps:$4 sm:$0xff]  }
 0x2eb   : > { %v2530_v40 = vadd.f32 %v2526_v28, %v12161_v62  ;;  %v2532_v41 = vadd.f32 %v2526_v28, %v12159_v57  ;;  %v2624_v18 = vrot.slane %v1909_v37, 2  ;;  %v2536_v44 = vrot.slane %v1976_v38, 7  ;;  %v1911_v49 = vpop.f32.mrb[23].mxu1  ;;  %v1978_v50 = vpop.f32.mrb[31].mxu0 }
 0x2ec   : > { %v2531_v52 = vadd.f32 %v2527_v35, %v12166_v4  ;;  %v2533_v47 = vadd.f32 %v2527_v35, %v12164_v2  ;;  %v2626_v53 = vrot.slane %v1911_v49, 2  ;;  %v2538_v54 = vrot.slane %v1978_v50, 7  ;;  %v10423_v50 = vld [vmem:[#allocation9 + $0xa28] ss:$144 sps:$4 sm:$0xff]  }
 0x2ed   : > { %v2625_v58 = vsel %vm647_vm1, %v2526_v28, %v2624_v18  ;;  %v2634_v60 = vadd.f32 %v2624_v18, %v12169_v8  ;;  %v2443_v62 = vsel %vm685_vm2, %v2354_v6, %v2442_v45  ;;  %v12211_v57 = vadd.f32 %v2530_v40, %v2442_v45 }
 0x2ee   : > { %v2627_v63 = vsel %vm647_vm1, %v2527_v35, %v2626_v53  ;;  %v2635_v4 = vadd.f32 %v2626_v53, %v12174_v11  ;;  %v12215_v3 = vadd.f32 %v2443_v62, %v2438_v19  ;;  %v2445_v2 = vsel %vm685_vm2, %v2357_v16, %v2444_v36  ;;  %v10429_v62 = vld [vmem:[#allocation9 + $0xb48] ss:$144 sps:$4 sm:$0xff]  }
 0x2ef   : > { %v12218_v7 = vadd.f32 %v2445_v2, %v2439_v34  ;;  %v12220_v9 = vadd.f32 %v2531_v52, %v2444_v36  ;;  %v2537_v8 = vsel %vm685_vm2, %v2442_v45, %v2536_v44  ;;  %v2632_v6 = vadd.f32 %v2625_v58, %v12171_v0  ;;  %v10435_v2 = vld [vmem:[#allocation9 + $0xc68] ss:$144 sps:$4 sm:$0xff]  }
 0x2f0   : > { %v1915_v10 = vpop.f32.mrb[24].mxu1  ;;  %v1982_v12 = vpop.f32.mrb[32].mxu0  ;;  %v12224_v59 = vadd.f32 %v2537_v8, %v2532_v41  ;;  %v2539_v11 = vsel %vm685_vm2, %v2444_v36, %v2538_v54  ;;  %v2633_v15 = vadd.f32 %v2627_v63, %v12176_v14  ;;  %v10437_v63 = vld [vmem:[#allocation9 + $0xc6c] ss:$144 sps:$4 sm:$0xff]  }
 0x2f1   : > { %v2718_v16 = vrot.slane %v1915_v10, 2  ;;  %v2638_v17 = vrot.slane %v1982_v12, 7  ;;  %v1917_v19 = vpop.f32.mrb[25].mxu1  ;;  %v1984_v5 = vpop.f32.mrb[33].mxu0  ;;  %v12228_v20 = vadd.f32 %v2632_v6, %v2536_v44  ;;  %v12230_v34 = vadd.f32 %v2539_v11, %v2533_v47 }
 0x2f2   : > { %v2720_v22 = vrot.slane %v1917_v19, 2  ;;  %v2640_v0 = vrot.slane %v1984_v5, 7  ;;  %v1919_v23 = vpop.f32.mrb[26].mxu1  ;;  %v1986_v24 = vpop.f32.mrb[34].mxu0  ;;  %v12232_v25 = vadd.f32 %v2633_v15, %v2538_v54 }
 0x2f3   : > { %v2719_v21 = vsel %vm647_vm1, %v2624_v18, %v2718_v16  ;;  %v2728_v43 = vadd.f32 %v2718_v16, %v12179_v46  ;;  %v1920_v14 = vpop.f32.mrb[27].mxu1  ;;  %v1987_v27 = vpop.f32.mrb[35].mxu0  ;;  %v2639_v28 = vsel %vm685_vm2, %v2536_v44, %v2638_v17  ;;  %v10422_v18 = vld [vmem:[#allocation9 + $0xa24] ss:$144 sps:$4 sm:$0xff]   ;;  %v10425_v44 = vld [vmem:[#allocation9 + $0xa2c] ss:$144 sps:$4 sm:$0xff]  }
 0x2f4   : > { %v2721_v45 = vsel %vm647_vm1, %v2626_v53, %v2720_v22  ;;  %v2729_v30 = vadd.f32 %v2720_v22, %v12184_v31  ;;  %v12239_v48 = vadd.f32 %v2639_v28, %v2634_v60  ;;  %v2726_v35 = vadd.f32 %v2719_v21, %v12181_v29  ;;  %v10420_v31 = vld [vmem:[#allocation9 + $0xa20] ss:$144 sps:$4 sm:$0xff]   ;;  %6547 = vmatprep.subr.bf16.mxu0 %v10422_v18  ;;  %v10440_v16 = vld [vmem:[#allocation9 + $0xd84] ss:$144 sps:$4 sm:$0xff]   ;;  %v10441_v27 = vld [vmem:[#allocation9 + $0xd88] ss:$144 sps:$4 sm:$0xff]  }
 0x2f5   : > { %v2641_v36 = vsel %vm685_vm2, %v2538_v54, %v2640_v0  ;;  %v2727_v37 = vadd.f32 %v2721_v45, %v12186_v33  ;;  %v12244_v38 = vadd.f32 %v2728_v43, %v2638_v17  ;;  %6596 = vmatprep.subr.bf16.mxu1 %v10425_v44  ;;  %6548 = vmatpush1.bf16.msra.mxu0 %v10420_v31  ;;  %v10428_v54 = vld [vmem:[#allocation9 + $0xb44] ss:$144 sps:$4 sm:$0xff]   ;;  %v10426_v60 = vld [vmem:[#allocation9 + $0xb40] ss:$144 sps:$4 sm:$0xff]  }
 0x2f6   : > { %v12246_v40 = vadd.f32 %v2726_v35, %v2638_v17  ;;  %v12248_v46 = vadd.f32 %v2641_v36, %v2635_v4  ;;  %v12250_v41 = vadd.f32 %v2729_v30, %v2640_v0  ;;  %6597 = vmatpush1.bf16.msra.mxu1 %v10423_v50  ;;  %6549 = vmatprep.subr.bf16.mxu0 %v10428_v54  ;;  %v10432_v4 = vld [vmem:[#allocation9 + $0xc60] ss:$144 sps:$4 sm:$0xff]   ;;  %v10443_v17 = vld [vmem:[#allocation9 + $0xd8c] ss:$144 sps:$4 sm:$0xff]   ;;  %v10447_v35 = vld [vmem:[#allocation9 + $0xea8] ss:$144 sps:$4 sm:$0xff]  }
 0x2f7   : > { %v12252_v49 = vadd.f32 %v2727_v37, %v2640_v0  ;;  %6598 = vmatprep.subr.bf16.mxu1 %v10431_v55  ;;  %v10438_v24 = vld [vmem:[#allocation9 + $0xd80] ss:$144 sps:$4 sm:$0xff]  }
 0x2f8   : > { %v1923_v51 = vpop.f32.mrb[28].mxu1  ;;  %v1990_v29 = vpop.f32.mrb[36].mxu0  ;;  %v10444_v30 = vld [vmem:[#allocation9 + $0xea0] ss:$144 sps:$4 sm:$0xff]  }
 0x2f9   : > { %v1924_v52 = vpop.f32.mrb[29].mxu1  ;;  %v1991_v33 = vpop.f32.mrb[37].mxu0  ;;  %6550 = vmatpush1.bf16.msra.mxu0 %v10426_v60 }
 0x2fa   : > { %v1925_v47 = vpop.f32.mrb[30].mxu1  ;;  %v1992_v53 = vpop.f32.mrb[38].mxu0  ;;  %6599 = vmatpush1.bf16.msra.mxu1 %v10429_v62  ;;  %6551 = vmatprep.subr.bf16.mxu0 %v10434_v61  ;;  %v10453_v61 = vld [vmem:[#allocation9 + $0xfc8] ss:$144 sps:$4 sm:$0xff]  }
 0x2fb   : > { %v1926_v56 = vpop.f32.mrb[31].mxu1  ;;  %v1993_v58 = vpop.f32.mrb[39].mxu0  ;;  %6600 = vmatprep.subr.bf16.mxu1 %v10437_v63  ;;  %v10455_v63 = vld [vmem:[#allocation9 + $0xfcc] ss:$144 sps:$4 sm:$0xff]  }
 0x2fc   : > { %v10450_v56 = vld [vmem:[#allocation9 + $0xfc0] ss:$144 sps:$4 sm:$0xff]   ;;  %v10452_v58 = vld [vmem:[#allocation9 + $0xfc4] ss:$144 sps:$4 sm:$0xff]  }
 0x2fd   : > { %6552 = vmatpush1.bf16.msra.mxu0 %v10432_v4 }
 0x2fe   : > { %6601 = vmatpush1.bf16.msra.mxu1 %v10435_v2  ;;  %6553 = vmatprep.subr.bf16.mxu0 %v10440_v16 }
 0x2ff   : > { %6602 = vmatprep.subr.bf16.mxu1 %v10443_v17 }
 0x300   : > { %v2029_v8 = vpop.f32.mrb[32].mxu1  ;;  %v2096_v6 = vpop.f32.mrb[40].mxu0 }
 0x301   : > { %v2030_v10 = vpop.f32.mrb[33].mxu1  ;;  %v2097_v12 = vpop.f32.mrb[41].mxu0  ;;  %6554 = vmatpush1.bf16.msra.mxu0 %v10438_v24  ;;  %v10458_v8 = vld [vmem:[#allocation9 + $0x10e4] ss:$144 sps:$4 sm:$0xff]   ;;  %v10461_v6 = vld [vmem:[#allocation9 + $0x10ec] ss:$144 sps:$4 sm:$0xff]  }
 0x302   : > { %v2031_v11 = vpop.f32.mrb[34].mxu1  ;;  %v2098_v15 = vpop.f32.mrb[42].mxu0  ;;  %6603 = vmatpush1.bf16.msra.mxu1 %v10441_v27 }
 0x303   : > { %v2363_v19 = vadd.f32 %v12195_v32, %v2031_v11  ;;  %v2454_v5 = vadd.f32 %v12198_v42, %v2031_v11  ;;  %v2367_v22 = vrot.slane %v2098_v15, 1  ;;  %v2033_v0 = vpop.f32.mrb[35].mxu1  ;;  %v2100_v23 = vpop.f32.mrb[43].mxu0  ;;  %v10446_v32 = vld [vmem:[#allocation9 + $0xea4] ss:$144 sps:$4 sm:$0xff]  }
 0x304   : > { %v2364_v21 = vadd.f32 %v12200_v39, %v2033_v0  ;;  %v2455_v43 = vadd.f32 %v12202_v26, %v2033_v0  ;;  %v2368_v14 = vrot.slane %v2100_v23, 1  ;;  %v10449_v42 = vld [vmem:[#allocation9 + $0xeac] ss:$144 sps:$4 sm:$0xff]   ;;  %6555 = vmatprep.subr.bf16.mxu0 %v10446_v32  ;;  %v10459_v15 = vld [vmem:[#allocation9 + $0x10e8] ss:$144 sps:$4 sm:$0xff]  }
 0x305   : > { %v12258_v28 = vadd.f32 %v2367_v22, %v2363_v19  ;;  %6604 = vmatprep.subr.bf16.mxu1 %v10449_v42  ;;  %6556 = vmatpush1.bf16.msra.mxu0 %v10444_v30  ;;  %v10464_v32 = vld [vmem:[#allocation9 + $0x14] ss:$144 sps:$4 sm:$0xff]  }
 0x306   : > { %v12260_v45 = vadd.f32 %v2368_v14, %v2364_v21  ;;  %6605 = vmatpush1.bf16.msra.mxu1 %v10447_v35  ;;  %6557 = vmatprep.subr.bf16.mxu0 %v10452_v58 }
 0x307   : > { %6606 = vmatprep.subr.bf16.mxu1 %v10455_v63 }
 0x308   : > { %v2037_v36 = vpop.f32.mrb[36].mxu1  ;;  %v2104_v37 = vpop.f32.mrb[44].mxu0 }
 0x309   : > { %v2456_v39 = vadd.f32 %v12215_v3, %v2037_v36  ;;  %v2548_v26 = vadd.f32 %v12211_v57, %v2037_v36  ;;  %v2460_v18 = vrot.slane %v2104_v37, 1  ;;  %v2039_v44 = vpop.f32.mrb[37].mxu1  ;;  %v2106_v31 = vpop.f32.mrb[45].mxu0  ;;  %6558 = vmatpush1.bf16.msra.mxu0 %v10450_v56 }
 0x30a   : > { %v2457_v50 = vadd.f32 %v12218_v7, %v2039_v44  ;;  %v2549_v51 = vadd.f32 %v12220_v9, %v2039_v44  ;;  %v2461_v29 = vrot.slane %v2106_v31, 1  ;;  %v2041_v52 = vpop.f32.mrb[38].mxu1  ;;  %v2108_v33 = vpop.f32.mrb[46].mxu0  ;;  %6607 = vmatpush1.bf16.msra.mxu1 %v10453_v61  ;;  %6559 = vmatprep.subr.bf16.mxu0 %v10458_v8 }
 0x30b   : > { %v12266_v47 = vadd.f32 %v2460_v18, %v2454_v5  ;;  %v12268_v53 = vadd.f32 %v2460_v18, %v2456_v39  ;;  %v2550_v3 = vadd.f32 %v12224_v59, %v2041_v52  ;;  %v2650_v57 = vadd.f32 %v12228_v20, %v2041_v52  ;;  %v2043_v54 = vpop.f32.mrb[39].mxu1  ;;  %v2110_v55 = vpop.f32.mrb[47].mxu0  ;;  %6608 = vmatprep.subr.bf16.mxu1 %v10461_v6 }
 0x30c   : > { %v12272_v60 = vadd.f32 %v2461_v29, %v2455_v43  ;;  %v12274_v7 = vadd.f32 %v2461_v29, %v2457_v50  ;;  %v2554_v9 = vrot.slane %v2108_v33, 1  ;;  %v2551_v62 = vadd.f32 %v12230_v34, %v2043_v54  ;;  %v10456_v34 = vld [vmem:[#allocation9 + $0x10e0] ss:$144 sps:$4 sm:$0xff]  }
 0x30d   : > { %v2651_v4 = vadd.f32 %v12232_v25, %v2043_v54  ;;  %v2556_v2 = vrot.slane %v2110_v55, 1  ;;  %6560 = vmatpush1.bf16.msra.mxu0 %v10456_v34 }
 0x30e   : > { %v2555_v59 = vsel %vm629_vm0, %v2460_v18, %v2554_v9  ;;  %v12279_v20 = vadd.f32 %v2554_v9, %v2550_v3  ;;  %6609 = vmatpush1.bf16.msra.mxu1 %v10459_v15  ;;  %6627 = vmatprep.subr.bf16.mxu0 %v10464_v32 }
 0x30f   : > { %v12281_v10 = vadd.f32 %v2555_v59, %v2548_v26  ;;  %v2557_v12 = vsel %vm629_vm0, %v2461_v29, %v2556_v2  ;;  %v12284_v11 = vadd.f32 %v2556_v2, %v2551_v62  ;;  %v10467_v26 = vld [vmem:[#allocation9 + $0x1c] ss:$144 sps:$4 sm:$0xff]  }
 0x310   : > { %v12286_v25 = vadd.f32 %v2557_v12, %v2549_v51  ;;  %v2047_v16 = vpop.f32.mrb[40].mxu1  ;;  %v2114_v17 = vpop.f32.mrb[48].mxu0  ;;  %6676 = vmatprep.subr.bf16.mxu1 %v10467_v26 }
 0x311   : > { %v2652_v19 = vadd.f32 %v12239_v48, %v2047_v16  ;;  %v2736_v5 = vadd.f32 %v12246_v40, %v2047_v16  ;;  %v2656_v22 = vrot.slane %v2114_v17, 1  ;;  %v2049_v0 = vpop.f32.mrb[41].mxu1  ;;  %v2116_v23 = vpop.f32.mrb[49].mxu0 }
 0x312   : > { %v2653_v24 = vadd.f32 %v12248_v46, %v2049_v0  ;;  %v2737_v21 = vadd.f32 %v12252_v49, %v2049_v0  ;;  %v2658_v43 = vrot.slane %v2116_v23, 1  ;;  %v2051_v14 = vpop.f32.mrb[42].mxu1  ;;  %v2118_v27 = vpop.f32.mrb[50].mxu0 }
 0x313   : > { %v2657_v42 = vsel %vm629_vm0, %v2554_v9, %v2656_v22  ;;  %v12293_v30 = vadd.f32 %v2656_v22, %v2652_v19  ;;  %v2738_v48 = vadd.f32 %v12244_v38, %v2051_v14  ;;  %v2742_v35 = vrot.slane %v2118_v27, 1  ;;  %v2053_v40 = vpop.f32.mrb[43].mxu1  ;;  %v2120_v36 = vpop.f32.mrb[51].mxu0 }
 0x314   : > { %v12296_v37 = vadd.f32 %v2657_v42, %v2650_v57  ;;  %v2659_v46 = vsel %vm629_vm0, %v2556_v2, %v2658_v43  ;;  %v12299_v49 = vadd.f32 %v2658_v43, %v2653_v24  ;;  %v2739_v39 = vadd.f32 %v12250_v41, %v2053_v40 }
 0x315   : > { %v12302_v18 = vadd.f32 %v2659_v46, %v2651_v4  ;;  %v2743_v44 = vsel %vm629_vm0, %v2656_v22, %v2742_v35  ;;  %v12305_v31 = vadd.f32 %v2742_v35, %v2738_v48  ;;  %v2744_v38 = vrot.slane %v2120_v36, 1 }
 0x316   : > { %v12307_v50 = vadd.f32 %v2743_v44, %v2736_v5 }
 0x317   : > { %v2745_v51 = vsel %vm629_vm0, %v2658_v43, %v2744_v38  ;;  %v12310_v29 = vadd.f32 %v2744_v38, %v2739_v39 }
 0x318   : > { %v2057_v52 = vpop.f32.mrb[44].mxu1  ;;  %v2124_v33 = vpop.f32.mrb[52].mxu0  ;;  %v12312_v3 = vadd.f32 %v2745_v51, %v2737_v21 }
 0x319   : > { %v2058_v41 = vpop.f32.mrb[45].mxu1  ;;  %v2125_v57 = vpop.f32.mrb[53].mxu0 }
 0x31a   : > { %v2059_v54 = vpop.f32.mrb[46].mxu1  ;;  %v2126_v55 = vpop.f32.mrb[54].mxu0 }
 0x31b   : > { %v2060_v56 = vpop.f32.mrb[47].mxu1  ;;  %v2127_v58 = vpop.f32.mrb[55].mxu0 }
 0x320   : > { %v2163_v9 = vpop.f32.mrb[48].mxu1  ;;  %v2230_v62 = vpop.f32.mrb[56].mxu0 }
 0x321   : > { %v2164_v61 = vpop.f32.mrb[49].mxu1  ;;  %v2231_v63 = vpop.f32.mrb[57].mxu0 }
 0x322   : > { %v2165_v4 = vpop.f32.mrb[50].mxu1  ;;  %v2232_v2 = vpop.f32.mrb[58].mxu0 }
 0x323   : > { %v2167_v59 = vpop.f32.mrb[51].mxu1  ;;  %v2234_v8 = vpop.f32.mrb[59].mxu0  ;;  %v2377_v34 = vrot.slane %v2165_v4, 6  ;;  %v2391_v15 = vrot.slane %v2232_v2, 7 }
 0x324   : > { %v2380_v22 = vrot.slane %v2167_v59, 6  ;;  %v2394_v0 = vrot.slane %v2234_v8, 7 }
 0x328   : > { %v2171_v6 = vpop.f32.mrb[52].mxu1  ;;  %v2238_v12 = vpop.f32.mrb[60].mxu0 }
 0x329   : > { %v2378_v16 = vrot.slane %v2171_v6, 6  ;;  %v2392_v17 = vrot.slane %v2238_v12, 7  ;;  %v2173_v19 = vpop.f32.mrb[53].mxu1  ;;  %v2240_v5 = vpop.f32.mrb[61].mxu0 }
 0x32a   : > { %v2381_v23 = vrot.slane %v2173_v19, 6  ;;  %v2395_v24 = vrot.slane %v2240_v5, 7  ;;  %v2175_v21 = vpop.f32.mrb[54].mxu1  ;;  %v2242_v43 = vpop.f32.mrb[62].mxu0 }
 0x32b   : > { %v2379_v14 = vsel %vm693_vm3, %v2377_v34, %v2378_v16  ;;  %v2478_v27 = vadd.f32 %v12266_v47, %v2378_v16  ;;  %v2470_v32 = vrot.slane %v2175_v21, 6  ;;  %v2484_v42 = vrot.slane %v2242_v43, 7  ;;  %v2177_v48 = vpop.f32.mrb[55].mxu1  ;;  %v2244_v35 = vpop.f32.mrb[63].mxu0 }
 0x32c   : > { %v2382_v40 = vsel %vm693_vm3, %v2380_v22, %v2381_v23  ;;  %v2479_v36 = vadd.f32 %v12272_v60, %v2381_v23  ;;  %v2472_v46 = vrot.slane %v2177_v48, 6  ;;  %v2486_v39 = vrot.slane %v2244_v35, 7 }
 0x32d   : > { %v2471_v26 = vsel %vm693_vm3, %v2378_v16, %v2470_v32  ;;  %v2576_v44 = vadd.f32 %v12281_v10, %v2470_v32  ;;  %v2385_v38 = vadd.f32 %v2379_v14, %v12258_v28  ;;  %v2393_v51 = vsel %vm685_vm2, %v2391_v15, %v2392_v17 }
 0x32e   : > { %v2473_v47 = vsel %vm693_vm3, %v2381_v23, %v2472_v46  ;;  %v2577_v52 = vadd.f32 %v12286_v25, %v2472_v46  ;;  %v12324_v33 = vadd.f32 %v2478_v27, %v2392_v17  ;;  %v2386_v41 = vadd.f32 %v2382_v40, %v12260_v45 }
 0x32f   : > { %v12327_v57 = vadd.f32 %v2393_v51, %v2385_v38  ;;  %v2396_v60 = vsel %vm685_vm2, %v2394_v0, %v2395_v24  ;;  %v12330_v54 = vadd.f32 %v2479_v36, %v2395_v24  ;;  %v2480_v10 = vadd.f32 %v2471_v26, %v12268_v53 }
 0x330   : > { %v2181_v55 = vpop.f32.mrb[56].mxu1  ;;  %v2248_v28 = vpop.f32.mrb[64].mxu0  ;;  %v12333_v56 = vadd.f32 %v2396_v60, %v2386_v41  ;;  %v2485_v58 = vsel %vm685_vm2, %v2392_v17, %v2484_v42  ;;  %v12336_v9 = vadd.f32 %v2576_v44, %v2484_v42  ;;  %v2481_v25 = vadd.f32 %v2473_v47, %v12274_v7 }
 0x331   : > { %v2568_v62 = vrot.slane %v2181_v55, 6  ;;  %v2582_v45 = vrot.slane %v2248_v28, 7  ;;  %v2183_v61 = vpop.f32.mrb[57].mxu1  ;;  %v2250_v63 = vpop.f32.mrb[65].mxu0  ;;  %v12339_v4 = vadd.f32 %v2485_v58, %v2480_v10  ;;  %v2487_v2 = vsel %vm685_vm2, %v2395_v24, %v2486_v39 }
 0x332   : > { %v2570_v59 = vrot.slane %v2183_v61, 6  ;;  %v2584_v53 = vrot.slane %v2250_v63, 7  ;;  %v2185_v8 = vpop.f32.mrb[58].mxu1  ;;  %v2252_v6 = vpop.f32.mrb[66].mxu0  ;;  %v12342_v12 = vadd.f32 %v2487_v2, %v2481_v25  ;;  %v12344_v34 = vadd.f32 %v2577_v52, %v2486_v39  ;;  %v2330_v61 = vld [vmem:[#allocation7] sm:$0x3] }
 0x333   : > { %v2569_v15 = vsel %vm693_vm3, %v2470_v32, %v2568_v62  ;;  %v2670_v7 = vadd.f32 %v12296_v37, %v2568_v62  ;;  %v2672_v16 = vadd.f32 %v12293_v30, %v2568_v62  ;;  %v2756_v17 = vrot.slane %v2185_v8, 6  ;;  %v2187_v19 = vpop.f32.mrb[59].mxu1  ;;  %v2254_v5 = vpop.f32.mrb[67].mxu0 }
 0x334   : > { %v2571_v22 = vsel %vm693_vm3, %v2472_v46, %v2570_v59  ;;  %v2671_v0 = vadd.f32 %v12302_v18, %v2570_v59  ;;  %v2673_v23 = vadd.f32 %v12299_v49, %v2570_v59  ;;  %v2676_v24 = vrot.slane %v2252_v6, 7 }
 0x335   : > { %v2760_v21 = vadd.f32 %v2756_v17, %v12307_v50  ;;  %v2762_v43 = vadd.f32 %v2756_v17, %v12305_v31  ;;  %v2757_v14 = vrot.slane %v2187_v19, 6  ;;  %v2678_v27 = vrot.slane %v2254_v5, 7 }
 0x336   : > { %v2578_v37 = vadd.f32 %v2569_v15, %v12279_v20  ;;  %v2583_v30 = vsel %vm685_vm2, %v2484_v42, %v2582_v45  ;;  %v12356_v32 = vadd.f32 %v2670_v7, %v2582_v45  ;;  %v2579_v48 = vadd.f32 %v2571_v22, %v12284_v11 }
 0x337   : > { %v2761_v35 = vadd.f32 %v2757_v14, %v12312_v3  ;;  %v2763_v18 = vadd.f32 %v2757_v14, %v12310_v29  ;;  %v2585_v49 = vsel %vm685_vm2, %v2486_v39, %v2584_v53  ;;  %v12362_v40 = vadd.f32 %v2671_v0, %v2584_v53 }
 0x338   : > { %v2191_v50 = vpop.f32.mrb[60].mxu1  ;;  %v12364_v31 = vadd.f32 %v2583_v30, %v2578_v37  ;;  %v12366_v36 = vadd.f32 %v2585_v49, %v2579_v48  ;;  %v2677_v20 = vsel %vm685_vm2, %v2582_v45, %v2676_v24  ;;  %v12369_v42 = vadd.f32 %v2760_v21, %v2676_v24  ;;  %v2258_v46 = vpop.f32.mrb[68].mxu0 }
 0x339   : > { %v2192_v26 = vpop.f32.mrb[61].mxu1  ;;  %v12371_v11 = vadd.f32 %v2677_v20, %v2672_v16  ;;  %v2679_v3 = vsel %vm685_vm2, %v2584_v53, %v2678_v27  ;;  %v12374_v29 = vadd.f32 %v2761_v35, %v2678_v27  ;;  %v12376_v39 = vadd.f32 %v2762_v43, %v2676_v24  ;;  %v2259_v44 = vpop.f32.mrb[69].mxu0 }
 0x33a   : > { %v2193_v38 = vpop.f32.mrb[62].mxu1  ;;  %v12378_v51 = vadd.f32 %v2679_v3, %v2673_v23  ;;  %v12380_v47 = vadd.f32 %v2763_v18, %v2678_v27  ;;  %v2260_v52 = vpop.f32.mrb[70].mxu0  ;;  %v2404_v60 = vlaneseq }
 0x33b   : > { %v2194_v41 = vpop.f32.mrb[63].mxu1  ;;  %v2261_v10 = vpop.f32.mrb[71].mxu0 }
 0x33c   : > { %v12382_v55 = vshrl.u32 %v2404_v60, 7 }
 0x33e   : > { %v12385_v45 = vsub.s32 0, %v12382_v55  ;;  %v12388_v63 = vsub.s32 1, %v12382_v55 }
 0x340   : > { %v2297_v28 = vpop.f32.mrb[64].mxu1  ;;  %v12391_v2 = vrot.slane %v2330_v61, %v12385_v45  ;;  %v12394_v53 = vrot.slane %v2330_v61, %v12388_v63 }
 0x341   : > { %v2298_v58 = vpop.f32.mrb[65].mxu1 }
 0x342   : > { %v2299_v25 = vpop.f32.mrb[66].mxu1 }
 0x343   : > { %v2300_v62 = vpop.f32.mrb[67].mxu1 }
 0x348   : > { %v2303_v59 = vpop.f32.mrb[68].mxu1 }
 0x349   : > { %v2401_v8 = vadd.f32 %v12327_v57, %v2303_v59  ;;  %v2496_v6 = vadd.f32 %v12324_v33, %v2303_v59  ;;  %v2305_v15 = vpop.f32.mrb[69].mxu1 }
 0x34a   : > { %v2402_v7 = vadd.f32 %v12333_v56, %v2305_v15  ;;  %v2497_v16 = vadd.f32 %v12330_v54, %v2305_v15  ;;  %v2307_v17 = vpop.f32.mrb[70].mxu1 }
 0x34b   : > { %v2414_v19 = vadd.f32 %v12391_v2, %v2401_v8  ;;  %v2500_v5 = vadd.f32 %v2496_v6, %v12391_v2  ;;  %v2498_v22 = vadd.f32 %v12339_v4, %v2307_v17  ;;  %v2594_v0 = vadd.f32 %v12336_v9, %v2307_v17  ;;  %v2309_v23 = vpop.f32.mrb[71].mxu1 }
 0x34c   : > { %v2415_v24 = vadd.f32 %v12394_v53, %v2402_v7  ;;  %v2501_v57 = vadd.f32 %v2497_v16, %v12394_v53  ;;  %v2499_v33 = vadd.f32 %v12342_v12, %v2309_v23  ;;  %v2595_v56 = vadd.f32 %v12344_v34, %v2309_v23 }
 0x34d   : > { %v2416_v21 = vmax.f32 %v2414_v19, 0.0  ;;  %v2502_v54 = vadd.f32 %v2498_v22, %v12391_v2  ;;  %v12410_v43 = vadd.f32 %v2594_v0, %v12391_v2  ;;  %v2504_v27 = vmax.f32 %v2500_v5, 0.0 }
 0x34e   : > { %v2417_v14 = vmax.f32 %v2415_v24, 0.0  ;;  %v2503_v4 = vadd.f32 %v2499_v33, %v12394_v53  ;;  %v12414_v9 = vadd.f32 %v2595_v56, %v12394_v53  ;;  %v2505_v35 = vmax.f32 %v2501_v57, 0.0 }
 0x34f   : > { %v2784_v37 = vrot.slane %v2416_v21, 1  ;;  %v2506_v30 = vmax.f32 %v2502_v54, 0.0  ;;  %v2602_v48 = vmax.f32 %v12410_v43, 0.0  ;;  %v2790_v12 = vrot.slane %v2416_v21, 2 }
 0x350   : > { %v2785_v34 = vrot.slane %v2417_v14, 1  ;;  %v2507_v18 = vmax.f32 %v2503_v4, 0.0  ;;  %v2313_v49 = vpop.f32.mrb[72].mxu1  ;;  %v2791_v20 = vrot.slane %v2417_v14, 2  ;;  %v2603_v26 = vmax.f32 %v12414_v9, 0.0 }
 0x351   : > { %v2788_v50 = vmax.f32 %v2416_v21, %v2784_v37  ;;  %v2798_v46 = vrot.slane %v2506_v30, 1  ;;  %v2315_v3 = vpop.f32.mrb[73].mxu1  ;;  %v2806_v38 = vrot.slane %v2506_v30, 2  ;;  %v2818_v52 = vrot.slane %v2602_v48, 1 }
 0x352   : > { %v2789_v44 = vmax.f32 %v2417_v14, %v2785_v34  ;;  %v2799_v41 = vrot.slane %v2507_v18, 1  ;;  %v2317_v60 = vpop.f32.mrb[74].mxu1  ;;  %v2807_v58 = vrot.slane %v2507_v18, 2  ;;  %v2596_v25 = vadd.f32 %v12364_v31, %v2313_v49 }
 0x353   : > { %v2802_v10 = vmax.f32 %v2504_v27, %v2798_v46  ;;  %v2804_v28 = vmax.f32 %v2506_v30, %v2798_v46  ;;  %v2319_v62 = vpop.f32.mrb[75].mxu1  ;;  %v12419_v61 = vmax.f32 %v2788_v50, %v2790_v12  ;;  %v2688_v6 = vadd.f32 %v12356_v32, %v2313_v49 }
 0x354   : > { %v2803_v59 = vmax.f32 %v2505_v35, %v2799_v41  ;;  %v2805_v8 = vmax.f32 %v2507_v18, %v2799_v41  ;;  %v2600_v16 = vadd.f32 %v2596_v25, %v12391_v2  ;;  %v2597_v17 = vadd.f32 %v12366_v36, %v2315_v3 }
 0x355   : > { %v2810_v15 = vmax.f32 %v2802_v10, %v2806_v38  ;;  %v12422_v7 = vmax.f32 %v2804_v28, %v2806_v38  ;;  %v2692_v31 = vadd.f32 %v2688_v6, %v12391_v2  ;;  %v2689_v22 = vadd.f32 %v12362_v40, %v2315_v3 }
 0x356   : > { %v12426_v19 = vmax.f32 %v2803_v59, %v2807_v58  ;;  %v12428_v5 = vmax.f32 %v2805_v8, %v2807_v58  ;;  %v2604_v24 = vmax.f32 %v2600_v16, 0.0  ;;  %v2601_v32 = vadd.f32 %v2597_v17, %v12394_v53 }
 0x357   : > { %v2888_v0 = vrot.slane %v2810_v15, 7  ;;  %v2889_v23 = vrot.slane %v12422_v7, 7  ;;  %v2795_v57 = vmax.f32 %v2789_v44, %v2791_v20  ;;  %v12436_v36 = vmax.f32 %v2692_v31, 0.0 }
 0x358   : > { %v2891_v33 = vrot.slane %v12426_v19, 7  ;;  %v2892_v56 = vrot.slane %v12428_v5, 7  ;;  %v12438_v21 = vpop.f32.mrb[76].mxu1  ;;  %v2819_v43 = vrot.slane %v2604_v24, 1  ;;  %v2605_v14 = vmax.f32 %v2601_v32, 0.0 }
 0x359   : > { %v2890_v54 = vsel %vm685_vm2, %v2888_v0, %v2889_v23  ;;  %v2693_v40 = vadd.f32 %v2689_v22, %v12394_v53  ;;  %v12442_v4 = vpop.f32.mrb[77].mxu1  ;;  %v2821_v27 = vrot.slane %v2603_v26, 1  ;;  %v2832_v18 = vrot.slane %v2604_v24, 2 }
 0x35a   : > { %v2896_v9 = vmax.f32 %v12419_v61, %v2890_v54  ;;  %v2893_v37 = vsel %vm685_vm2, %v2891_v33, %v2892_v56  ;;  %v2327_v30 = vpop.f32.mrb[78].mxu1  ;;  %v2820_v35 = vsel %vm629_vm0, %v2818_v52, %v2819_v43  ;;  %v2830_v34 = vmax.f32 %v2604_v24, %v2819_v43 }
 0x35b   : > { %v2897_v12 = vmax.f32 %v2795_v57, %v2893_v37  ;;  %v2328_v49 = vpop.f32.mrb[79].mxu1  ;;  %v2828_v50 = vmax.f32 %v2602_v48, %v2820_v35  ;;  %v2844_v20 = vrot.slane %v12436_v36, 1  ;;  %v2822_v46 = vrot.slane %v2605_v14, 1 }
 0x35c   : > { %v2690_v3 = vadd.f32 %v12371_v11, %v2317_v60  ;;  %v12449_v44 = vmax.f32 %v2830_v34, %v2832_v18  ;;  %v12451_v38 = vmax.f32 %v2693_v40, 0.0  ;;  %v2833_v41 = vrot.slane %v2605_v14, 2 }
 0x35d   : > { %v2770_v10 = vadd.f32 %v12369_v42, %v2317_v60  ;;  %v12454_v28 = vmax.f32 %v2828_v50, %v2832_v18  ;;  %v2823_v52 = vsel %vm629_vm0, %v2821_v27, %v2822_v46  ;;  %v2831_v58 = vmax.f32 %v2605_v14, %v2822_v46 }
 0x35e   : > { %v2694_v25 = vadd.f32 %v2690_v3, %v12391_v2  ;;  %v2903_v48 = vrot.slane %v12449_v44, 6  ;;  %v2914_v61 = vrot.slane %v12449_v44, 7  ;;  %v2829_v59 = vmax.f32 %v2603_v26, %v2823_v52 }
 0x35f   : > { %v2774_v11 = vadd.f32 %v2770_v10, %v12391_v2  ;;  %v2902_v8 = vrot.slane %v12454_v28, 6  ;;  %v2912_v6 = vrot.slane %v12454_v28, 7  ;;  %v12463_v16 = vmax.f32 %v2831_v58, %v2833_v41 }
 0x360   : > { %v2698_v42 = vmax.f32 %v2694_v25, 0.0  ;;  %v2854_v60 = vrot.slane %v12436_v36, 2  ;;  %v12466_v17 = vmax.f32 %v2829_v59, %v2833_v41  ;;  %v2691_v31 = vadd.f32 %v12378_v51, %v2319_v62 }
 0x361   : > { %v2771_v22 = vadd.f32 %v12374_v29, %v2319_v62  ;;  %v2904_v0 = vsel %vm693_vm3, %v2902_v8, %v2903_v48  ;;  %v2922_v26 = vmax.f32 %v2810_v15, %v2912_v6  ;;  %v2906_v23 = vrot.slane %v12463_v16, 6 }
 0x362   : > { %v12472_v24 = vmax.f32 %v2774_v11, 0.0  ;;  %v2910_v32 = vmax.f32 %v2896_v9, %v2904_v0  ;;  %v2905_v57 = vrot.slane %v12466_v17, 6  ;;  %v2913_v33 = vrot.slane %v12466_v17, 7 }
 0x363   : > { %v2845_v56 = vrot.slane %v2698_v42, 1  ;;  %v2847_v54 = vrot.slane %v12451_v38, 1  ;;  %v2916_v43 = vrot.slane %v12463_v16, 7  ;;  %v2855_v51 = vrot.slane %v2698_v42, 2 }
 0x364   : > { %v2915_v29 = vsel %vm685_vm2, %v2912_v6, %v2914_v61  ;;  %v2954_v62 = vpack.c.bf16 %v2910_v32, %v2910_v32  ;;  %v2907_v15 = vsel %vm693_vm3, %v2905_v57, %v2906_v23  ;;  %v2923_v14 = vmax.f32 %v12426_v19, %v2913_v33 }
 0x365   : > { %v2846_v40 = vsel %vm629_vm0, %v2844_v20, %v2845_v56  ;;  %v2857_v9 = vrot.slane %v12451_v38, 2  ;;  %v2911_v27 = vmax.f32 %v2897_v12, %v2907_v15  ;;  %v2856_v30 = vsel %vm647_vm1, %v2854_v60, %v2855_v51 }
 0x366   : > { %v2852_v37 = vmax.f32 %v12436_v36, %v2846_v40  ;;  %v2957_v35 = vshrl.u32 %v2954_v62, 16  ;;  %v2866_v34 = vrot.slane %v12472_v24, 1  ;;  %v2924_v18 = vmax.f32 %v12422_v7, %v2915_v29 }
 0x367   : > { %v2695_v49 = vadd.f32 %v2691_v31, %v12394_v53  ;;  %v2960_v50 = vshll.u32 %v2954_v62, 16  ;;  %v2955_v46 = vpack.c.bf16 %v2911_v27, %v2911_v27  ;;  %v2917_v19 = vsel %vm685_vm2, %v2913_v33, %v2916_v43 }
 0x368   : > { %v2862_v3 = vmax.f32 %v2852_v37, %v2856_v30  ;;  %v2959_v20 = vrot.slane %v2957_v35, 7  ;;  %v2925_v12 = vmax.f32 %v12428_v5, %v2917_v19  ;;  %v2772_v36 = vadd.f32 %v12376_v39, %v12438_v21 }
 0x369   : > { %v2699_v41 = vmax.f32 %v2695_v49, 0.0  ;;  %v2964_v10 = vshrl.u32 %v2955_v46, 16  ;;  %v2874_v52 = vrot.slane %v12472_v24, 2  ;;  %v2775_v7 = vadd.f32 %v2771_v22, %v12394_v53 }
 0x36a   : > { %v2928_v58 = vrot.slane %v2862_v3, 6  ;;  %v2962_v25 = vor.u32 %v2960_v50, %v2959_v20  ;;  %v2967_v48 = vshll.u32 %v2955_v46, 16  ;;  %v2776_v42 = vadd.f32 %v2772_v36, %v12391_v2 }
 0x36b   : > { %v2848_v61 = vrot.slane %v2699_v41, 1  ;;  %v2858_v59 = vrot.slane %v2699_v41, 2  ;;  %v2966_v11 = vrot.slane %v2964_v10, 7  ;;  %v2936_v60 = vrot.slane %v2862_v3, 7 }
 0x36c   : > { %v2932_v8 = vmax.f32 %v2922_v26, %v2928_v58  ;;  %v2934_v6 = vmax.f32 %v2924_v18, %v2928_v58  ;;  %v2972_v5 = vsel %vm12008_vm5, 0, %v2962_v25  ;;  %v2870_v26 = vmax.f32 %v12472_v24, %v2866_v34 }
 0x36d   : > { %v2849_v39 = vsel %vm629_vm0, %v2847_v54, %v2848_v61  ;;  %v2859_v21 = vsel %vm647_vm1, %v2857_v9, %v2858_v59  ;;  %v2975_v31 = vsel %vm693_vm3, %v2972_v5, 0  ;;  %v2969_v22 = vor.u32 %v2967_v48, %v2966_v11 }
 0x36e   : > { %v2978_v0 = vpack.c.bf16 %v2934_v6, %v2932_v8  ;;  %v2853_v23 = vmax.f32 %v12451_v38, %v2849_v39  ;;  %v3018_v32 = vshrl.u32 %v2975_v31, 16  ;;  %v3021_v57 = vshll.u32 %v2975_v31, 16 }
 0x36f   : > { %v2779_v33 = vmax.f32 %v2775_v7, 0.0  ;;  %v2973_v2 = vsel %vm12008_vm5, 0, %v2969_v22  ;;  %v2780_v51 = vmax.f32 %v2776_v42, 0.0  ;;  %v2940_v15 = vmax.f32 %v12454_v28, %v2936_v60 }
 0x370   : > { %v2982_v56 = vrot.slane %v2978_v0, 3  ;;  %v2863_v43 = vmax.f32 %v2853_v23, %v2859_v21  ;;  %v3020_v54 = vrot.slane %v3018_v32, 5  ;;  %v3023_v29 = vrot.slane %v3021_v57, 6 }
 0x371   : > { %v2977_v62 = vsel %vm693_vm3, %v2973_v2, 0  ;;  %v2875_v35 = vrot.slane %v2780_v51, 2  ;;  %v2942_v19 = vmax.f32 %v12449_v44, %v2936_v60  ;;  %v2773_v36 = vadd.f32 %v12380_v47, %v12442_v4 }
 0x372   : > { %v3025_v40 = vshrl.u32 %v2977_v62, 16  ;;  %v3028_v9 = vshll.u32 %v2977_v62, 16  ;;  %v2986_v38 = vsel %vm12008_vm5, 0, %v2982_v56  ;;  %v2929_v27 = vrot.slane %v2863_v43, 6  ;;  %v10533_v56 = vld [vmem:[#allocation9 + $0xc7c] ss:$144 sps:$4 sm:$0xff]  }
 0x373   : > { %v2989_v24 = vsel %vm693_vm3, %v2986_v38, 0  ;;  %v3024_v37 = vor.u32 %v3023_v29, %v3020_v54  ;;  %v2937_v30 = vrot.slane %v2863_v43, 7  ;;  %v2876_v28 = vsel %vm647_vm1, %v2874_v52, %v2875_v35  ;;  %v10465_v35 = vld [vmem:[#allocation9 + $0x18] ss:$144 sps:$4 sm:$0xff]  }
 0x374   : > { %v3027_v34 = vrot.slane %v3025_v40, 5  ;;  %v3030_v18 = vrot.slane %v3028_v9, 6  ;;  %v3036_v49 = vrot.slane %v2989_v24, 3  ;;  %v2933_v50 = vmax.f32 %v2923_v14, %v2929_v27 }
 0x375   : > { %v3052_v46 = vsel %vm12046_vm12, 0, %v3024_v37  ;;  %v2935_v3 = vmax.f32 %v2925_v12, %v2929_v27  ;;  %v2882_v41 = vmax.f32 %v2870_v26, %v2876_v28  ;;  %v2941_v58 = vmax.f32 %v12466_v17, %v2937_v30  ;;  %v10476_v28 = vld [vmem:[#allocation9 + $0x254] ss:$144 sps:$4 sm:$0xff]  }
 0x376   : > { %v3056_v20 = vsel %vm859_vm14, %v3052_v46, %v3036_v49  ;;  %v2943_v7 = vmax.f32 %v12463_v16, %v2937_v30  ;;  %v3031_v14 = vor.u32 %v3030_v18, %v3027_v34  ;;  %v2777_v48 = vadd.f32 %v2773_v36, %v12394_v53  ;;  %v10462_v30 = vld [vmem:[#allocation9 + $0x10] ss:$144 sps:$4 sm:$0xff]   ;;  %v10470_v49 = vld [vmem:[#allocation9 + $0x134] ss:$144 sps:$4 sm:$0xff]   ;;  %v10477_v36 = vld [vmem:[#allocation9 + $0x258] ss:$144 sps:$4 sm:$0xff]  }
 0x377   : > { %v2979_v10 = vpack.c.bf16 %v2935_v3, %v2933_v50  ;;  %v2946_v25 = vrot.slane %v2882_v41, 6  ;;  %v2867_v12 = vrot.slane %v2779_v33, 1  ;;  %v2877_v11 = vrot.slane %v2779_v33, 2  ;;  %v10473_v50 = vld [vmem:[#allocation9 + $0x13c] ss:$144 sps:$4 sm:$0xff]  }
 0x378   : > { %v2781_v44 = vmax.f32 %v2777_v48, 0.0  ;;  %v3053_v4 = vsel %vm12046_vm12, 0, %v3031_v14  ;;  %v10468_v46 = vld [vmem:[#allocation9 + $0x130] ss:$144 sps:$4 sm:$0xff]   ;;  %v10471_v3 = vld [vmem:[#allocation9 + $0x138] ss:$144 sps:$4 sm:$0xff]  }
 0x379   : > { %v2983_v61 = vrot.slane %v2979_v10, 3  ;;  %v2950_v52 = vmax.f32 %v2940_v15, %v2946_v25  ;;  %v2952_v59 = vmax.f32 %v2942_v19, %v2946_v25  ;;  %v2871_v6 = vmax.f32 %v2779_v33, %v2867_v12  ;;  %v10479_v19 = vld [vmem:[#allocation9 + $0x25c] ss:$144 sps:$4 sm:$0xff]   ;;  %v10474_v41 = vld [vmem:[#allocation9 + $0x250] ss:$144 sps:$4 sm:$0xff]  }
 0x37a   : > { %v2878_v16 = vrot.slane %v2781_v44, 2  ;;  %v10480_v14 = vld [vmem:[#allocation9 + $0x370] ss:$144 sps:$4 sm:$0xff]   ;;  %v10483_v25 = vld [vmem:[#allocation9 + $0x378] ss:$144 sps:$4 sm:$0xff]  }
 0x37b   : > { %v2987_v8 = vsel %vm12008_vm5, 0, %v2983_v61  ;;  %v2992_v17 = vpack.c.bf16 %v2952_v59, %v2950_v52  ;;  %v10488_v48 = vld [vmem:[#allocation9 + $0x494] ss:$144 sps:$4 sm:$0xff]   ;;  %v10491_v12 = vld [vmem:[#allocation9 + $0x49c] ss:$144 sps:$4 sm:$0xff]  }
 0x37c   : > { %v2991_v47 = vsel %vm693_vm3, %v2987_v8, 0  ;;  %v2879_v60 = vsel %vm647_vm1, %v2877_v11, %v2878_v16  ;;  %v10486_v61 = vld [vmem:[#allocation9 + $0x490] ss:$144 sps:$4 sm:$0xff]   ;;  %v10489_v52 = vld [vmem:[#allocation9 + $0x498] ss:$144 sps:$4 sm:$0xff]  }
 0x37d   : > { %v3037_v42 = vrot.slane %v2991_v47, 3  ;;  %v2995_v5 = vshrl.u32 %v2992_v17, 16  ;;  %v2998_v53 = vshll.u32 %v2992_v17, 16  ;;  %v2883_v21 = vmax.f32 %v2871_v6, %v2879_v60  ;;  %v10494_v59 = vld [vmem:[#allocation9 + $0x5b4] ss:$144 sps:$4 sm:$0xff]  }
 0x37e   : > { %v10497_v44 = vld [vmem:[#allocation9 + $0x5bc] ss:$144 sps:$4 sm:$0xff]   ;;  %v10492_v11 = vld [vmem:[#allocation9 + $0x5b0] ss:$144 sps:$4 sm:$0xff]   ;;  %v10495_v8 = vld [vmem:[#allocation9 + $0x5b8] ss:$144 sps:$4 sm:$0xff]  }
 0x37f   : > { %v3060_v39 = vsel %vm859_vm14, %v3053_v4, %v3037_v42  ;;  %v2997_v31 = vrot.slane %v2995_v5, 2  ;;  %v3000_v22 = vrot.slane %v2998_v53, 3  ;;  %v2947_v0 = vrot.slane %v2883_v21, 6  ;;  %v10500_v47 = vld [vmem:[#allocation9 + $0x6d4] ss:$144 sps:$4 sm:$0xff]  }
 0x380   : > { %v10503_v4 = vld [vmem:[#allocation9 + $0x6dc] ss:$144 sps:$4 sm:$0xff]   ;;  %v10498_v17 = vld [vmem:[#allocation9 + $0x6d0] ss:$144 sps:$4 sm:$0xff]   ;;  %v10501_v16 = vld [vmem:[#allocation9 + $0x6d8] ss:$144 sps:$4 sm:$0xff]  }
 0x381   : > { %v3001_v23 = vor.u32 %v3000_v22, %v2997_v31  ;;  %v2951_v32 = vmax.f32 %v2941_v58, %v2947_v0  ;;  %v2953_v57 = vmax.f32 %v2943_v7, %v2947_v0  ;;  %v10482_v58 = vld [vmem:[#allocation9 + $0x374] ss:$144 sps:$4 sm:$0xff]   ;;  %v10485_v7 = vld [vmem:[#allocation9 + $0x37c] ss:$144 sps:$4 sm:$0xff]   ;;  %v10504_v5 = vld [vmem:[#allocation9 + $0x7f0] ss:$144 sps:$4 sm:$0xff]  }
 0x382   : > { %v10506_v6 = vld [vmem:[#allocation9 + $0x7f4] ss:$144 sps:$4 sm:$0xff]   ;;  %v10509_v42 = vld [vmem:[#allocation9 + $0x7fc] ss:$144 sps:$4 sm:$0xff]   ;;  %v10507_v53 = vld [vmem:[#allocation9 + $0x7f8] ss:$144 sps:$4 sm:$0xff]  }
 0x383   : > { %v3012_v13 = vsel %vm12008_vm5, 0, %v3001_v23  ;;  %v2993_v33 = vpack.c.bf16 %v2953_v57, %v2951_v32  ;;  %v10512_v60 = vld [vmem:[#allocation9 + $0x914] ss:$144 sps:$4 sm:$0xff]   ;;  %v10510_v21 = vld [vmem:[#allocation9 + $0x910] ss:$144 sps:$4 sm:$0xff]  }
 0x384   : > { %v3015_v26 = vsel %vm693_vm3, %v3012_v13, 0  ;;  %v10513_v31 = vld [vmem:[#allocation9 + $0x918] ss:$144 sps:$4 sm:$0xff]   ;;  %v10518_v22 = vld [vmem:[#allocation9 + $0xa34] ss:$144 sps:$4 sm:$0xff]  }
 0x385   : > { %v3038_v2 = vshll.u32 %v3015_v26, 16  ;;  %v3003_v43 = vshrl.u32 %v2993_v33, 16  ;;  %v3006_v51 = vshll.u32 %v2993_v33, 16  ;;  %v10521_v0 = vld [vmem:[#allocation9 + $0xa3c] ss:$144 sps:$4 sm:$0xff]  }
 0x386   : > { %v10516_v23 = vld [vmem:[#allocation9 + $0xa30] ss:$144 sps:$4 sm:$0xff]   ;;  %v10519_v32 = vld [vmem:[#allocation9 + $0xa38] ss:$144 sps:$4 sm:$0xff]   ;;  %v10524_v57 = vld [vmem:[#allocation9 + $0xb54] ss:$144 sps:$4 sm:$0xff]  }
 0x387   : > { %v3040_v54 = vrot.slane %v3038_v2, 1  ;;  %v3005_v29 = vrot.slane %v3003_v43, 2  ;;  %v3008_v62 = vrot.slane %v3006_v51, 3  ;;  %v10527_v13 = vld [vmem:[#allocation9 + $0xb5c] ss:$144 sps:$4 sm:$0xff]  }
 0x388   : > { %v10525_v33 = vld [vmem:[#allocation9 + $0xb58] ss:$144 sps:$4 sm:$0xff]   ;;  %v10530_v2 = vld [vmem:[#allocation9 + $0xc74] ss:$144 sps:$4 sm:$0xff]   ;;  %v10528_v43 = vld [vmem:[#allocation9 + $0xc70] ss:$144 sps:$4 sm:$0xff]  }
 0x389   : > { %v12535_v15 = vsel %vm12529_vm9, %v3056_v20, %v3040_v54  ;;  %v3009_v40 = vor.u32 %v3008_v62, %v3005_v29  ;;  %v3044_v20 = vshrl.u32 %v3015_v26, 16  ;;  %v10522_v26 = vld [vmem:[#allocation9 + $0xb50] ss:$144 sps:$4 sm:$0xff]   ;;  %v10531_v51 = vld [vmem:[#allocation9 + $0xc78] ss:$144 sps:$4 sm:$0xff]  }
 0x38a   : > { %v10539_v29 = vld [vmem:[#allocation9 + $0xd9c] ss:$144 sps:$4 sm:$0xff]   ;;  %v10534_v62 = vld [vmem:[#allocation9 + $0xd90] ss:$144 sps:$4 sm:$0xff]  }
 0x38b   : > { %v3013_v9 = vsel %vm12008_vm5, 0, %v3009_v40  ;;  %v12554_v10 = vor.u32 %v3044_v20, %v3040_v54  ;;  %v10536_v54 = vld [vmem:[#allocation9 + $0xd94] ss:$144 sps:$4 sm:$0xff]   ;;  %v10537_v40 = vld [vmem:[#allocation9 + $0xd98] ss:$144 sps:$4 sm:$0xff]  }
 0x38c   : > { %v3017_v38 = vsel %vm693_vm3, %v3013_v9, 0  ;;  %v10542_v9 = vld [vmem:[#allocation9 + $0xeb4] ss:$144 sps:$4 sm:$0xff]   ;;  %v10563_v20 = vld [vmem:[#allocation9 + $0x2c] ss:$144 sps:$4 sm:$0xff]  }
 0x38d   : > { %v3041_v27 = vshll.u32 %v3017_v38, 16  ;;  %v3047_v37 = vshrl.u32 %v3017_v38, 16  ;;  %v10545_v38 = vld [vmem:[#allocation9 + $0xebc] ss:$144 sps:$4 sm:$0xff]  }
 0x38f   : > { %v3043_v24 = vrot.slane %v3041_v27, 1  ;;  %v10540_v27 = vld [vmem:[#allocation9 + $0xeb0] ss:$144 sps:$4 sm:$0xff]  }
 0x391   : > { %v12540_v34 = vor.u32 %v3047_v37, %v3043_v24  ;;  %v12544_v18 = vsel %vm12529_vm9, %v3060_v39, %v3043_v24  ;;  %v10515_v39 = vld [vmem:[#allocation9 + $0x91c] ss:$144 sps:$4 sm:$0xff]   ;;  %v10543_v24 = vld [vmem:[#allocation9 + $0xeb8] ss:$144 sps:$4 sm:$0xff]   ;;  %v10548_v37 = vld [vmem:[#allocation9 + $0xfd4] ss:$144 sps:$4 sm:$0xff]  }
 0x392   : > { %6561 = vmatprep.mubr.bf16.mxu0 %v12544_v18  ;;  %6610 = vmatprep.mubr.bf16.mxu1 %v12544_v18 }
 0x393   : > { %6562 = vmatmul.mubr.bf16.vlgmr.msra.gmra.mrb[72].mxu0 %v12535_v15  ;;  %6611 = vmatmul.mubr.bf16.vlgmr.msra.gmra.mrb[80].mxu1 %v12535_v15 }
 0x394   : > { %6628 = vmatpush1.bf16.msra.mxu0 %v10462_v30  ;;  %6677 = vmatpush1.bf16.msra.mxu1 %v10465_v35  ;;  %v10551_v30 = vld [vmem:[#allocation9 + $0xfdc] ss:$144 sps:$4 sm:$0xff]   ;;  %v10546_v35 = vld [vmem:[#allocation9 + $0xfd0] ss:$144 sps:$4 sm:$0xff]  }
 0x395   : > { %9822 = vmatprep.mubr.msk.bf16.mxu0 %vm693_vm3, %v12540_v34  ;;  %9824 = vmatprep.mubr.msk.bf16.mxu1 %vm693_vm3, %v12540_v34 }
 0x396   : > { %6629 = vmatprep.subr.bf16.mxu0 %v10470_v49  ;;  %6678 = vmatprep.subr.bf16.mxu1 %v10473_v50  ;;  %v10549_v49 = vld [vmem:[#allocation9 + $0xfd8] ss:$144 sps:$4 sm:$0xff]   ;;  %v10554_v50 = vld [vmem:[#allocation9 + $0x10f4] ss:$144 sps:$4 sm:$0xff]  }
 0x398   : > { %6630 = vmatpush1.bf16.msra.mxu0 %v10468_v46  ;;  %6679 = vmatpush1.bf16.msra.mxu1 %v10471_v3  ;;  %v10557_v46 = vld [vmem:[#allocation9 + $0x10fc] ss:$144 sps:$4 sm:$0xff]   ;;  %v10552_v3 = vld [vmem:[#allocation9 + $0x10f0] ss:$144 sps:$4 sm:$0xff]  }
 0x399   : > { %6631 = vmatprep.subr.bf16.mxu0 %v10476_v28  ;;  %6680 = vmatprep.subr.bf16.mxu1 %v10479_v19  ;;  %v10555_v28 = vld [vmem:[#allocation9 + $0x10f8] ss:$144 sps:$4 sm:$0xff]   ;;  %v10560_v19 = vld [vmem:[#allocation9 + $0x24] ss:$144 sps:$4 sm:$0xff]  }
 0x39b   : > { %9823 = vmatmul.mubr.msk.bf16.gmra.mrb[76].mxu0 %vm693_vm3, %v12554_v10  ;;  %9825 = vmatmul.mubr.msk.bf16.gmra.mrb[84].mxu1 %vm693_vm3, %v12554_v10 }
 0x39c   : > { %6632 = vmatpush1.bf16.msra.mxu0 %v10474_v41  ;;  %6681 = vmatpush1.bf16.msra.mxu1 %v10477_v36  ;;  %v10558_v41 = vld [vmem:[#allocation9 + $0x20] ss:$144 sps:$4 sm:$0xff]   ;;  %v10561_v36 = vld [vmem:[#allocation9 + $0x28] ss:$144 sps:$4 sm:$0xff]  }
 0x39d   : > { %6659 = vmatprep.mubr.bf16.mxu0 %v12544_v18  ;;  %6708 = vmatprep.mubr.bf16.mxu1 %v12544_v18 }
 0x39e   : > { %6633 = vmatprep.subr.bf16.mxu0 %v10482_v58  ;;  %6682 = vmatprep.subr.bf16.mxu1 %v10485_v7  ;;  %v10566_v58 = vld [vmem:[#allocation9 + $0x144] ss:$144 sps:$4 sm:$0xff]   ;;  %v10569_v7 = vld [vmem:[#allocation9 + $0x14c] ss:$144 sps:$4 sm:$0xff]  }
 0x3a0   : > { %6634 = vmatpush1.bf16.msra.mxu0 %v10480_v14  ;;  %6683 = vmatpush1.bf16.msra.mxu1 %v10483_v25  ;;  %v10564_v14 = vld [vmem:[#allocation9 + $0x140] ss:$144 sps:$4 sm:$0xff]   ;;  %v10567_v25 = vld [vmem:[#allocation9 + $0x148] ss:$144 sps:$4 sm:$0xff]  }
 0x3a1   : > { %6635 = vmatprep.subr.bf16.mxu0 %v10488_v48  ;;  %6684 = vmatprep.subr.bf16.mxu1 %v10491_v12  ;;  %v10572_v48 = vld [vmem:[#allocation9 + $0x264] ss:$144 sps:$4 sm:$0xff]   ;;  %v10575_v12 = vld [vmem:[#allocation9 + $0x26c] ss:$144 sps:$4 sm:$0xff]  }
 0x3a4   : > { %6636 = vmatpush1.bf16.msra.mxu0 %v10486_v61  ;;  %6685 = vmatpush1.bf16.msra.mxu1 %v10489_v52  ;;  %v10570_v61 = vld [vmem:[#allocation9 + $0x260] ss:$144 sps:$4 sm:$0xff]   ;;  %v10573_v52 = vld [vmem:[#allocation9 + $0x268] ss:$144 sps:$4 sm:$0xff]  }
 0x3a5   : > { %6637 = vmatprep.subr.bf16.mxu0 %v10494_v59  ;;  %6686 = vmatprep.subr.bf16.mxu1 %v10497_v44  ;;  %v10578_v59 = vld [vmem:[#allocation9 + $0x384] ss:$144 sps:$4 sm:$0xff]   ;;  %v10581_v44 = vld [vmem:[#allocation9 + $0x38c] ss:$144 sps:$4 sm:$0xff]  }
 0x3a8   : > { %6638 = vmatpush1.bf16.msra.mxu0 %v10492_v11  ;;  %6687 = vmatpush1.bf16.msra.mxu1 %v10495_v8  ;;  %v10576_v11 = vld [vmem:[#allocation9 + $0x380] ss:$144 sps:$4 sm:$0xff]   ;;  %v10579_v8 = vld [vmem:[#allocation9 + $0x388] ss:$144 sps:$4 sm:$0xff]  }
 0x3a9   : > { %6639 = vmatprep.subr.bf16.mxu0 %v10500_v47  ;;  %6688 = vmatprep.subr.bf16.mxu1 %v10503_v4  ;;  %v10584_v47 = vld [vmem:[#allocation9 + $0x4a4] ss:$144 sps:$4 sm:$0xff]   ;;  %v10587_v4 = vld [vmem:[#allocation9 + $0x4ac] ss:$144 sps:$4 sm:$0xff]  }
 0x3ac   : > { %6640 = vmatpush1.bf16.msra.mxu0 %v10498_v17  ;;  %6689 = vmatpush1.bf16.msra.mxu1 %v10501_v16  ;;  %v10582_v17 = vld [vmem:[#allocation9 + $0x4a0] ss:$144 sps:$4 sm:$0xff]   ;;  %v10585_v16 = vld [vmem:[#allocation9 + $0x4a8] ss:$144 sps:$4 sm:$0xff]  }
 0x3ad   : > { %6641 = vmatprep.subr.bf16.mxu0 %v10506_v6  ;;  %6690 = vmatprep.subr.bf16.mxu1 %v10509_v42  ;;  %v10590_v6 = vld [vmem:[#allocation9 + $0x5c4] ss:$144 sps:$4 sm:$0xff]   ;;  %v10593_v42 = vld [vmem:[#allocation9 + $0x5cc] ss:$144 sps:$4 sm:$0xff]  }
 0x3b0   : > { %6642 = vmatpush1.bf16.msra.mxu0 %v10504_v5  ;;  %6691 = vmatpush1.bf16.msra.mxu1 %v10507_v53  ;;  %v10588_v5 = vld [vmem:[#allocation9 + $0x5c0] ss:$144 sps:$4 sm:$0xff]   ;;  %v10591_v53 = vld [vmem:[#allocation9 + $0x5c8] ss:$144 sps:$4 sm:$0xff]  }
 0x3b1   : > { %6643 = vmatprep.subr.bf16.mxu0 %v10512_v60  ;;  %6692 = vmatprep.subr.bf16.mxu1 %v10515_v39  ;;  %v10596_v60 = vld [vmem:[#allocation9 + $0x6e4] ss:$144 sps:$4 sm:$0xff]   ;;  %v10599_v39 = vld [vmem:[#allocation9 + $0x6ec] ss:$144 sps:$4 sm:$0xff]  }
 0x3b4   : > { %6644 = vmatpush1.bf16.msra.mxu0 %v10510_v21  ;;  %6693 = vmatpush1.bf16.msra.mxu1 %v10513_v31  ;;  %v10594_v21 = vld [vmem:[#allocation9 + $0x6e0] ss:$144 sps:$4 sm:$0xff]   ;;  %v10597_v31 = vld [vmem:[#allocation9 + $0x6e8] ss:$144 sps:$4 sm:$0xff]  }
 0x3b5   : > { %6645 = vmatprep.subr.bf16.mxu0 %v10518_v22  ;;  %6694 = vmatprep.subr.bf16.mxu1 %v10521_v0  ;;  %v10602_v22 = vld [vmem:[#allocation9 + $0x804] ss:$144 sps:$4 sm:$0xff]   ;;  %v10605_v0 = vld [vmem:[#allocation9 + $0x80c] ss:$144 sps:$4 sm:$0xff]  }
 0x3b8   : > { %6646 = vmatpush1.bf16.msra.mxu0 %v10516_v23  ;;  %6695 = vmatpush1.bf16.msra.mxu1 %v10519_v32  ;;  %v10600_v23 = vld [vmem:[#allocation9 + $0x800] ss:$144 sps:$4 sm:$0xff]   ;;  %v10603_v32 = vld [vmem:[#allocation9 + $0x808] ss:$144 sps:$4 sm:$0xff]  }
 0x3b9   : > { %6647 = vmatprep.subr.bf16.mxu0 %v10524_v57  ;;  %6696 = vmatprep.subr.bf16.mxu1 %v10527_v13  ;;  %v10608_v57 = vld [vmem:[#allocation9 + $0x924] ss:$144 sps:$4 sm:$0xff]   ;;  %v10611_v13 = vld [vmem:[#allocation9 + $0x92c] ss:$144 sps:$4 sm:$0xff]  }
 0x3bc   : > { %6648 = vmatpush1.bf16.msra.mxu0 %v10522_v26  ;;  %6697 = vmatpush1.bf16.msra.mxu1 %v10525_v33  ;;  %v10606_v26 = vld [vmem:[#allocation9 + $0x920] ss:$144 sps:$4 sm:$0xff]   ;;  %v10609_v33 = vld [vmem:[#allocation9 + $0x928] ss:$144 sps:$4 sm:$0xff]  }
 0x3bd   : > { %6649 = vmatprep.subr.bf16.mxu0 %v10530_v2  ;;  %6698 = vmatprep.subr.bf16.mxu1 %v10533_v56  ;;  %v10614_v2 = vld [vmem:[#allocation9 + $0xa44] ss:$144 sps:$4 sm:$0xff]   ;;  %v10617_v56 = vld [vmem:[#allocation9 + $0xa4c] ss:$144 sps:$4 sm:$0xff]  }
 0x3c0   : > { %6650 = vmatpush1.bf16.msra.mxu0 %v10528_v43  ;;  %6699 = vmatpush1.bf16.msra.mxu1 %v10531_v51  ;;  %v10612_v43 = vld [vmem:[#allocation9 + $0xa40] ss:$144 sps:$4 sm:$0xff]   ;;  %v10615_v51 = vld [vmem:[#allocation9 + $0xa48] ss:$144 sps:$4 sm:$0xff]  }
 0x3c1   : > { %6651 = vmatprep.subr.bf16.mxu0 %v10536_v54  ;;  %6700 = vmatprep.subr.bf16.mxu1 %v10539_v29  ;;  %v10620_v54 = vld [vmem:[#allocation9 + $0xb64] ss:$144 sps:$4 sm:$0xff]   ;;  %v10623_v29 = vld [vmem:[#allocation9 + $0xb6c] ss:$144 sps:$4 sm:$0xff]  }
 0x3c4   : > { %6652 = vmatpush1.bf16.msra.mxu0 %v10534_v62  ;;  %6701 = vmatpush1.bf16.msra.mxu1 %v10537_v40  ;;  %v10618_v62 = vld [vmem:[#allocation9 + $0xb60] ss:$144 sps:$4 sm:$0xff]   ;;  %v10621_v40 = vld [vmem:[#allocation9 + $0xb68] ss:$144 sps:$4 sm:$0xff]  }
 0x3c5   : > { %6653 = vmatprep.subr.bf16.mxu0 %v10542_v9  ;;  %6702 = vmatprep.subr.bf16.mxu1 %v10545_v38  ;;  %v10626_v9 = vld [vmem:[#allocation9 + $0xc84] ss:$144 sps:$4 sm:$0xff]   ;;  %v10629_v38 = vld [vmem:[#allocation9 + $0xc8c] ss:$144 sps:$4 sm:$0xff]  }
 0x3c8   : > { %6654 = vmatpush1.bf16.msra.mxu0 %v10540_v27  ;;  %6703 = vmatpush1.bf16.msra.mxu1 %v10543_v24  ;;  %v10624_v27 = vld [vmem:[#allocation9 + $0xc80] ss:$144 sps:$4 sm:$0xff]   ;;  %v10627_v24 = vld [vmem:[#allocation9 + $0xc88] ss:$144 sps:$4 sm:$0xff]  }
 0x3c9   : > { %6655 = vmatprep.subr.bf16.mxu0 %v10548_v37  ;;  %6704 = vmatprep.subr.bf16.mxu1 %v10551_v30  ;;  %v10632_v37 = vld [vmem:[#allocation9 + $0xda4] ss:$144 sps:$4 sm:$0xff]   ;;  %v10635_v30 = vld [vmem:[#allocation9 + $0xdac] ss:$144 sps:$4 sm:$0xff]  }
 0x3cc   : > { %6656 = vmatpush1.bf16.msra.mxu0 %v10546_v35  ;;  %6705 = vmatpush1.bf16.msra.mxu1 %v10549_v49  ;;  %v10630_v35 = vld [vmem:[#allocation9 + $0xda0] ss:$144 sps:$4 sm:$0xff]   ;;  %v10633_v49 = vld [vmem:[#allocation9 + $0xda8] ss:$144 sps:$4 sm:$0xff]  }
 0x3cd   : > { %6657 = vmatprep.subr.bf16.mxu0 %v10554_v50  ;;  %6706 = vmatprep.subr.bf16.mxu1 %v10557_v46  ;;  %v10638_v50 = vld [vmem:[#allocation9 + $0xec4] ss:$144 sps:$4 sm:$0xff]   ;;  %v10641_v46 = vld [vmem:[#allocation9 + $0xecc] ss:$144 sps:$4 sm:$0xff]  }
 0x3d0   : > { %6658 = vmatpush1.bf16.msra.mxu0 %v10552_v3  ;;  %6707 = vmatpush1.bf16.msra.mxu1 %v10555_v28  ;;  %v10636_v3 = vld [vmem:[#allocation9 + $0xec0] ss:$144 sps:$4 sm:$0xff]   ;;  %v10639_v28 = vld [vmem:[#allocation9 + $0xec8] ss:$144 sps:$4 sm:$0xff]  }
 0x3d1   : > { %6725 = vmatprep.subr.bf16.mxu0 %v10560_v19  ;;  %6774 = vmatprep.subr.bf16.mxu1 %v10563_v20  ;;  %v10644_v19 = vld [vmem:[#allocation9 + $0xfe4] ss:$144 sps:$4 sm:$0xff]   ;;  %v10647_v20 = vld [vmem:[#allocation9 + $0xfec] ss:$144 sps:$4 sm:$0xff]  }
 0x3d3   : > { %6660 = vmatmul.mubr.bf16.vlgmr.msra.gmra.mrb[80].mxu0 %v12535_v15  ;;  %6709 = vmatmul.mubr.bf16.vlgmr.msra.gmra.mrb[88].mxu1 %v12535_v15 }
 0x3d4   : > { %9826 = vmatprep.mubr.msk.bf16.mxu0 %vm693_vm3, %v12540_v34  ;;  %9828 = vmatprep.mubr.msk.bf16.mxu1 %vm693_vm3, %v12540_v34 }
 0x3d5   : > { %6726 = vmatpush1.bf16.msra.mxu0 %v10558_v41  ;;  %6775 = vmatpush1.bf16.msra.mxu1 %v10561_v36  ;;  %v10642_v41 = vld [vmem:[#allocation9 + $0xfe0] ss:$144 sps:$4 sm:$0xff]   ;;  %v10645_v36 = vld [vmem:[#allocation9 + $0xfe8] ss:$144 sps:$4 sm:$0xff]  }
 0x3d6   : > { %6727 = vmatprep.subr.bf16.mxu0 %v10566_v58  ;;  %6776 = vmatprep.subr.bf16.mxu1 %v10569_v7  ;;  %v10650_v58 = vld [vmem:[#allocation9 + $0x1104] ss:$144 sps:$4 sm:$0xff]   ;;  %v10653_v7 = vld [vmem:[#allocation9 + $0x110c] ss:$144 sps:$4 sm:$0xff]  }
 0x3d9   : > { %6728 = vmatpush1.bf16.msra.mxu0 %v10564_v14  ;;  %6777 = vmatpush1.bf16.msra.mxu1 %v10567_v25  ;;  %v10648_v14 = vld [vmem:[#allocation9 + $0x1100] ss:$144 sps:$4 sm:$0xff]   ;;  %v10651_v25 = vld [vmem:[#allocation9 + $0x1108] ss:$144 sps:$4 sm:$0xff]  }
 0x3da   : > { %6729 = vmatprep.subr.bf16.mxu0 %v10572_v48  ;;  %6778 = vmatprep.subr.bf16.mxu1 %v10575_v12  ;;  %v10656_v48 = vld [vmem:[#allocation9 + $0x34] ss:$144 sps:$4 sm:$0xff]   ;;  %v10659_v12 = vld [vmem:[#allocation9 + $0x3c] ss:$144 sps:$4 sm:$0xff]  }
 0x3db   : > { %9827 = vmatmul.mubr.msk.bf16.gmra.mrb[84].mxu0 %vm693_vm3, %v12554_v10  ;;  %9829 = vmatmul.mubr.msk.bf16.gmra.mrb[92].mxu1 %vm693_vm3, %v12554_v10 }
 0x3dc   : > { %6757 = vmatprep.mubr.bf16.mxu0 %v12544_v18  ;;  %6806 = vmatprep.mubr.bf16.mxu1 %v12544_v18 }
 0x3dd   : > { %6730 = vmatpush1.bf16.msra.mxu0 %v10570_v61  ;;  %6779 = vmatpush1.bf16.msra.mxu1 %v10573_v52  ;;  %v10654_v61 = vld [vmem:[#allocation9 + $0x30] ss:$144 sps:$4 sm:$0xff]   ;;  %v10657_v52 = vld [vmem:[#allocation9 + $0x38] ss:$144 sps:$4 sm:$0xff]  }
 0x3de   : > { %6731 = vmatprep.subr.bf16.mxu0 %v10578_v59  ;;  %6780 = vmatprep.subr.bf16.mxu1 %v10581_v44  ;;  %v10662_v59 = vld [vmem:[#allocation9 + $0x154] ss:$144 sps:$4 sm:$0xff]   ;;  %v10665_v44 = vld [vmem:[#allocation9 + $0x15c] ss:$144 sps:$4 sm:$0xff]  }
 0x3e1   : > { %6732 = vmatpush1.bf16.msra.mxu0 %v10576_v11  ;;  %6781 = vmatpush1.bf16.msra.mxu1 %v10579_v8  ;;  %v10660_v11 = vld [vmem:[#allocation9 + $0x150] ss:$144 sps:$4 sm:$0xff]   ;;  %v10663_v8 = vld [vmem:[#allocation9 + $0x158] ss:$144 sps:$4 sm:$0xff]  }
 0x3e2   : > { %6733 = vmatprep.subr.bf16.mxu0 %v10584_v47  ;;  %6782 = vmatprep.subr.bf16.mxu1 %v10587_v4  ;;  %v10668_v47 = vld [vmem:[#allocation9 + $0x274] ss:$144 sps:$4 sm:$0xff]   ;;  %v10671_v4 = vld [vmem:[#allocation9 + $0x27c] ss:$144 sps:$4 sm:$0xff]  }
 0x3e5   : > { %6734 = vmatpush1.bf16.msra.mxu0 %v10582_v17  ;;  %6783 = vmatpush1.bf16.msra.mxu1 %v10585_v16  ;;  %v10666_v17 = vld [vmem:[#allocation9 + $0x270] ss:$144 sps:$4 sm:$0xff]   ;;  %v10669_v16 = vld [vmem:[#allocation9 + $0x278] ss:$144 sps:$4 sm:$0xff]  }
 0x3e6   : > { %6735 = vmatprep.subr.bf16.mxu0 %v10590_v6  ;;  %6784 = vmatprep.subr.bf16.mxu1 %v10593_v42  ;;  %v10674_v6 = vld [vmem:[#allocation9 + $0x394] ss:$144 sps:$4 sm:$0xff]   ;;  %v10677_v42 = vld [vmem:[#allocation9 + $0x39c] ss:$144 sps:$4 sm:$0xff]  }
 0x3e9   : > { %6736 = vmatpush1.bf16.msra.mxu0 %v10588_v5  ;;  %6785 = vmatpush1.bf16.msra.mxu1 %v10591_v53  ;;  %v10672_v5 = vld [vmem:[#allocation9 + $0x390] ss:$144 sps:$4 sm:$0xff]   ;;  %v10675_v53 = vld [vmem:[#allocation9 + $0x398] ss:$144 sps:$4 sm:$0xff]  }
 0x3ea   : > { %6737 = vmatprep.subr.bf16.mxu0 %v10596_v60  ;;  %6786 = vmatprep.subr.bf16.mxu1 %v10599_v39  ;;  %v10680_v60 = vld [vmem:[#allocation9 + $0x4b4] ss:$144 sps:$4 sm:$0xff]   ;;  %v10683_v39 = vld [vmem:[#allocation9 + $0x4bc] ss:$144 sps:$4 sm:$0xff]  }
 0x3ed   : > { %6738 = vmatpush1.bf16.msra.mxu0 %v10594_v21  ;;  %6787 = vmatpush1.bf16.msra.mxu1 %v10597_v31  ;;  %v10678_v21 = vld [vmem:[#allocation9 + $0x4b0] ss:$144 sps:$4 sm:$0xff]   ;;  %v10681_v31 = vld [vmem:[#allocation9 + $0x4b8] ss:$144 sps:$4 sm:$0xff]  }
 0x3ee   : > { %6739 = vmatprep.subr.bf16.mxu0 %v10602_v22  ;;  %6788 = vmatprep.subr.bf16.mxu1 %v10605_v0  ;;  %v10686_v22 = vld [vmem:[#allocation9 + $0x5d4] ss:$144 sps:$4 sm:$0xff]   ;;  %v10689_v0 = vld [vmem:[#allocation9 + $0x5dc] ss:$144 sps:$4 sm:$0xff]  }
 0x3f1   : > { %6740 = vmatpush1.bf16.msra.mxu0 %v10600_v23  ;;  %6789 = vmatpush1.bf16.msra.mxu1 %v10603_v32  ;;  %v10684_v23 = vld [vmem:[#allocation9 + $0x5d0] ss:$144 sps:$4 sm:$0xff]   ;;  %v10687_v32 = vld [vmem:[#allocation9 + $0x5d8] ss:$144 sps:$4 sm:$0xff]  }
 0x3f2   : > { %6741 = vmatprep.subr.bf16.mxu0 %v10608_v57  ;;  %6790 = vmatprep.subr.bf16.mxu1 %v10611_v13  ;;  %v10692_v57 = vld [vmem:[#allocation9 + $0x6f4] ss:$144 sps:$4 sm:$0xff]   ;;  %v10695_v13 = vld [vmem:[#allocation9 + $0x6fc] ss:$144 sps:$4 sm:$0xff]  }
 0x3f5   : > { %6742 = vmatpush1.bf16.msra.mxu0 %v10606_v26  ;;  %6791 = vmatpush1.bf16.msra.mxu1 %v10609_v33  ;;  %v10690_v26 = vld [vmem:[#allocation9 + $0x6f0] ss:$144 sps:$4 sm:$0xff]   ;;  %v10693_v33 = vld [vmem:[#allocation9 + $0x6f8] ss:$144 sps:$4 sm:$0xff]  }
 0x3f6   : > { %6743 = vmatprep.subr.bf16.mxu0 %v10614_v2  ;;  %6792 = vmatprep.subr.bf16.mxu1 %v10617_v56  ;;  %v10698_v2 = vld [vmem:[#allocation9 + $0x814] ss:$144 sps:$4 sm:$0xff]   ;;  %v10701_v56 = vld [vmem:[#allocation9 + $0x81c] ss:$144 sps:$4 sm:$0xff]  }
 0x3f9   : > { %6744 = vmatpush1.bf16.msra.mxu0 %v10612_v43  ;;  %6793 = vmatpush1.bf16.msra.mxu1 %v10615_v51  ;;  %v10696_v43 = vld [vmem:[#allocation9 + $0x810] ss:$144 sps:$4 sm:$0xff]   ;;  %v10699_v51 = vld [vmem:[#allocation9 + $0x818] ss:$144 sps:$4 sm:$0xff]  }
 0x3fa   : > { %6745 = vmatprep.subr.bf16.mxu0 %v10620_v54  ;;  %6794 = vmatprep.subr.bf16.mxu1 %v10623_v29  ;;  %v10704_v54 = vld [vmem:[#allocation9 + $0x934] ss:$144 sps:$4 sm:$0xff]   ;;  %v10707_v29 = vld [vmem:[#allocation9 + $0x93c] ss:$144 sps:$4 sm:$0xff]  }
 0x3fd   : > { %6746 = vmatpush1.bf16.msra.mxu0 %v10618_v62  ;;  %6795 = vmatpush1.bf16.msra.mxu1 %v10621_v40  ;;  %v10702_v62 = vld [vmem:[#allocation9 + $0x930] ss:$144 sps:$4 sm:$0xff]   ;;  %v10705_v40 = vld [vmem:[#allocation9 + $0x938] ss:$144 sps:$4 sm:$0xff]  }
 0x3fe   : > { %6747 = vmatprep.subr.bf16.mxu0 %v10626_v9  ;;  %6796 = vmatprep.subr.bf16.mxu1 %v10629_v38  ;;  %v10710_v9 = vld [vmem:[#allocation9 + $0xa54] ss:$144 sps:$4 sm:$0xff]   ;;  %v10713_v38 = vld [vmem:[#allocation9 + $0xa5c] ss:$144 sps:$4 sm:$0xff]  }
 0x401   : > { %6748 = vmatpush1.bf16.msra.mxu0 %v10624_v27  ;;  %6797 = vmatpush1.bf16.msra.mxu1 %v10627_v24  ;;  %v10708_v27 = vld [vmem:[#allocation9 + $0xa50] ss:$144 sps:$4 sm:$0xff]   ;;  %v10711_v24 = vld [vmem:[#allocation9 + $0xa58] ss:$144 sps:$4 sm:$0xff]  }
 0x402   : > { %6749 = vmatprep.subr.bf16.mxu0 %v10632_v37  ;;  %6798 = vmatprep.subr.bf16.mxu1 %v10635_v30  ;;  %v10716_v37 = vld [vmem:[#allocation9 + $0xb74] ss:$144 sps:$4 sm:$0xff]   ;;  %v10719_v30 = vld [vmem:[#allocation9 + $0xb7c] ss:$144 sps:$4 sm:$0xff]  }
 0x405   : > { %6750 = vmatpush1.bf16.msra.mxu0 %v10630_v35  ;;  %6799 = vmatpush1.bf16.msra.mxu1 %v10633_v49  ;;  %v10714_v35 = vld [vmem:[#allocation9 + $0xb70] ss:$144 sps:$4 sm:$0xff]   ;;  %v10717_v49 = vld [vmem:[#allocation9 + $0xb78] ss:$144 sps:$4 sm:$0xff]  }
 0x406   : > { %6751 = vmatprep.subr.bf16.mxu0 %v10638_v50  ;;  %6800 = vmatprep.subr.bf16.mxu1 %v10641_v46  ;;  %v10722_v50 = vld [vmem:[#allocation9 + $0xc94] ss:$144 sps:$4 sm:$0xff]   ;;  %v10725_v46 = vld [vmem:[#allocation9 + $0xc9c] ss:$144 sps:$4 sm:$0xff]  }
 0x409   : > { %6752 = vmatpush1.bf16.msra.mxu0 %v10636_v3  ;;  %6801 = vmatpush1.bf16.msra.mxu1 %v10639_v28  ;;  %v10720_v3 = vld [vmem:[#allocation9 + $0xc90] ss:$144 sps:$4 sm:$0xff]   ;;  %v10723_v28 = vld [vmem:[#allocation9 + $0xc98] ss:$144 sps:$4 sm:$0xff]  }
 0x40a   : > { %6753 = vmatprep.subr.bf16.mxu0 %v10644_v19  ;;  %6802 = vmatprep.subr.bf16.mxu1 %v10647_v20  ;;  %v10728_v19 = vld [vmem:[#allocation9 + $0xdb4] ss:$144 sps:$4 sm:$0xff]   ;;  %v10731_v20 = vld [vmem:[#allocation9 + $0xdbc] ss:$144 sps:$4 sm:$0xff]  }
 0x40d   : > { %6754 = vmatpush1.bf16.msra.mxu0 %v10642_v41  ;;  %6803 = vmatpush1.bf16.msra.mxu1 %v10645_v36  ;;  %v10726_v41 = vld [vmem:[#allocation9 + $0xdb0] ss:$144 sps:$4 sm:$0xff]   ;;  %v10729_v36 = vld [vmem:[#allocation9 + $0xdb8] ss:$144 sps:$4 sm:$0xff]  }
 0x40e   : > { %6755 = vmatprep.subr.bf16.mxu0 %v10650_v58  ;;  %6804 = vmatprep.subr.bf16.mxu1 %v10653_v7  ;;  %v10734_v58 = vld [vmem:[#allocation9 + $0xed4] ss:$144 sps:$4 sm:$0xff]   ;;  %v10737_v7 = vld [vmem:[#allocation9 + $0xedc] ss:$144 sps:$4 sm:$0xff]  }
 0x411   : > { %6756 = vmatpush1.bf16.msra.mxu0 %v10648_v14  ;;  %6805 = vmatpush1.bf16.msra.mxu1 %v10651_v25  ;;  %v10732_v14 = vld [vmem:[#allocation9 + $0xed0] ss:$144 sps:$4 sm:$0xff]   ;;  %v10735_v25 = vld [vmem:[#allocation9 + $0xed8] ss:$144 sps:$4 sm:$0xff]  }
 0x412   : > { %6823 = vmatprep.subr.bf16.mxu0 %v10656_v48  ;;  %6874 = vmatprep.subr.bf16.mxu1 %v10659_v12  ;;  %v10740_v48 = vld [vmem:[#allocation9 + $0xff4] ss:$144 sps:$4 sm:$0xff]   ;;  %v10743_v12 = vld [vmem:[#allocation9 + $0xffc] ss:$144 sps:$4 sm:$0xff]  }
 0x414   : > { %6758 = vmatmul.mubr.bf16.vlgmr.msra.gmra.mrb[88].mxu0 %v12535_v15  ;;  %6807 = vmatmul.mubr.bf16.vlgmr.msra.gmra.mrb[96].mxu1 %v12535_v15 }
 0x415   : > { %9830 = vmatprep.mubr.msk.bf16.mxu0 %vm693_vm3, %v12540_v34  ;;  %9832 = vmatprep.mubr.msk.bf16.mxu1 %vm693_vm3, %v12540_v34 }
 0x416   : > { %6824 = vmatpush1.bf16.msra.mxu0 %v10654_v61  ;;  %6875 = vmatpush1.bf16.msra.mxu1 %v10657_v52  ;;  %v10738_v61 = vld [vmem:[#allocation9 + $0xff0] ss:$144 sps:$4 sm:$0xff]   ;;  %v10741_v52 = vld [vmem:[#allocation9 + $0xff8] ss:$144 sps:$4 sm:$0xff]  }
 0x417   : > { %6825 = vmatprep.subr.bf16.mxu0 %v10662_v59  ;;  %6876 = vmatprep.subr.bf16.mxu1 %v10665_v44  ;;  %v10746_v59 = vld [vmem:[#allocation9 + $0x1114] ss:$144 sps:$4 sm:$0xff]   ;;  %v10749_v44 = vld [vmem:[#allocation9 + $0x111c] ss:$144 sps:$4 sm:$0xff]  }
 0x41a   : > { %6826 = vmatpush1.bf16.msra.mxu0 %v10660_v11  ;;  %6877 = vmatpush1.bf16.msra.mxu1 %v10663_v8  ;;  %v10744_v11 = vld [vmem:[#allocation9 + $0x1110] ss:$144 sps:$4 sm:$0xff]   ;;  %v10747_v8 = vld [vmem:[#allocation9 + $0x1118] ss:$144 sps:$4 sm:$0xff]  }
 0x41b   : > { %6827 = vmatprep.subr.bf16.mxu0 %v10668_v47  ;;  %6878 = vmatprep.subr.bf16.mxu1 %v10671_v4  ;;  %v10752_v47 = vld [vmem:[#allocation9 + $0x44] ss:$144 sps:$4 sm:$0xff]   ;;  %v10755_v4 = vld [vmem:[#allocation9 + $0x4c] ss:$144 sps:$4 sm:$0xff]  }
 0x41c   : > { %9831 = vmatmul.mubr.msk.bf16.gmra.mrb[92].mxu0 %vm693_vm3, %v12554_v10  ;;  %9833 = vmatmul.mubr.msk.bf16.gmra.mrb[100].mxu1 %vm693_vm3, %v12554_v10 }
 0x41d   : > { %6855 = vmatprep.mubr.bf16.mxu0 %v12544_v18  ;;  %6906 = vmatprep.mubr.bf16.mxu1 %v12544_v18 }
 0x41e   : > { %6828 = vmatpush1.bf16.msra.mxu0 %v10666_v17  ;;  %6879 = vmatpush1.bf16.msra.mxu1 %v10669_v16  ;;  %v10750_v17 = vld [vmem:[#allocation9 + $0x40] ss:$144 sps:$4 sm:$0xff]   ;;  %v10753_v16 = vld [vmem:[#allocation9 + $0x48] ss:$144 sps:$4 sm:$0xff]  }
 0x41f   : > { %6829 = vmatprep.subr.bf16.mxu0 %v10674_v6  ;;  %6880 = vmatprep.subr.bf16.mxu1 %v10677_v42  ;;  %v10758_v6 = vld [vmem:[#allocation9 + $0x164] ss:$144 sps:$4 sm:$0xff]   ;;  %v10761_v42 = vld [vmem:[#allocation9 + $0x16c] ss:$144 sps:$4 sm:$0xff]  }
 0x422   : > { %6830 = vmatpush1.bf16.msra.mxu0 %v10672_v5  ;;  %6881 = vmatpush1.bf16.msra.mxu1 %v10675_v53  ;;  %v10756_v5 = vld [vmem:[#allocation9 + $0x160] ss:$144 sps:$4 sm:$0xff]   ;;  %v10759_v53 = vld [vmem:[#allocation9 + $0x168] ss:$144 sps:$4 sm:$0xff]  }
 0x423   : > { %6831 = vmatprep.subr.bf16.mxu0 %v10680_v60  ;;  %6882 = vmatprep.subr.bf16.mxu1 %v10683_v39  ;;  %v10764_v60 = vld [vmem:[#allocation9 + $0x284] ss:$144 sps:$4 sm:$0xff]   ;;  %v10767_v39 = vld [vmem:[#allocation9 + $0x28c] ss:$144 sps:$4 sm:$0xff]  }
 0x426   : > { %6832 = vmatpush1.bf16.msra.mxu0 %v10678_v21  ;;  %6883 = vmatpush1.bf16.msra.mxu1 %v10681_v31  ;;  %v10762_v21 = vld [vmem:[#allocation9 + $0x280] ss:$144 sps:$4 sm:$0xff]   ;;  %v10765_v31 = vld [vmem:[#allocation9 + $0x288] ss:$144 sps:$4 sm:$0xff]  }
 0x427   : > { %6833 = vmatprep.subr.bf16.mxu0 %v10686_v22  ;;  %6884 = vmatprep.subr.bf16.mxu1 %v10689_v0  ;;  %v10770_v22 = vld [vmem:[#allocation9 + $0x3a4] ss:$144 sps:$4 sm:$0xff]   ;;  %v10773_v0 = vld [vmem:[#allocation9 + $0x3ac] ss:$144 sps:$4 sm:$0xff]  }
 0x42a   : > { %6834 = vmatpush1.bf16.msra.mxu0 %v10684_v23  ;;  %6885 = vmatpush1.bf16.msra.mxu1 %v10687_v32  ;;  %v10768_v23 = vld [vmem:[#allocation9 + $0x3a0] ss:$144 sps:$4 sm:$0xff]   ;;  %v10771_v32 = vld [vmem:[#allocation9 + $0x3a8] ss:$144 sps:$4 sm:$0xff]  }
 0x42b   : > { %6835 = vmatprep.subr.bf16.mxu0 %v10692_v57  ;;  %6886 = vmatprep.subr.bf16.mxu1 %v10695_v13  ;;  %v10776_v57 = vld [vmem:[#allocation9 + $0x4c4] ss:$144 sps:$4 sm:$0xff]   ;;  %v10779_v13 = vld [vmem:[#allocation9 + $0x4cc] ss:$144 sps:$4 sm:$0xff]  }
 0x42e   : > { %6836 = vmatpush1.bf16.msra.mxu0 %v10690_v26  ;;  %6887 = vmatpush1.bf16.msra.mxu1 %v10693_v33  ;;  %v10774_v26 = vld [vmem:[#allocation9 + $0x4c0] ss:$144 sps:$4 sm:$0xff]   ;;  %v10777_v33 = vld [vmem:[#allocation9 + $0x4c8] ss:$144 sps:$4 sm:$0xff]  }
 0x42f   : > { %6837 = vmatprep.subr.bf16.mxu0 %v10698_v2  ;;  %6888 = vmatprep.subr.bf16.mxu1 %v10701_v56  ;;  %v10782_v2 = vld [vmem:[#allocation9 + $0x5e4] ss:$144 sps:$4 sm:$0xff]   ;;  %v10785_v56 = vld [vmem:[#allocation9 + $0x5ec] ss:$144 sps:$4 sm:$0xff]  }
 0x432   : > { %6838 = vmatpush1.bf16.msra.mxu0 %v10696_v43  ;;  %6889 = vmatpush1.bf16.msra.mxu1 %v10699_v51 }
 0x433   : > { %6839 = vmatprep.subr.bf16.mxu0 %v10704_v54  ;;  %6890 = vmatprep.subr.bf16.mxu1 %v10707_v29  ;;  %v10780_v54 = vld [vmem:[#allocation9 + $0x5e0] ss:$144 sps:$4 sm:$0xff]   ;;  %v10783_v29 = vld [vmem:[#allocation9 + $0x5e8] ss:$144 sps:$4 sm:$0xff]  }
 0x436   : > { %6840 = vmatpush1.bf16.msra.mxu0 %v10702_v62  ;;  %6891 = vmatpush1.bf16.msra.mxu1 %v10705_v40 }
 0x437   : > { %6841 = vmatprep.subr.bf16.mxu0 %v10710_v9  ;;  %6892 = vmatprep.subr.bf16.mxu1 %v10713_v38 }
 0x43a   : > { %6842 = vmatpush1.bf16.msra.mxu0 %v10708_v27  ;;  %6893 = vmatpush1.bf16.msra.mxu1 %v10711_v24  ;;  %v10788_v27 = vld [vmem:[#allocation9 + $0x704] ss:$144 sps:$4 sm:$0xff]   ;;  %v10791_v24 = vld [vmem:[#allocation9 + $0x70c] ss:$144 sps:$4 sm:$0xff]  }
 0x43b   : > { %6843 = vmatprep.subr.bf16.mxu0 %v10716_v37  ;;  %6894 = vmatprep.subr.bf16.mxu1 %v10719_v30 }
 0x43e   : > { %6844 = vmatpush1.bf16.msra.mxu0 %v10714_v35  ;;  %6895 = vmatpush1.bf16.msra.mxu1 %v10717_v49  ;;  %v10786_v35 = vld [vmem:[#allocation9 + $0x700] ss:$144 sps:$4 sm:$0xff]   ;;  %v10789_v49 = vld [vmem:[#allocation9 + $0x708] ss:$144 sps:$4 sm:$0xff]  }
 0x43f   : > { %6845 = vmatprep.subr.bf16.mxu0 %v10722_v50  ;;  %6896 = vmatprep.subr.bf16.mxu1 %v10725_v46  ;;  %v10794_v50 = vld [vmem:[#allocation9 + $0x824] ss:$144 sps:$4 sm:$0xff]   ;;  %v10797_v46 = vld [vmem:[#allocation9 + $0x82c] ss:$144 sps:$4 sm:$0xff]  }
 0x442   : > { %6846 = vmatpush1.bf16.msra.mxu0 %v10720_v3  ;;  %6897 = vmatpush1.bf16.msra.mxu1 %v10723_v28 }
 0x443   : > { %6847 = vmatprep.subr.bf16.mxu0 %v10728_v19  ;;  %6898 = vmatprep.subr.bf16.mxu1 %v10731_v20  ;;  %v10792_v19 = vld [vmem:[#allocation9 + $0x820] ss:$144 sps:$4 sm:$0xff]   ;;  %v10795_v20 = vld [vmem:[#allocation9 + $0x828] ss:$144 sps:$4 sm:$0xff]  }
 0x446   : > { %6848 = vmatpush1.bf16.msra.mxu0 %v10726_v41  ;;  %6899 = vmatpush1.bf16.msra.mxu1 %v10729_v36 }
 0x447   : > { %6849 = vmatprep.subr.bf16.mxu0 %v10734_v58  ;;  %6900 = vmatprep.subr.bf16.mxu1 %v10737_v7 }
 0x44a   : > { %6850 = vmatpush1.bf16.msra.mxu0 %v10732_v14  ;;  %6901 = vmatpush1.bf16.msra.mxu1 %v10735_v25  ;;  %v10800_v14 = vld [vmem:[#allocation9 + $0x944] ss:$144 sps:$4 sm:$0xff]   ;;  %v10803_v25 = vld [vmem:[#allocation9 + $0x94c] ss:$144 sps:$4 sm:$0xff]  }
 0x44b   : > { %6851 = vmatprep.subr.bf16.mxu0 %v10740_v48  ;;  %6902 = vmatprep.subr.bf16.mxu1 %v10743_v12 }
 0x44e   : > { %6852 = vmatpush1.bf16.msra.mxu0 %v10738_v61  ;;  %6903 = vmatpush1.bf16.msra.mxu1 %v10741_v52  ;;  %v10798_v61 = vld [vmem:[#allocation9 + $0x940] ss:$144 sps:$4 sm:$0xff]   ;;  %v10801_v52 = vld [vmem:[#allocation9 + $0x948] ss:$144 sps:$4 sm:$0xff]  }
 0x44f   : > { %6853 = vmatprep.subr.bf16.mxu0 %v10746_v59  ;;  %6904 = vmatprep.subr.bf16.mxu1 %v10749_v44  ;;  %v10806_v59 = vld [vmem:[#allocation9 + $0xa64] ss:$144 sps:$4 sm:$0xff]   ;;  %v10809_v44 = vld [vmem:[#allocation9 + $0xa6c] ss:$144 sps:$4 sm:$0xff]  }
 0x452   : > { %6854 = vmatpush1.bf16.msra.mxu0 %v10744_v11  ;;  %6905 = vmatpush1.bf16.msra.mxu1 %v10747_v8  ;;  %v10804_v11 = vld [vmem:[#allocation9 + $0xa60] ss:$144 sps:$4 sm:$0xff]   ;;  %v10807_v8 = vld [vmem:[#allocation9 + $0xa68] ss:$144 sps:$4 sm:$0xff]  }
 0x453   : > { %6925 = vmatprep.subr.bf16.mxu0 %v10752_v47  ;;  %6976 = vmatprep.subr.bf16.mxu1 %v10755_v4  ;;  %v10812_v47 = vld [vmem:[#allocation9 + $0xb84] ss:$144 sps:$4 sm:$0xff]   ;;  %v10815_v4 = vld [vmem:[#allocation9 + $0xb8c] ss:$144 sps:$4 sm:$0xff]  }
 0x455   : > { %6856 = vmatmul.mubr.bf16.vlgmr.msra.gmra.mrb[96].mxu0 %v12535_v15  ;;  %6907 = vmatmul.mubr.bf16.vlgmr.msra.gmra.mrb[104].mxu1 %v12535_v15 }
 0x456   : > { %9834 = vmatprep.mubr.msk.bf16.mxu0 %vm693_vm3, %v12540_v34  ;;  %9836 = vmatprep.mubr.msk.bf16.mxu1 %vm693_vm3, %v12540_v34 }
 0x457   : > { %6926 = vmatpush1.bf16.msra.mxu0 %v10750_v17  ;;  %6977 = vmatpush1.bf16.msra.mxu1 %v10753_v16  ;;  %v10810_v17 = vld [vmem:[#allocation9 + $0xb80] ss:$144 sps:$4 sm:$0xff]   ;;  %v10813_v16 = vld [vmem:[#allocation9 + $0xb88] ss:$144 sps:$4 sm:$0xff]  }
 0x458   : > { %6927 = vmatprep.subr.bf16.mxu0 %v10758_v6  ;;  %6978 = vmatprep.subr.bf16.mxu1 %v10761_v42  ;;  %v10818_v6 = vld [vmem:[#allocation9 + $0xca4] ss:$144 sps:$4 sm:$0xff]   ;;  %v10821_v42 = vld [vmem:[#allocation9 + $0xcac] ss:$144 sps:$4 sm:$0xff]  }
 0x45b   : > { %6928 = vmatpush1.bf16.msra.mxu0 %v10756_v5  ;;  %6979 = vmatpush1.bf16.msra.mxu1 %v10759_v53  ;;  %v10816_v5 = vld [vmem:[#allocation9 + $0xca0] ss:$144 sps:$4 sm:$0xff]   ;;  %v10819_v53 = vld [vmem:[#allocation9 + $0xca8] ss:$144 sps:$4 sm:$0xff]  }
 0x45c   : > { %6929 = vmatprep.subr.bf16.mxu0 %v10764_v60  ;;  %6980 = vmatprep.subr.bf16.mxu1 %v10767_v39  ;;  %v10824_v60 = vld [vmem:[#allocation9 + $0xdc4] ss:$144 sps:$4 sm:$0xff]   ;;  %v10827_v39 = vld [vmem:[#allocation9 + $0xdcc] ss:$144 sps:$4 sm:$0xff]  }
 0x45d   : > { %9835 = vmatmul.mubr.msk.bf16.gmra.mrb[100].mxu0 %vm693_vm3, %v12554_v10  ;;  %9837 = vmatmul.mubr.msk.bf16.gmra.mrb[108].mxu1 %vm693_vm3, %v12554_v10 }
 0x45e   : > { %6957 = vmatprep.mubr.bf16.mxu0 %v12544_v18  ;;  %7008 = vmatprep.mubr.bf16.mxu1 %v12544_v18 }
 0x45f   : > { %6930 = vmatpush1.bf16.msra.mxu0 %v10762_v21  ;;  %6981 = vmatpush1.bf16.msra.mxu1 %v10765_v31  ;;  %v10822_v21 = vld [vmem:[#allocation9 + $0xdc0] ss:$144 sps:$4 sm:$0xff]   ;;  %v10825_v31 = vld [vmem:[#allocation9 + $0xdc8] ss:$144 sps:$4 sm:$0xff]  }
 0x460   : > { %6931 = vmatprep.subr.bf16.mxu0 %v10770_v22  ;;  %6982 = vmatprep.subr.bf16.mxu1 %v10773_v0  ;;  %v10830_v22 = vld [vmem:[#allocation9 + $0xee4] ss:$144 sps:$4 sm:$0xff]   ;;  %v10833_v0 = vld [vmem:[#allocation9 + $0xeec] ss:$144 sps:$4 sm:$0xff]  }
 0x463   : > { %6932 = vmatpush1.bf16.msra.mxu0 %v10768_v23  ;;  %6983 = vmatpush1.bf16.msra.mxu1 %v10771_v32  ;;  %v10828_v23 = vld [vmem:[#allocation9 + $0xee0] ss:$144 sps:$4 sm:$0xff]   ;;  %v10831_v32 = vld [vmem:[#allocation9 + $0xee8] ss:$144 sps:$4 sm:$0xff]  }
 0x464   : > { %6933 = vmatprep.subr.bf16.mxu0 %v10776_v57  ;;  %6984 = vmatprep.subr.bf16.mxu1 %v10779_v13  ;;  %v10836_v57 = vld [vmem:[#allocation9 + $0x1004] ss:$144 sps:$4 sm:$0xff]   ;;  %v10839_v13 = vld [vmem:[#allocation9 + $0x100c] ss:$144 sps:$4 sm:$0xff]  }
 0x466   : > { %v12598_v43 = vpop.f32.mrb[72].mxu0  ;;  %v12600_v51 = vpop.f32.mrb[80].mxu1 }
 0x467   : > { %6934 = vmatpush1.bf16.msra.mxu0 %v10774_v26  ;;  %6985 = vmatpush1.bf16.msra.mxu1 %v10777_v33  ;;  %v12602_v62 = vpop.f32.mrb[73].mxu0  ;;  %v12604_v40 = vpop.f32.mrb[81].mxu1  ;;  %v10834_v26 = vld [vmem:[#allocation9 + $0x1000] ss:$144 sps:$4 sm:$0xff]   ;;  %v10837_v33 = vld [vmem:[#allocation9 + $0x1008] ss:$144 sps:$4 sm:$0xff]  }
 0x468   : > { %6935 = vmatprep.subr.bf16.mxu0 %v10782_v2  ;;  %6986 = vmatprep.subr.bf16.mxu1 %v10785_v56  ;;  %v12606_v9 = vpop.f32.mrb[74].mxu0  ;;  %v12608_v38 = vpop.f32.mrb[82].mxu1  ;;  %v10842_v2 = vld [vmem:[#allocation9 + $0x1124] ss:$144 sps:$4 sm:$0xff]   ;;  %v10845_v56 = vld [vmem:[#allocation9 + $0x112c] ss:$144 sps:$4 sm:$0xff]  }
 0x469   : > { %v12610_v37 = vpop.f32.mrb[75].mxu0  ;;  %v12612_v30 = vpop.f32.mrb[83].mxu1 }
 0x46b   : > { %6936 = vmatpush1.bf16.msra.mxu0 %v10780_v54  ;;  %6987 = vmatpush1.bf16.msra.mxu1 %v10783_v29  ;;  %v10840_v54 = vld [vmem:[#allocation9 + $0x1120] ss:$144 sps:$4 sm:$0xff]   ;;  %v10843_v29 = vld [vmem:[#allocation9 + $0x1128] ss:$144 sps:$4 sm:$0xff]  }
 0x46c   : > { %6937 = vmatprep.subr.bf16.mxu0 %v10788_v27  ;;  %6988 = vmatprep.subr.bf16.mxu1 %v10791_v24  ;;  %v10848_v27 = vld [vmem:[#allocation9 + $0x54] ss:$144 sps:$4 sm:$0xff]   ;;  %v10851_v24 = vld [vmem:[#allocation9 + $0x5c] ss:$144 sps:$4 sm:$0xff]  }
 0x46e   : > { %v6573_v3 = vpop.f32.mrb[76].mxu0  ;;  %v6622_v28 = vpop.f32.mrb[84].mxu1 }
 0x46f   : > { %6938 = vmatpush1.bf16.msra.mxu0 %v10786_v35  ;;  %6989 = vmatpush1.bf16.msra.mxu1 %v10789_v49  ;;  %v6574_v41 = vpop.f32.mrb[77].mxu0  ;;  %v6623_v36 = vpop.f32.mrb[85].mxu1  ;;  %v10846_v35 = vld [vmem:[#allocation9 + $0x50] ss:$144 sps:$4 sm:$0xff]   ;;  %v10849_v49 = vld [vmem:[#allocation9 + $0x58] ss:$144 sps:$4 sm:$0xff]  }
 0x470   : > { %6939 = vmatprep.subr.bf16.mxu0 %v10794_v50  ;;  %6990 = vmatprep.subr.bf16.mxu1 %v10797_v46  ;;  %v6575_v58 = vpop.f32.mrb[78].mxu0  ;;  %v6624_v7 = vpop.f32.mrb[86].mxu1  ;;  %v10854_v50 = vld [vmem:[#allocation9 + $0x174] ss:$144 sps:$4 sm:$0xff]   ;;  %v10857_v46 = vld [vmem:[#allocation9 + $0x17c] ss:$144 sps:$4 sm:$0xff]  }
 0x471   : > { %v6576_v48 = vpop.f32.mrb[79].mxu0  ;;  %v6625_v12 = vpop.f32.mrb[87].mxu1  ;;  %v10852_v3 = vld [vmem:[#allocation9 + $0x170] ss:$144 sps:$4 sm:$0xff]   ;;  %v10855_v28 = vld [vmem:[#allocation9 + $0x178] ss:$144 sps:$4 sm:$0xff]  }
 0x472   : > { %v10858_v41 = vld [vmem:[#allocation9 + $0x290] ss:$144 sps:$4 sm:$0xff]   ;;  %v10861_v36 = vld [vmem:[#allocation9 + $0x298] ss:$144 sps:$4 sm:$0xff]   ;;  %v10866_v58 = vld [vmem:[#allocation9 + $0x3b4] ss:$144 sps:$4 sm:$0xff]  }
 0x473   : > { %6940 = vmatpush1.bf16.msra.mxu0 %v10792_v19  ;;  %6991 = vmatpush1.bf16.msra.mxu1 %v10795_v20  ;;  %v10860_v19 = vld [vmem:[#allocation9 + $0x294] ss:$144 sps:$4 sm:$0xff]   ;;  %v10863_v20 = vld [vmem:[#allocation9 + $0x29c] ss:$144 sps:$4 sm:$0xff]  }
 0x474   : > { %6941 = vmatprep.subr.bf16.mxu0 %v10800_v14  ;;  %6992 = vmatprep.subr.bf16.mxu1 %v10803_v25  ;;  %v10869_v7 = vld [vmem:[#allocation9 + $0x3bc] ss:$144 sps:$4 sm:$0xff]   ;;  %v10864_v14 = vld [vmem:[#allocation9 + $0x3b0] ss:$144 sps:$4 sm:$0xff]   ;;  %v10867_v25 = vld [vmem:[#allocation9 + $0x3b8] ss:$144 sps:$4 sm:$0xff]  }
 0x475   : > { %v10872_v48 = vld [vmem:[#allocation9 + $0x4d4] ss:$144 sps:$4 sm:$0xff]   ;;  %v10875_v12 = vld [vmem:[#allocation9 + $0x4dc] ss:$144 sps:$4 sm:$0xff]  }
 0x477   : > { %6942 = vmatpush1.bf16.msra.mxu0 %v10798_v61  ;;  %6993 = vmatpush1.bf16.msra.mxu1 %v10801_v52  ;;  %v10870_v61 = vld [vmem:[#allocation9 + $0x4d0] ss:$144 sps:$4 sm:$0xff]   ;;  %v10873_v52 = vld [vmem:[#allocation9 + $0x4d8] ss:$144 sps:$4 sm:$0xff]  }
 0x478   : > { %6943 = vmatprep.subr.bf16.mxu0 %v10806_v59  ;;  %6994 = vmatprep.subr.bf16.mxu1 %v10809_v44  ;;  %v10878_v59 = vld [vmem:[#allocation9 + $0x5f4] ss:$144 sps:$4 sm:$0xff]   ;;  %v10881_v44 = vld [vmem:[#allocation9 + $0x5fc] ss:$144 sps:$4 sm:$0xff]  }
 0x47b   : > { %6944 = vmatpush1.bf16.msra.mxu0 %v10804_v11  ;;  %6995 = vmatpush1.bf16.msra.mxu1 %v10807_v8 }
 0x47c   : > { %6945 = vmatprep.subr.bf16.mxu0 %v10812_v47  ;;  %6996 = vmatprep.subr.bf16.mxu1 %v10815_v4 }
 0x47f   : > { %6946 = vmatpush1.bf16.msra.mxu0 %v10810_v17  ;;  %6997 = vmatpush1.bf16.msra.mxu1 %v10813_v16 }
 0x480   : > { %6947 = vmatprep.subr.bf16.mxu0 %v10818_v6  ;;  %6998 = vmatprep.subr.bf16.mxu1 %v10821_v42  ;;  %v10876_v6 = vld [vmem:[#allocation9 + $0x5f0] ss:$144 sps:$4 sm:$0xff]  }
 0x483   : > { %6948 = vmatpush1.bf16.msra.mxu0 %v10816_v5  ;;  %6999 = vmatpush1.bf16.msra.mxu1 %v10819_v53  ;;  %v10879_v53 = vld [vmem:[#allocation9 + $0x5f8] ss:$144 sps:$4 sm:$0xff]  }
 0x484   : > { %6949 = vmatprep.subr.bf16.mxu0 %v10824_v60  ;;  %7000 = vmatprep.subr.bf16.mxu1 %v10827_v39 }
 0x487   : > { %6950 = vmatpush1.bf16.msra.mxu0 %v10822_v21  ;;  %7001 = vmatpush1.bf16.msra.mxu1 %v10825_v31 }
 0x488   : > { %6951 = vmatprep.subr.bf16.mxu0 %v10830_v22  ;;  %7002 = vmatprep.subr.bf16.mxu1 %v10833_v0 }
 0x48b   : > { %6952 = vmatpush1.bf16.msra.mxu0 %v10828_v23  ;;  %7003 = vmatpush1.bf16.msra.mxu1 %v10831_v32 }
 0x48c   : > { %6953 = vmatprep.subr.bf16.mxu0 %v10836_v57  ;;  %7004 = vmatprep.subr.bf16.mxu1 %v10839_v13  ;;  %v10884_v57 = vld [vmem:[#allocation9 + $0x714] ss:$144 sps:$4 sm:$0xff]  }
 0x48f   : > { %6954 = vmatpush1.bf16.msra.mxu0 %v10834_v26  ;;  %7005 = vmatpush1.bf16.msra.mxu1 %v10837_v33 }
 0x490   : > { %6955 = vmatprep.subr.bf16.mxu0 %v10842_v2  ;;  %7006 = vmatprep.subr.bf16.mxu1 %v10845_v56  ;;  %v10887_v56 = vld [vmem:[#allocation9 + $0x71c] ss:$144 sps:$4 sm:$0xff]  }
 0x493   : > { %6956 = vmatpush1.bf16.msra.mxu0 %v10840_v54  ;;  %7007 = vmatpush1.bf16.msra.mxu1 %v10843_v29 }
 0x494   : > { %7027 = vmatprep.subr.bf16.mxu0 %v10848_v27  ;;  %7078 = vmatprep.subr.bf16.mxu1 %v10851_v24 }
 0x496   : > { %6958 = vmatmul.mubr.bf16.vlgmr.msra.gmra.mrb[104].mxu0 %v12535_v15  ;;  %7009 = vmatmul.mubr.bf16.vlgmr.msra.gmra.mrb[112].mxu1 %v12535_v15 }
 0x497   : > { %9838 = vmatprep.mubr.msk.bf16.mxu0 %vm693_vm3, %v12540_v34  ;;  %9840 = vmatprep.mubr.msk.bf16.mxu1 %vm693_vm3, %v12540_v34 }
 0x498   : > { %7028 = vmatpush1.bf16.msra.mxu0 %v10846_v35  ;;  %7079 = vmatpush1.bf16.msra.mxu1 %v10849_v49 }
 0x499   : > { %7029 = vmatprep.subr.bf16.mxu0 %v10854_v50  ;;  %7080 = vmatprep.subr.bf16.mxu1 %v10857_v46  ;;  %v10882_v46 = vld [vmem:[#allocation9 + $0x710] ss:$144 sps:$4 sm:$0xff]  }
 0x49c   : > { %7030 = vmatpush1.bf16.msra.mxu0 %v10852_v3  ;;  %7081 = vmatpush1.bf16.msra.mxu1 %v10855_v28  ;;  %v10885_v3 = vld [vmem:[#allocation9 + $0x718] ss:$144 sps:$4 sm:$0xff]  }
 0x49d   : > { %7031 = vmatprep.subr.bf16.mxu0 %v10860_v19  ;;  %7082 = vmatprep.subr.bf16.mxu1 %v10863_v20  ;;  %v10893_v19 = vld [vmem:[#allocation9 + $0x83c] ss:$144 sps:$4 sm:$0xff]  }
 0x49e   : > { %9839 = vmatmul.mubr.msk.bf16.gmra.mrb[108].mxu0 %vm693_vm3, %v12554_v10  ;;  %9841 = vmatmul.mubr.msk.bf16.gmra.mrb[116].mxu1 %vm693_vm3, %v12554_v10 }
 0x49f   : > { %7059 = vmatprep.mubr.bf16.mxu0 %v12544_v18  ;;  %7110 = vmatprep.mubr.bf16.mxu1 %v12544_v18 }
 0x4a0   : > { %7032 = vmatpush1.bf16.msra.mxu0 %v10858_v41  ;;  %7083 = vmatpush1.bf16.msra.mxu1 %v10861_v36 }
 0x4a1   : > { %7033 = vmatprep.subr.bf16.mxu0 %v10866_v58  ;;  %7084 = vmatprep.subr.bf16.mxu1 %v10869_v7  ;;  %v10891_v7 = vld [vmem:[#allocation9 + $0x838] ss:$144 sps:$4 sm:$0xff]  }
 0x4a4   : > { %7034 = vmatpush1.bf16.msra.mxu0 %v10864_v14  ;;  %7085 = vmatpush1.bf16.msra.mxu1 %v10867_v25 }
 0x4a5   : > { %7035 = vmatprep.subr.bf16.mxu0 %v10872_v48  ;;  %7086 = vmatprep.subr.bf16.mxu1 %v10875_v12  ;;  %v10896_v12 = vld [vmem:[#allocation9 + $0x954] ss:$144 sps:$4 sm:$0xff]  }
 0x4a6   : > { %v6661_v11 = vpop.f32.mrb[80].mxu0  ;;  %v6710_v8 = vpop.f32.mrb[88].mxu1 }
 0x4a7   : > { %v7436_v47 = vrot.slane %v6661_v11, 1  ;;  %v7438_v4 = vrot.slane %v6710_v8, 1  ;;  %v6663_v17 = vpop.f32.mrb[81].mxu0  ;;  %v6712_v16 = vpop.f32.mrb[89].mxu1  ;;  %v10900_v11 = vld [vmem:[#allocation9 + $0xa70] ss:$144 sps:$4 sm:$0xff]  }
 0x4a8   : > { %7036 = vmatpush1.bf16.msra.mxu0 %v10870_v61  ;;  %7087 = vmatpush1.bf16.msra.mxu1 %v10873_v52  ;;  %v7437_v42 = vrot.slane %v6663_v17, 1  ;;  %v7439_v5 = vrot.slane %v6712_v16, 1  ;;  %v6665_v60 = vpop.f32.mrb[82].mxu0  ;;  %v6714_v39 = vpop.f32.mrb[90].mxu1  ;;  %v10899_v61 = vld [vmem:[#allocation9 + $0x95c] ss:$144 sps:$4 sm:$0xff]  }
 0x4a9   : > { %v12627_v21 = vadd.f32 %v7436_v47, %v12598_v43  ;;  %v12630_v31 = vadd.f32 %v7438_v4, %v12600_v51  ;;  %7037 = vmatprep.subr.bf16.mxu0 %v10878_v59  ;;  %7088 = vmatprep.subr.bf16.mxu1 %v10881_v44  ;;  %v7617_v22 = vrot.slane %v6665_v60, 1  ;;  %v7621_v0 = vrot.slane %v6714_v39, 1  ;;  %v6667_v23 = vpop.f32.mrb[83].mxu0  ;;  %v6716_v32 = vpop.f32.mrb[91].mxu1  ;;  %v10897_v52 = vld [vmem:[#allocation9 + $0x958] ss:$144 sps:$4 sm:$0xff]  }
 0x4aa   : > { %v12633_v13 = vadd.f32 %v7437_v42, %v12602_v62  ;;  %v12636_v26 = vadd.f32 %v7439_v5, %v12604_v40  ;;  %v7619_v33 = vrot.slane %v6667_v23, 1  ;;  %v7623_v2 = vrot.slane %v6716_v32, 1  ;;  %v10902_v59 = vld [vmem:[#allocation9 + $0xa74] ss:$144 sps:$4 sm:$0xff]   ;;  %v10905_v44 = vld [vmem:[#allocation9 + $0xa7c] ss:$144 sps:$4 sm:$0xff]  }
 0x4ab   : > { %v7618_v54 = vsel %vm629_vm0, %v7436_v47, %v7617_v22  ;;  %v12640_v29 = vadd.f32 %v7617_v22, %v12606_v9  ;;  %v7622_v27 = vsel %vm629_vm0, %v7438_v4, %v7621_v0  ;;  %v12644_v24 = vadd.f32 %v7621_v0, %v12608_v38  ;;  %v10903_v8 = vld [vmem:[#allocation9 + $0xa78] ss:$144 sps:$4 sm:$0xff]   ;;  %v10908_v47 = vld [vmem:[#allocation9 + $0xb94] ss:$144 sps:$4 sm:$0xff]   ;;  %v10911_v4 = vld [vmem:[#allocation9 + $0xb9c] ss:$144 sps:$4 sm:$0xff]  }
 0x4ac   : > { %v12647_v35 = vadd.f32 %v7618_v54, %v12598_v43  ;;  %v12650_v49 = vadd.f32 %v7622_v27, %v12600_v51  ;;  %7038 = vmatpush1.bf16.msra.mxu0 %v10876_v6  ;;  %7089 = vmatpush1.bf16.msra.mxu1 %v10879_v53  ;;  %v7620_v50 = vsel %vm629_vm0, %v7437_v42, %v7619_v33  ;;  %v10890_v51 = vld [vmem:[#allocation9 + $0x834] ss:$144 sps:$4 sm:$0xff]   ;;  %v10906_v17 = vld [vmem:[#allocation9 + $0xb90] ss:$144 sps:$4 sm:$0xff]   ;;  %v10909_v16 = vld [vmem:[#allocation9 + $0xb98] ss:$144 sps:$4 sm:$0xff]  }
 0x4ad   : > { %v12654_v9 = vadd.f32 %v7620_v50, %v12602_v62  ;;  %v12657_v28 = vadd.f32 %v7619_v33, %v12610_v37  ;;  %v7624_v38 = vsel %vm629_vm0, %v7439_v5, %v7623_v2  ;;  %v12661_v43 = vadd.f32 %v7623_v2, %v12612_v30  ;;  %7039 = vmatprep.subr.bf16.mxu0 %v10884_v57  ;;  %v10888_v37 = vld [vmem:[#allocation9 + $0x830] ss:$144 sps:$4 sm:$0xff]   ;;  %v10914_v6 = vld [vmem:[#allocation9 + $0xcb4] ss:$144 sps:$4 sm:$0xff]   ;;  %v10917_v42 = vld [vmem:[#allocation9 + $0xcbc] ss:$144 sps:$4 sm:$0xff]  }
 0x4ae   : > { %v12664_v20 = vadd.f32 %v7624_v38, %v12604_v40  ;;  %7090 = vmatprep.subr.bf16.mxu1 %v10887_v56  ;;  %v6671_v41 = vpop.f32.mrb[84].mxu0  ;;  %v6720_v36 = vpop.f32.mrb[92].mxu1  ;;  %v10894_v40 = vld [vmem:[#allocation9 + $0x950] ss:$144 sps:$4 sm:$0xff]   ;;  %v10915_v53 = vld [vmem:[#allocation9 + $0xcb8] ss:$144 sps:$4 sm:$0xff]  }
 0x4af   : > { %v6672_v58 = vpop.f32.mrb[85].mxu0  ;;  %v6721_v62 = vpop.f32.mrb[93].mxu1  ;;  %v10912_v5 = vld [vmem:[#allocation9 + $0xcb0] ss:$144 sps:$4 sm:$0xff]   ;;  %v10920_v60 = vld [vmem:[#allocation9 + $0xdd4] ss:$144 sps:$4 sm:$0xff]  }
 0x4b0   : > { %7040 = vmatpush1.bf16.msra.mxu0 %v10882_v46  ;;  %7091 = vmatpush1.bf16.msra.mxu1 %v10885_v3  ;;  %v6673_v14 = vpop.f32.mrb[86].mxu0  ;;  %v6722_v25 = vpop.f32.mrb[94].mxu1  ;;  %v10923_v39 = vld [vmem:[#allocation9 + $0xddc] ss:$144 sps:$4 sm:$0xff]   ;;  %v10918_v22 = vld [vmem:[#allocation9 + $0xdd0] ss:$144 sps:$4 sm:$0xff]  }
 0x4b1   : > { %7041 = vmatprep.subr.bf16.mxu0 %v10890_v51  ;;  %7092 = vmatprep.subr.bf16.mxu1 %v10893_v19  ;;  %v6674_v30 = vpop.f32.mrb[87].mxu0  ;;  %v6723_v48 = vpop.f32.mrb[95].mxu1  ;;  %v10921_v0 = vld [vmem:[#allocation9 + $0xdd8] ss:$144 sps:$4 sm:$0xff]   ;;  %v10926_v23 = vld [vmem:[#allocation9 + $0xef4] ss:$144 sps:$4 sm:$0xff]  }
 0x4b2   : > { %v10929_v32 = vld [vmem:[#allocation9 + $0xefc] ss:$144 sps:$4 sm:$0xff]   ;;  %v10924_v57 = vld [vmem:[#allocation9 + $0xef0] ss:$144 sps:$4 sm:$0xff]   ;;  %v10927_v33 = vld [vmem:[#allocation9 + $0xef8] ss:$144 sps:$4 sm:$0xff]  }
 0x4b3   : > { %v10932_v2 = vld [vmem:[#allocation9 + $0x1014] ss:$144 sps:$4 sm:$0xff]   ;;  %v10935_v56 = vld [vmem:[#allocation9 + $0x101c] ss:$144 sps:$4 sm:$0xff]   ;;  %v10930_v54 = vld [vmem:[#allocation9 + $0x1010] ss:$144 sps:$4 sm:$0xff]  }
 0x4b4   : > { %7042 = vmatpush1.bf16.msra.mxu0 %v10888_v37  ;;  %7093 = vmatpush1.bf16.msra.mxu1 %v10891_v7  ;;  %v10933_v27 = vld [vmem:[#allocation9 + $0x1018] ss:$144 sps:$4 sm:$0xff]   ;;  %v10938_v50 = vld [vmem:[#allocation9 + $0x1134] ss:$144 sps:$4 sm:$0xff]   ;;  %v10941_v46 = vld [vmem:[#allocation9 + $0x113c] ss:$144 sps:$4 sm:$0xff]  }
 0x4b5   : > { %7043 = vmatprep.subr.bf16.mxu0 %v10896_v12  ;;  %7094 = vmatprep.subr.bf16.mxu1 %v10899_v61  ;;  %v10936_v3 = vld [vmem:[#allocation9 + $0x1130] ss:$144 sps:$4 sm:$0xff]   ;;  %v10939_v38 = vld [vmem:[#allocation9 + $0x1138] ss:$144 sps:$4 sm:$0xff]   ;;  %v10944_v51 = vld [vmem:[#allocation9 + $0x64] ss:$144 sps:$4 sm:$0xff]  }
 0x4b6   : > { %v10947_v19 = vld [vmem:[#allocation9 + $0x6c] ss:$144 sps:$4 sm:$0xff]   ;;  %v10942_v41 = vld [vmem:[#allocation9 + $0x60] ss:$144 sps:$4 sm:$0xff]   ;;  %v10945_v36 = vld [vmem:[#allocation9 + $0x68] ss:$144 sps:$4 sm:$0xff]  }
 0x4b7   : > { %v10950_v58 = vld [vmem:[#allocation9 + $0x184] ss:$144 sps:$4 sm:$0xff]   ;;  %v10953_v62 = vld [vmem:[#allocation9 + $0x18c] ss:$144 sps:$4 sm:$0xff]   ;;  %v10948_v37 = vld [vmem:[#allocation9 + $0x180] ss:$144 sps:$4 sm:$0xff]  }
 0x4b8   : > { %7044 = vmatpush1.bf16.msra.mxu0 %v10894_v40  ;;  %7095 = vmatpush1.bf16.msra.mxu1 %v10897_v52  ;;  %v10951_v7 = vld [vmem:[#allocation9 + $0x188] ss:$144 sps:$4 sm:$0xff]   ;;  %v10956_v14 = vld [vmem:[#allocation9 + $0x2a4] ss:$144 sps:$4 sm:$0xff]   ;;  %v10959_v25 = vld [vmem:[#allocation9 + $0x2ac] ss:$144 sps:$4 sm:$0xff]  }
 0x4b9   : > { %7045 = vmatprep.subr.bf16.mxu0 %v10902_v59  ;;  %7096 = vmatprep.subr.bf16.mxu1 %v10905_v44  ;;  %v10954_v30 = vld [vmem:[#allocation9 + $0x2a0] ss:$144 sps:$4 sm:$0xff]   ;;  %v10957_v48 = vld [vmem:[#allocation9 + $0x2a8] ss:$144 sps:$4 sm:$0xff]   ;;  %v10962_v12 = vld [vmem:[#allocation9 + $0x3c4] ss:$144 sps:$4 sm:$0xff]  }
 0x4ba   : > { %v10965_v61 = vld [vmem:[#allocation9 + $0x3cc] ss:$144 sps:$4 sm:$0xff]   ;;  %v10960_v40 = vld [vmem:[#allocation9 + $0x3c0] ss:$144 sps:$4 sm:$0xff]   ;;  %v10963_v52 = vld [vmem:[#allocation9 + $0x3c8] ss:$144 sps:$4 sm:$0xff]  }
 0x4bb   : > { %v10968_v59 = vld [vmem:[#allocation9 + $0x4e4] ss:$144 sps:$4 sm:$0xff]   ;;  %v10971_v44 = vld [vmem:[#allocation9 + $0x4ec] ss:$144 sps:$4 sm:$0xff]   ;;  %vm8913_vm0 = vcmask 1041409  }
 0x4bc   : > { %7046 = vmatpush1.bf16.msra.mxu0 %v10900_v11  ;;  %7097 = vmatpush1.bf16.msra.mxu1 %v10903_v8  ;;  %v10966_v11 = vld [vmem:[#allocation9 + $0x4e0] ss:$144 sps:$4 sm:$0xff]   ;;  %v10969_v8 = vld [vmem:[#allocation9 + $0x4e8] ss:$144 sps:$4 sm:$0xff]  }
 0x4bd   : > { %7047 = vmatprep.subr.bf16.mxu0 %v10908_v47  ;;  %7098 = vmatprep.subr.bf16.mxu1 %v10911_v4  ;;  %v10974_v47 = vld [vmem:[#allocation9 + $0x604] ss:$144 sps:$4 sm:$0xff]   ;;  %v10977_v4 = vld [vmem:[#allocation9 + $0x60c] ss:$144 sps:$4 sm:$0xff]  }
 0x4c0   : > { %7048 = vmatpush1.bf16.msra.mxu0 %v10906_v17  ;;  %7099 = vmatpush1.bf16.msra.mxu1 %v10909_v16 }
 0x4c1   : > { %7049 = vmatprep.subr.bf16.mxu0 %v10914_v6  ;;  %7100 = vmatprep.subr.bf16.mxu1 %v10917_v42  ;;  %v10972_v6 = vld [vmem:[#allocation9 + $0x600] ss:$144 sps:$4 sm:$0xff]  }
 0x4c4   : > { %7050 = vmatpush1.bf16.msra.mxu0 %v10912_v5  ;;  %7101 = vmatpush1.bf16.msra.mxu1 %v10915_v53 }
 0x4c5   : > { %7051 = vmatprep.subr.bf16.mxu0 %v10920_v60  ;;  %7102 = vmatprep.subr.bf16.mxu1 %v10923_v39  ;;  %v10975_v39 = vld [vmem:[#allocation9 + $0x608] ss:$144 sps:$4 sm:$0xff]  }
 0x4c8   : > { %7052 = vmatpush1.bf16.msra.mxu0 %v10918_v22  ;;  %7103 = vmatpush1.bf16.msra.mxu1 %v10921_v0 }
 0x4c9   : > { %7053 = vmatprep.subr.bf16.mxu0 %v10926_v23  ;;  %7104 = vmatprep.subr.bf16.mxu1 %v10929_v32 }
 0x4cc   : > { %7054 = vmatpush1.bf16.msra.mxu0 %v10924_v57  ;;  %7105 = vmatpush1.bf16.msra.mxu1 %v10927_v33  ;;  %v10980_v57 = vld [vmem:[#allocation9 + $0x724] ss:$144 sps:$4 sm:$0xff]  }
 0x4cd   : > { %7055 = vmatprep.subr.bf16.mxu0 %v10932_v2  ;;  %7106 = vmatprep.subr.bf16.mxu1 %v10935_v56 }
 0x4d0   : > { %7056 = vmatpush1.bf16.msra.mxu0 %v10930_v54  ;;  %7107 = vmatpush1.bf16.msra.mxu1 %v10933_v27 }
 0x4d1   : > { %7057 = vmatprep.subr.bf16.mxu0 %v10938_v50  ;;  %7108 = vmatprep.subr.bf16.mxu1 %v10941_v46  ;;  %v10983_v46 = vld [vmem:[#allocation9 + $0x72c] ss:$144 sps:$4 sm:$0xff]  }
 0x4d4   : > { %7058 = vmatpush1.bf16.msra.mxu0 %v10936_v3  ;;  %7109 = vmatpush1.bf16.msra.mxu1 %v10939_v38 }
 0x4d5   : > { %7129 = vmatprep.subr.bf16.mxu0 %v10944_v51  ;;  %7178 = vmatprep.subr.bf16.mxu1 %v10947_v19 }
 0x4d7   : > { %7060 = vmatmul.mubr.bf16.vlgmr.msra.gmra.mrb[112].mxu0 %v12535_v15  ;;  %7111 = vmatmul.mubr.bf16.vlgmr.msra.gmra.mrb[120].mxu1 %v12535_v15 }
 0x4d8   : > { %9842 = vmatprep.mubr.msk.bf16.mxu0 %vm693_vm3, %v12540_v34  ;;  %9844 = vmatprep.mubr.msk.bf16.mxu1 %vm693_vm3, %v12540_v34 }
 0x4d9   : > { %7130 = vmatpush1.bf16.msra.mxu0 %v10942_v41  ;;  %7179 = vmatpush1.bf16.msra.mxu1 %v10945_v36 }
 0x4da   : > { %7131 = vmatprep.subr.bf16.mxu0 %v10950_v58  ;;  %7180 = vmatprep.subr.bf16.mxu1 %v10953_v62  ;;  %v10978_v62 = vld [vmem:[#allocation9 + $0x720] ss:$144 sps:$4 sm:$0xff]  }
 0x4dd   : > { %7132 = vmatpush1.bf16.msra.mxu0 %v10948_v37  ;;  %7181 = vmatpush1.bf16.msra.mxu1 %v10951_v7  ;;  %v10981_v37 = vld [vmem:[#allocation9 + $0x728] ss:$144 sps:$4 sm:$0xff]  }
 0x4de   : > { %7133 = vmatprep.subr.bf16.mxu0 %v10956_v14  ;;  %7182 = vmatprep.subr.bf16.mxu1 %v10959_v25  ;;  %v10989_v14 = vld [vmem:[#allocation9 + $0x84c] ss:$144 sps:$4 sm:$0xff]  }
 0x4df   : > { %9843 = vmatmul.mubr.msk.bf16.gmra.mrb[116].mxu0 %vm693_vm3, %v12554_v10  ;;  %9845 = vmatmul.mubr.msk.bf16.gmra.mrb[124].mxu1 %vm693_vm3, %v12554_v10 }
 0x4e0   : > { %7161 = vmatprep.mubr.bf16.mxu0 %v12544_v18  ;;  %7210 = vmatprep.mubr.bf16.mxu1 %v12544_v18 }
 0x4e1   : > { %7134 = vmatpush1.bf16.msra.mxu0 %v10954_v30  ;;  %7183 = vmatpush1.bf16.msra.mxu1 %v10957_v48 }
 0x4e2   : > { %7135 = vmatprep.subr.bf16.mxu0 %v10962_v12  ;;  %7184 = vmatprep.subr.bf16.mxu1 %v10965_v61 }
 0x4e5   : > { %7136 = vmatpush1.bf16.msra.mxu0 %v10960_v40  ;;  %7185 = vmatpush1.bf16.msra.mxu1 %v10963_v52  ;;  %v10984_v40 = vld [vmem:[#allocation9 + $0x840] ss:$144 sps:$4 sm:$0xff]   ;;  %v10987_v52 = vld [vmem:[#allocation9 + $0x848] ss:$144 sps:$4 sm:$0xff]  }
 0x4e6   : > { %7137 = vmatprep.subr.bf16.mxu0 %v10968_v59  ;;  %7186 = vmatprep.subr.bf16.mxu1 %v10971_v44 }
 0x4e7   : > { %v6759_v17 = vpop.f32.mrb[88].mxu0  ;;  %v6808_v16 = vpop.f32.mrb[96].mxu1 }
 0x4e8   : > { %v7452_v42 = vrot.slane %v6759_v17, 2  ;;  %v7454_v5 = vrot.slane %v6808_v16, 2  ;;  %v6761_v53 = vpop.f32.mrb[89].mxu0  ;;  %v6810_v60 = vpop.f32.mrb[97].mxu1  ;;  %v10996_v17 = vld [vmem:[#allocation9 + $0xa80] ss:$144 sps:$4 sm:$0xff]  }
 0x4e9   : > { %7138 = vmatpush1.bf16.msra.mxu0 %v10966_v11  ;;  %7187 = vmatpush1.bf16.msra.mxu1 %v10969_v8  ;;  %v7453_v22 = vrot.slane %v6761_v53, 2  ;;  %v7455_v0 = vrot.slane %v6810_v60, 2  ;;  %v6763_v23 = vpop.f32.mrb[90].mxu0  ;;  %v6812_v32 = vpop.f32.mrb[98].mxu1  ;;  %v10992_v11 = vld [vmem:[#allocation9 + $0x964] ss:$144 sps:$4 sm:$0xff]  }
 0x4ea   : > { %v12679_v33 = vadd.f32 %v7452_v42, %v12627_v21  ;;  %v12682_v2 = vadd.f32 %v7454_v5, %v12630_v31  ;;  %7139 = vmatprep.subr.bf16.mxu0 %v10974_v47  ;;  %7188 = vmatprep.subr.bf16.mxu1 %v10977_v4  ;;  %v7637_v56 = vrot.slane %v6763_v23, 2  ;;  %v7641_v54 = vrot.slane %v6812_v32, 2  ;;  %v6765_v27 = vpop.f32.mrb[91].mxu0  ;;  %v6814_v50 = vpop.f32.mrb[99].mxu1  ;;  %v10995_v8 = vld [vmem:[#allocation9 + $0x96c] ss:$144 sps:$4 sm:$0xff]  }
 0x4eb   : > { %v12685_v3 = vadd.f32 %v7453_v22, %v12633_v13  ;;  %v12688_v38 = vadd.f32 %v7455_v0, %v12636_v26  ;;  %v7639_v51 = vrot.slane %v6765_v27, 2  ;;  %v7643_v19 = vrot.slane %v6814_v50, 2  ;;  %v10993_v47 = vld [vmem:[#allocation9 + $0x968] ss:$144 sps:$4 sm:$0xff]   ;;  %v11001_v4 = vld [vmem:[#allocation9 + $0xa8c] ss:$144 sps:$4 sm:$0xff]  }
 0x4ec   : > { %v7638_v21 = vsel %vm647_vm1, %v7452_v42, %v7637_v56  ;;  %v12692_v31 = vadd.f32 %v12640_v29, %v7637_v56  ;;  %v7642_v41 = vsel %vm647_vm1, %v7454_v5, %v7641_v54  ;;  %v12696_v36 = vadd.f32 %v12644_v24, %v7641_v54  ;;  %v10986_v29 = vld [vmem:[#allocation9 + $0x844] ss:$144 sps:$4 sm:$0xff]   ;;  %v10999_v16 = vld [vmem:[#allocation9 + $0xa88] ss:$144 sps:$4 sm:$0xff]   ;;  %v11007_v42 = vld [vmem:[#allocation9 + $0xbac] ss:$144 sps:$4 sm:$0xff]  }
 0x4ed   : > { %7140 = vmatpush1.bf16.msra.mxu0 %v10972_v6  ;;  %7189 = vmatpush1.bf16.msra.mxu1 %v10975_v39  ;;  %v7640_v13 = vsel %vm647_vm1, %v7453_v22, %v7639_v51  ;;  %v12700_v58 = vadd.f32 %v12657_v28, %v7639_v51  ;;  %v7644_v26 = vsel %vm647_vm1, %v7455_v0, %v7643_v19  ;;  %v11004_v6 = vld [vmem:[#allocation9 + $0xba4] ss:$144 sps:$4 sm:$0xff]   ;;  %v11002_v5 = vld [vmem:[#allocation9 + $0xba0] ss:$144 sps:$4 sm:$0xff]   ;;  %v11005_v53 = vld [vmem:[#allocation9 + $0xba8] ss:$144 sps:$4 sm:$0xff]  }
 0x4ee   : > { %v12704_v7 = vadd.f32 %v12661_v43, %v7643_v19  ;;  %7141 = vmatprep.subr.bf16.mxu0 %v10980_v57  ;;  %7190 = vmatprep.subr.bf16.mxu1 %v10983_v46  ;;  %v12707_v24 = vadd.f32 %v7638_v21, %v12647_v35  ;;  %v12710_v25 = vadd.f32 %v7642_v41, %v12650_v49  ;;  %v11010_v60 = vld [vmem:[#allocation9 + $0xcc4] ss:$144 sps:$4 sm:$0xff]   ;;  %v11013_v39 = vld [vmem:[#allocation9 + $0xccc] ss:$144 sps:$4 sm:$0xff]   ;;  %v11008_v22 = vld [vmem:[#allocation9 + $0xcc0] ss:$144 sps:$4 sm:$0xff]  }
 0x4ef   : > { %v6769_v30 = vpop.f32.mrb[92].mxu0  ;;  %v6818_v28 = vpop.f32.mrb[100].mxu1  ;;  %v12713_v48 = vadd.f32 %v7640_v13, %v12654_v9  ;;  %v12716_v12 = vadd.f32 %v7644_v26, %v12664_v20  ;;  %v10990_v9 = vld [vmem:[#allocation9 + $0x960] ss:$144 sps:$4 sm:$0xff]   ;;  %v10998_v20 = vld [vmem:[#allocation9 + $0xa84] ss:$144 sps:$4 sm:$0xff]  }
 0x4f0   : > { %v6770_v43 = vpop.f32.mrb[93].mxu0  ;;  %v6819_v61 = vpop.f32.mrb[101].mxu1  ;;  %v11011_v0 = vld [vmem:[#allocation9 + $0xcc8] ss:$144 sps:$4 sm:$0xff]   ;;  %v11016_v23 = vld [vmem:[#allocation9 + $0xde4] ss:$144 sps:$4 sm:$0xff]  }
 0x4f1   : > { %7142 = vmatpush1.bf16.msra.mxu0 %v10978_v62  ;;  %7191 = vmatpush1.bf16.msra.mxu1 %v10981_v37  ;;  %v6771_v59 = vpop.f32.mrb[94].mxu0  ;;  %v6820_v35 = vpop.f32.mrb[102].mxu1  ;;  %v11019_v32 = vld [vmem:[#allocation9 + $0xdec] ss:$144 sps:$4 sm:$0xff]   ;;  %v11014_v57 = vld [vmem:[#allocation9 + $0xde0] ss:$144 sps:$4 sm:$0xff]  }
 0x4f2   : > { %7143 = vmatprep.subr.bf16.mxu0 %v10986_v29  ;;  %7192 = vmatprep.subr.bf16.mxu1 %v10989_v14  ;;  %v6772_v49 = vpop.f32.mrb[95].mxu0  ;;  %v6821_v44 = vpop.f32.mrb[103].mxu1  ;;  %v11017_v56 = vld [vmem:[#allocation9 + $0xde8] ss:$144 sps:$4 sm:$0xff]   ;;  %v11022_v54 = vld [vmem:[#allocation9 + $0xf04] ss:$144 sps:$4 sm:$0xff]  }
 0x4f3   : > { %v11025_v27 = vld [vmem:[#allocation9 + $0xf0c] ss:$144 sps:$4 sm:$0xff]   ;;  %v11020_v50 = vld [vmem:[#allocation9 + $0xf00] ss:$144 sps:$4 sm:$0xff]   ;;  %v11023_v46 = vld [vmem:[#allocation9 + $0xf08] ss:$144 sps:$4 sm:$0xff]  }
 0x4f4   : > { %v11028_v51 = vld [vmem:[#allocation9 + $0x1024] ss:$144 sps:$4 sm:$0xff]   ;;  %v11031_v19 = vld [vmem:[#allocation9 + $0x102c] ss:$144 sps:$4 sm:$0xff]   ;;  %v11026_v21 = vld [vmem:[#allocation9 + $0x1020] ss:$144 sps:$4 sm:$0xff]  }
 0x4f5   : > { %7144 = vmatpush1.bf16.msra.mxu0 %v10984_v40  ;;  %7193 = vmatpush1.bf16.msra.mxu1 %v10987_v52  ;;  %v11029_v41 = vld [vmem:[#allocation9 + $0x1028] ss:$144 sps:$4 sm:$0xff]   ;;  %v11034_v13 = vld [vmem:[#allocation9 + $0x1144] ss:$144 sps:$4 sm:$0xff]   ;;  %v11037_v26 = vld [vmem:[#allocation9 + $0x114c] ss:$144 sps:$4 sm:$0xff]  }
 0x4f6   : > { %7145 = vmatprep.subr.bf16.mxu0 %v10992_v11  ;;  %7194 = vmatprep.subr.bf16.mxu1 %v10995_v8  ;;  %v11032_v62 = vld [vmem:[#allocation9 + $0x1140] ss:$144 sps:$4 sm:$0xff]   ;;  %v11035_v37 = vld [vmem:[#allocation9 + $0x1148] ss:$144 sps:$4 sm:$0xff]   ;;  %v11040_v29 = vld [vmem:[#allocation9 + $0x74] ss:$144 sps:$4 sm:$0xff]  }
 0x4f7   : > { %v11043_v14 = vld [vmem:[#allocation9 + $0x7c] ss:$144 sps:$4 sm:$0xff]   ;;  %v11038_v30 = vld [vmem:[#allocation9 + $0x70] ss:$144 sps:$4 sm:$0xff]   ;;  %v11041_v28 = vld [vmem:[#allocation9 + $0x78] ss:$144 sps:$4 sm:$0xff]  }
 0x4f8   : > { %v11046_v43 = vld [vmem:[#allocation9 + $0x194] ss:$144 sps:$4 sm:$0xff]   ;;  %v11049_v61 = vld [vmem:[#allocation9 + $0x19c] ss:$144 sps:$4 sm:$0xff]   ;;  %v11044_v40 = vld [vmem:[#allocation9 + $0x190] ss:$144 sps:$4 sm:$0xff]  }
 0x4f9   : > { %7146 = vmatpush1.bf16.msra.mxu0 %v10990_v9  ;;  %7195 = vmatpush1.bf16.msra.mxu1 %v10993_v47  ;;  %v11047_v52 = vld [vmem:[#allocation9 + $0x198] ss:$144 sps:$4 sm:$0xff]   ;;  %v11052_v59 = vld [vmem:[#allocation9 + $0x2b4] ss:$144 sps:$4 sm:$0xff]   ;;  %v11055_v35 = vld [vmem:[#allocation9 + $0x2bc] ss:$144 sps:$4 sm:$0xff]  }
 0x4fa   : > { %7147 = vmatprep.subr.bf16.mxu0 %v10998_v20  ;;  %7196 = vmatprep.subr.bf16.mxu1 %v11001_v4  ;;  %v11050_v49 = vld [vmem:[#allocation9 + $0x2b0] ss:$144 sps:$4 sm:$0xff]   ;;  %v11053_v44 = vld [vmem:[#allocation9 + $0x2b8] ss:$144 sps:$4 sm:$0xff]   ;;  %v11058_v11 = vld [vmem:[#allocation9 + $0x3d4] ss:$144 sps:$4 sm:$0xff]  }
 0x4fb   : > { %v11061_v8 = vld [vmem:[#allocation9 + $0x3dc] ss:$144 sps:$4 sm:$0xff]   ;;  %v11056_v9 = vld [vmem:[#allocation9 + $0x3d0] ss:$144 sps:$4 sm:$0xff]   ;;  %v11059_v47 = vld [vmem:[#allocation9 + $0x3d8] ss:$144 sps:$4 sm:$0xff]  }
 0x4fc   : > { %v11064_v20 = vld [vmem:[#allocation9 + $0x4f4] ss:$144 sps:$4 sm:$0xff]   ;;  %v11067_v4 = vld [vmem:[#allocation9 + $0x4fc] ss:$144 sps:$4 sm:$0xff]  }
 0x4fd   : > { %7148 = vmatpush1.bf16.msra.mxu0 %v10996_v17  ;;  %7197 = vmatpush1.bf16.msra.mxu1 %v10999_v16  ;;  %v11062_v17 = vld [vmem:[#allocation9 + $0x4f0] ss:$144 sps:$4 sm:$0xff]   ;;  %v11065_v16 = vld [vmem:[#allocation9 + $0x4f8] ss:$144 sps:$4 sm:$0xff]  }
 0x4fe   : > { %7149 = vmatprep.subr.bf16.mxu0 %v11004_v6  ;;  %7198 = vmatprep.subr.bf16.mxu1 %v11007_v42  ;;  %v11070_v6 = vld [vmem:[#allocation9 + $0x614] ss:$144 sps:$4 sm:$0xff]   ;;  %v11073_v42 = vld [vmem:[#allocation9 + $0x61c] ss:$144 sps:$4 sm:$0xff]  }
 0x501   : > { %7150 = vmatpush1.bf16.msra.mxu0 %v11002_v5  ;;  %7199 = vmatpush1.bf16.msra.mxu1 %v11005_v53 }
 0x502   : > { %7151 = vmatprep.subr.bf16.mxu0 %v11010_v60  ;;  %7200 = vmatprep.subr.bf16.mxu1 %v11013_v39  ;;  %v11068_v60 = vld [vmem:[#allocation9 + $0x610] ss:$144 sps:$4 sm:$0xff]  }
 0x505   : > { %7152 = vmatpush1.bf16.msra.mxu0 %v11008_v22  ;;  %7201 = vmatpush1.bf16.msra.mxu1 %v11011_v0 }
 0x506   : > { %7153 = vmatprep.subr.bf16.mxu0 %v11016_v23  ;;  %7202 = vmatprep.subr.bf16.mxu1 %v11019_v32  ;;  %v11071_v32 = vld [vmem:[#allocation9 + $0x618] ss:$144 sps:$4 sm:$0xff]  }
 0x509   : > { %7154 = vmatpush1.bf16.msra.mxu0 %v11014_v57  ;;  %7203 = vmatpush1.bf16.msra.mxu1 %v11017_v56 }
 0x50a   : > { %7155 = vmatprep.subr.bf16.mxu0 %v11022_v54  ;;  %7204 = vmatprep.subr.bf16.mxu1 %v11025_v27 }
 0x50d   : > { %7156 = vmatpush1.bf16.msra.mxu0 %v11020_v50  ;;  %7205 = vmatpush1.bf16.msra.mxu1 %v11023_v46  ;;  %v11076_v50 = vld [vmem:[#allocation9 + $0x734] ss:$144 sps:$4 sm:$0xff]  }
 0x50e   : > { %7157 = vmatprep.subr.bf16.mxu0 %v11028_v51  ;;  %7206 = vmatprep.subr.bf16.mxu1 %v11031_v19 }
 0x511   : > { %7158 = vmatpush1.bf16.msra.mxu0 %v11026_v21  ;;  %7207 = vmatpush1.bf16.msra.mxu1 %v11029_v41 }
 0x512   : > { %7159 = vmatprep.subr.bf16.mxu0 %v11034_v13  ;;  %7208 = vmatprep.subr.bf16.mxu1 %v11037_v26  ;;  %v11079_v26 = vld [vmem:[#allocation9 + $0x73c] ss:$144 sps:$4 sm:$0xff]  }
 0x515   : > { %7160 = vmatpush1.bf16.msra.mxu0 %v11032_v62  ;;  %7209 = vmatpush1.bf16.msra.mxu1 %v11035_v37 }
 0x516   : > { %7227 = vmatprep.subr.bf16.mxu0 %v11040_v29  ;;  %7276 = vmatprep.subr.bf16.mxu1 %v11043_v14 }
 0x518   : > { %7162 = vmatmul.mubr.bf16.vlgmr.msra.gmra.mrb[120].mxu0 %v12535_v15  ;;  %7211 = vmatmul.mubr.bf16.vlgmr.msra.gmra.mrb[128].mxu1 %v12535_v15 }
 0x519   : > { %9846 = vmatprep.mubr.msk.bf16.mxu0 %vm693_vm3, %v12540_v34  ;;  %9848 = vmatprep.mubr.msk.bf16.mxu1 %vm693_vm3, %v12540_v34 }
 0x51a   : > { %7228 = vmatpush1.bf16.msra.mxu0 %v11038_v30  ;;  %7277 = vmatpush1.bf16.msra.mxu1 %v11041_v28 }
 0x51b   : > { %7229 = vmatprep.subr.bf16.mxu0 %v11046_v43  ;;  %7278 = vmatprep.subr.bf16.mxu1 %v11049_v61  ;;  %v11077_v43 = vld [vmem:[#allocation9 + $0x738] ss:$144 sps:$4 sm:$0xff]   ;;  %v11085_v61 = vld [vmem:[#allocation9 + $0x85c] ss:$144 sps:$4 sm:$0xff]  }
 0x51e   : > { %7230 = vmatpush1.bf16.msra.mxu0 %v11044_v40  ;;  %7279 = vmatpush1.bf16.msra.mxu1 %v11047_v52 }
 0x51f   : > { %7231 = vmatprep.subr.bf16.mxu0 %v11052_v59  ;;  %7280 = vmatprep.subr.bf16.mxu1 %v11055_v35 }
 0x520   : > { %9847 = vmatmul.mubr.msk.bf16.gmra.mrb[124].mxu0 %vm693_vm3, %v12554_v10  ;;  %9849 = vmatmul.mubr.msk.bf16.gmra.mrb[132].mxu1 %vm693_vm3, %v12554_v10 }
 0x521   : > { %7259 = vmatprep.mubr.bf16.mxu0 %v12544_v18  ;;  %7308 = vmatprep.mubr.bf16.mxu1 %v12544_v18 }
 0x522   : > { %7232 = vmatpush1.bf16.msra.mxu0 %v11050_v49  ;;  %7281 = vmatpush1.bf16.msra.mxu1 %v11053_v44  ;;  %v11080_v49 = vld [vmem:[#allocation9 + $0x850] ss:$144 sps:$4 sm:$0xff]  }
 0x523   : > { %7233 = vmatprep.subr.bf16.mxu0 %v11058_v11  ;;  %7282 = vmatprep.subr.bf16.mxu1 %v11061_v8  ;;  %v11083_v11 = vld [vmem:[#allocation9 + $0x858] ss:$144 sps:$4 sm:$0xff]  }
 0x526   : > { %7234 = vmatpush1.bf16.msra.mxu0 %v11056_v9  ;;  %7283 = vmatpush1.bf16.msra.mxu1 %v11059_v47 }
 0x527   : > { %7235 = vmatprep.subr.bf16.mxu0 %v11064_v20  ;;  %7284 = vmatprep.subr.bf16.mxu1 %v11067_v4 }
 0x528   : > { %v6857_v5 = vpop.f32.mrb[96].mxu0  ;;  %v6908_v53 = vpop.f32.mrb[104].mxu1 }
 0x529   : > { %v7468_v39 = vrot.slane %v6857_v5, 5  ;;  %v7470_v22 = vrot.slane %v6908_v53, 5  ;;  %v6859_v0 = vpop.f32.mrb[97].mxu0  ;;  %v6910_v23 = vpop.f32.mrb[105].mxu1 }
 0x52a   : > { %7236 = vmatpush1.bf16.msra.mxu0 %v11062_v17  ;;  %7285 = vmatpush1.bf16.msra.mxu1 %v11065_v16  ;;  %v7469_v57 = vrot.slane %v6859_v0, 5  ;;  %v7471_v56 = vrot.slane %v6910_v23, 5  ;;  %v6861_v54 = vpop.f32.mrb[98].mxu0  ;;  %v6912_v27 = vpop.f32.mrb[106].mxu1  ;;  %v11088_v17 = vld [vmem:[#allocation9 + $0x974] ss:$144 sps:$4 sm:$0xff]  }
 0x52b   : > { %v12731_v46 = vadd.f32 %v7468_v39, %v12679_v33  ;;  %v12734_v51 = vadd.f32 %v7470_v22, %v12682_v2  ;;  %7237 = vmatprep.subr.bf16.mxu0 %v11070_v6  ;;  %7286 = vmatprep.subr.bf16.mxu1 %v11073_v42  ;;  %v7657_v19 = vrot.slane %v6861_v54, 5  ;;  %v7659_v21 = vrot.slane %v6912_v27, 5  ;;  %v6863_v41 = vpop.f32.mrb[99].mxu0  ;;  %v6914_v13 = vpop.f32.mrb[107].mxu1  ;;  %v11091_v16 = vld [vmem:[#allocation9 + $0x97c] ss:$144 sps:$4 sm:$0xff]  }
 0x52c   : > { %v12737_v62 = vadd.f32 %v7469_v57, %v12685_v3  ;;  %v12740_v37 = vadd.f32 %v7471_v56, %v12688_v38  ;;  %v7658_v29 = vrot.slane %v6863_v41, 5  ;;  %v7660_v14 = vrot.slane %v6914_v13, 5  ;;  %v11074_v3 = vld [vmem:[#allocation9 + $0x730] ss:$144 sps:$4 sm:$0xff]   ;;  %v11082_v38 = vld [vmem:[#allocation9 + $0x854] ss:$144 sps:$4 sm:$0xff]  }
 0x52d   : > { %v12743_v33 = vadd.f32 %v7657_v19, %v12707_v24  ;;  %v12746_v2 = vadd.f32 %v7659_v21, %v12710_v25  ;;  %v11086_v22 = vld [vmem:[#allocation9 + $0x970] ss:$144 sps:$4 sm:$0xff]   ;;  %v11089_v0 = vld [vmem:[#allocation9 + $0x978] ss:$144 sps:$4 sm:$0xff]   ;;  %v11094_v23 = vld [vmem:[#allocation9 + $0xa94] ss:$144 sps:$4 sm:$0xff]  }
 0x52e   : > { %7238 = vmatpush1.bf16.msra.mxu0 %v11068_v60  ;;  %7287 = vmatpush1.bf16.msra.mxu1 %v11071_v32  ;;  %v12749_v30 = vadd.f32 %v7658_v29, %v12713_v48  ;;  %v12752_v28 = vadd.f32 %v7660_v14, %v12716_v12  ;;  %v11097_v32 = vld [vmem:[#allocation9 + $0xa9c] ss:$144 sps:$4 sm:$0xff]   ;;  %v11095_v57 = vld [vmem:[#allocation9 + $0xa98] ss:$144 sps:$4 sm:$0xff]   ;;  %v11106_v54 = vld [vmem:[#allocation9 + $0xcd4] ss:$144 sps:$4 sm:$0xff]  }
 0x52f   : > { %7239 = vmatprep.subr.bf16.mxu0 %v11076_v50  ;;  %7288 = vmatprep.subr.bf16.mxu1 %v11079_v26  ;;  %v11101_v56 = vld [vmem:[#allocation9 + $0xbb8] ss:$144 sps:$4 sm:$0xff]   ;;  %v11109_v27 = vld [vmem:[#allocation9 + $0xcdc] ss:$144 sps:$4 sm:$0xff]   ;;  %v11104_v50 = vld [vmem:[#allocation9 + $0xcd0] ss:$144 sps:$4 sm:$0xff]  }
 0x530   : > { %v6867_v40 = vpop.f32.mrb[100].mxu0  ;;  %v6918_v24 = vpop.f32.mrb[108].mxu1  ;;  %v11115_v41 = vld [vmem:[#allocation9 + $0xdfc] ss:$144 sps:$4 sm:$0xff]   ;;  %v11110_v13 = vld [vmem:[#allocation9 + $0xdf0] ss:$144 sps:$4 sm:$0xff]  }
 0x531   : > { %v7769_v52 = vrot.slane %v6867_v40, 5  ;;  %v7773_v59 = vrot.slane %v6918_v24, 5  ;;  %v6869_v25 = vpop.f32.mrb[101].mxu0  ;;  %v6920_v35 = vpop.f32.mrb[109].mxu1  ;;  %v11113_v26 = vld [vmem:[#allocation9 + $0xdf8] ss:$144 sps:$4 sm:$0xff]  }
 0x532   : > { %7240 = vmatpush1.bf16.msra.mxu0 %v11074_v3  ;;  %7289 = vmatpush1.bf16.msra.mxu1 %v11077_v43  ;;  %v7771_v48 = vrot.slane %v6869_v25, 5  ;;  %v7775_v44 = vrot.slane %v6920_v35, 5  ;;  %v6871_v12 = vpop.f32.mrb[102].mxu0  ;;  %v6922_v8 = vpop.f32.mrb[110].mxu1  ;;  %v11116_v3 = vld [vmem:[#allocation9 + $0xf10] ss:$144 sps:$4 sm:$0xff]  }
 0x533   : > { %v7770_v9 = vsel %vm765_vm6, %v7657_v19, %v7769_v52  ;;  %v7774_v47 = vsel %vm765_vm6, %v7659_v21, %v7773_v59  ;;  %7241 = vmatprep.subr.bf16.mxu0 %v11082_v38  ;;  %7290 = vmatprep.subr.bf16.mxu1 %v11085_v61  ;;  %v6872_v20 = vpop.f32.mrb[103].mxu0  ;;  %v6923_v4 = vpop.f32.mrb[111].mxu1  ;;  %v11107_v19 = vld [vmem:[#allocation9 + $0xcd8] ss:$144 sps:$4 sm:$0xff]   ;;  %v11112_v21 = vld [vmem:[#allocation9 + $0xdf4] ss:$144 sps:$4 sm:$0xff]  }
 0x534   : > { %v7772_v6 = vsel %vm765_vm6, %v7658_v29, %v7771_v48  ;;  %v7776_v42 = vsel %vm765_vm6, %v7660_v14, %v7775_v44  ;;  %v12759_v5 = vadd.f32 %v7770_v9, %v12692_v31  ;;  %v12762_v53 = vadd.f32 %v7774_v47, %v12696_v36  ;;  %v11092_v31 = vld [vmem:[#allocation9 + $0xa90] ss:$144 sps:$4 sm:$0xff]   ;;  %v11100_v36 = vld [vmem:[#allocation9 + $0xbb4] ss:$144 sps:$4 sm:$0xff]   ;;  %v11121_v14 = vld [vmem:[#allocation9 + $0xf1c] ss:$144 sps:$4 sm:$0xff]  }
 0x535   : > { %v12765_v60 = vadd.f32 %v7772_v6, %v12700_v58  ;;  %v12768_v39 = vadd.f32 %v7776_v42, %v12704_v7  ;;  %v11103_v58 = vld [vmem:[#allocation9 + $0xbbc] ss:$144 sps:$4 sm:$0xff]   ;;  %v11098_v7 = vld [vmem:[#allocation9 + $0xbb0] ss:$144 sps:$4 sm:$0xff]   ;;  %v11118_v29 = vld [vmem:[#allocation9 + $0xf14] ss:$144 sps:$4 sm:$0xff]  }
 0x536   : > { %7242 = vmatpush1.bf16.msra.mxu0 %v11080_v49  ;;  %7291 = vmatpush1.bf16.msra.mxu1 %v11083_v11  ;;  %v11119_v43 = vld [vmem:[#allocation9 + $0xf18] ss:$144 sps:$4 sm:$0xff]   ;;  %v11124_v38 = vld [vmem:[#allocation9 + $0x1034] ss:$144 sps:$4 sm:$0xff]   ;;  %v11127_v61 = vld [vmem:[#allocation9 + $0x103c] ss:$144 sps:$4 sm:$0xff]  }
 0x537   : > { %7243 = vmatprep.subr.bf16.mxu0 %v11088_v17  ;;  %7292 = vmatprep.subr.bf16.mxu1 %v11091_v16  ;;  %v11122_v40 = vld [vmem:[#allocation9 + $0x1030] ss:$144 sps:$4 sm:$0xff]   ;;  %v11125_v24 = vld [vmem:[#allocation9 + $0x1038] ss:$144 sps:$4 sm:$0xff]   ;;  %v11130_v52 = vld [vmem:[#allocation9 + $0x1154] ss:$144 sps:$4 sm:$0xff]  }
 0x538   : > { %v11133_v59 = vld [vmem:[#allocation9 + $0x115c] ss:$144 sps:$4 sm:$0xff]   ;;  %v11128_v25 = vld [vmem:[#allocation9 + $0x1150] ss:$144 sps:$4 sm:$0xff]   ;;  %v11131_v35 = vld [vmem:[#allocation9 + $0x1158] ss:$144 sps:$4 sm:$0xff]  }
 0x539   : > { %v11136_v49 = vld [vmem:[#allocation9 + $0x84] ss:$144 sps:$4 sm:$0xff]   ;;  %v11139_v48 = vld [vmem:[#allocation9 + $0x8c] ss:$144 sps:$4 sm:$0xff]   ;;  %v11134_v44 = vld [vmem:[#allocation9 + $0x80] ss:$144 sps:$4 sm:$0xff]  }
 0x53a   : > { %7244 = vmatpush1.bf16.msra.mxu0 %v11086_v22  ;;  %7293 = vmatpush1.bf16.msra.mxu1 %v11089_v0  ;;  %v11137_v11 = vld [vmem:[#allocation9 + $0x88] ss:$144 sps:$4 sm:$0xff]   ;;  %v11142_v12 = vld [vmem:[#allocation9 + $0x1a4] ss:$144 sps:$4 sm:$0xff]   ;;  %v11145_v8 = vld [vmem:[#allocation9 + $0x1ac] ss:$144 sps:$4 sm:$0xff]  }
 0x53b   : > { %7245 = vmatprep.subr.bf16.mxu0 %v11094_v23  ;;  %7294 = vmatprep.subr.bf16.mxu1 %v11097_v32  ;;  %v11140_v9 = vld [vmem:[#allocation9 + $0x1a0] ss:$144 sps:$4 sm:$0xff]   ;;  %v11143_v47 = vld [vmem:[#allocation9 + $0x1a8] ss:$144 sps:$4 sm:$0xff]   ;;  %v11148_v20 = vld [vmem:[#allocation9 + $0x2c4] ss:$144 sps:$4 sm:$0xff]  }
 0x53c   : > { %v11151_v4 = vld [vmem:[#allocation9 + $0x2cc] ss:$144 sps:$4 sm:$0xff]   ;;  %v11146_v17 = vld [vmem:[#allocation9 + $0x2c0] ss:$144 sps:$4 sm:$0xff]   ;;  %v11149_v16 = vld [vmem:[#allocation9 + $0x2c8] ss:$144 sps:$4 sm:$0xff]  }
 0x53d   : > { %v11154_v6 = vld [vmem:[#allocation9 + $0x3e4] ss:$144 sps:$4 sm:$0xff]   ;;  %v11157_v42 = vld [vmem:[#allocation9 + $0x3ec] ss:$144 sps:$4 sm:$0xff]   ;;  %v11152_v22 = vld [vmem:[#allocation9 + $0x3e0] ss:$144 sps:$4 sm:$0xff]  }
 0x53e   : > { %7246 = vmatpush1.bf16.msra.mxu0 %v11092_v31  ;;  %7295 = vmatpush1.bf16.msra.mxu1 %v11095_v57  ;;  %v11155_v0 = vld [vmem:[#allocation9 + $0x3e8] ss:$144 sps:$4 sm:$0xff]   ;;  %v11160_v23 = vld [vmem:[#allocation9 + $0x504] ss:$144 sps:$4 sm:$0xff]   ;;  %v11163_v32 = vld [vmem:[#allocation9 + $0x50c] ss:$144 sps:$4 sm:$0xff]  }
 0x53f   : > { %7247 = vmatprep.subr.bf16.mxu0 %v11100_v36  ;;  %7296 = vmatprep.subr.bf16.mxu1 %v11103_v58  ;;  %v11158_v31 = vld [vmem:[#allocation9 + $0x500] ss:$144 sps:$4 sm:$0xff]   ;;  %v11161_v57 = vld [vmem:[#allocation9 + $0x508] ss:$144 sps:$4 sm:$0xff]   ;;  %v11166_v36 = vld [vmem:[#allocation9 + $0x624] ss:$144 sps:$4 sm:$0xff]  }
 0x540   : > { %v11169_v58 = vld [vmem:[#allocation9 + $0x62c] ss:$144 sps:$4 sm:$0xff]  }
 0x542   : > { %7248 = vmatpush1.bf16.msra.mxu0 %v11098_v7  ;;  %7297 = vmatpush1.bf16.msra.mxu1 %v11101_v56 }
 0x543   : > { %7249 = vmatprep.subr.bf16.mxu0 %v11106_v54  ;;  %7298 = vmatprep.subr.bf16.mxu1 %v11109_v27  ;;  %v11164_v27 = vld [vmem:[#allocation9 + $0x620] ss:$144 sps:$4 sm:$0xff]  }
 0x546   : > { %7250 = vmatpush1.bf16.msra.mxu0 %v11104_v50  ;;  %7299 = vmatpush1.bf16.msra.mxu1 %v11107_v19  ;;  %v11167_v50 = vld [vmem:[#allocation9 + $0x628] ss:$144 sps:$4 sm:$0xff]  }
 0x547   : > { %7251 = vmatprep.subr.bf16.mxu0 %v11112_v21  ;;  %7300 = vmatprep.subr.bf16.mxu1 %v11115_v41  ;;  %v11172_v41 = vld [vmem:[#allocation9 + $0x744] ss:$144 sps:$4 sm:$0xff]  }
 0x54a   : > { %7252 = vmatpush1.bf16.msra.mxu0 %v11110_v13  ;;  %7301 = vmatpush1.bf16.msra.mxu1 %v11113_v26 }
 0x54b   : > { %7253 = vmatprep.subr.bf16.mxu0 %v11118_v29  ;;  %7302 = vmatprep.subr.bf16.mxu1 %v11121_v14 }
 0x54e   : > { %7254 = vmatpush1.bf16.msra.mxu0 %v11116_v3  ;;  %7303 = vmatpush1.bf16.msra.mxu1 %v11119_v43 }
 0x54f   : > { %7255 = vmatprep.subr.bf16.mxu0 %v11124_v38  ;;  %7304 = vmatprep.subr.bf16.mxu1 %v11127_v61 }
 0x552   : > { %7256 = vmatpush1.bf16.msra.mxu0 %v11122_v40  ;;  %7305 = vmatpush1.bf16.msra.mxu1 %v11125_v24 }
 0x553   : > { %7257 = vmatprep.subr.bf16.mxu0 %v11130_v52  ;;  %7306 = vmatprep.subr.bf16.mxu1 %v11133_v59  ;;  %v11175_v52 = vld [vmem:[#allocation9 + $0x74c] ss:$144 sps:$4 sm:$0xff]  }
 0x556   : > { %7258 = vmatpush1.bf16.msra.mxu0 %v11128_v25  ;;  %7307 = vmatpush1.bf16.msra.mxu1 %v11131_v35 }
 0x557   : > { %7325 = vmatprep.subr.bf16.mxu0 %v11136_v49  ;;  %7376 = vmatprep.subr.bf16.mxu1 %v11139_v48 }
 0x559   : > { %7260 = vmatmul.mubr.bf16.vlgmr.msra.gmra.mrb[128].mxu0 %v12535_v15  ;;  %7309 = vmatmul.mubr.bf16.vlgmr.msra.gmra.mrb[136].mxu1 %v12535_v15 }
 0x55a   : > { %9850 = vmatprep.mubr.msk.bf16.mxu0 %vm693_vm3, %v12540_v34  ;;  %9852 = vmatprep.mubr.msk.bf16.mxu1 %vm693_vm3, %v12540_v34 }
 0x55b   : > { %7326 = vmatpush1.bf16.msra.mxu0 %v11134_v44  ;;  %7377 = vmatpush1.bf16.msra.mxu1 %v11137_v11 }
 0x55c   : > { %7327 = vmatprep.subr.bf16.mxu0 %v11142_v12  ;;  %7378 = vmatprep.subr.bf16.mxu1 %v11145_v8  ;;  %v11170_v12 = vld [vmem:[#allocation9 + $0x740] ss:$144 sps:$4 sm:$0xff]   ;;  %v11173_v8 = vld [vmem:[#allocation9 + $0x748] ss:$144 sps:$4 sm:$0xff]  }
 0x55f   : > { %7328 = vmatpush1.bf16.msra.mxu0 %v11140_v9  ;;  %7379 = vmatpush1.bf16.msra.mxu1 %v11143_v47  ;;  %v11181_v47 = vld [vmem:[#allocation9 + $0x86c] ss:$144 sps:$4 sm:$0xff]  }
 0x560   : > { %7329 = vmatprep.subr.bf16.mxu0 %v11148_v20  ;;  %7380 = vmatprep.subr.bf16.mxu1 %v11151_v4 }
 0x561   : > { %9851 = vmatmul.mubr.msk.bf16.gmra.mrb[132].mxu0 %vm693_vm3, %v12554_v10  ;;  %9853 = vmatmul.mubr.msk.bf16.gmra.mrb[140].mxu1 %vm693_vm3, %v12554_v10 }
 0x562   : > { %7357 = vmatprep.mubr.bf16.mxu0 %v12544_v18  ;;  %7408 = vmatprep.mubr.bf16.mxu1 %v12544_v18 }
 0x563   : > { %7330 = vmatpush1.bf16.msra.mxu0 %v11146_v17  ;;  %7381 = vmatpush1.bf16.msra.mxu1 %v11149_v16 }
 0x564   : > { %7331 = vmatprep.subr.bf16.mxu0 %v11154_v6  ;;  %7382 = vmatprep.subr.bf16.mxu1 %v11157_v42 }
 0x567   : > { %7332 = vmatpush1.bf16.msra.mxu0 %v11152_v22  ;;  %7383 = vmatpush1.bf16.msra.mxu1 %v11155_v0 }
 0x568   : > { %7333 = vmatprep.subr.bf16.mxu0 %v11160_v23  ;;  %7384 = vmatprep.subr.bf16.mxu1 %v11163_v32 }
 0x569   : > { %v6959_v7 = vpop.f32.mrb[104].mxu0  ;;  %v7010_v56 = vpop.f32.mrb[112].mxu1 }
 0x56a   : > { %v6961_v54 = vpop.f32.mrb[105].mxu0  ;;  %v7012_v18 = vpop.f32.mrb[113].mxu1  ;;  %v7488_v13 = vrot.slane %v6959_v7, 6  ;;  %v7494_v26 = vrot.slane %v7010_v56, 6  ;;  %v11187_v7 = vld [vmem:[#allocation9 + $0x98c] ss:$144 sps:$4 sm:$0xff]  }
 0x56b   : > { %7334 = vmatpush1.bf16.msra.mxu0 %v11158_v31  ;;  %7385 = vmatpush1.bf16.msra.mxu1 %v11161_v57  ;;  %v6963_v19 = vpop.f32.mrb[106].mxu0  ;;  %v7014_v21 = vpop.f32.mrb[114].mxu1  ;;  %v7491_v38 = vrot.slane %v6961_v54, 6  ;;  %v7497_v61 = vrot.slane %v7012_v18, 6  ;;  %v11182_v18 = vld [vmem:[#allocation9 + $0x980] ss:$144 sps:$4 sm:$0xff]  }
 0x56c   : > { %7335 = vmatprep.subr.bf16.mxu0 %v11166_v36  ;;  %7386 = vmatprep.subr.bf16.mxu1 %v11169_v58  ;;  %v7489_v29 = vrot.slane %v6963_v19, 6  ;;  %v7495_v14 = vrot.slane %v7014_v21, 6  ;;  %v6965_v3 = vpop.f32.mrb[107].mxu0  ;;  %v7016_v43 = vpop.f32.mrb[115].mxu1  ;;  %v11184_v58 = vld [vmem:[#allocation9 + $0x984] ss:$144 sps:$4 sm:$0xff]  }
 0x56d   : > { %v7492_v40 = vrot.slane %v6965_v3, 6  ;;  %v7498_v24 = vrot.slane %v7016_v43, 6  ;;  %v11191_v19 = vld [vmem:[#allocation9 + $0xaa8] ss:$144 sps:$4 sm:$0xff]   ;;  %v11196_v21 = vld [vmem:[#allocation9 + $0xbc4] ss:$144 sps:$4 sm:$0xff]  }
 0x56e   : > { %v7490_v59 = vsel %vm693_vm3, %v7488_v13, %v7489_v29  ;;  %v12784_v25 = vadd.f32 %v12743_v33, %v7489_v29  ;;  %v7496_v35 = vsel %vm693_vm3, %v7494_v26, %v7495_v14  ;;  %v12788_v49 = vadd.f32 %v12746_v2, %v7495_v14  ;;  %v11202_v13 = vld [vmem:[#allocation9 + $0xce4] ss:$144 sps:$4 sm:$0xff]   ;;  %v11205_v26 = vld [vmem:[#allocation9 + $0xcec] ss:$144 sps:$4 sm:$0xff]   ;;  %v11200_v29 = vld [vmem:[#allocation9 + $0xce0] ss:$144 sps:$4 sm:$0xff]  }
 0x56f   : > { %v12791_v48 = vadd.f32 %v7490_v59, %v12731_v46  ;;  %v12794_v44 = vadd.f32 %v7496_v35, %v12734_v51  ;;  %7336 = vmatpush1.bf16.msra.mxu0 %v11164_v27  ;;  %7387 = vmatpush1.bf16.msra.mxu1 %v11167_v50  ;;  %v7493_v11 = vsel %vm693_vm3, %v7491_v38, %v7492_v40  ;;  %v11178_v51 = vld [vmem:[#allocation9 + $0x864] ss:$144 sps:$4 sm:$0xff]   ;;  %v11193_v27 = vld [vmem:[#allocation9 + $0xaac] ss:$144 sps:$4 sm:$0xff]   ;;  %v11188_v50 = vld [vmem:[#allocation9 + $0xaa0] ss:$144 sps:$4 sm:$0xff]  }
 0x570   : > { %v12798_v33 = vadd.f32 %v7493_v11, %v12737_v62  ;;  %v12801_v9 = vadd.f32 %v12749_v30, %v7492_v40  ;;  %v7499_v2 = vsel %vm693_vm3, %v7497_v61, %v7498_v24  ;;  %v12805_v46 = vadd.f32 %v12752_v28, %v7498_v24  ;;  %7337 = vmatprep.subr.bf16.mxu0 %v11172_v41  ;;  %v11176_v30 = vld [vmem:[#allocation9 + $0x860] ss:$144 sps:$4 sm:$0xff]   ;;  %v11179_v28 = vld [vmem:[#allocation9 + $0x868] ss:$144 sps:$4 sm:$0xff]   ;;  %v11208_v3 = vld [vmem:[#allocation9 + $0xe04] ss:$144 sps:$4 sm:$0xff]  }
 0x571   : > { %v12808_v20 = vadd.f32 %v7499_v2, %v12740_v37  ;;  %7388 = vmatprep.subr.bf16.mxu1 %v11175_v52  ;;  %v6969_v4 = vpop.f32.mrb[108].mxu0  ;;  %v7020_v17 = vpop.f32.mrb[116].mxu1  ;;  %v11197_v41 = vld [vmem:[#allocation9 + $0xbc8] ss:$144 sps:$4 sm:$0xff]   ;;  %v11211_v43 = vld [vmem:[#allocation9 + $0xe0c] ss:$144 sps:$4 sm:$0xff]  }
 0x572   : > { %v7789_v16 = vrot.slane %v6969_v4, 6  ;;  %v7791_v62 = vrot.slane %v7020_v17, 6  ;;  %v6971_v6 = vpop.f32.mrb[109].mxu0  ;;  %v7022_v42 = vpop.f32.mrb[117].mxu1  ;;  %v11203_v14 = vld [vmem:[#allocation9 + $0xce8] ss:$144 sps:$4 sm:$0xff]  }
 0x573   : > { %7338 = vmatpush1.bf16.msra.mxu0 %v11170_v12  ;;  %7389 = vmatpush1.bf16.msra.mxu1 %v11173_v8  ;;  %v7790_v22 = vrot.slane %v6971_v6, 6  ;;  %v7792_v0 = vrot.slane %v7022_v42, 6  ;;  %v6973_v23 = vpop.f32.mrb[110].mxu0  ;;  %v7024_v32 = vpop.f32.mrb[118].mxu1  ;;  %v11206_v38 = vld [vmem:[#allocation9 + $0xe00] ss:$144 sps:$4 sm:$0xff]  }
 0x574   : > { %v12811_v31 = vadd.f32 %v7789_v16, %v12759_v5  ;;  %v12814_v37 = vadd.f32 %v7791_v62, %v12762_v53  ;;  %7339 = vmatprep.subr.bf16.mxu0 %v11178_v51  ;;  %7390 = vmatprep.subr.bf16.mxu1 %v11181_v47  ;;  %v6974_v57 = vpop.f32.mrb[111].mxu0  ;;  %v7025_v36 = vpop.f32.mrb[119].mxu1  ;;  %v11185_v5 = vld [vmem:[#allocation9 + $0x988] ss:$144 sps:$4 sm:$0xff]   ;;  %v11190_v53 = vld [vmem:[#allocation9 + $0xaa4] ss:$144 sps:$4 sm:$0xff]  }
 0x575   : > { %v12817_v56 = vadd.f32 %v7790_v22, %v12765_v60  ;;  %v12820_v54 = vadd.f32 %v7792_v0, %v12768_v39  ;;  %v11199_v60 = vld [vmem:[#allocation9 + $0xbcc] ss:$144 sps:$4 sm:$0xff]   ;;  %v11194_v39 = vld [vmem:[#allocation9 + $0xbc0] ss:$144 sps:$4 sm:$0xff]   ;;  %v11209_v61 = vld [vmem:[#allocation9 + $0xe08] ss:$144 sps:$4 sm:$0xff]  }
 0x576   : > { %v11214_v40 = vld [vmem:[#allocation9 + $0xf24] ss:$144 sps:$4 sm:$0xff]   ;;  %v11217_v24 = vld [vmem:[#allocation9 + $0xf2c] ss:$144 sps:$4 sm:$0xff]   ;;  %v11212_v52 = vld [vmem:[#allocation9 + $0xf20] ss:$144 sps:$4 sm:$0xff]  }
 0x577   : > { %7340 = vmatpush1.bf16.msra.mxu0 %v11176_v30  ;;  %7391 = vmatpush1.bf16.msra.mxu1 %v11179_v28  ;;  %v11215_v59 = vld [vmem:[#allocation9 + $0xf28] ss:$144 sps:$4 sm:$0xff]   ;;  %v11220_v35 = vld [vmem:[#allocation9 + $0x1044] ss:$144 sps:$4 sm:$0xff]   ;;  %v11223_v11 = vld [vmem:[#allocation9 + $0x104c] ss:$144 sps:$4 sm:$0xff]  }
 0x578   : > { %7341 = vmatprep.subr.bf16.mxu0 %v11184_v58  ;;  %7392 = vmatprep.subr.bf16.mxu1 %v11187_v7  ;;  %v11218_v12 = vld [vmem:[#allocation9 + $0x1040] ss:$144 sps:$4 sm:$0xff]   ;;  %v11221_v8 = vld [vmem:[#allocation9 + $0x1048] ss:$144 sps:$4 sm:$0xff]   ;;  %v11226_v2 = vld [vmem:[#allocation9 + $0x1164] ss:$144 sps:$4 sm:$0xff]  }
 0x579   : > { %v11229_v51 = vld [vmem:[#allocation9 + $0x116c] ss:$144 sps:$4 sm:$0xff]   ;;  %v11224_v47 = vld [vmem:[#allocation9 + $0x1160] ss:$144 sps:$4 sm:$0xff]   ;;  %v11227_v4 = vld [vmem:[#allocation9 + $0x1168] ss:$144 sps:$4 sm:$0xff]  }
 0x57b   : > { %7342 = vmatpush1.bf16.msra.mxu0 %v11182_v18  ;;  %7393 = vmatpush1.bf16.msra.mxu1 %v11185_v5 }
 0x57c   : > { %7343 = vmatprep.subr.bf16.mxu0 %v11190_v53  ;;  %7394 = vmatprep.subr.bf16.mxu1 %v11193_v27 }
 0x57f   : > { %7344 = vmatpush1.bf16.msra.mxu0 %v11188_v50  ;;  %7395 = vmatpush1.bf16.msra.mxu1 %v11191_v19 }
 0x580   : > { %7345 = vmatprep.subr.bf16.mxu0 %v11196_v21  ;;  %7396 = vmatprep.subr.bf16.mxu1 %v11199_v60 }
 0x583   : > { %7346 = vmatpush1.bf16.msra.mxu0 %v11194_v39  ;;  %7397 = vmatpush1.bf16.msra.mxu1 %v11197_v41 }
 0x584   : > { %7347 = vmatprep.subr.bf16.mxu0 %v11202_v13  ;;  %7398 = vmatprep.subr.bf16.mxu1 %v11205_v26 }
 0x587   : > { %7348 = vmatpush1.bf16.msra.mxu0 %v11200_v29  ;;  %7399 = vmatpush1.bf16.msra.mxu1 %v11203_v14 }
 0x588   : > { %7349 = vmatprep.subr.bf16.mxu0 %v11208_v3  ;;  %7400 = vmatprep.subr.bf16.mxu1 %v11211_v43 }
 0x58b   : > { %7350 = vmatpush1.bf16.msra.mxu0 %v11206_v38  ;;  %7401 = vmatpush1.bf16.msra.mxu1 %v11209_v61 }
 0x58c   : > { %7351 = vmatprep.subr.bf16.mxu0 %v11214_v40  ;;  %7402 = vmatprep.subr.bf16.mxu1 %v11217_v24  ;;  %v11230_v40 = vld [vmem:[#allocation12] ss:$16 sps:$4 sm:$0xff]   ;;  %v11232_v24 = vld [vmem:[#allocation12 + $0x4] ss:$16 sps:$4 sm:$0xff]  }
 0x58f   : > { %7352 = vmatpush1.bf16.msra.mxu0 %v11212_v52  ;;  %7403 = vmatpush1.bf16.msra.mxu1 %v11215_v59  ;;  %v11233_v52 = vld [vmem:[#allocation12 + $0x8] ss:$16 sps:$4 sm:$0xff]   ;;  %v11235_v59 = vld [vmem:[#allocation12 + $0xc] ss:$16 sps:$4 sm:$0xff]  }
 0x590   : > { %7353 = vmatprep.subr.bf16.mxu0 %v11220_v35  ;;  %7404 = vmatprep.subr.bf16.mxu1 %v11223_v11  ;;  %v11238_v35 = vld [vmem:[#allocation12 + $0x24] ss:$16 sps:$4 sm:$0xff]   ;;  %v11241_v11 = vld [vmem:[#allocation12 + $0x2c] ss:$16 sps:$4 sm:$0xff]  }
 0x593   : > { %7354 = vmatpush1.bf16.msra.mxu0 %v11218_v12  ;;  %7405 = vmatpush1.bf16.msra.mxu1 %v11221_v8  ;;  %v11244_v12 = vld [vmem:[#allocation12 + $0x44] ss:$16 sps:$4 sm:$0xff]   ;;  %v11242_v8 = vld [vmem:[#allocation12 + $0x40] ss:$16 sps:$4 sm:$0xff]  }
 0x594   : > { %7355 = vmatprep.subr.bf16.mxu0 %v11226_v2  ;;  %7406 = vmatprep.subr.bf16.mxu1 %v11229_v51  ;;  %v11250_v2 = vld [vmem:[#allocation12 + $0x64] ss:$16 sps:$4 sm:$0xff]   ;;  %v11253_v51 = vld [vmem:[#allocation12 + $0x6c] ss:$16 sps:$4 sm:$0xff]  }
 0x597   : > { %7356 = vmatpush1.bf16.msra.mxu0 %v11224_v47  ;;  %7407 = vmatpush1.bf16.msra.mxu1 %v11227_v4  ;;  %v11248_v47 = vld [vmem:[#allocation12 + $0x60] ss:$16 sps:$4 sm:$0xff]   ;;  %v11251_v4 = vld [vmem:[#allocation12 + $0x68] ss:$16 sps:$4 sm:$0xff]  }
 0x598   : > { %8712 = vmatprep.subr.bf16.mxu0 %v11232_v24  ;;  %8794 = vmatprep.subr.bf16.mxu1 %v11235_v59  ;;  %v11289_v59 = vld [vmem:[#allocation12 + $0x12c] ss:$16 sps:$4 sm:$0xff]  }
 0x59a   : > { %7358 = vmatmul.mubr.bf16.vlgmr.msra.gmra.mrb[136].mxu0 %v12535_v15  ;;  %7409 = vmatmul.mubr.bf16.vlgmr.msra.gmra.mrb[144].mxu1 %v12535_v15 }
 0x59b   : > { %9854 = vmatprep.mubr.msk.bf16.mxu0 %vm693_vm3, %v12540_v34  ;;  %9856 = vmatprep.mubr.msk.bf16.mxu1 %vm693_vm3, %v12540_v34 }
 0x59c   : > { %8713 = vmatpush1.bf16.msra.mxu0 %v11230_v40  ;;  %8795 = vmatpush1.bf16.msra.mxu1 %v11233_v52  ;;  %v11286_v52 = vld [vmem:[#allocation12 + $0x124] ss:$16 sps:$4 sm:$0xff]  }
 0x59d   : > { %8714 = vmatprep.subr.bf16.mxu0 %v11238_v35  ;;  %8796 = vmatprep.subr.bf16.mxu1 %v11241_v11 }
 0x5a2   : > { %9855 = vmatmul.mubr.msk.bf16.gmra.mrb[140].mxu0 %vm693_vm3, %v12554_v10  ;;  %9857 = vmatmul.mubr.msk.bf16.gmra.mrb[148].mxu1 %vm693_vm3, %v12554_v10 }
 0x5aa   : > { %v7061_v17 = vpop.f32.mrb[112].mxu0  ;;  %v7112_v16 = vpop.f32.mrb[120].mxu1 }
 0x5ab   : > { %v7063_v62 = vpop.f32.mrb[113].mxu0  ;;  %v7114_v6 = vpop.f32.mrb[121].mxu1  ;;  %v7516_v22 = vrot.slane %v7061_v17, 7  ;;  %v7522_v15 = vrot.slane %v7112_v16, 7  ;;  %v11256_v17 = vld [vmem:[#allocation12 + $0x84] ss:$16 sps:$4 sm:$0xff]  }
 0x5ac   : > { %v7065_v42 = vpop.f32.mrb[114].mxu0  ;;  %v7116_v30 = vpop.f32.mrb[122].mxu1  ;;  %v7519_v57 = vrot.slane %v7063_v62, 7  ;;  %v7525_v34 = vrot.slane %v7114_v6, 7  ;;  %v11259_v16 = vld [vmem:[#allocation12 + $0x8c] ss:$16 sps:$4 sm:$0xff]  }
 0x5ad   : > { %v7517_v0 = vrot.slane %v7065_v42, 7  ;;  %v7523_v28 = vrot.slane %v7116_v30, 7  ;;  %v7067_v23 = vpop.f32.mrb[115].mxu0  ;;  %v7118_v32 = vpop.f32.mrb[123].mxu1  ;;  %v11254_v62 = vld [vmem:[#allocation12 + $0x80] ss:$16 sps:$4 sm:$0xff]  }
 0x5ae   : > { %v7520_v36 = vrot.slane %v7067_v23, 7  ;;  %v7526_v58 = vrot.slane %v7118_v32, 7  ;;  %v11257_v6 = vld [vmem:[#allocation12 + $0x88] ss:$16 sps:$4 sm:$0xff]   ;;  %v11262_v42 = vld [vmem:[#allocation12 + $0xa4] ss:$16 sps:$4 sm:$0xff]  }
 0x5af   : > { %v7518_v7 = vsel %vm685_vm2, %v7516_v22, %v7517_v0  ;;  %v12834_v10 = vadd.f32 %v12784_v25, %v7517_v0  ;;  %v7524_v18 = vsel %vm685_vm2, %v7522_v15, %v7523_v28  ;;  %v12838_v5 = vadd.f32 %v12788_v49, %v7523_v28  ;;  %v11265_v30 = vld [vmem:[#allocation12 + $0xac] ss:$16 sps:$4 sm:$0xff]   ;;  %v11260_v22 = vld [vmem:[#allocation12 + $0xa0] ss:$16 sps:$4 sm:$0xff]   ;;  %v11263_v15 = vld [vmem:[#allocation12 + $0xa8] ss:$16 sps:$4 sm:$0xff]  }
 0x5b0   : > { %v7521_v53 = vsel %vm685_vm2, %v7519_v57, %v7520_v36  ;;  %v12842_v27 = vadd.f32 %v12801_v9, %v7520_v36  ;;  %v7527_v50 = vsel %vm685_vm2, %v7525_v34, %v7526_v58  ;;  %v12846_v19 = vadd.f32 %v12805_v46, %v7526_v58  ;;  %v11268_v0 = vld [vmem:[#allocation12 + $0xc4] ss:$16 sps:$4 sm:$0xff]   ;;  %v11271_v28 = vld [vmem:[#allocation12 + $0xcc] ss:$16 sps:$4 sm:$0xff]   ;;  %v11266_v23 = vld [vmem:[#allocation12 + $0xc0] ss:$16 sps:$4 sm:$0xff]  }
 0x5b1   : > { %v12849_v21 = vadd.f32 %v7518_v7, %v12791_v48  ;;  %v12852_v25 = vadd.f32 %v7524_v18, %v12794_v44  ;;  %v12855_v60 = vadd.f32 %v7521_v53, %v12798_v33  ;;  %v12858_v49 = vadd.f32 %v7527_v50, %v12808_v20  ;;  %v11269_v32 = vld [vmem:[#allocation12 + $0xc8] ss:$16 sps:$4 sm:$0xff]   ;;  %v11274_v57 = vld [vmem:[#allocation12 + $0xe4] ss:$16 sps:$4 sm:$0xff]   ;;  %v11277_v34 = vld [vmem:[#allocation12 + $0xec] ss:$16 sps:$4 sm:$0xff]  }
 0x5b2   : > { %v7071_v39 = vpop.f32.mrb[116].mxu0  ;;  %v7122_v9 = vpop.f32.mrb[124].mxu1  ;;  %v11272_v36 = vld [vmem:[#allocation12 + $0xe0] ss:$16 sps:$4 sm:$0xff]   ;;  %v11275_v58 = vld [vmem:[#allocation12 + $0xe8] ss:$16 sps:$4 sm:$0xff]  }
 0x5b3   : > { %v7805_v41 = vrot.slane %v7071_v39, 7  ;;  %v7807_v13 = vrot.slane %v7122_v9, 7  ;;  %v7073_v26 = vpop.f32.mrb[117].mxu0  ;;  %v7124_v29 = vpop.f32.mrb[125].mxu1  ;;  %v11280_v39 = vld [vmem:[#allocation12 + $0x104] ss:$16 sps:$4 sm:$0xff]  }
 0x5b4   : > { %v7806_v46 = vrot.slane %v7073_v26, 7  ;;  %v7808_v14 = vrot.slane %v7124_v29, 7  ;;  %v7075_v3 = vpop.f32.mrb[118].mxu0  ;;  %v7126_v48 = vpop.f32.mrb[126].mxu1  ;;  %v11283_v9 = vld [vmem:[#allocation12 + $0x10c] ss:$16 sps:$4 sm:$0xff]  }
 0x5b5   : > { %v12861_v43 = vadd.f32 %v7805_v41, %v12811_v31  ;;  %v12864_v44 = vadd.f32 %v7807_v13, %v12814_v37  ;;  %v7076_v33 = vpop.f32.mrb[119].mxu0  ;;  %v7127_v38 = vpop.f32.mrb[127].mxu1  ;;  %v11236_v31 = vld [vmem:[#allocation12 + $0x20] ss:$16 sps:$4 sm:$0xff]   ;;  %v11239_v37 = vld [vmem:[#allocation12 + $0x28] ss:$16 sps:$4 sm:$0xff]  }
 0x5b6   : > { %v12867_v20 = vadd.f32 %v7806_v46, %v12817_v56  ;;  %v12870_v61 = vadd.f32 %v7808_v14, %v12820_v54  ;;  %v11247_v56 = vld [vmem:[#allocation12 + $0x4c] ss:$16 sps:$4 sm:$0xff]   ;;  %8715 = vmatpush1.bf16.msra.mxu0 %v11236_v31  ;;  %8797 = vmatpush1.bf16.msra.mxu1 %v11239_v37  ;;  %v11245_v54 = vld [vmem:[#allocation12 + $0x48] ss:$16 sps:$4 sm:$0xff]   ;;  %v11278_v26 = vld [vmem:[#allocation12 + $0x100] ss:$16 sps:$4 sm:$0xff]  }
 0x5b7   : > { %8716 = vmatprep.subr.bf16.mxu0 %v11244_v12  ;;  %8798 = vmatprep.subr.bf16.mxu1 %v11247_v56  ;;  %v11281_v29 = vld [vmem:[#allocation12 + $0x108] ss:$16 sps:$4 sm:$0xff]   ;;  %v11284_v31 = vld [vmem:[#allocation12 + $0x120] ss:$16 sps:$4 sm:$0xff]   ;;  %vm8916_vm2 = vcmask 1042434  }
 0x5b8   : > { %v11287_v37 = vld [vmem:[#allocation12 + $0x128] ss:$16 sps:$4 sm:$0xff]   ;;  %vm8917_vm6 = vmand %vm8916_vm2, %vm848_vm10 }
 0x5ba   : > { %8717 = vmatpush1.bf16.msra.mxu0 %v11242_v8  ;;  %8799 = vmatpush1.bf16.msra.mxu1 %v11245_v54 }
 0x5bb   : > { %8718 = vmatprep.subr.bf16.mxu0 %v11250_v2  ;;  %8800 = vmatprep.subr.bf16.mxu1 %v11253_v51  ;;  %v11292_v2 = vld [vmem:[#allocation12 + $0x144] ss:$16 sps:$4 sm:$0xff]  }
 0x5be   : > { %8719 = vmatpush1.bf16.msra.mxu0 %v11248_v47  ;;  %8801 = vmatpush1.bf16.msra.mxu1 %v11251_v4 }
 0x5bf   : > { %8720 = vmatprep.subr.bf16.mxu0 %v11256_v17  ;;  %8802 = vmatprep.subr.bf16.mxu1 %v11259_v16  ;;  %v11290_v17 = vld [vmem:[#allocation12 + $0x140] ss:$16 sps:$4 sm:$0xff]  }
 0x5c2   : > { %8721 = vmatpush1.bf16.msra.mxu0 %v11254_v62  ;;  %8803 = vmatpush1.bf16.msra.mxu1 %v11257_v6 }
 0x5c3   : > { %8722 = vmatprep.subr.bf16.mxu0 %v11262_v42  ;;  %8804 = vmatprep.subr.bf16.mxu1 %v11265_v30 }
 0x5c6   : > { %8723 = vmatpush1.bf16.msra.mxu0 %v11260_v22  ;;  %8805 = vmatpush1.bf16.msra.mxu1 %v11263_v15  ;;  %v11293_v22 = vld [vmem:[#allocation12 + $0x148] ss:$16 sps:$4 sm:$0xff]   ;;  %v11295_v15 = vld [vmem:[#allocation12 + $0x14c] ss:$16 sps:$4 sm:$0xff]  }
 0x5c7   : > { %8724 = vmatprep.subr.bf16.mxu0 %v11268_v0  ;;  %8806 = vmatprep.subr.bf16.mxu1 %v11271_v28 }
 0x5ca   : > { %8725 = vmatpush1.bf16.msra.mxu0 %v11266_v23  ;;  %8807 = vmatpush1.bf16.msra.mxu1 %v11269_v32 }
 0x5cb   : > { %8726 = vmatprep.subr.bf16.mxu0 %v11274_v57  ;;  %8808 = vmatprep.subr.bf16.mxu1 %v11277_v34 }
 0x5ce   : > { %8727 = vmatpush1.bf16.msra.mxu0 %v11272_v36  ;;  %8809 = vmatpush1.bf16.msra.mxu1 %v11275_v58  ;;  %v11301_v36 = vld [vmem:[#allocation12 + $0x16c] ss:$16 sps:$4 sm:$0xff]   ;;  %v11296_v58 = vld [vmem:[#allocation12 + $0x160] ss:$16 sps:$4 sm:$0xff]  }
 0x5cf   : > { %8728 = vmatprep.subr.bf16.mxu0 %v11280_v39  ;;  %8810 = vmatprep.subr.bf16.mxu1 %v11283_v9  ;;  %v11314_v39 = vld [vmem:[#allocation12 + $0x1c0] ss:$16 sps:$4 sm:$0xff]   ;;  %v11316_v9 = vld [vmem:[#allocation12 + $0x1c4] ss:$16 sps:$4 sm:$0xff]  }
 0x5d2   : > { %8729 = vmatpush1.bf16.msra.mxu0 %v11278_v26  ;;  %8811 = vmatpush1.bf16.msra.mxu1 %v11281_v29  ;;  %v11322_v26 = vld [vmem:[#allocation12 + $0x1e4] ss:$16 sps:$4 sm:$0xff]   ;;  %v11325_v29 = vld [vmem:[#allocation12 + $0x1ec] ss:$16 sps:$4 sm:$0xff]  }
 0x5d3   : > { %8730 = vmatprep.subr.bf16.mxu0 %v11286_v52  ;;  %8812 = vmatprep.subr.bf16.mxu1 %v11289_v59 }
 0x5d6   : > { %8731 = vmatpush1.bf16.msra.mxu0 %v11284_v31  ;;  %8813 = vmatpush1.bf16.msra.mxu1 %v11287_v37 }
 0x5d7   : > { %8732 = vmatprep.subr.bf16.mxu0 %v11292_v2  ;;  %8814 = vmatprep.subr.bf16.mxu1 %v11295_v15 }
 0x5da   : > { %8733 = vmatpush1.bf16.msra.mxu0 %v11290_v17  ;;  %8815 = vmatpush1.bf16.msra.mxu1 %v11293_v22 }
 0x5db   : > { %8816 = vmatprep.subr.bf16.mxu1 %v11301_v36 }
 0x5eb   : > { %v7163_v7 = vpop.f32.mrb[120].mxu0  ;;  %v7212_v18 = vpop.f32.mrb[128].mxu1 }
 0x5ec   : > { %v7164_v53 = vpop.f32.mrb[121].mxu0  ;;  %v7213_v50 = vpop.f32.mrb[129].mxu1  ;;  %v11307_v7 = vld [vmem:[#allocation12 + $0x18c] ss:$16 sps:$4 sm:$0xff]   ;;  %v11305_v18 = vld [vmem:[#allocation12 + $0x188] ss:$16 sps:$4 sm:$0xff]  }
 0x5ed   : > { %v7165_v41 = vpop.f32.mrb[122].mxu0  ;;  %v7214_v13 = vpop.f32.mrb[130].mxu1  ;;  %v11308_v53 = vld [vmem:[#allocation12 + $0x1a0] ss:$16 sps:$4 sm:$0xff]   ;;  %v11311_v50 = vld [vmem:[#allocation12 + $0x1a8] ss:$16 sps:$4 sm:$0xff]  }
 0x5ee   : > { %v7540_v46 = vrot.slane %v7165_v41, 2  ;;  %v7542_v14 = vrot.slane %v7214_v13, 2  ;;  %v7167_v3 = vpop.f32.mrb[123].mxu0  ;;  %v7216_v48 = vpop.f32.mrb[131].mxu1  ;;  %v11317_v41 = vld [vmem:[#allocation12 + $0x1c8] ss:$16 sps:$4 sm:$0xff]  }
 0x5ef   : > { %v7541_v33 = vrot.slane %v7167_v3, 2  ;;  %v7543_v38 = vrot.slane %v7216_v48, 2  ;;  %v11319_v13 = vld [vmem:[#allocation12 + $0x1cc] ss:$16 sps:$4 sm:$0xff]   ;;  %v11328_v3 = vld [vmem:[#allocation12 + $0x204] ss:$16 sps:$4 sm:$0xff]  }
 0x5f0   : > { %v12873_v40 = vadd.f32 %v7540_v46, %v12849_v21  ;;  %v12876_v24 = vadd.f32 %v7542_v14, %v12852_v25  ;;  %v11331_v48 = vld [vmem:[#allocation12 + $0x20c] ss:$16 sps:$4 sm:$0xff]  }
 0x5f1   : > { %v12879_v35 = vadd.f32 %v7541_v33, %v12855_v60  ;;  %v12882_v11 = vadd.f32 %v7543_v38, %v12858_v49 }
 0x5f3   : > { %v7171_v12 = vpop.f32.mrb[124].mxu0  ;;  %v7220_v56 = vpop.f32.mrb[132].mxu1 }
 0x5f4   : > { %v7689_v21 = vrot.slane %v7171_v12, 2  ;;  %v7693_v8 = vrot.slane %v7220_v56, 2  ;;  %v7173_v25 = vpop.f32.mrb[125].mxu0  ;;  %v7222_v54 = vpop.f32.mrb[133].mxu1 }
 0x5f5   : > { %v7691_v51 = vrot.slane %v7173_v25, 2  ;;  %v7695_v47 = vrot.slane %v7222_v54, 2  ;;  %v7175_v60 = vpop.f32.mrb[126].mxu0  ;;  %v7224_v4 = vpop.f32.mrb[134].mxu1 }
 0x5f6   : > { %v7690_v49 = vsel %vm647_vm1, %v7540_v46, %v7689_v21  ;;  %v12886_v16 = vadd.f32 %v12861_v43, %v7689_v21  ;;  %v7694_v62 = vsel %vm647_vm1, %v7542_v14, %v7693_v8  ;;  %v12890_v6 = vadd.f32 %v12864_v44, %v7693_v8  ;;  %v7176_v42 = vpop.f32.mrb[127].mxu0  ;;  %v7225_v30 = vpop.f32.mrb[135].mxu1  ;;  %v11320_v46 = vld [vmem:[#allocation12 + $0x1e0] ss:$16 sps:$4 sm:$0xff]   ;;  %v11323_v14 = vld [vmem:[#allocation12 + $0x1e8] ss:$16 sps:$4 sm:$0xff]  }
 0x5f7   : > { %v7692_v0 = vsel %vm647_vm1, %v7541_v33, %v7691_v51  ;;  %v12894_v28 = vadd.f32 %v12867_v20, %v7691_v51  ;;  %v7696_v23 = vsel %vm647_vm1, %v7543_v38, %v7695_v47  ;;  %v12898_v43 = vadd.f32 %v12870_v61, %v7695_v47  ;;  %v11298_v20 = vld [vmem:[#allocation12 + $0x164] ss:$16 sps:$4 sm:$0xff]   ;;  %v11299_v61 = vld [vmem:[#allocation12 + $0x168] ss:$16 sps:$4 sm:$0xff]   ;;  %vm12960_vm1 = vmand %vm8913_vm0, %vm856_vm11 }
 0x5f8   : > { %v12901_v32 = vadd.f32 %v7690_v49, %v12834_v10  ;;  %v12904_v44 = vadd.f32 %v7694_v62, %v12838_v5  ;;  %v12907_v57 = vadd.f32 %v7692_v0, %v12842_v27  ;;  %v12910_v34 = vadd.f32 %v7696_v23, %v12846_v19  ;;  %8734 = vmatprep.subr.bf16.mxu0 %v11298_v20  ;;  %v11304_v10 = vld [vmem:[#allocation12 + $0x184] ss:$16 sps:$4 sm:$0xff]   ;;  %v11302_v5 = vld [vmem:[#allocation12 + $0x180] ss:$16 sps:$4 sm:$0xff]   ;;  %v11313_v19 = vld [vmem:[#allocation12 + $0x1ac] ss:$16 sps:$4 sm:$0xff]  }
 0x5f9   : > { %8735 = vmatpush1.bf16.msra.mxu0 %v11296_v58  ;;  %8817 = vmatpush1.bf16.msra.mxu1 %v11299_v61  ;;  %v11310_v27 = vld [vmem:[#allocation12 + $0x1a4] ss:$16 sps:$4 sm:$0xff]   ;;  %vm8915_vm3 = vmor %vm12960_vm1, %vm12008_vm5 }
 0x5fa   : > { %8736 = vmatprep.subr.bf16.mxu0 %v11304_v10  ;;  %8818 = vmatprep.subr.bf16.mxu1 %v11307_v7  ;;  %vm8918_vm11 = vmor %vm8917_vm6, %vm8915_vm3 }
 0x5fd   : > { %8737 = vmatpush1.bf16.msra.mxu0 %v11302_v5  ;;  %8819 = vmatpush1.bf16.msra.mxu1 %v11305_v18 }
 0x5fe   : > { %8738 = vmatprep.subr.bf16.mxu0 %v11310_v27  ;;  %8820 = vmatprep.subr.bf16.mxu1 %v11313_v19 }
 0x601   : > { %8739 = vmatpush1.bf16.msra.mxu0 %v11308_v53  ;;  %8821 = vmatpush1.bf16.msra.mxu1 %v11311_v50 }
 0x602   : > { %8740 = vmatprep.subr.bf16.mxu0 %v11316_v9  ;;  %8822 = vmatprep.subr.bf16.mxu1 %v11319_v13 }
 0x605   : > { %8741 = vmatpush1.bf16.msra.mxu0 %v11314_v39  ;;  %8823 = vmatpush1.bf16.msra.mxu1 %v11317_v41 }
 0x606   : > { %8742 = vmatprep.subr.bf16.mxu0 %v11322_v26  ;;  %8824 = vmatprep.subr.bf16.mxu1 %v11325_v29 }
 0x609   : > { %8743 = vmatpush1.bf16.msra.mxu0 %v11320_v46  ;;  %8825 = vmatpush1.bf16.msra.mxu1 %v11323_v14 }
 0x60a   : > { %8753 = vmatprep.subr.bf16.mxu0 %v11328_v3  ;;  %8835 = vmatprep.subr.bf16.mxu1 %v11331_v48 }
 0x62c   : > { %v7261_v33 = vpop.f32.mrb[128].mxu0  ;;  %v7310_v38 = vpop.f32.mrb[136].mxu1 }
 0x62d   : > { %v7262_v52 = vpop.f32.mrb[129].mxu0  ;;  %v7311_v59 = vpop.f32.mrb[137].mxu1 }
 0x62e   : > { %v7263_v31 = vpop.f32.mrb[130].mxu0  ;;  %v7312_v37 = vpop.f32.mrb[138].mxu1 }
 0x62f   : > { %v7556_v12 = vrot.slane %v7263_v31, 3  ;;  %v7558_v56 = vrot.slane %v7312_v37, 3  ;;  %v7265_v21 = vpop.f32.mrb[131].mxu0  ;;  %v7314_v8 = vpop.f32.mrb[139].mxu1 }
 0x630   : > { %v7557_v25 = vrot.slane %v7265_v21, 3  ;;  %v7559_v54 = vrot.slane %v7314_v8, 3 }
 0x631   : > { %v7564_v2 = vadd.f32 %v7556_v12, %v12873_v40  ;;  %v7566_v51 = vadd.f32 %v7558_v56, %v12876_v24 }
 0x632   : > { %v7565_v47 = vadd.f32 %v7557_v25, %v12879_v35  ;;  %v7567_v60 = vadd.f32 %v7559_v54, %v12882_v11 }
 0x634   : > { %v7269_v4 = vpop.f32.mrb[132].mxu0  ;;  %v7318_v17 = vpop.f32.mrb[140].mxu1 }
 0x635   : > { %v7709_v49 = vrot.slane %v7269_v4, 3  ;;  %v7711_v62 = vrot.slane %v7318_v17, 3  ;;  %v7271_v42 = vpop.f32.mrb[133].mxu0  ;;  %v7320_v30 = vpop.f32.mrb[141].mxu1 }
 0x636   : > { %v7710_v22 = vrot.slane %v7271_v42, 3  ;;  %v7712_v15 = vrot.slane %v7320_v30, 3  ;;  %v7273_v0 = vpop.f32.mrb[134].mxu0  ;;  %v7322_v23 = vpop.f32.mrb[142].mxu1 }
 0x637   : > { %v7717_v20 = vadd.f32 %v7709_v49, %v12901_v32  ;;  %v12918_v40 = vadd.f32 %v12886_v16, %v7709_v49  ;;  %v7719_v24 = vadd.f32 %v7711_v62, %v12904_v44  ;;  %v12922_v35 = vadd.f32 %v12890_v6, %v7711_v62  ;;  %v7274_v11 = vpop.f32.mrb[135].mxu0  ;;  %v7323_v36 = vpop.f32.mrb[143].mxu1  ;;  %v7427_v44 = vld [vmem:[#allocation10] sm:$0xf] }
 0x638   : > { %v7718_v58 = vadd.f32 %v7710_v22, %v12907_v57  ;;  %v12926_v61 = vadd.f32 %v12894_v28, %v7710_v22  ;;  %v7720_v10 = vadd.f32 %v7712_v15, %v12910_v34  ;;  %v12930_v7 = vadd.f32 %v12898_v43, %v7712_v15 }
 0x639   : > { %v7595_v16 = vsub.s32 2, %v12382_v55  ;;  %v7599_v6 = vsub.s32 3, %v12382_v55  ;;  %v7588_v28 = vrot.slane %v7427_v44, %v12385_v45  ;;  %v7592_v41 = vrot.slane %v7427_v44, %v12388_v63 }
 0x63b   : > { %v7596_v34 = vrot.slane %v7427_v44, %v7595_v16  ;;  %v7600_v26 = vrot.slane %v7427_v44, %v7599_v6 }
 0x66d   : > { %v7359_v32 = vpop.f32.mrb[136].mxu0  ;;  %v7410_v5 = vpop.f32.mrb[144].mxu1 }
 0x66e   : > { %v7360_v18 = vpop.f32.mrb[137].mxu0  ;;  %v7411_v27 = vpop.f32.mrb[145].mxu1 }
 0x66f   : > { %v7361_v19 = vpop.f32.mrb[138].mxu0  ;;  %v7412_v53 = vpop.f32.mrb[146].mxu1 }
 0x670   : > { %v7572_v57 = vrot.slane %v7361_v19, 4  ;;  %v7574_v50 = vrot.slane %v7412_v53, 4  ;;  %v7363_v43 = vpop.f32.mrb[139].mxu0  ;;  %v7414_v39 = vpop.f32.mrb[147].mxu1 }
 0x671   : > { %v7573_v9 = vrot.slane %v7363_v43, 4  ;;  %v7575_v13 = vrot.slane %v7414_v39, 4 }
 0x672   : > { %v7580_v29 = vadd.f32 %v7572_v57, %v7564_v2  ;;  %v7582_v46 = vadd.f32 %v7574_v50, %v7566_v51 }
 0x673   : > { %v7581_v14 = vadd.f32 %v7573_v9, %v7565_v47  ;;  %v7583_v3 = vadd.f32 %v7575_v13, %v7567_v60 }
 0x674   : > { %v7605_v48 = vadd.f32 %v7588_v28, %v7580_v29  ;;  %v7607_v33 = vadd.f32 %v7596_v34, %v7582_v46 }
 0x675   : > { %v7606_v38 = vadd.f32 %v7592_v41, %v7581_v14  ;;  %v7608_v52 = vadd.f32 %v7600_v26, %v7583_v3  ;;  %v7367_v59 = vpop.f32.mrb[140].mxu0  ;;  %v7418_v31 = vpop.f32.mrb[148].mxu1 }
 0x676   : > { %v7609_v37 = vmax.f32 %v7605_v48, 0.0  ;;  %v7611_v12 = vmax.f32 %v7607_v33, 0.0  ;;  %v7725_v56 = vrot.slane %v7367_v59, 4  ;;  %v7727_v21 = vrot.slane %v7418_v31, 4  ;;  %v7369_v8 = vpop.f32.mrb[141].mxu0  ;;  %v7420_v25 = vpop.f32.mrb[149].mxu1 }
 0x677   : > { %v7610_v54 = vmax.f32 %v7606_v38, 0.0  ;;  %v7612_v4 = vmax.f32 %v7608_v52, 0.0  ;;  %v7726_v17 = vrot.slane %v7369_v8, 4  ;;  %v7728_v49 = vrot.slane %v7420_v25, 4  ;;  %v7371_v2 = vpop.f32.mrb[142].mxu0  ;;  %v7422_v51 = vpop.f32.mrb[150].mxu1 }
 0x678   : > { %v7733_v47 = vadd.f32 %v7725_v56, %v7717_v20  ;;  %v7735_v60 = vadd.f32 %v7727_v21, %v7719_v24  ;;  %v7834_v62 = vrot.slane %v7371_v2, 4  ;;  %v7838_v42 = vrot.slane %v7422_v51, 4  ;;  %v7373_v30 = vpop.f32.mrb[143].mxu0  ;;  %v7424_v22 = vpop.f32.mrb[151].mxu1 }
 0x679   : > { %v7734_v15 = vadd.f32 %v7726_v17, %v7718_v58  ;;  %v7736_v0 = vadd.f32 %v7728_v49, %v7720_v10  ;;  %v7836_v23 = vrot.slane %v7373_v30, 4  ;;  %v7840_v11 = vrot.slane %v7424_v22, 4  ;;  %v11326_v22 = vld [vmem:[#allocation12 + $0x200] ss:$16 sps:$4 sm:$0xff]  }
 0x67a   : > { %v7737_v36 = vadd.f32 %v7733_v47, %v7588_v28  ;;  %v7739_v32 = vadd.f32 %v7735_v60, %v7596_v34  ;;  %v7835_v5 = vsel %vm839_vm7, %v7725_v56, %v7834_v62  ;;  %v7839_v44 = vsel %vm839_vm7, %v7727_v21, %v7838_v42 }
 0x67b   : > { %v7738_v18 = vadd.f32 %v7734_v15, %v7592_v41  ;;  %v7740_v27 = vadd.f32 %v7736_v0, %v7600_v26  ;;  %v7846_v19 = vadd.f32 %v7835_v5, %v12918_v40  ;;  %v7848_v20 = vadd.f32 %v7839_v44, %v12922_v35  ;;  %v11329_v15 = vld [vmem:[#allocation12 + $0x208] ss:$16 sps:$4 sm:$0xff]   ;;  %v11340_v44 = vld [vmem:[#allocation12 + $0x244] ss:$16 sps:$4 sm:$0xff]  }
 0x67c   : > { %v7741_v24 = vmax.f32 %v7737_v36, 0.0  ;;  %v7743_v53 = vmax.f32 %v7739_v32, 0.0  ;;  %v7837_v57 = vsel %vm839_vm7, %v7726_v17, %v7836_v23  ;;  %v7841_v58 = vsel %vm839_vm7, %v7728_v49, %v7840_v11  ;;  %v11334_v23 = vld [vmem:[#allocation12 + $0x224] ss:$16 sps:$4 sm:$0xff]   ;;  %v11337_v11 = vld [vmem:[#allocation12 + $0x22c] ss:$16 sps:$4 sm:$0xff]  }
 0x67d   : > { %v7742_v10 = vmax.f32 %v7738_v18, 0.0  ;;  %v7744_v50 = vmax.f32 %v7740_v27, 0.0  ;;  %v7850_v43 = vadd.f32 %v7846_v19, %v7588_v28  ;;  %v7852_v39 = vadd.f32 %v7848_v20, %v7596_v34  ;;  %v11332_v32 = vld [vmem:[#allocation12 + $0x220] ss:$16 sps:$4 sm:$0xff]   ;;  %v11335_v5 = vld [vmem:[#allocation12 + $0x228] ss:$16 sps:$4 sm:$0xff]  }
 0x67e   : > { %v7862_v9 = vrot.slane %v7741_v24, 5  ;;  %v7864_v13 = vrot.slane %v7743_v53, 5  ;;  %v7847_v29 = vadd.f32 %v7837_v57, %v12926_v61  ;;  %v7849_v46 = vadd.f32 %v7841_v58, %v12930_v7  ;;  %v11343_v18 = vld [vmem:[#allocation12 + $0x24c] ss:$16 sps:$4 sm:$0xff]   ;;  %v11338_v27 = vld [vmem:[#allocation12 + $0x240] ss:$16 sps:$4 sm:$0xff]  }
 0x67f   : > { %v7863_v14 = vrot.slane %v7742_v10, 5  ;;  %v7865_v40 = vrot.slane %v7744_v50, 5  ;;  %v7854_v3 = vmax.f32 %v7850_v43, 0.0  ;;  %v7856_v35 = vmax.f32 %v7852_v39, 0.0  ;;  %v11341_v19 = vld [vmem:[#allocation12 + $0x248] ss:$16 sps:$4 sm:$0xff]  }
 0x680   : > { %v7870_v48 = vmax.f32 %v7609_v37, %v7862_v9  ;;  %v7872_v33 = vmax.f32 %v7611_v12, %v7864_v13  ;;  %v7851_v38 = vadd.f32 %v7847_v29, %v7592_v41  ;;  %v7853_v52 = vadd.f32 %v7849_v46, %v7600_v26  ;;  %v11346_v20 = vld [vmem:[#allocation12 + $0x264] ss:$16 sps:$4 sm:$0xff]   ;;  %v11349_v24 = vld [vmem:[#allocation12 + $0x26c] ss:$16 sps:$4 sm:$0xff]   ;;  %v11344_v53 = vld [vmem:[#allocation12 + $0x260] ss:$16 sps:$4 sm:$0xff]  }
 0x681   : > { %v7871_v59 = vmax.f32 %v7610_v54, %v7863_v14  ;;  %v7873_v31 = vmax.f32 %v7612_v4, %v7865_v40  ;;  %v7878_v56 = vrot.slane %v7854_v3, 2  ;;  %v7880_v21 = vrot.slane %v7856_v35, 2  ;;  %v11347_v57 = vld [vmem:[#allocation12 + $0x268] ss:$16 sps:$4 sm:$0xff]   ;;  %v11352_v58 = vld [vmem:[#allocation12 + $0x284] ss:$16 sps:$4 sm:$0xff]  }
 0x682   : > { %v7855_v28 = vmax.f32 %v7851_v38, 0.0  ;;  %v7857_v34 = vmax.f32 %v7853_v52, 0.0  ;;  %v11355_v10 = vld [vmem:[#allocation12 + $0x28c] ss:$16 sps:$4 sm:$0xff]   ;;  %v11350_v50 = vld [vmem:[#allocation12 + $0x280] ss:$16 sps:$4 sm:$0xff]  }
 0x683   : > { %v7886_v8 = vmax.f32 %v7870_v48, %v7878_v56  ;;  %v12948_v25 = vmax.f32 %v7872_v33, %v7880_v21  ;;  %v11353_v43 = vld [vmem:[#allocation12 + $0x288] ss:$16 sps:$4 sm:$0xff]   ;;  %v11358_v39 = vld [vmem:[#allocation12 + $0x2a4] ss:$16 sps:$4 sm:$0xff]   ;;  %v11361_v9 = vld [vmem:[#allocation12 + $0x2ac] ss:$16 sps:$4 sm:$0xff]  }
 0x684   : > { %v7879_v61 = vrot.slane %v7855_v28, 2  ;;  %v7881_v17 = vrot.slane %v7857_v34, 2  ;;  %v11356_v13 = vld [vmem:[#allocation12 + $0x2a0] ss:$16 sps:$4 sm:$0xff]   ;;  %v11359_v29 = vld [vmem:[#allocation12 + $0x2a8] ss:$16 sps:$4 sm:$0xff]  }
 0x685   : > { %v7894_v7 = vrot.slane %v7886_v8, 1  ;;  %v7906_v12 = vrot.slane %v7886_v8, 2  ;;  %v11364_v46 = vld [vmem:[#allocation12 + $0x2c4] ss:$16 sps:$4 sm:$0xff]   ;;  %v11367_v14 = vld [vmem:[#allocation12 + $0x2cc] ss:$16 sps:$4 sm:$0xff]  }
 0x686   : > { %v7887_v49 = vmax.f32 %v7871_v59, %v7879_v61  ;;  %v7889_v2 = vmax.f32 %v7873_v31, %v7881_v17  ;;  %v11362_v40 = vld [vmem:[#allocation12 + $0x2c0] ss:$16 sps:$4 sm:$0xff]   ;;  %v11365_v3 = vld [vmem:[#allocation12 + $0x2c8] ss:$16 sps:$4 sm:$0xff]   ;;  %v11370_v35 = vld [vmem:[#allocation12 + $0x2e4] ss:$16 sps:$4 sm:$0xff]  }
 0x687   : > { %v7902_v51 = vmax.f32 %v7886_v8, %v7894_v7  ;;  %v11373_v48 = vld [vmem:[#allocation12 + $0x2ec] ss:$16 sps:$4 sm:$0xff]   ;;  %v11368_v33 = vld [vmem:[#allocation12 + $0x2e0] ss:$16 sps:$4 sm:$0xff]   ;;  %v11371_v38 = vld [vmem:[#allocation12 + $0x2e8] ss:$16 sps:$4 sm:$0xff]  }
 0x688   : > { %v7895_v47 = vrot.slane %v7887_v49, 1  ;;  %v7897_v37 = vrot.slane %v7889_v2, 1  ;;  %v7907_v26 = vrot.slane %v7887_v49, 2  ;;  %v7909_v60 = vrot.slane %v7889_v2, 2  ;;  %v11376_v52 = vld [vmem:[#allocation12 + $0x304] ss:$16 sps:$4 sm:$0xff]  }
 0x689   : > { %v7914_v4 = vmax.f32 %v7902_v51, %v7906_v12  ;;  %v11379_v59 = vld [vmem:[#allocation12 + $0x30c] ss:$16 sps:$4 sm:$0xff]   ;;  %v11374_v31 = vld [vmem:[#allocation12 + $0x300] ss:$16 sps:$4 sm:$0xff]   ;;  %v11377_v56 = vld [vmem:[#allocation12 + $0x308] ss:$16 sps:$4 sm:$0xff]  }
 0x68a   : > { %v7903_v41 = vmax.f32 %v7887_v49, %v7895_v47  ;;  %v7905_v54 = vmax.f32 %v7889_v2, %v7897_v37  ;;  %v11382_v21 = vld [vmem:[#allocation12 + $0x324] ss:$16 sps:$4 sm:$0xff]   ;;  %v11385_v28 = vld [vmem:[#allocation12 + $0x32c] ss:$16 sps:$4 sm:$0xff]   ;;  %v11380_v34 = vld [vmem:[#allocation12 + $0x320] ss:$16 sps:$4 sm:$0xff]  }
 0x68b   : > { %v7918_v0 = vpack.c.bf16 %v7914_v4, %v7914_v4  ;;  %v11383_v8 = vld [vmem:[#allocation12 + $0x328] ss:$16 sps:$4 sm:$0xff]   ;;  %v11388_v61 = vld [vmem:[#allocation12 + $0x344] ss:$16 sps:$4 sm:$0xff]   ;;  %v11391_v17 = vld [vmem:[#allocation12 + $0x34c] ss:$16 sps:$4 sm:$0xff]  }
 0x68c   : > { %v7915_v62 = vmax.f32 %v7903_v41, %v7907_v26  ;;  %v7917_v42 = vmax.f32 %v7905_v54, %v7909_v60  ;;  %v11386_v7 = vld [vmem:[#allocation12 + $0x340] ss:$16 sps:$4 sm:$0xff]   ;;  %v11389_v49 = vld [vmem:[#allocation12 + $0x348] ss:$16 sps:$4 sm:$0xff]   ;;  %v11394_v2 = vld [vmem:[#allocation12 + $0x364] ss:$16 sps:$4 sm:$0xff]  }
 0x68d   : > { %v11397_v51 = vld [vmem:[#allocation12 + $0x36c] ss:$16 sps:$4 sm:$0xff]   ;;  %v11392_v47 = vld [vmem:[#allocation12 + $0x360] ss:$16 sps:$4 sm:$0xff]   ;;  %v11395_v37 = vld [vmem:[#allocation12 + $0x368] ss:$16 sps:$4 sm:$0xff]  }
 0x68e   : > { %v7919_v30 = vpack.c.bf16 %v7915_v62, %v7915_v62  ;;  %v7921_v36 = vpack.c.bf16 %v7917_v42, %v7917_v42  ;;  %v11400_v12 = vld [vmem:[#allocation12 + $0x384] ss:$16 sps:$4 sm:$0xff]   ;;  %v11403_v41 = vld [vmem:[#allocation12 + $0x38c] ss:$16 sps:$4 sm:$0xff]   ;;  %v11398_v26 = vld [vmem:[#allocation12 + $0x380] ss:$16 sps:$4 sm:$0xff]  }
 0x68f   : > { %v11401_v54 = vld [vmem:[#allocation12 + $0x388] ss:$16 sps:$4 sm:$0xff]   ;;  %v11406_v4 = vld [vmem:[#allocation12 + $0x3a4] ss:$16 sps:$4 sm:$0xff]   ;;  %v11409_v60 = vld [vmem:[#allocation12 + $0x3ac] ss:$16 sps:$4 sm:$0xff]  }
 0x690   : > { %8744 = vmatprep.mubr.bf16.mxu0 %v7919_v30  ;;  %8826 = vmatprep.mubr.bf16.mxu1 %v7919_v30  ;;  %v11404_v62 = vld [vmem:[#allocation12 + $0x3a0] ss:$16 sps:$4 sm:$0xff]   ;;  %v11407_v42 = vld [vmem:[#allocation12 + $0x3a8] ss:$16 sps:$4 sm:$0xff]   ;;  %v11412_v30 = vld [vmem:[#allocation12 + $0x3c4] ss:$16 sps:$4 sm:$0xff]  }
 0x691   : > { %8745 = vmatmul.mubr.bf16.vlgmr.msra.gmra.mrb[144].mxu0 %v7918_v0  ;;  %8827 = vmatmul.mubr.bf16.vlgmr.msra.gmra.mrb[152].mxu1 %v7918_v0  ;;  %v11410_v0 = vld [vmem:[#allocation12 + $0x3c0] ss:$16 sps:$4 sm:$0xff]   ;;  %vm8919_vm7 = vcmask 1043459  }
 0x692   : > { %8754 = vmatpush1.bf16.msra.mxu0 %v11326_v22  ;;  %8836 = vmatpush1.bf16.msra.mxu1 %v11329_v15  ;;  %v11415_v22 = vld [vmem:[#allocation12 + $0x3cc] ss:$16 sps:$4 sm:$0xff]   ;;  %v7896_v15 = vrot.slane %v12948_v25, 1  ;;  %vm8920_vm5 = vmand %vm8919_vm7, %vm840_vm8 }
 0x693   : > { %8785 = vmatprep.mubr.bf16.mxu0 %v7921_v36  ;;  %8867 = vmatprep.mubr.bf16.mxu1 %v7921_v36  ;;  %v11421_v36 = vld [vmem:[#allocation12 + $0x3ec] ss:$16 sps:$4 sm:$0xff]   ;;  %vm8921_vm12 = vmor %vm8920_vm5, %vm8918_vm11 }
 0x694   : > { %8755 = vmatprep.subr.bf16.mxu0 %v11334_v23  ;;  %8837 = vmatprep.subr.bf16.mxu1 %v11337_v11  ;;  %v11413_v23 = vld [vmem:[#allocation12 + $0x3c8] ss:$16 sps:$4 sm:$0xff]   ;;  %v11418_v11 = vld [vmem:[#allocation12 + $0x3e4] ss:$16 sps:$4 sm:$0xff]  }
 0x696   : > { %8756 = vmatpush1.bf16.msra.mxu0 %v11332_v32  ;;  %8838 = vmatpush1.bf16.msra.mxu1 %v11335_v5  ;;  %v7904_v32 = vmax.f32 %v12948_v25, %v7896_v15  ;;  %v7908_v5 = vrot.slane %v12948_v25, 2 }
 0x697   : > { %8757 = vmatprep.subr.bf16.mxu0 %v11340_v44  ;;  %8839 = vmatprep.subr.bf16.mxu1 %v11343_v18  ;;  %v11416_v44 = vld [vmem:[#allocation12 + $0x3e0] ss:$16 sps:$4 sm:$0xff]   ;;  %v11419_v18 = vld [vmem:[#allocation12 + $0x3e8] ss:$16 sps:$4 sm:$0xff]  }
 0x69a   : > { %8758 = vmatpush1.bf16.msra.mxu0 %v11338_v27  ;;  %8840 = vmatpush1.bf16.msra.mxu1 %v11341_v19  ;;  %v7916_v27 = vmax.f32 %v7904_v32, %v7908_v5 }
 0x69b   : > { %8759 = vmatprep.subr.bf16.mxu0 %v11346_v20  ;;  %8841 = vmatprep.subr.bf16.mxu1 %v11349_v24  ;;  %v8050_v20 = vld [vmem:[#allocation13] sm:$0xf]  ;;  %v11691_v24 = vmov 1966171168  }
 0x69c   : > { %v7920_v19 = vpack.c.bf16 %v7916_v27, %v7916_v27  ;;  %v8703_v25 = vrot.slane %v8050_v20, %v7595_v16 }
 0x69e   : > { %8760 = vmatpush1.bf16.msra.mxu0 %v11344_v53  ;;  %8842 = vmatpush1.bf16.msra.mxu1 %v11347_v57  ;;  %v8891_v53 = vunpack.c.l.s4 %v11691_v24  ;;  %v8695_v57 = vrot.slane %v8050_v20, %v12385_v45 }
 0x69f   : > { %8761 = vmatprep.subr.bf16.mxu0 %v11352_v58  ;;  %8843 = vmatprep.subr.bf16.mxu1 %v11355_v10  ;;  %v8699_v58 = vrot.slane %v8050_v20, %v12388_v63  ;;  %v8707_v10 = vrot.slane %v8050_v20, %v7599_v6 }
 0x6a2   : > { %8762 = vmatpush1.bf16.msra.mxu0 %v11350_v50  ;;  %8844 = vmatpush1.bf16.msra.mxu1 %v11353_v43 }
 0x6a3   : > { %8763 = vmatprep.subr.bf16.mxu0 %v11358_v39  ;;  %8845 = vmatprep.subr.bf16.mxu1 %v11361_v9  ;;  %v8892_v39 = vunpack.c.0.s8 %v8891_v53 }
 0x6a6   : > { %8764 = vmatpush1.bf16.msra.mxu0 %v11356_v13  ;;  %8846 = vmatpush1.bf16.msra.mxu1 %v11359_v29 }
 0x6a7   : > { %8765 = vmatprep.subr.bf16.mxu0 %v11364_v46  ;;  %8847 = vmatprep.subr.bf16.mxu1 %v11367_v14 }
 0x6aa   : > { %8766 = vmatpush1.bf16.msra.mxu0 %v11362_v40  ;;  %8848 = vmatpush1.bf16.msra.mxu1 %v11365_v3 }
 0x6ab   : > { %8767 = vmatprep.subr.bf16.mxu0 %v11370_v35  ;;  %8849 = vmatprep.subr.bf16.mxu1 %v11373_v48 }
 0x6ae   : > { %8768 = vmatpush1.bf16.msra.mxu0 %v11368_v33  ;;  %8850 = vmatpush1.bf16.msra.mxu1 %v11371_v38  ;;  %v8895_v38 = vsub.s32 %v8892_v39, %v12382_v55 }
 0x6af   : > { %8769 = vmatprep.subr.bf16.mxu0 %v11376_v52  ;;  %8851 = vmatprep.subr.bf16.mxu1 %v11379_v59 }
 0x6b2   : > { %8770 = vmatpush1.bf16.msra.mxu0 %v11374_v31  ;;  %8852 = vmatpush1.bf16.msra.mxu1 %v11377_v56 }
 0x6b3   : > { %8771 = vmatprep.subr.bf16.mxu0 %v11382_v21  ;;  %8853 = vmatprep.subr.bf16.mxu1 %v11385_v28  ;;  %v8922_v28 = vld [vmem:[%s439_s16] sm:$0xf] }
 0x6b6   : > { %8772 = vmatpush1.bf16.msra.mxu0 %v11380_v34  ;;  %8854 = vmatpush1.bf16.msra.mxu1 %v11383_v8 }
 0x6b7   : > { %8773 = vmatprep.subr.bf16.mxu0 %v11388_v61  ;;  %8855 = vmatprep.subr.bf16.mxu1 %v11391_v17 }
 0x6ba   : > { %8774 = vmatpush1.bf16.msra.mxu0 %v11386_v7  ;;  %8856 = vmatpush1.bf16.msra.mxu1 %v11389_v49 }
 0x6bb   : > { %8775 = vmatprep.subr.bf16.mxu0 %v11394_v2  ;;  %8857 = vmatprep.subr.bf16.mxu1 %v11397_v51 }
 0x6be   : > { %8776 = vmatpush1.bf16.msra.mxu0 %v11392_v47  ;;  %8858 = vmatpush1.bf16.msra.mxu1 %v11395_v37 }
 0x6bf   : > { %8777 = vmatprep.subr.bf16.mxu0 %v11400_v12  ;;  %8859 = vmatprep.subr.bf16.mxu1 %v11403_v41 }
 0x6c2   : > { %8778 = vmatpush1.bf16.msra.mxu0 %v11398_v26  ;;  %8860 = vmatpush1.bf16.msra.mxu1 %v11401_v54 }
 0x6c3   : > { %8779 = vmatprep.subr.bf16.mxu0 %v11406_v4  ;;  %8861 = vmatprep.subr.bf16.mxu1 %v11409_v60 }
 0x6c6   : > { %8780 = vmatpush1.bf16.msra.mxu0 %v11404_v62  ;;  %8862 = vmatpush1.bf16.msra.mxu1 %v11407_v42 }
 0x6c7   : > { %8781 = vmatprep.subr.bf16.mxu0 %v11412_v30  ;;  %8863 = vmatprep.subr.bf16.mxu1 %v11415_v22 }
 0x6ca   : > { %8782 = vmatpush1.bf16.msra.mxu0 %v11410_v0  ;;  %8864 = vmatpush1.bf16.msra.mxu1 %v11413_v23 }
 0x6cb   : > { %8783 = vmatprep.subr.bf16.mxu0 %v11418_v11  ;;  %8865 = vmatprep.subr.bf16.mxu1 %v11421_v36 }
 0x6ce   : > { %8784 = vmatpush1.bf16.msra.mxu0 %v11416_v44  ;;  %8866 = vmatpush1.bf16.msra.mxu1 %v11419_v18 }
 0x6d1   : > { %8786 = vmatmul.mubr.bf16.vlgmr.msra.gmra.mrb[144].mxu0 %v7920_v19  ;;  %8868 = vmatmul.mubr.bf16.vlgmr.msra.gmra.mrb[152].mxu1 %v7920_v19 }
 0x7a4   : > { %v8787_v50 = vpop.f32.mrb[144].mxu0  ;;  %v8869_v43 = vpop.f32.mrb[152].mxu1 }
 0x7a5   : > { %v10026_v13 = vadd.f32 %v8787_v50, %v8695_v57  ;;  %v10028_v29 = vadd.f32 %v8869_v43, %v8703_v25  ;;  %v8789_v45 = vpop.f32.mrb[145].mxu0  ;;  %v8871_v46 = vpop.f32.mrb[153].mxu1 }
 0x7a6   : > { %v10027_v16 = vadd.f32 %v8789_v45, %v8699_v58  ;;  %v10029_v14 = vadd.f32 %v8871_v46, %v8707_v10  ;;  %v8791_v63 = vpop.f32.mrb[146].mxu0  ;;  %v8873_v40 = vpop.f32.mrb[154].mxu1 }
 0x7a7   : > { %v8876_v3 = vmax.f32 %v10026_v13, 0.0  ;;  %v8878_v6 = vmax.f32 %v10028_v29, 0.0  ;;  %v8792_v35 = vpop.f32.mrb[147].mxu0  ;;  %v8874_v48 = vpop.f32.mrb[155].mxu1 }
 0x7a8   : > { %v8877_v33 = vmax.f32 %v10027_v16, 0.0  ;;  %v8879_v52 = vmax.f32 %v10029_v14, 0.0 }
 0x7aa   : > { %v9986_v59 = vpack.c.bf16 %v8877_v33, %v8876_v3  ;;  %v9987_v31 = vpack.c.bf16 %v8879_v52, %v8878_v6 }
 0x7ac   : > { %v8896_v56 = vrot.slane %v9986_v59, %v8895_v38  ;;  %v8903_v1 = vrot.slane %v9987_v31, %v8895_v38 }
 0x7ae   : > { %v8904_v21 = vcombine.low %v8896_v56, %v8903_v1 }
 0x7b0   : > { %v8911_v55 = vrot.slane %v8904_v21, %v8895_v38 }
 0x7b2   : > { %v8923_v34 = vsel %vm8921_vm12, %v8911_v55, %v8922_v28 }
 0x7b3   : > { %8924 = vst [vmem:[%s439_s16] sm:$0xf] %v8923_v34 }
 0x7b4 PF: > { %s24_s30 = sadd.s32 1, %s11672_s30  }
 0x7b5   : > { %p21_p13 = scmp.ge.s32.totalorder %s24_s30, 4  }
 0x7b7   :  { %23 = sbr.rel (!%p21_p13) target bundleno = 5 (0x5), region = 119 }
 0x7be   :  { %8944 = vsyncpa [#allocation3], 1 }
 0x7bf   :  { %8946 = vsyncpa [#allocation3 + $0x1], 1 }
 0x7c0   :  { %8947 = vsyncpa [#allocation5], 1 }
 0x7c1   :  { %8948 = vsyncpa [#allocation8], 1 }
 0x7c2   :  { %8949 = vsyncpa [#allocation11], 1 }
 0x7c3   :  { %8950 = vsyncpa [#allocation14], 1 }

</bundles_post_ra>
